<compile_context>
chip_gen: v7x
topology: tpu7x:2x2x1
jax: 0.10.0
libtpu: 0.0.40
codegen_flags: <defaults>
</compile_context>

<pallas_src>
import functools

import jax
import jax.numpy as jnp
from jax.experimental import pallas as pl
from jax.experimental.pallas import tpu as pltpu

SCALE = 4
_VMEM_LIMIT = 40 * 1024 * 1024        # explicit scoped-VMEM budget (v7x-safe, < 64 MiB)
_BLOCK_BYTES = 2 * 1024 * 1024        # ~2 MiB per input block


def _compiler_params():
    return pltpu.CompilerParams(
        dimension_semantics=("parallel",),
        vmem_limit_bytes=_VMEM_LIMIT)


def _pick_tm(M, K, itemsize, target_bytes=_BLOCK_BYTES):
    """Largest multiple-of-8 divisor of M whose (tm, K) block fits the byte target."""
    assert M % 8 == 0, M
    best, tm = 8, 8
    while tm <= M:
        if M % tm == 0 and tm * K * itemsize <= target_bytes:
            best = tm
        tm += 8
    return best


# --------------------------------------------------------------------------
# Fused 1x1-conv matmul: optional input BN-apply+ReLU, optional output BN stats
# --------------------------------------------------------------------------

def matmul_fused(x, w, *, in_scale=None, in_shift=None, want_stats=True,
                 out_dtype=jnp.bfloat16):
    """y = (relu(x*in_scale + in_shift) if in_scale is given else x) @ w.

    Optionally also returns per-M-block partial column sums / sums of squares of
    the f32 product (for a downstream BatchNorm), computed while the tile is
    still resident in VMEM.
    """
    M, K = x.shape
    K2, C = w.shape
    assert K == K2
    fuse_in = in_scale is not None
    tm = _pick_tm(M, K, x.dtype.itemsize)
    nm = M // tm

    def kernel(*refs):
        if fuse_in:
            x_ref, w_ref, sc_ref, sh_ref = refs[:4]
            outs = refs[4:]
        else:
            x_ref, w_ref = refs[:2]
            outs = refs[2:]
        a = x_ref[...]
        if fuse_in:
            # fused BN-apply + ReLU of the *previous* layer on the A operand (VPU,
            # free filler under the MXU / DMA slots)
            a = jnp.maximum(a.astype(jnp.float32) * sc_ref[...] + sh_ref[...], 0.0)
        y = jnp.dot(a.astype(w_ref.dtype), w_ref[...],
                    preferred_element_type=jnp.float32)
        o_ref = outs[0]
        o_ref[...] = y.astype(o_ref.dtype)
        if want_stats:
            s_ref, q_ref = outs[1], outs[2]
            s_ref[0] = jnp.sum(y, axis=0, keepdims=True)
            q_ref[0] = jnp.sum(y * y, axis=0, keepdims=True)

    in_specs = [pl.BlockSpec((tm, K), lambda i: (i, 0)),
                pl.BlockSpec((K, C), lambda i: (0, 0))]
    args = [x, w]
    if fuse_in:
        in_specs += [pl.BlockSpec((1, K), lambda i: (0, 0)),
                     pl.BlockSpec((1, K), lambda i: (0, 0))]
        args += [in_scale, in_shift]

    out_shape = [jax.ShapeDtypeStruct((M, C), out_dtype)]
    out_specs = [pl.BlockSpec((tm, C), lambda i: (i, 0))]
    if want_stats:
        out_shape += [jax.ShapeDtypeStruct((nm, 1, C), jnp.float32)] * 2
        out_specs += [pl.BlockSpec((1, 1, C), lambda i: (i, 0, 0))] * 2

    outs = pl.pallas_call(
        kernel,
        out_shape=tuple(out_shape),
        grid_spec=pltpu.PrefetchScalarGridSpec(
            num_scalar_prefetch=0, grid=(nm,),
            in_specs=in_specs, out_specs=tuple(out_specs)),
        compiler_params=_compiler_params(),
    )(*args)
    if want_stats:
        return outs[0], outs[1], outs[2]
    return outs[0]


# --------------------------------------------------------------------------
# Small-window conv (3x3 and stride-2 1x1) without im2col, one image per step
# --------------------------------------------------------------------------

def conv_taps(xp, w_taps, *, taps, row_stride, Ho, Wo, out_dtype=jnp.bfloat16):
    """Accumulated tap-matmul conv over a pre-packed NHWC tensor.

    xp     : (N, Hx, Wx, Kc)   padded and/or column-packed input (bf16)
    w_taps : (T, Kc, Cout)     one weight matrix per tap
    taps   : list of (row_off, col_off); output (oh, ow) reads input
             row = row_stride*oh + row_off, col = ow + col_off  (column stride is
             always 1: a stride-2 conv packs column pairs into channels in glue
             with zero-padded weights, so no patch tensor and no strided VMEM
             access is ever materialised).
    Also emits per-image partial BN statistics of the f32 accumulator.
    """
    N, Hx, Wx, Kc = xp.shape
    T, Kc2, Cout = w_taps.shape
    assert Kc == Kc2 and T == len(taps)

    def kernel(x_ref, w_ref, o_ref, s_ref, q_ref):
        acc = jnp.zeros((Ho * Wo, Cout), jnp.float32)
        for t, (dh, dw) in enumerate(taps):
            if row_stride == 1:
                patch = x_ref[0, dh:dh + Ho, dw:dw + Wo, :]
            else:
                rows = x_ref[0, dh:dh + row_stride * Ho, dw:dw + Wo, :]
                # stride-2 row select via leading-dim reshape (no sublane shuffles)
                patch = rows.reshape(Ho, row_stride, Wo, Kc)[:, 0]
            acc = acc + jnp.dot(patch.reshape(Ho * Wo, Kc), w_ref[t],
                                preferred_element_type=jnp.float32)
        o_ref[0] = acc.astype(o_ref.dtype)
        s_ref[0] = jnp.sum(acc, axis=0, keepdims=True)
        q_ref[0] = jnp.sum(acc * acc, axis=0, keepdims=True)

    return pl.pallas_call(
        kernel,
        out_shape=(jax.ShapeDtypeStruct((N, Ho * Wo, Cout), out_dtype),
                   jax.ShapeDtypeStruct((N, 1, Cout), jnp.float32),
                   jax.ShapeDtypeStruct((N, 1, Cout), jnp.float32)),
        grid_spec=pltpu.PrefetchScalarGridSpec(
            num_scalar_prefetch=0, grid=(N,),
            in_specs=[pl.BlockSpec((1, Hx, Wx, Kc), lambda n: (n, 0, 0, 0)),
                      pl.BlockSpec((T, Kc, Cout), lambda n: (0, 0, 0))],
            out_specs=(pl.BlockSpec((1, Ho * Wo, Cout), lambda n: (n, 0, 0)),
                       pl.BlockSpec((1, 1, Cout), lambda n: (n, 0, 0)),
                       pl.BlockSpec((1, 1, Cout), lambda n: (n, 0, 0)))),
        compiler_params=_compiler_params(),
    )(xp, w_taps)


# --------------------------------------------------------------------------
# Fused BN-apply + ReLU + zero-pad (produces conv2's padded input in one pass)
# --------------------------------------------------------------------------

def pad_affine_relu(y, scale, shift, out_dtype=jnp.bfloat16):
    """out[n, 1:H+1, 1:W+1, :] = relu(y*scale + shift); zero border (pad=1)."""
    N, H, W, C = y.shape
    Hp, Wp = H + 2, W + 2

    def kernel(x_ref, sc_ref, sh_ref, o_ref):
        o_ref[...] = jnp.zeros_like(o_ref)
        a = jnp.maximum(
            x_ref[...].astype(jnp.float32) * sc_ref[...] + sh_ref[...], 0.0)
        o_ref[0, 1:H + 1, 1:W + 1, :] = a[0].astype(o_ref.dtype)

    return pl.pallas_call(
        kernel,
        out_shape=jax.ShapeDtypeStruct((N, Hp, Wp, C), out_dtype),
        grid_spec=pltpu.PrefetchScalarGridSpec(
            num_scalar_prefetch=0, grid=(N,),
            in_specs=[pl.BlockSpec((1, H, W, C), lambda n: (n, 0, 0, 0)),
                      pl.BlockSpec((1, C), lambda n: (0, 0)),
                      pl.BlockSpec((1, C), lambda n: (0, 0))],
            out_specs=pl.BlockSpec((1, Hp, Wp, C), lambda n: (n, 0, 0, 0))),
        compiler_params=_compiler_params(),
    )(y, scale, shift)


# --------------------------------------------------------------------------
# Fused norm3-apply + norm_skip-apply + residual + ReLU (lane-dense)
# --------------------------------------------------------------------------

def affine_add_relu(y, y_scale, y_shift, skip, skip_scale, skip_shift,
                    out_dtype=jnp.bfloat16):
    """relu(y*y_scale + y_shift + skip*skip_scale + skip_shift), all (M, C)."""
    M, C = y.shape
    assert skip.shape == (M, C)
    # Lane-dense repack: narrow-C slabs waste 75-94% of lanes / vst bandwidth, so
    # fold rows into the 128-lane axis when divisibility allows (real CORnet-S
    # widths C >= 128 are already lane-dense and take the L == C path trivially).
    L = C
    if 128 % C == 0 and (M * C) % 128 == 0 and ((M * C) // 128) % 8 == 0:
        L = 128
    rep = L // C
    Mr = (M * C) // L
    yr = y.reshape(Mr, L)
    sr = skip.reshape(Mr, L)
    a = jnp.tile(y_scale, (1, rep))
    b = jnp.tile(y_shift, (1, rep))
    c = jnp.tile(skip_scale, (1, rep))
    d = jnp.tile(skip_shift, (1, rep))
    tm = _pick_tm(Mr, L, y.dtype.itemsize)

    def kernel(y_ref, s_ref, a_ref, b_ref, c_ref, d_ref, o_ref):
        o_ref[...] = jnp.maximum(
            y_ref[...].astype(jnp.float32) * a_ref[...] + b_ref[...]
            + s_ref[...].astype(jnp.float32) * c_ref[...] + d_ref[...],
            0.0).astype(o_ref.dtype)

    vec = pl.BlockSpec((1, L), lambda i: (0, 0))
    slab = pl.BlockSpec((tm, L), lambda i: (i, 0))
    out = pl.pallas_call(
        kernel,
        out_shape=jax.ShapeDtypeStruct((Mr, L), out_dtype),
        grid_spec=pltpu.PrefetchScalarGridSpec(
            num_scalar_prefetch=0, grid=(Mr // tm,),
            in_specs=[slab, slab, vec, vec, vec, vec],
            out_specs=pl.BlockSpec((tm, L), lambda i: (i, 0))),
        compiler_params=_compiler_params(),
    )(yr, sr, a, b, c, d)
    return out.reshape(M, C)


# --------------------------------------------------------------------------
# Tiny glue: BatchNorm (training-mode batch stats) coefficients from partials
# --------------------------------------------------------------------------

def bn_coeffs(psum, psq, gamma, beta, count, eps=1e-5):
    s = jnp.sum(psum, axis=0)                          # (1, C)
    q = jnp.sum(psq, axis=0)
    mean = s / count
    var = jnp.maximum(q / count - mean * mean, 0.0)    # clamp: E[x^2]-m^2 may go < 0
    inv = jax.lax.rsqrt(var + eps)
    scale = gamma[None, :] * inv
    shift = beta[None, :] - mean * scale
    return scale, shift


# --------------------------------------------------------------------------
# CORblock_S forward
# --------------------------------------------------------------------------

def corblock_s_forward(inp_nchw, params, times=2):
    bf16 = jnp.bfloat16
    x = jnp.transpose(inp_nchw, (0, 2, 3, 1)).astype(bf16)    # NCHW -> NHWC
    N, H0, W0, Cin = x.shape
    Cout = params['conv_input'].shape[1]
    C4 = params['conv1'].shape[1]

    # conv_input (1x1; no BN between it and conv1 in the reference)
    y = matmul_fused(x.reshape(N * H0 * W0, Cin),
                     params['conv_input'].astype(bf16), want_stats=False)
    x = y.reshape(N, H0, W0, Cout)

    for t in range(times):
        Nn, H, W, _ = x.shape
        if t == 0:
            stride = 2
            Ho, Wo = H // 2, W // 2
            # skip = norm_skip(skip_conv(x)): 1x1 stride-2 conv without any XLA
            # strided-slice copy — pack column pairs into channels (free reshape)
            # and zero the odd-column half of the weight.
            assert W % 2 == 0
            xpk = x.reshape(Nn, H, W // 2, 2 * Cout)
            w_sk = jnp.concatenate(
                [params['skip'], jnp.zeros_like(params['skip'])], axis=0)[None]
            skip_raw, ss, sq = conv_taps(xpk, w_sk.astype(bf16),
                                         taps=[(0, 0)], row_stride=2,
                                         Ho=Ho, Wo=Wo)
            sk_scale, sk_shift = bn_coeffs(ss, sq, params['norm_skip_g'],
                                           params['norm_skip_b'], Nn * Ho * Wo)
        else:
            stride = 1
            Ho, Wo = H, W
            skip_raw = x                                        # already activated
            sk_scale = jnp.ones((1, Cout), jnp.float32)
            sk_shift = jnp.zeros((1, Cout), jnp.float32)

        M1 = Nn * H * W
        M2 = Nn * Ho * Wo

        # conv1 (1x1) + fused BN1 statistics
        y1, s1, q1 = matmul_fused(x.reshape(M1, Cout),
                                  params['conv1'].astype(bf16))
        sc1, sh1 = bn_coeffs(s1, q1, params[f'norm1_{t}_g'],
                             params[f'norm1_{t}_b'], M1)

        # norm1-apply + ReLU fused with conv2's zero-padding pass
        y1p = pad_affine_relu(y1.reshape(Nn, H, W, C4), sc1, sh1)  # (Nn,H+2,W+2,C4)

        # conv2 (3x3, stride) as accumulated in-kernel tap matmuls + BN2 stats
        w2 = params['conv2']                                    # (3, 3, C4, C4) HWIO
        if stride == 2:
            xin = y1p.reshape(Nn, H + 2, (W + 2) // 2, 2 * C4)   # pack column pairs
            wm0 = jnp.concatenate([w2[:, 0], w2[:, 1]], axis=1)  # (3, 2C4, C4)
            wm1 = jnp.concatenate([w2[:, 2], jnp.zeros_like(w2[:, 2])], axis=1)
            w_taps = jnp.stack([wm0, wm1], axis=1).reshape(6, 2 * C4, C4)
            taps = [(kh, sc) for kh in range(3) for sc in range(2)]
        else:
            xin = y1p
            w_taps = w2.reshape(9, C4, C4)
            taps = [(kh, kw) for kh in range(3) for kw in range(3)]
        y2, s2, q2 = conv_taps(xin, w_taps.astype(bf16), taps=taps,
                               row_stride=stride, Ho=Ho, Wo=Wo)
        sc2, sh2 = bn_coeffs(s2, q2, params[f'norm2_{t}_g'],
                             params[f'norm2_{t}_b'], M2)

        # conv3 (1x1) with norm2-apply + ReLU fused into its A-load, + BN3 stats
        y3, s3, q3 = matmul_fused(y2.reshape(M2, C4),
                                  params['conv3'].astype(bf16),
                                  in_scale=sc2, in_shift=sh2)
        sc3, sh3 = bn_coeffs(s3, q3, params[f'norm3_{t}_g'],
                             params[f'norm3_{t}_b'], M2)

        # norm3-apply + norm_skip-apply + residual add + ReLU (lane-dense)
        xf = affine_add_relu(y3, sc3, sh3,
                             skip_raw.reshape(M2, Cout), sk_scale, sk_shift)
        x = xf.reshape(Nn, Ho, Wo, Cout)

    return jnp.transpose(x.astype(jnp.float32), (0, 3, 1, 2))  # NHWC -> NCHW


# --------------------------------------------------------------------------
# Deterministic synthetic params matching nn.Conv2d / nn.BatchNorm2d shapes
# --------------------------------------------------------------------------

def init_params(key, in_channels, out_channels, times):
    c4 = out_channels * SCALE
    ks = jax.random.split(key, 5)

    def conv_w(k, cout, cin, kh, kw):                  # PyTorch OIHW weight
        return jax.random.normal(k, (cout, cin, kh, kw), jnp.float32) * 0.1

    w_in = conv_w(ks[0], out_channels, in_channels, 1, 1)
    w_skip = conv_w(ks[1], out_channels, out_channels, 1, 1)
    w_c1 = conv_w(ks[2], c4, out_channels, 1, 1)
    w_c2 = conv_w(ks[3], c4, c4, 3, 3)
    w_c3 = conv_w(ks[4], out_channels, c4, 1, 1)

    params = {
        'conv_input': w_in[:, :, 0, 0].T,                       # (Cin, Cout)
        'skip':       w_skip[:, :, 0, 0].T,
        'conv1':      w_c1[:, :, 0, 0].T,
        'conv2':      jnp.transpose(w_c2, (2, 3, 1, 0)),        # HWIO (3,3,Cin,Cout)
        'conv3':      w_c3[:, :, 0, 0].T,
        'norm_skip_g': jnp.ones((out_channels,), jnp.float32),
        'norm_skip_b': jnp.zeros((out_channels,), jnp.float32),
    }
    for t in range(times):
        params[f'norm1_{t}_g'] = jnp.ones((c4,), jnp.float32)
        params[f'norm1_{t}_b'] = jnp.zeros((c4,), jnp.float32)
        params[f'norm2_{t}_g'] = jnp.ones((c4,), jnp.float32)
        params[f'norm2_{t}_b'] = jnp.zeros((c4,), jnp.float32)
        params[f'norm3_{t}_g'] = jnp.ones((out_channels,), jnp.float32)
        params[f'norm3_{t}_b'] = jnp.zeros((out_channels,), jnp.float32)
    return params


if __name__ == "__main__":
    key = jax.random.PRNGKey(0)
    k_in, k_par = jax.random.split(key)

    in_channels, out_channels, times = 4, 8, 2
    x = jax.random.normal(k_in, (2, in_channels, 16, 16), jnp.float32)  # NCHW
    params = init_params(k_par, in_channels, out_channels, times)

    fwd = jax.jit(functools.partial(corblock_s_forward, times=times))
    out = jax.block_until_ready(fwd(x, params))

    assert out.shape == (2, out_channels, 8, 8), out.shape
    assert bool(jnp.all(jnp.isfinite(out)))
    print("KERNEL_OK")
</pallas_src>

<mosaic_0001>
module attributes {stable_mosaic.version = 11 : i64} {
  func.func @kernel(%arg0: i32, %arg1: memref<512x4xbf16, #tpu.memory_space<vmem>>, %arg2: memref<4x8xbf16, #tpu.memory_space<vmem>>, %arg3: memref<512x8xbf16, #tpu.memory_space<vmem>>) attributes {dimension_semantics = [#tpu.dimension_semantics<parallel>], iteration_bounds = array<i64: 1>, scalar_prefetch = 0 : i64, scratch_operands = 0 : i64, tpu.core_type = #tpu.core_type<tc>, window_params = [{transform_indices = @transform_0, window_bounds = array<i64: 512, 4>}, {pipeline_mode = #tpu.pipeline_mode<synchronous>, transform_indices = @transform_1, window_bounds = array<i64: 4, 8>}, {transform_indices = @transform_2, window_bounds = array<i64: 512, 8>}]} {
    %c0 = arith.constant 0 : index
    %c0_0 = arith.constant 0 : index
    %0 = vector.load %arg1[%c0, %c0_0] : memref<512x4xbf16, #tpu.memory_space<vmem>>, vector<512x4xbf16>
    %c0_1 = arith.constant 0 : index
    %c0_2 = arith.constant 0 : index
    %1 = vector.load %arg2[%c0_1, %c0_2] : memref<4x8xbf16, #tpu.memory_space<vmem>>, vector<4x8xbf16>
    %cst = arith.constant dense<0.000000e+00> : vector<512x8xf32>
    %2 = tpu.matmul %0, %1, %cst {dimension_numbers = #tpu.dot_dimension_numbers<[1], [0], [0], [1], [0, 0, 1, 1], [], []>} : vector<512x4xbf16>, vector<4x8xbf16>, vector<512x8xf32> -> vector<512x8xf32>
    %3 = arith.truncf %2 : vector<512x8xf32> to vector<512x8xbf16>
    %c0_3 = arith.constant 0 : index
    %c0_4 = arith.constant 0 : index
    %4 = vector.load %arg3[%c0_3, %c0_4] : memref<512x8xbf16, #tpu.memory_space<vmem>>, vector<512x8xbf16>
    tpu.vector_store %arg3[%c0_3, %c0_4], %3 {strides = array<i32>} : memref<512x8xbf16, #tpu.memory_space<vmem>>, vector<512x8xbf16>,
    return
  }
  func.func @transform_0(%arg0: i32) -> (i32, i32) {
    %c0_i32 = arith.constant 0 : i32
    %c0_i32_0 = arith.constant 0 : i32
    return %arg0, %c0_i32 : i32, i32
  }
  func.func @transform_1(%arg0: i32) -> (i32, i32) {
    %c0_i32 = arith.constant 0 : i32
    %c0_i32_0 = arith.constant 0 : i32
    %c0_i32_1 = arith.constant 0 : i32
    return %c0_i32, %c0_i32_0 : i32, i32
  }
  func.func @transform_2(%arg0: i32) -> (i32, i32) {
    %c0_i32 = arith.constant 0 : i32
    %c0_i32_0 = arith.constant 0 : i32
    return %arg0, %c0_i32 : i32, i32
  }
}

module attributes {stable_mosaic.version = 11 : i64} {
  func.func @kernel(%arg0: i32, %arg1: memref<512x8xbf16, #tpu.memory_space<vmem>>, %arg2: memref<8x32xbf16, #tpu.memory_space<vmem>>, %arg3: memref<512x32xbf16, #tpu.memory_space<vmem>>, %arg4: memref<1x1x32xf32, #tpu.memory_space<vmem>>, %arg5: memref<1x1x32xf32, #tpu.memory_space<vmem>>) attributes {dimension_semantics = [#tpu.dimension_semantics<parallel>], iteration_bounds = array<i64: 1>, scalar_prefetch = 0 : i64, scratch_operands = 0 : i64, tpu.core_type = #tpu.core_type<tc>, window_params = [{transform_indices = @transform_0, window_bounds = array<i64: 512, 8>}, {pipeline_mode = #tpu.pipeline_mode<synchronous>, transform_indices = @transform_1, window_bounds = array<i64: 8, 32>}, {transform_indices = @transform_2, window_bounds = array<i64: 512, 32>}, {transform_indices = @transform_3, window_bounds = array<i64: 1, 1, 32>}, {transform_indices = @transform_4, window_bounds = array<i64: 1, 1, 32>}]} {
    %c0 = arith.constant 0 : index
    %c0_0 = arith.constant 0 : index
    %0 = vector.load %arg1[%c0, %c0_0] : memref<512x8xbf16, #tpu.memory_space<vmem>>, vector<512x8xbf16>
    %c0_1 = arith.constant 0 : index
    %c0_2 = arith.constant 0 : index
    %1 = vector.load %arg2[%c0_1, %c0_2] : memref<8x32xbf16, #tpu.memory_space<vmem>>, vector<8x32xbf16>
    %cst = arith.constant dense<0.000000e+00> : vector<512x32xf32>
    %2 = tpu.matmul %0, %1, %cst {dimension_numbers = #tpu.dot_dimension_numbers<[1], [0], [0], [1], [0, 0, 1, 1], [], []>} : vector<512x8xbf16>, vector<8x32xbf16>, vector<512x32xf32> -> vector<512x32xf32>
    %3 = arith.truncf %2 : vector<512x32xf32> to vector<512x32xbf16>
    %c0_3 = arith.constant 0 : index
    %c0_4 = arith.constant 0 : index
    %4 = vector.load %arg3[%c0_3, %c0_4] : memref<512x32xbf16, #tpu.memory_space<vmem>>, vector<512x32xbf16>
    tpu.vector_store %arg3[%c0_3, %c0_4], %3 {strides = array<i32>} : memref<512x32xbf16, #tpu.memory_space<vmem>>, vector<512x32xbf16>,
    %cst_5 = arith.constant dense<0.000000e+00> : vector<32xf32>
    %5 = vector.multi_reduction <add>, %2, %cst_5 [0] : vector<512x32xf32> to vector<32xf32>
    %6 = vector.shape_cast %5 : vector<32xf32> to vector<1x32xf32>
    %c0_6 = arith.constant 0 : index
    %c0_7 = arith.constant 0 : index
    %c0_8 = arith.constant 0 : index
    %7 = vector.load %arg4[%c0_6, %c0_7, %c0_8] : memref<1x1x32xf32, #tpu.memory_space<vmem>>, vector<1x1x32xf32>
    %8 = vector.shape_cast %7 : vector<1x1x32xf32> to vector<1x32xf32>
    %9 = vector.shape_cast %6 : vector<1x32xf32> to vector<1x1x32xf32>
    tpu.vector_store %arg4[%c0_6, %c0_7, %c0_8], %9 {strides = array<i32>} : memref<1x1x32xf32, #tpu.memory_space<vmem>>, vector<1x1x32xf32>,
    %10 = arith.mulf %2, %2 : vector<512x32xf32>
    %cst_9 = arith.constant dense<0.000000e+00> : vector<32xf32>
    %11 = vector.multi_reduction <add>, %10, %cst_9 [0] : vector<512x32xf32> to vector<32xf32>
    %12 = vector.shape_cast %11 : vector<32xf32> to vector<1x32xf32>
    %c0_10 = arith.constant 0 : index
    %c0_11 = arith.constant 0 : index
    %c0_12 = arith.constant 0 : index
    %13 = vector.load %arg5[%c0_10, %c0_11, %c0_12] : memref<1x1x32xf32, #tpu.memory_space<vmem>>, vector<1x1x32xf32>
    %14 = vector.shape_cast %13 : vector<1x1x32xf32> to vector<1x32xf32>
    %15 = vector.shape_cast %12 : vector<1x32xf32> to vector<1x1x32xf32>
    tpu.vector_store %arg5[%c0_10, %c0_11, %c0_12], %15 {strides = array<i32>} : memref<1x1x32xf32, #tpu.memory_space<vmem>>, vector<1x1x32xf32>,
    return
  }
  func.func @transform_0(%arg0: i32) -> (i32, i32) {
    %c0_i32 = arith.constant 0 : i32
    %c0_i32_0 = arith.constant 0 : i32
    return %arg0, %c0_i32 : i32, i32
  }
  func.func @transform_1(%arg0: i32) -> (i32, i32) {
    %c0_i32 = arith.constant 0 : i32
    %c0_i32_0 = arith.constant 0 : i32
    %c0_i32_1 = arith.constant 0 : i32
    return %c0_i32, %c0_i32_0 : i32, i32
  }
  func.func @transform_2(%arg0: i32) -> (i32, i32) {
    %c0_i32 = arith.constant 0 : i32
    %c0_i32_0 = arith.constant 0 : i32
    return %arg0, %c0_i32 : i32, i32
  }
  func.func @transform_3(%arg0: i32) -> (i32, i32, i32) {
    %c0_i32 = arith.constant 0 : i32
    %c0_i32_0 = arith.constant 0 : i32
    %c0_i32_1 = arith.constant 0 : i32
    return %arg0, %c0_i32, %c0_i32_0 : i32, i32, i32
  }
  func.func @transform_4(%arg0: i32) -> (i32, i32, i32) {
    %c0_i32 = arith.constant 0 : i32
    %c0_i32_0 = arith.constant 0 : i32
    %c0_i32_1 = arith.constant 0 : i32
    return %arg0, %c0_i32, %c0_i32_0 : i32, i32, i32
  }
}

module attributes {stable_mosaic.version = 11 : i64} {
  func.func @kernel(%arg0: i32, %arg1: memref<1x16x16x32xbf16, #tpu.memory_space<vmem>>, %arg2: memref<1x32xf32, #tpu.memory_space<vmem>>, %arg3: memref<1x32xf32, #tpu.memory_space<vmem>>, %arg4: memref<1x18x18x32xbf16, #tpu.memory_space<vmem>>) attributes {dimension_semantics = [#tpu.dimension_semantics<parallel>], iteration_bounds = array<i64: 2>, scalar_prefetch = 0 : i64, scratch_operands = 0 : i64, tpu.core_type = #tpu.core_type<tc>, window_params = [{transform_indices = @transform_0, window_bounds = array<i64: 1, 16, 16, 32>}, {pipeline_mode = #tpu.pipeline_mode<synchronous>, transform_indices = @transform_1, window_bounds = array<i64: 1, 32>}, {pipeline_mode = #tpu.pipeline_mode<synchronous>, transform_indices = @transform_2, window_bounds = array<i64: 1, 32>}, {transform_indices = @transform_3, window_bounds = array<i64: 1, 18, 18, 32>}]} {
    %cst = arith.constant 0.000000e+00 : bf16
    %0 = vector.broadcast %cst : bf16 to vector<1x18x18x32xbf16>
    %c0 = arith.constant 0 : index
    %c0_0 = arith.constant 0 : index
    %c0_1 = arith.constant 0 : index
    %c0_2 = arith.constant 0 : index
    %1 = vector.load %arg4[%c0, %c0_0, %c0_1, %c0_2] : memref<1x18x18x32xbf16, #tpu.memory_space<vmem>>, vector<1x18x18x32xbf16>
    tpu.vector_store %arg4[%c0, %c0_0, %c0_1, %c0_2], %0 {strides = array<i32>} : memref<1x18x18x32xbf16, #tpu.memory_space<vmem>>, vector<1x18x18x32xbf16>,
    %c0_3 = arith.constant 0 : index
    %c0_4 = arith.constant 0 : index
    %c0_5 = arith.constant 0 : index
    %c0_6 = arith.constant 0 : index
    %2 = vector.load %arg1[%c0_3, %c0_4, %c0_5, %c0_6] : memref<1x16x16x32xbf16, #tpu.memory_space<vmem>>, vector<1x16x16x32xbf16>
    %3 = arith.extf %2 : vector<1x16x16x32xbf16> to vector<1x16x16x32xf32>
    %c0_7 = arith.constant 0 : index
    %c0_8 = arith.constant 0 : index
    %4 = vector.load %arg2[%c0_7, %c0_8] : memref<1x32xf32, #tpu.memory_space<vmem>>, vector<1x32xf32>
    %5 = vector.shape_cast %4 : vector<1x32xf32> to vector<1x1x1x32xf32>
    %6 = vector.broadcast %5 : vector<1x1x1x32xf32> to vector<1x16x16x32xf32>
    %7 = arith.mulf %3, %6 : vector<1x16x16x32xf32>
    %c0_9 = arith.constant 0 : index
    %c0_10 = arith.constant 0 : index
    %8 = vector.load %arg3[%c0_9, %c0_10] : memref<1x32xf32, #tpu.memory_space<vmem>>, vector<1x32xf32>
    %9 = vector.shape_cast %8 : vector<1x32xf32> to vector<1x1x1x32xf32>
    %10 = vector.broadcast %9 : vector<1x1x1x32xf32> to vector<1x16x16x32xf32>
    %11 = arith.addf %7, %10 : vector<1x16x16x32xf32>
    %cst_11 = arith.constant 0.000000e+00 : f32
    %12 = vector.broadcast %cst_11 : f32 to vector<1x16x16x32xf32>
    %13 = arith.maximumf %11, %12 : vector<1x16x16x32xf32>
    %14 = vector.shape_cast %13 : vector<1x16x16x32xf32> to vector<16x16x32xf32>
    %15 = arith.truncf %14 : vector<16x16x32xf32> to vector<16x16x32xbf16>
    %c0_12 = arith.constant 0 : index
    %c1 = arith.constant 1 : index
    %c1_13 = arith.constant 1 : index
    %c0_14 = arith.constant 0 : index
    %16 = vector.load %arg4[%c0_12, %c1, %c1_13, %c0_14] : memref<1x18x18x32xbf16, #tpu.memory_space<vmem>>, vector<1x16x16x32xbf16>
    %17 = vector.shape_cast %16 : vector<1x16x16x32xbf16> to vector<16x16x32xbf16>
    %18 = vector.shape_cast %15 : vector<16x16x32xbf16> to vector<1x16x16x32xbf16>
    tpu.vector_store %arg4[%c0_12, %c1, %c1_13, %c0_14], %18 {strides = array<i32>} : memref<1x18x18x32xbf16, #tpu.memory_space<vmem>>, vector<1x16x16x32xbf16>,
    return
  }
  func.func @transform_0(%arg0: i32) -> (i32, i32, i32, i32) {
    %c0_i32 = arith.constant 0 : i32
    %c0_i32_0 = arith.constant 0 : i32
    %c0_i32_1 = arith.constant 0 : i32
    %c0_i32_2 = arith.constant 0 : i32
    return %arg0, %c0_i32, %c0_i32_0, %c0_i32_1 : i32, i32, i32, i32
  }
  func.func @transform_1(%arg0: i32) -> (i32, i32) {
    %c0_i32 = arith.constant 0 : i32
    %c0_i32_0 = arith.constant 0 : i32
    %c0_i32_1 = arith.constant 0 : i32
    return %c0_i32, %c0_i32_0 : i32, i32
  }
  func.func @transform_2(%arg0: i32) -> (i32, i32) {
    %c0_i32 = arith.constant 0 : i32
    %c0_i32_0 = arith.constant 0 : i32
    %c0_i32_1 = arith.constant 0 : i32
    return %c0_i32, %c0_i32_0 : i32, i32
  }
  func.func @transform_3(%arg0: i32) -> (i32, i32, i32, i32) {
    %c0_i32 = arith.constant 0 : i32
    %c0_i32_0 = arith.constant 0 : i32
    %c0_i32_1 = arith.constant 0 : i32
    %c0_i32_2 = arith.constant 0 : i32
    return %arg0, %c0_i32, %c0_i32_0, %c0_i32_1 : i32, i32, i32, i32
  }
}

module attributes {stable_mosaic.version = 11 : i64} {
  func.func @kernel(%arg0: i32, %arg1: memref<1x18x9x64xbf16, #tpu.memory_space<vmem>>, %arg2: memref<6x64x32xbf16, #tpu.memory_space<vmem>>, %arg3: memref<1x64x32xbf16, #tpu.memory_space<vmem>>, %arg4: memref<1x1x32xf32, #tpu.memory_space<vmem>>, %arg5: memref<1x1x32xf32, #tpu.memory_space<vmem>>) attributes {dimension_semantics = [#tpu.dimension_semantics<parallel>], iteration_bounds = array<i64: 2>, scalar_prefetch = 0 : i64, scratch_operands = 0 : i64, tpu.core_type = #tpu.core_type<tc>, window_params = [{transform_indices = @transform_0, window_bounds = array<i64: 1, 18, 9, 64>}, {pipeline_mode = #tpu.pipeline_mode<synchronous>, transform_indices = @transform_1, window_bounds = array<i64: 6, 64, 32>}, {transform_indices = @transform_2, window_bounds = array<i64: 1, 64, 32>}, {transform_indices = @transform_3, window_bounds = array<i64: 1, 1, 32>}, {transform_indices = @transform_4, window_bounds = array<i64: 1, 1, 32>}]} {
    %cst = arith.constant 0.000000e+00 : f32
    %0 = vector.broadcast %cst : f32 to vector<64x32xf32>
    %c0 = arith.constant 0 : index
    %c0_0 = arith.constant 0 : index
    %c0_1 = arith.constant 0 : index
    %c0_2 = arith.constant 0 : index
    %1 = vector.load %arg1[%c0, %c0_0, %c0_1, %c0_2] : memref<1x18x9x64xbf16, #tpu.memory_space<vmem>>, vector<1x16x8x64xbf16>
    %2 = vector.shape_cast %1 : vector<1x16x8x64xbf16> to vector<16x8x64xbf16>
    %3 = vector.shape_cast %2 : vector<16x8x64xbf16> to vector<8x2x8x64xbf16>
    %4 = vector.extract_strided_slice %3 {offsets = [0, 0, 0, 0], sizes = [8, 1, 8, 64], strides = [1, 1, 1, 1]} : vector<8x2x8x64xbf16> to vector<8x1x8x64xbf16>
    %5 = vector.shape_cast %4 : vector<8x1x8x64xbf16> to vector<8x8x64xbf16>
    %6 = vector.shape_cast %5 : vector<8x8x64xbf16> to vector<64x64xbf16>
    %c0_3 = arith.constant 0 : index
    %c0_4 = arith.constant 0 : index
    %c0_5 = arith.constant 0 : index
    %7 = vector.load %arg2[%c0_3, %c0_4, %c0_5] : memref<6x64x32xbf16, #tpu.memory_space<vmem>>, vector<1x64x32xbf16>
    %8 = vector.shape_cast %7 : vector<1x64x32xbf16> to vector<64x32xbf16>
    %cst_6 = arith.constant dense<0.000000e+00> : vector<64x32xf32>
    %9 = tpu.matmul %6, %8, %cst_6 {dimension_numbers = #tpu.dot_dimension_numbers<[1], [0], [0], [1], [0, 0, 1, 1], [], []>} : vector<64x64xbf16>, vector<64x32xbf16>, vector<64x32xf32> -> vector<64x32xf32>
    %10 = arith.addf %0, %9 : vector<64x32xf32>
    %c0_7 = arith.constant 0 : index
    %c0_8 = arith.constant 0 : index
    %c1 = arith.constant 1 : index
    %c0_9 = arith.constant 0 : index
    %11 = vector.load %arg1[%c0_7, %c0_8, %c1, %c0_9] : memref<1x18x9x64xbf16, #tpu.memory_space<vmem>>, vector<1x16x8x64xbf16>
    %12 = vector.shape_cast %11 : vector<1x16x8x64xbf16> to vector<16x8x64xbf16>
    %13 = vector.shape_cast %12 : vector<16x8x64xbf16> to vector<8x2x8x64xbf16>
    %14 = vector.extract_strided_slice %13 {offsets = [0, 0, 0, 0], sizes = [8, 1, 8, 64], strides = [1, 1, 1, 1]} : vector<8x2x8x64xbf16> to vector<8x1x8x64xbf16>
    %15 = vector.shape_cast %14 : vector<8x1x8x64xbf16> to vector<8x8x64xbf16>
    %16 = vector.shape_cast %15 : vector<8x8x64xbf16> to vector<64x64xbf16>
    %c1_10 = arith.constant 1 : index
    %c0_11 = arith.constant 0 : index
    %c0_12 = arith.constant 0 : index
    %17 = vector.load %arg2[%c1_10, %c0_11, %c0_12] : memref<6x64x32xbf16, #tpu.memory_space<vmem>>, vector<1x64x32xbf16>
    %18 = vector.shape_cast %17 : vector<1x64x32xbf16> to vector<64x32xbf16>
    %cst_13 = arith.constant dense<0.000000e+00> : vector<64x32xf32>
    %19 = tpu.matmul %16, %18, %cst_13 {dimension_numbers = #tpu.dot_dimension_numbers<[1], [0], [0], [1], [0, 0, 1, 1], [], []>} : vector<64x64xbf16>, vector<64x32xbf16>, vector<64x32xf32> -> vector<64x32xf32>
    %20 = arith.addf %10, %19 : vector<64x32xf32>
    %c0_14 = arith.constant 0 : index
    %c1_15 = arith.constant 1 : index
    %c0_16 = arith.constant 0 : index
    %c0_17 = arith.constant 0 : index
    %21 = vector.load %arg1[%c0_14, %c1_15, %c0_16, %c0_17] : memref<1x18x9x64xbf16, #tpu.memory_space<vmem>>, vector<1x16x8x64xbf16>
    %22 = vector.shape_cast %21 : vector<1x16x8x64xbf16> to vector<16x8x64xbf16>
    %23 = vector.shape_cast %22 : vector<16x8x64xbf16> to vector<8x2x8x64xbf16>
    %24 = vector.extract_strided_slice %23 {offsets = [0, 0, 0, 0], sizes = [8, 1, 8, 64], strides = [1, 1, 1, 1]} : vector<8x2x8x64xbf16> to vector<8x1x8x64xbf16>
    %25 = vector.shape_cast %24 : vector<8x1x8x64xbf16> to vector<8x8x64xbf16>
    %26 = vector.shape_cast %25 : vector<8x8x64xbf16> to vector<64x64xbf16>
    %c2 = arith.constant 2 : index
    %c0_18 = arith.constant 0 : index
    %c0_19 = arith.constant 0 : index
    %27 = vector.load %arg2[%c2, %c0_18, %c0_19] : memref<6x64x32xbf16, #tpu.memory_space<vmem>>, vector<1x64x32xbf16>
    %28 = vector.shape_cast %27 : vector<1x64x32xbf16> to vector<64x32xbf16>
    %cst_20 = arith.constant dense<0.000000e+00> : vector<64x32xf32>
    %29 = tpu.matmul %26, %28, %cst_20 {dimension_numbers = #tpu.dot_dimension_numbers<[1], [0], [0], [1], [0, 0, 1, 1], [], []>} : vector<64x64xbf16>, vector<64x32xbf16>, vector<64x32xf32> -> vector<64x32xf32>
    %30 = arith.addf %20, %29 : vector<64x32xf32>
    %c0_21 = arith.constant 0 : index
    %c1_22 = arith.constant 1 : index
    %c1_23 = arith.constant 1 : index
    %c0_24 = arith.constant 0 : index
    %31 = vector.load %arg1[%c0_21, %c1_22, %c1_23, %c0_24] : memref<1x18x9x64xbf16, #tpu.memory_space<vmem>>, vector<1x16x8x64xbf16>
    %32 = vector.shape_cast %31 : vector<1x16x8x64xbf16> to vector<16x8x64xbf16>
    %33 = vector.shape_cast %32 : vector<16x8x64xbf16> to vector<8x2x8x64xbf16>
    %34 = vector.extract_strided_slice %33 {offsets = [0, 0, 0, 0], sizes = [8, 1, 8, 64], strides = [1, 1, 1, 1]} : vector<8x2x8x64xbf16> to vector<8x1x8x64xbf16>
    %35 = vector.shape_cast %34 : vector<8x1x8x64xbf16> to vector<8x8x64xbf16>
    %36 = vector.shape_cast %35 : vector<8x8x64xbf16> to vector<64x64xbf16>
    %c3 = arith.constant 3 : index
    %c0_25 = arith.constant 0 : index
    %c0_26 = arith.constant 0 : index
    %37 = vector.load %arg2[%c3, %c0_25, %c0_26] : memref<6x64x32xbf16, #tpu.memory_space<vmem>>, vector<1x64x32xbf16>
    %38 = vector.shape_cast %37 : vector<1x64x32xbf16> to vector<64x32xbf16>
    %cst_27 = arith.constant dense<0.000000e+00> : vector<64x32xf32>
    %39 = tpu.matmul %36, %38, %cst_27 {dimension_numbers = #tpu.dot_dimension_numbers<[1], [0], [0], [1], [0, 0, 1, 1], [], []>} : vector<64x64xbf16>, vector<64x32xbf16>, vector<64x32xf32> -> vector<64x32xf32>
    %40 = arith.addf %30, %39 : vector<64x32xf32>
    %c0_28 = arith.constant 0 : index
    %c2_29 = arith.constant 2 : index
    %c0_30 = arith.constant 0 : index
    %c0_31 = arith.constant 0 : index
    %41 = vector.load %arg1[%c0_28, %c2_29, %c0_30, %c0_31] : memref<1x18x9x64xbf16, #tpu.memory_space<vmem>>, vector<1x16x8x64xbf16>
    %42 = vector.shape_cast %41 : vector<1x16x8x64xbf16> to vector<16x8x64xbf16>
    %43 = vector.shape_cast %42 : vector<16x8x64xbf16> to vector<8x2x8x64xbf16>
    %44 = vector.extract_strided_slice %43 {offsets = [0, 0, 0, 0], sizes = [8, 1, 8, 64], strides = [1, 1, 1, 1]} : vector<8x2x8x64xbf16> to vector<8x1x8x64xbf16>
    %45 = vector.shape_cast %44 : vector<8x1x8x64xbf16> to vector<8x8x64xbf16>
    %46 = vector.shape_cast %45 : vector<8x8x64xbf16> to vector<64x64xbf16>
    %c4 = arith.constant 4 : index
    %c0_32 = arith.constant 0 : index
    %c0_33 = arith.constant 0 : index
    %47 = vector.load %arg2[%c4, %c0_32, %c0_33] : memref<6x64x32xbf16, #tpu.memory_space<vmem>>, vector<1x64x32xbf16>
    %48 = vector.shape_cast %47 : vector<1x64x32xbf16> to vector<64x32xbf16>
    %cst_34 = arith.constant dense<0.000000e+00> : vector<64x32xf32>
    %49 = tpu.matmul %46, %48, %cst_34 {dimension_numbers = #tpu.dot_dimension_numbers<[1], [0], [0], [1], [0, 0, 1, 1], [], []>} : vector<64x64xbf16>, vector<64x32xbf16>, vector<64x32xf32> -> vector<64x32xf32>
    %50 = arith.addf %40, %49 : vector<64x32xf32>
    %c0_35 = arith.constant 0 : index
    %c2_36 = arith.constant 2 : index
    %c1_37 = arith.constant 1 : index
    %c0_38 = arith.constant 0 : index
    %51 = vector.load %arg1[%c0_35, %c2_36, %c1_37, %c0_38] : memref<1x18x9x64xbf16, #tpu.memory_space<vmem>>, vector<1x16x8x64xbf16>
    %52 = vector.shape_cast %51 : vector<1x16x8x64xbf16> to vector<16x8x64xbf16>
    %53 = vector.shape_cast %52 : vector<16x8x64xbf16> to vector<8x2x8x64xbf16>
    %54 = vector.extract_strided_slice %53 {offsets = [0, 0, 0, 0], sizes = [8, 1, 8, 64], strides = [1, 1, 1, 1]} : vector<8x2x8x64xbf16> to vector<8x1x8x64xbf16>
    %55 = vector.shape_cast %54 : vector<8x1x8x64xbf16> to vector<8x8x64xbf16>
    %56 = vector.shape_cast %55 : vector<8x8x64xbf16> to vector<64x64xbf16>
    %c5 = arith.constant 5 : index
    %c0_39 = arith.constant 0 : index
    %c0_40 = arith.constant 0 : index
    %57 = vector.load %arg2[%c5, %c0_39, %c0_40] : memref<6x64x32xbf16, #tpu.memory_space<vmem>>, vector<1x64x32xbf16>
    %58 = vector.shape_cast %57 : vector<1x64x32xbf16> to vector<64x32xbf16>
    %cst_41 = arith.constant dense<0.000000e+00> : vector<64x32xf32>
    %59 = tpu.matmul %56, %58, %cst_41 {dimension_numbers = #tpu.dot_dimension_numbers<[1], [0], [0], [1], [0, 0, 1, 1], [], []>} : vector<64x64xbf16>, vector<64x32xbf16>, vector<64x32xf32> -> vector<64x32xf32>
    %60 = arith.addf %50, %59 : vector<64x32xf32>
    %61 = arith.truncf %60 : vector<64x32xf32> to vector<64x32xbf16>
    %c0_42 = arith.constant 0 : index
    %c0_43 = arith.constant 0 : index
    %c0_44 = arith.constant 0 : index
    %62 = vector.load %arg3[%c0_42, %c0_43, %c0_44] : memref<1x64x32xbf16, #tpu.memory_space<vmem>>, vector<1x64x32xbf16>
    %63 = vector.shape_cast %62 : vector<1x64x32xbf16> to vector<64x32xbf16>
    %64 = vector.shape_cast %61 : vector<64x32xbf16> to vector<1x64x32xbf16>
    tpu.vector_store %arg3[%c0_42, %c0_43, %c0_44], %64 {strides = array<i32>} : memref<1x64x32xbf16, #tpu.memory_space<vmem>>, vector<1x64x32xbf16>,
    %cst_45 = arith.constant dense<0.000000e+00> : vector<32xf32>
    %65 = vector.multi_reduction <add>, %60, %cst_45 [0] : vector<64x32xf32> to vector<32xf32>
    %66 = vector.shape_cast %65 : vector<32xf32> to vector<1x32xf32>
    %c0_46 = arith.constant 0 : index
    %c0_47 = arith.constant 0 : index
    %c0_48 = arith.constant 0 : index
    %67 = vector.load %arg4[%c0_46, %c0_47, %c0_48] : memref<1x1x32xf32, #tpu.memory_space<vmem>>, vector<1x1x32xf32>
    %68 = vector.shape_cast %67 : vector<1x1x32xf32> to vector<1x32xf32>
    %69 = vector.shape_cast %66 : vector<1x32xf32> to vector<1x1x32xf32>
    tpu.vector_store %arg4[%c0_46, %c0_47, %c0_48], %69 {strides = array<i32>} : memref<1x1x32xf32, #tpu.memory_space<vmem>>, vector<1x1x32xf32>,
    %70 = arith.mulf %60, %60 : vector<64x32xf32>
    %cst_49 = arith.constant dense<0.000000e+00> : vector<32xf32>
    %71 = vector.multi_reduction <add>, %70, %cst_49 [0] : vector<64x32xf32> to vector<32xf32>
    %72 = vector.shape_cast %71 : vector<32xf32> to vector<1x32xf32>
    %c0_50 = arith.constant 0 : index
    %c0_51 = arith.constant 0 : index
    %c0_52 = arith.constant 0 : index
    %73 = vector.load %arg5[%c0_50, %c0_51, %c0_52] : memref<1x1x32xf32, #tpu.memory_space<vmem>>, vector<1x1x32xf32>
    %74 = vector.shape_cast %73 : vector<1x1x32xf32> to vector<1x32xf32>
    %75 = vector.shape_cast %72 : vector<1x32xf32> to vector<1x1x32xf32>
    tpu.vector_store %arg5[%c0_50, %c0_51, %c0_52], %75 {strides = array<i32>} : memref<1x1x32xf32, #tpu.memory_space<vmem>>, vector<1x1x32xf32>,
    return
  }
  func.func @transform_0(%arg0: i32) -> (i32, i32, i32, i32) {
    %c0_i32 = arith.constant 0 : i32
    %c0_i32_0 = arith.constant 0 : i32
    %c0_i32_1 = arith.constant 0 : i32
    %c0_i32_2 = arith.constant 0 : i32
    return %arg0, %c0_i32, %c0_i32_0, %c0_i32_1 : i32, i32, i32, i32
  }
  func.func @transform_1(%arg0: i32) -> (i32, i32, i32) {
    %c0_i32 = arith.constant 0 : i32
    %c0_i32_0 = arith.constant 0 : i32
    %c0_i32_1 = arith.constant 0 : i32
    %c0_i32_2 = arith.constant 0 : i32
    return %c0_i32, %c0_i32_0, %c0_i32_1 : i32, i32, i32
  }
  func.func @transform_2(%arg0: i32) -> (i32, i32, i32) {
    %c0_i32 = arith.constant 0 : i32
    %c0_i32_0 = arith.constant 0 : i32
    %c0_i32_1 = arith.constant 0 : i32
    return %arg0, %c0_i32, %c0_i32_0 : i32, i32, i32
  }
  func.func @transform_3(%arg0: i32) -> (i32, i32, i32) {
    %c0_i32 = arith.constant 0 : i32
    %c0_i32_0 = arith.constant 0 : i32
    %c0_i32_1 = arith.constant 0 : i32
    return %arg0, %c0_i32, %c0_i32_0 : i32, i32, i32
  }
  func.func @transform_4(%arg0: i32) -> (i32, i32, i32) {
    %c0_i32 = arith.constant 0 : i32
    %c0_i32_0 = arith.constant 0 : i32
    %c0_i32_1 = arith.constant 0 : i32
    return %arg0, %c0_i32, %c0_i32_0 : i32, i32, i32
  }
}

module attributes {stable_mosaic.version = 11 : i64} {
  func.func @kernel(%arg0: i32, %arg1: memref<128x32xbf16, #tpu.memory_space<vmem>>, %arg2: memref<32x8xbf16, #tpu.memory_space<vmem>>, %arg3: memref<1x32xf32, #tpu.memory_space<vmem>>, %arg4: memref<1x32xf32, #tpu.memory_space<vmem>>, %arg5: memref<128x8xbf16, #tpu.memory_space<vmem>>, %arg6: memref<1x1x8xf32, #tpu.memory_space<vmem>>, %arg7: memref<1x1x8xf32, #tpu.memory_space<vmem>>) attributes {dimension_semantics = [#tpu.dimension_semantics<parallel>], iteration_bounds = array<i64: 1>, scalar_prefetch = 0 : i64, scratch_operands = 0 : i64, tpu.core_type = #tpu.core_type<tc>, window_params = [{transform_indices = @transform_0, window_bounds = array<i64: 128, 32>}, {pipeline_mode = #tpu.pipeline_mode<synchronous>, transform_indices = @transform_1, window_bounds = array<i64: 32, 8>}, {pipeline_mode = #tpu.pipeline_mode<synchronous>, transform_indices = @transform_2, window_bounds = array<i64: 1, 32>}, {pipeline_mode = #tpu.pipeline_mode<synchronous>, transform_indices = @transform_3, window_bounds = array<i64: 1, 32>}, {transform_indices = @transform_4, window_bounds = array<i64: 128, 8>}, {transform_indices = @transform_5, window_bounds = array<i64: 1, 1, 8>}, {transform_indices = @transform_6, window_bounds = array<i64: 1, 1, 8>}]} {
    %c0 = arith.constant 0 : index
    %c0_0 = arith.constant 0 : index
    %0 = vector.load %arg1[%c0, %c0_0] : memref<128x32xbf16, #tpu.memory_space<vmem>>, vector<128x32xbf16>
    %1 = arith.extf %0 : vector<128x32xbf16> to vector<128x32xf32>
    %c0_1 = arith.constant 0 : index
    %c0_2 = arith.constant 0 : index
    %2 = vector.load %arg3[%c0_1, %c0_2] : memref<1x32xf32, #tpu.memory_space<vmem>>, vector<1x32xf32>
    %3 = vector.broadcast %2 : vector<1x32xf32> to vector<128x32xf32>
    %4 = arith.mulf %1, %3 : vector<128x32xf32>
    %c0_3 = arith.constant 0 : index
    %c0_4 = arith.constant 0 : index
    %5 = vector.load %arg4[%c0_3, %c0_4] : memref<1x32xf32, #tpu.memory_space<vmem>>, vector<1x32xf32>
    %6 = vector.broadcast %5 : vector<1x32xf32> to vector<128x32xf32>
    %7 = arith.addf %4, %6 : vector<128x32xf32>
    %cst = arith.constant 0.000000e+00 : f32
    %8 = vector.broadcast %cst : f32 to vector<128x32xf32>
    %9 = arith.maximumf %7, %8 : vector<128x32xf32>
    %10 = arith.truncf %9 : vector<128x32xf32> to vector<128x32xbf16>
    %c0_5 = arith.constant 0 : index
    %c0_6 = arith.constant 0 : index
    %11 = vector.load %arg2[%c0_5, %c0_6] : memref<32x8xbf16, #tpu.memory_space<vmem>>, vector<32x8xbf16>
    %cst_7 = arith.constant dense<0.000000e+00> : vector<128x8xf32>
    %12 = tpu.matmul %10, %11, %cst_7 {dimension_numbers = #tpu.dot_dimension_numbers<[1], [0], [0], [1], [0, 0, 1, 1], [], []>} : vector<128x32xbf16>, vector<32x8xbf16>, vector<128x8xf32> -> vector<128x8xf32>
    %13 = arith.truncf %12 : vector<128x8xf32> to vector<128x8xbf16>
    %c0_8 = arith.constant 0 : index
    %c0_9 = arith.constant 0 : index
    %14 = vector.load %arg5[%c0_8, %c0_9] : memref<128x8xbf16, #tpu.memory_space<vmem>>, vector<128x8xbf16>
    tpu.vector_store %arg5[%c0_8, %c0_9], %13 {strides = array<i32>} : memref<128x8xbf16, #tpu.memory_space<vmem>>, vector<128x8xbf16>,
    %cst_10 = arith.constant dense<0.000000e+00> : vector<8xf32>
    %15 = vector.multi_reduction <add>, %12, %cst_10 [0] : vector<128x8xf32> to vector<8xf32>
    %16 = vector.shape_cast %15 : vector<8xf32> to vector<1x8xf32>
    %c0_11 = arith.constant 0 : index
    %c0_12 = arith.constant 0 : index
    %c0_13 = arith.constant 0 : index
    %17 = vector.load %arg6[%c0_11, %c0_12, %c0_13] : memref<1x1x8xf32, #tpu.memory_space<vmem>>, vector<1x1x8xf32>
    %18 = vector.shape_cast %17 : vector<1x1x8xf32> to vector<1x8xf32>
    %19 = vector.shape_cast %16 : vector<1x8xf32> to vector<1x1x8xf32>
    tpu.vector_store %arg6[%c0_11, %c0_12, %c0_13], %19 {strides = array<i32>} : memref<1x1x8xf32, #tpu.memory_space<vmem>>, vector<1x1x8xf32>,
    %20 = arith.mulf %12, %12 : vector<128x8xf32>
    %cst_14 = arith.constant dense<0.000000e+00> : vector<8xf32>
    %21 = vector.multi_reduction <add>, %20, %cst_14 [0] : vector<128x8xf32> to vector<8xf32>
    %22 = vector.shape_cast %21 : vector<8xf32> to vector<1x8xf32>
    %c0_15 = arith.constant 0 : index
    %c0_16 = arith.constant 0 : index
    %c0_17 = arith.constant 0 : index
    %23 = vector.load %arg7[%c0_15, %c0_16, %c0_17] : memref<1x1x8xf32, #tpu.memory_space<vmem>>, vector<1x1x8xf32>
    %24 = vector.shape_cast %23 : vector<1x1x8xf32> to vector<1x8xf32>
    %25 = vector.shape_cast %22 : vector<1x8xf32> to vector<1x1x8xf32>
    tpu.vector_store %arg7[%c0_15, %c0_16, %c0_17], %25 {strides = array<i32>} : memref<1x1x8xf32, #tpu.memory_space<vmem>>, vector<1x1x8xf32>,
    return
  }
  func.func @transform_0(%arg0: i32) -> (i32, i32) {
    %c0_i32 = arith.constant 0 : i32
    %c0_i32_0 = arith.constant 0 : i32
    return %arg0, %c0_i32 : i32, i32
  }
  func.func @transform_1(%arg0: i32) -> (i32, i32) {
    %c0_i32 = arith.constant 0 : i32
    %c0_i32_0 = arith.constant 0 : i32
    %c0_i32_1 = arith.constant 0 : i32
    return %c0_i32, %c0_i32_0 : i32, i32
  }
  func.func @transform_2(%arg0: i32) -> (i32, i32) {
    %c0_i32 = arith.constant 0 : i32
    %c0_i32_0 = arith.constant 0 : i32
    %c0_i32_1 = arith.constant 0 : i32
    return %c0_i32, %c0_i32_0 : i32, i32
  }
  func.func @transform_3(%arg0: i32) -> (i32, i32) {
    %c0_i32 = arith.constant 0 : i32
    %c0_i32_0 = arith.constant 0 : i32
    %c0_i32_1 = arith.constant 0 : i32
    return %c0_i32, %c0_i32_0 : i32, i32
  }
  func.func @transform_4(%arg0: i32) -> (i32, i32) {
    %c0_i32 = arith.constant 0 : i32
    %c0_i32_0 = arith.constant 0 : i32
    return %arg0, %c0_i32 : i32, i32
  }
  func.func @transform_5(%arg0: i32) -> (i32, i32, i32) {
    %c0_i32 = arith.constant 0 : i32
    %c0_i32_0 = arith.constant 0 : i32
    %c0_i32_1 = arith.constant 0 : i32
    return %arg0, %c0_i32, %c0_i32_0 : i32, i32, i32
  }
  func.func @transform_6(%arg0: i32) -> (i32, i32, i32) {
    %c0_i32 = arith.constant 0 : i32
    %c0_i32_0 = arith.constant 0 : i32
    %c0_i32_1 = arith.constant 0 : i32
    return %arg0, %c0_i32, %c0_i32_0 : i32, i32, i32
  }
}

module attributes {stable_mosaic.version = 11 : i64} {
  func.func @kernel(%arg0: i32, %arg1: memref<1x16x8x16xbf16, #tpu.memory_space<vmem>>, %arg2: memref<1x16x8xbf16, #tpu.memory_space<vmem>>, %arg3: memref<1x64x8xbf16, #tpu.memory_space<vmem>>, %arg4: memref<1x1x8xf32, #tpu.memory_space<vmem>>, %arg5: memref<1x1x8xf32, #tpu.memory_space<vmem>>) attributes {dimension_semantics = [#tpu.dimension_semantics<parallel>], iteration_bounds = array<i64: 2>, scalar_prefetch = 0 : i64, scratch_operands = 0 : i64, tpu.core_type = #tpu.core_type<tc>, window_params = [{transform_indices = @transform_0, window_bounds = array<i64: 1, 16, 8, 16>}, {pipeline_mode = #tpu.pipeline_mode<synchronous>, transform_indices = @transform_1, window_bounds = array<i64: 1, 16, 8>}, {transform_indices = @transform_2, window_bounds = array<i64: 1, 64, 8>}, {transform_indices = @transform_3, window_bounds = array<i64: 1, 1, 8>}, {transform_indices = @transform_4, window_bounds = array<i64: 1, 1, 8>}]} {
    %cst = arith.constant 0.000000e+00 : f32
    %0 = vector.broadcast %cst : f32 to vector<64x8xf32>
    %c0 = arith.constant 0 : index
    %c0_0 = arith.constant 0 : index
    %c0_1 = arith.constant 0 : index
    %c0_2 = arith.constant 0 : index
    %1 = vector.load %arg1[%c0, %c0_0, %c0_1, %c0_2] : memref<1x16x8x16xbf16, #tpu.memory_space<vmem>>, vector<1x16x8x16xbf16>
    %2 = vector.shape_cast %1 : vector<1x16x8x16xbf16> to vector<16x8x16xbf16>
    %3 = vector.shape_cast %2 : vector<16x8x16xbf16> to vector<8x2x8x16xbf16>
    %4 = vector.extract_strided_slice %3 {offsets = [0, 0, 0, 0], sizes = [8, 1, 8, 16], strides = [1, 1, 1, 1]} : vector<8x2x8x16xbf16> to vector<8x1x8x16xbf16>
    %5 = vector.shape_cast %4 : vector<8x1x8x16xbf16> to vector<8x8x16xbf16>
    %6 = vector.shape_cast %5 : vector<8x8x16xbf16> to vector<64x16xbf16>
    %c0_3 = arith.constant 0 : index
    %c0_4 = arith.constant 0 : index
    %c0_5 = arith.constant 0 : index
    %7 = vector.load %arg2[%c0_3, %c0_4, %c0_5] : memref<1x16x8xbf16, #tpu.memory_space<vmem>>, vector<1x16x8xbf16>
    %8 = vector.shape_cast %7 : vector<1x16x8xbf16> to vector<16x8xbf16>
    %cst_6 = arith.constant dense<0.000000e+00> : vector<64x8xf32>
    %9 = tpu.matmul %6, %8, %cst_6 {dimension_numbers = #tpu.dot_dimension_numbers<[1], [0], [0], [1], [0, 0, 1, 1], [], []>} : vector<64x16xbf16>, vector<16x8xbf16>, vector<64x8xf32> -> vector<64x8xf32>
    %10 = arith.addf %0, %9 : vector<64x8xf32>
    %11 = arith.truncf %10 : vector<64x8xf32> to vector<64x8xbf16>
    %c0_7 = arith.constant 0 : index
    %c0_8 = arith.constant 0 : index
    %c0_9 = arith.constant 0 : index
    %12 = vector.load %arg3[%c0_7, %c0_8, %c0_9] : memref<1x64x8xbf16, #tpu.memory_space<vmem>>, vector<1x64x8xbf16>
    %13 = vector.shape_cast %12 : vector<1x64x8xbf16> to vector<64x8xbf16>
    %14 = vector.shape_cast %11 : vector<64x8xbf16> to vector<1x64x8xbf16>
    tpu.vector_store %arg3[%c0_7, %c0_8, %c0_9], %14 {strides = array<i32>} : memref<1x64x8xbf16, #tpu.memory_space<vmem>>, vector<1x64x8xbf16>,
    %cst_10 = arith.constant dense<0.000000e+00> : vector<8xf32>
    %15 = vector.multi_reduction <add>, %10, %cst_10 [0] : vector<64x8xf32> to vector<8xf32>
    %16 = vector.shape_cast %15 : vector<8xf32> to vector<1x8xf32>
    %c0_11 = arith.constant 0 : index
    %c0_12 = arith.constant 0 : index
    %c0_13 = arith.constant 0 : index
    %17 = vector.load %arg4[%c0_11, %c0_12, %c0_13] : memref<1x1x8xf32, #tpu.memory_space<vmem>>, vector<1x1x8xf32>
    %18 = vector.shape_cast %17 : vector<1x1x8xf32> to vector<1x8xf32>
    %19 = vector.shape_cast %16 : vector<1x8xf32> to vector<1x1x8xf32>
    tpu.vector_store %arg4[%c0_11, %c0_12, %c0_13], %19 {strides = array<i32>} : memref<1x1x8xf32, #tpu.memory_space<vmem>>, vector<1x1x8xf32>,
    %20 = arith.mulf %10, %10 : vector<64x8xf32>
    %cst_14 = arith.constant dense<0.000000e+00> : vector<8xf32>
    %21 = vector.multi_reduction <add>, %20, %cst_14 [0] : vector<64x8xf32> to vector<8xf32>
    %22 = vector.shape_cast %21 : vector<8xf32> to vector<1x8xf32>
    %c0_15 = arith.constant 0 : index
    %c0_16 = arith.constant 0 : index
    %c0_17 = arith.constant 0 : index
    %23 = vector.load %arg5[%c0_15, %c0_16, %c0_17] : memref<1x1x8xf32, #tpu.memory_space<vmem>>, vector<1x1x8xf32>
    %24 = vector.shape_cast %23 : vector<1x1x8xf32> to vector<1x8xf32>
    %25 = vector.shape_cast %22 : vector<1x8xf32> to vector<1x1x8xf32>
    tpu.vector_store %arg5[%c0_15, %c0_16, %c0_17], %25 {strides = array<i32>} : memref<1x1x8xf32, #tpu.memory_space<vmem>>, vector<1x1x8xf32>,
    return
  }
  func.func @transform_0(%arg0: i32) -> (i32, i32, i32, i32) {
    %c0_i32 = arith.constant 0 : i32
    %c0_i32_0 = arith.constant 0 : i32
    %c0_i32_1 = arith.constant 0 : i32
    %c0_i32_2 = arith.constant 0 : i32
    return %arg0, %c0_i32, %c0_i32_0, %c0_i32_1 : i32, i32, i32, i32
  }
  func.func @transform_1(%arg0: i32) -> (i32, i32, i32) {
    %c0_i32 = arith.constant 0 : i32
    %c0_i32_0 = arith.constant 0 : i32
    %c0_i32_1 = arith.constant 0 : i32
    %c0_i32_2 = arith.constant 0 : i32
    return %c0_i32, %c0_i32_0, %c0_i32_1 : i32, i32, i32
  }
  func.func @transform_2(%arg0: i32) -> (i32, i32, i32) {
    %c0_i32 = arith.constant 0 : i32
    %c0_i32_0 = arith.constant 0 : i32
    %c0_i32_1 = arith.constant 0 : i32
    return %arg0, %c0_i32, %c0_i32_0 : i32, i32, i32
  }
  func.func @transform_3(%arg0: i32) -> (i32, i32, i32) {
    %c0_i32 = arith.constant 0 : i32
    %c0_i32_0 = arith.constant 0 : i32
    %c0_i32_1 = arith.constant 0 : i32
    return %arg0, %c0_i32, %c0_i32_0 : i32, i32, i32
  }
  func.func @transform_4(%arg0: i32) -> (i32, i32, i32) {
    %c0_i32 = arith.constant 0 : i32
    %c0_i32_0 = arith.constant 0 : i32
    %c0_i32_1 = arith.constant 0 : i32
    return %arg0, %c0_i32, %c0_i32_0 : i32, i32, i32
  }
}

module attributes {stable_mosaic.version = 11 : i64} {
  func.func @kernel(%arg0: i32, %arg1: memref<8x128xbf16, #tpu.memory_space<vmem>>, %arg2: memref<8x128xbf16, #tpu.memory_space<vmem>>, %arg3: memref<1x128xf32, #tpu.memory_space<vmem>>, %arg4: memref<1x128xf32, #tpu.memory_space<vmem>>, %arg5: memref<1x128xf32, #tpu.memory_space<vmem>>, %arg6: memref<1x128xf32, #tpu.memory_space<vmem>>, %arg7: memref<8x128xbf16, #tpu.memory_space<vmem>>) attributes {dimension_semantics = [#tpu.dimension_semantics<parallel>], iteration_bounds = array<i64: 1>, scalar_prefetch = 0 : i64, scratch_operands = 0 : i64, tpu.core_type = #tpu.core_type<tc>, window_params = [{transform_indices = @transform_0, window_bounds = array<i64: 8, 128>}, {transform_indices = @transform_1, window_bounds = array<i64: 8, 128>}, {pipeline_mode = #tpu.pipeline_mode<synchronous>, transform_indices = @transform_2, window_bounds = array<i64: 1, 128>}, {pipeline_mode = #tpu.pipeline_mode<synchronous>, transform_indices = @transform_3, window_bounds = array<i64: 1, 128>}, {pipeline_mode = #tpu.pipeline_mode<synchronous>, transform_indices = @transform_4, window_bounds = array<i64: 1, 128>}, {pipeline_mode = #tpu.pipeline_mode<synchronous>, transform_indices = @transform_5, window_bounds = array<i64: 1, 128>}, {transform_indices = @transform_6, window_bounds = array<i64: 8, 128>}]} {
    %c0 = arith.constant 0 : index
    %c0_0 = arith.constant 0 : index
    %0 = vector.load %arg1[%c0, %c0_0] : memref<8x128xbf16, #tpu.memory_space<vmem>>, vector<8x128xbf16>
    %1 = arith.extf %0 : vector<8x128xbf16> to vector<8x128xf32>
    %c0_1 = arith.constant 0 : index
    %c0_2 = arith.constant 0 : index
    %2 = vector.load %arg3[%c0_1, %c0_2] : memref<1x128xf32, #tpu.memory_space<vmem>>, vector<1x128xf32>
    %3 = vector.broadcast %2 : vector<1x128xf32> to vector<8x128xf32>
    %4 = arith.mulf %1, %3 : vector<8x128xf32>
    %c0_3 = arith.constant 0 : index
    %c0_4 = arith.constant 0 : index
    %5 = vector.load %arg4[%c0_3, %c0_4] : memref<1x128xf32, #tpu.memory_space<vmem>>, vector<1x128xf32>
    %6 = vector.broadcast %5 : vector<1x128xf32> to vector<8x128xf32>
    %7 = arith.addf %4, %6 : vector<8x128xf32>
    %c0_5 = arith.constant 0 : index
    %c0_6 = arith.constant 0 : index
    %8 = vector.load %arg2[%c0_5, %c0_6] : memref<8x128xbf16, #tpu.memory_space<vmem>>, vector<8x128xbf16>
    %9 = arith.extf %8 : vector<8x128xbf16> to vector<8x128xf32>
    %c0_7 = arith.constant 0 : index
    %c0_8 = arith.constant 0 : index
    %10 = vector.load %arg5[%c0_7, %c0_8] : memref<1x128xf32, #tpu.memory_space<vmem>>, vector<1x128xf32>
    %11 = vector.broadcast %10 : vector<1x128xf32> to vector<8x128xf32>
    %12 = arith.mulf %9, %11 : vector<8x128xf32>
    %13 = arith.addf %7, %12 : vector<8x128xf32>
    %c0_9 = arith.constant 0 : index
    %c0_10 = arith.constant 0 : index
    %14 = vector.load %arg6[%c0_9, %c0_10] : memref<1x128xf32, #tpu.memory_space<vmem>>, vector<1x128xf32>
    %15 = vector.broadcast %14 : vector<1x128xf32> to vector<8x128xf32>
    %16 = arith.addf %13, %15 : vector<8x128xf32>
    %cst = arith.constant 0.000000e+00 : f32
    %17 = vector.broadcast %cst : f32 to vector<8x128xf32>
    %18 = arith.maximumf %16, %17 : vector<8x128xf32>
    %19 = arith.truncf %18 : vector<8x128xf32> to vector<8x128xbf16>
    %c0_11 = arith.constant 0 : index
    %c0_12 = arith.constant 0 : index
    %20 = vector.load %arg7[%c0_11, %c0_12] : memref<8x128xbf16, #tpu.memory_space<vmem>>, vector<8x128xbf16>
    tpu.vector_store %arg7[%c0_11, %c0_12], %19 {strides = array<i32>} : memref<8x128xbf16, #tpu.memory_space<vmem>>, vector<8x128xbf16>,
    return
  }
  func.func @transform_0(%arg0: i32) -> (i32, i32) {
    %c0_i32 = arith.constant 0 : i32
    %c0_i32_0 = arith.constant 0 : i32
    return %arg0, %c0_i32 : i32, i32
  }
  func.func @transform_1(%arg0: i32) -> (i32, i32) {
    %c0_i32 = arith.constant 0 : i32
    %c0_i32_0 = arith.constant 0 : i32
    return %arg0, %c0_i32 : i32, i32
  }
  func.func @transform_2(%arg0: i32) -> (i32, i32) {
    %c0_i32 = arith.constant 0 : i32
    %c0_i32_0 = arith.constant 0 : i32
    %c0_i32_1 = arith.constant 0 : i32
    return %c0_i32, %c0_i32_0 : i32, i32
  }
  func.func @transform_3(%arg0: i32) -> (i32, i32) {
    %c0_i32 = arith.constant 0 : i32
    %c0_i32_0 = arith.constant 0 : i32
    %c0_i32_1 = arith.constant 0 : i32
    return %c0_i32, %c0_i32_0 : i32, i32
  }
  func.func @transform_4(%arg0: i32) -> (i32, i32) {
    %c0_i32 = arith.constant 0 : i32
    %c0_i32_0 = arith.constant 0 : i32
    %c0_i32_1 = arith.constant 0 : i32
    return %c0_i32, %c0_i32_0 : i32, i32
  }
  func.func @transform_5(%arg0: i32) -> (i32, i32) {
    %c0_i32 = arith.constant 0 : i32
    %c0_i32_0 = arith.constant 0 : i32
    %c0_i32_1 = arith.constant 0 : i32
    return %c0_i32, %c0_i32_0 : i32, i32
  }
  func.func @transform_6(%arg0: i32) -> (i32, i32) {
    %c0_i32 = arith.constant 0 : i32
    %c0_i32_0 = arith.constant 0 : i32
    return %arg0, %c0_i32 : i32, i32
  }
}

module attributes {stable_mosaic.version = 11 : i64} {
  func.func @kernel(%arg0: i32, %arg1: memref<128x8xbf16, #tpu.memory_space<vmem>>, %arg2: memref<8x32xbf16, #tpu.memory_space<vmem>>, %arg3: memref<128x32xbf16, #tpu.memory_space<vmem>>, %arg4: memref<1x1x32xf32, #tpu.memory_space<vmem>>, %arg5: memref<1x1x32xf32, #tpu.memory_space<vmem>>) attributes {dimension_semantics = [#tpu.dimension_semantics<parallel>], iteration_bounds = array<i64: 1>, scalar_prefetch = 0 : i64, scratch_operands = 0 : i64, tpu.core_type = #tpu.core_type<tc>, window_params = [{transform_indices = @transform_0, window_bounds = array<i64: 128, 8>}, {pipeline_mode = #tpu.pipeline_mode<synchronous>, transform_indices = @transform_1, window_bounds = array<i64: 8, 32>}, {transform_indices = @transform_2, window_bounds = array<i64: 128, 32>}, {transform_indices = @transform_3, window_bounds = array<i64: 1, 1, 32>}, {transform_indices = @transform_4, window_bounds = array<i64: 1, 1, 32>}]} {
    %c0 = arith.constant 0 : index
    %c0_0 = arith.constant 0 : index
    %0 = vector.load %arg1[%c0, %c0_0] : memref<128x8xbf16, #tpu.memory_space<vmem>>, vector<128x8xbf16>
    %c0_1 = arith.constant 0 : index
    %c0_2 = arith.constant 0 : index
    %1 = vector.load %arg2[%c0_1, %c0_2] : memref<8x32xbf16, #tpu.memory_space<vmem>>, vector<8x32xbf16>
    %cst = arith.constant dense<0.000000e+00> : vector<128x32xf32>
    %2 = tpu.matmul %0, %1, %cst {dimension_numbers = #tpu.dot_dimension_numbers<[1], [0], [0], [1], [0, 0, 1, 1], [], []>} : vector<128x8xbf16>, vector<8x32xbf16>, vector<128x32xf32> -> vector<128x32xf32>
    %3 = arith.truncf %2 : vector<128x32xf32> to vector<128x32xbf16>
    %c0_3 = arith.constant 0 : index
    %c0_4 = arith.constant 0 : index
    %4 = vector.load %arg3[%c0_3, %c0_4] : memref<128x32xbf16, #tpu.memory_space<vmem>>, vector<128x32xbf16>
    tpu.vector_store %arg3[%c0_3, %c0_4], %3 {strides = array<i32>} : memref<128x32xbf16, #tpu.memory_space<vmem>>, vector<128x32xbf16>,
    %cst_5 = arith.constant dense<0.000000e+00> : vector<32xf32>
    %5 = vector.multi_reduction <add>, %2, %cst_5 [0] : vector<128x32xf32> to vector<32xf32>
    %6 = vector.shape_cast %5 : vector<32xf32> to vector<1x32xf32>
    %c0_6 = arith.constant 0 : index
    %c0_7 = arith.constant 0 : index
    %c0_8 = arith.constant 0 : index
    %7 = vector.load %arg4[%c0_6, %c0_7, %c0_8] : memref<1x1x32xf32, #tpu.memory_space<vmem>>, vector<1x1x32xf32>
    %8 = vector.shape_cast %7 : vector<1x1x32xf32> to vector<1x32xf32>
    %9 = vector.shape_cast %6 : vector<1x32xf32> to vector<1x1x32xf32>
    tpu.vector_store %arg4[%c0_6, %c0_7, %c0_8], %9 {strides = array<i32>} : memref<1x1x32xf32, #tpu.memory_space<vmem>>, vector<1x1x32xf32>,
    %10 = arith.mulf %2, %2 : vector<128x32xf32>
    %cst_9 = arith.constant dense<0.000000e+00> : vector<32xf32>
    %11 = vector.multi_reduction <add>, %10, %cst_9 [0] : vector<128x32xf32> to vector<32xf32>
    %12 = vector.shape_cast %11 : vector<32xf32> to vector<1x32xf32>
    %c0_10 = arith.constant 0 : index
    %c0_11 = arith.constant 0 : index
    %c0_12 = arith.constant 0 : index
    %13 = vector.load %arg5[%c0_10, %c0_11, %c0_12] : memref<1x1x32xf32, #tpu.memory_space<vmem>>, vector<1x1x32xf32>
    %14 = vector.shape_cast %13 : vector<1x1x32xf32> to vector<1x32xf32>
    %15 = vector.shape_cast %12 : vector<1x32xf32> to vector<1x1x32xf32>
    tpu.vector_store %arg5[%c0_10, %c0_11, %c0_12], %15 {strides = array<i32>} : memref<1x1x32xf32, #tpu.memory_space<vmem>>, vector<1x1x32xf32>,
    return
  }
  func.func @transform_0(%arg0: i32) -> (i32, i32) {
    %c0_i32 = arith.constant 0 : i32
    %c0_i32_0 = arith.constant 0 : i32
    return %arg0, %c0_i32 : i32, i32
  }
  func.func @transform_1(%arg0: i32) -> (i32, i32) {
    %c0_i32 = arith.constant 0 : i32
    %c0_i32_0 = arith.constant 0 : i32
    %c0_i32_1 = arith.constant 0 : i32
    return %c0_i32, %c0_i32_0 : i32, i32
  }
  func.func @transform_2(%arg0: i32) -> (i32, i32) {
    %c0_i32 = arith.constant 0 : i32
    %c0_i32_0 = arith.constant 0 : i32
    return %arg0, %c0_i32 : i32, i32
  }
  func.func @transform_3(%arg0: i32) -> (i32, i32, i32) {
    %c0_i32 = arith.constant 0 : i32
    %c0_i32_0 = arith.constant 0 : i32
    %c0_i32_1 = arith.constant 0 : i32
    return %arg0, %c0_i32, %c0_i32_0 : i32, i32, i32
  }
  func.func @transform_4(%arg0: i32) -> (i32, i32, i32) {
    %c0_i32 = arith.constant 0 : i32
    %c0_i32_0 = arith.constant 0 : i32
    %c0_i32_1 = arith.constant 0 : i32
    return %arg0, %c0_i32, %c0_i32_0 : i32, i32, i32
  }
}

module attributes {stable_mosaic.version = 11 : i64} {
  func.func @kernel(%arg0: i32, %arg1: memref<1x8x8x32xbf16, #tpu.memory_space<vmem>>, %arg2: memref<1x32xf32, #tpu.memory_space<vmem>>, %arg3: memref<1x32xf32, #tpu.memory_space<vmem>>, %arg4: memref<1x10x10x32xbf16, #tpu.memory_space<vmem>>) attributes {dimension_semantics = [#tpu.dimension_semantics<parallel>], iteration_bounds = array<i64: 2>, scalar_prefetch = 0 : i64, scratch_operands = 0 : i64, tpu.core_type = #tpu.core_type<tc>, window_params = [{transform_indices = @transform_0, window_bounds = array<i64: 1, 8, 8, 32>}, {pipeline_mode = #tpu.pipeline_mode<synchronous>, transform_indices = @transform_1, window_bounds = array<i64: 1, 32>}, {pipeline_mode = #tpu.pipeline_mode<synchronous>, transform_indices = @transform_2, window_bounds = array<i64: 1, 32>}, {transform_indices = @transform_3, window_bounds = array<i64: 1, 10, 10, 32>}]} {
    %cst = arith.constant 0.000000e+00 : bf16
    %0 = vector.broadcast %cst : bf16 to vector<1x10x10x32xbf16>
    %c0 = arith.constant 0 : index
    %c0_0 = arith.constant 0 : index
    %c0_1 = arith.constant 0 : index
    %c0_2 = arith.constant 0 : index
    %1 = vector.load %arg4[%c0, %c0_0, %c0_1, %c0_2] : memref<1x10x10x32xbf16, #tpu.memory_space<vmem>>, vector<1x10x10x32xbf16>
    tpu.vector_store %arg4[%c0, %c0_0, %c0_1, %c0_2], %0 {strides = array<i32>} : memref<1x10x10x32xbf16, #tpu.memory_space<vmem>>, vector<1x10x10x32xbf16>,
    %c0_3 = arith.constant 0 : index
    %c0_4 = arith.constant 0 : index
    %c0_5 = arith.constant 0 : index
    %c0_6 = arith.constant 0 : index
    %2 = vector.load %arg1[%c0_3, %c0_4, %c0_5, %c0_6] : memref<1x8x8x32xbf16, #tpu.memory_space<vmem>>, vector<1x8x8x32xbf16>
    %3 = arith.extf %2 : vector<1x8x8x32xbf16> to vector<1x8x8x32xf32>
    %c0_7 = arith.constant 0 : index
    %c0_8 = arith.constant 0 : index
    %4 = vector.load %arg2[%c0_7, %c0_8] : memref<1x32xf32, #tpu.memory_space<vmem>>, vector<1x32xf32>
    %5 = vector.shape_cast %4 : vector<1x32xf32> to vector<1x1x1x32xf32>
    %6 = vector.broadcast %5 : vector<1x1x1x32xf32> to vector<1x8x8x32xf32>
    %7 = arith.mulf %3, %6 : vector<1x8x8x32xf32>
    %c0_9 = arith.constant 0 : index
    %c0_10 = arith.constant 0 : index
    %8 = vector.load %arg3[%c0_9, %c0_10] : memref<1x32xf32, #tpu.memory_space<vmem>>, vector<1x32xf32>
    %9 = vector.shape_cast %8 : vector<1x32xf32> to vector<1x1x1x32xf32>
    %10 = vector.broadcast %9 : vector<1x1x1x32xf32> to vector<1x8x8x32xf32>
    %11 = arith.addf %7, %10 : vector<1x8x8x32xf32>
    %cst_11 = arith.constant 0.000000e+00 : f32
    %12 = vector.broadcast %cst_11 : f32 to vector<1x8x8x32xf32>
    %13 = arith.maximumf %11, %12 : vector<1x8x8x32xf32>
    %14 = vector.shape_cast %13 : vector<1x8x8x32xf32> to vector<8x8x32xf32>
    %15 = arith.truncf %14 : vector<8x8x32xf32> to vector<8x8x32xbf16>
    %c0_12 = arith.constant 0 : index
    %c1 = arith.constant 1 : index
    %c1_13 = arith.constant 1 : index
    %c0_14 = arith.constant 0 : index
    %16 = vector.load %arg4[%c0_12, %c1, %c1_13, %c0_14] : memref<1x10x10x32xbf16, #tpu.memory_space<vmem>>, vector<1x8x8x32xbf16>
    %17 = vector.shape_cast %16 : vector<1x8x8x32xbf16> to vector<8x8x32xbf16>
    %18 = vector.shape_cast %15 : vector<8x8x32xbf16> to vector<1x8x8x32xbf16>
    tpu.vector_store %arg4[%c0_12, %c1, %c1_13, %c0_14], %18 {strides = array<i32>} : memref<1x10x10x32xbf16, #tpu.memory_space<vmem>>, vector<1x8x8x32xbf16>,
    return
  }
  func.func @transform_0(%arg0: i32) -> (i32, i32, i32, i32) {
    %c0_i32 = arith.constant 0 : i32
    %c0_i32_0 = arith.constant 0 : i32
    %c0_i32_1 = arith.constant 0 : i32
    %c0_i32_2 = arith.constant 0 : i32
    return %arg0, %c0_i32, %c0_i32_0, %c0_i32_1 : i32, i32, i32, i32
  }
  func.func @transform_1(%arg0: i32) -> (i32, i32) {
    %c0_i32 = arith.constant 0 : i32
    %c0_i32_0 = arith.constant 0 : i32
    %c0_i32_1 = arith.constant 0 : i32
    return %c0_i32, %c0_i32_0 : i32, i32
  }
  func.func @transform_2(%arg0: i32) -> (i32, i32) {
    %c0_i32 = arith.constant 0 : i32
    %c0_i32_0 = arith.constant 0 : i32
    %c0_i32_1 = arith.constant 0 : i32
    return %c0_i32, %c0_i32_0 : i32, i32
  }
  func.func @transform_3(%arg0: i32) -> (i32, i32, i32, i32) {
    %c0_i32 = arith.constant 0 : i32
    %c0_i32_0 = arith.constant 0 : i32
    %c0_i32_1 = arith.constant 0 : i32
    %c0_i32_2 = arith.constant 0 : i32
    return %arg0, %c0_i32, %c0_i32_0, %c0_i32_1 : i32, i32, i32, i32
  }
}

module attributes {stable_mosaic.version = 11 : i64} {
  func.func @kernel(%arg0: i32, %arg1: memref<1x10x10x32xbf16, #tpu.memory_space<vmem>>, %arg2: memref<9x32x32xbf16, #tpu.memory_space<vmem>>, %arg3: memref<1x64x32xbf16, #tpu.memory_space<vmem>>, %arg4: memref<1x1x32xf32, #tpu.memory_space<vmem>>, %arg5: memref<1x1x32xf32, #tpu.memory_space<vmem>>) attributes {dimension_semantics = [#tpu.dimension_semantics<parallel>], iteration_bounds = array<i64: 2>, scalar_prefetch = 0 : i64, scratch_operands = 0 : i64, tpu.core_type = #tpu.core_type<tc>, window_params = [{transform_indices = @transform_0, window_bounds = array<i64: 1, 10, 10, 32>}, {pipeline_mode = #tpu.pipeline_mode<synchronous>, transform_indices = @transform_1, window_bounds = array<i64: 9, 32, 32>}, {transform_indices = @transform_2, window_bounds = array<i64: 1, 64, 32>}, {transform_indices = @transform_3, window_bounds = array<i64: 1, 1, 32>}, {transform_indices = @transform_4, window_bounds = array<i64: 1, 1, 32>}]} {
    %cst = arith.constant 0.000000e+00 : f32
    %0 = vector.broadcast %cst : f32 to vector<64x32xf32>
    %c0 = arith.constant 0 : index
    %c0_0 = arith.constant 0 : index
    %c0_1 = arith.constant 0 : index
    %c0_2 = arith.constant 0 : index
    %1 = vector.load %arg1[%c0, %c0_0, %c0_1, %c0_2] : memref<1x10x10x32xbf16, #tpu.memory_space<vmem>>, vector<1x8x8x32xbf16>
    %2 = vector.shape_cast %1 : vector<1x8x8x32xbf16> to vector<8x8x32xbf16>
    %3 = vector.shape_cast %2 : vector<8x8x32xbf16> to vector<64x32xbf16>
    %c0_3 = arith.constant 0 : index
    %c0_4 = arith.constant 0 : index
    %c0_5 = arith.constant 0 : index
    %4 = vector.load %arg2[%c0_3, %c0_4, %c0_5] : memref<9x32x32xbf16, #tpu.memory_space<vmem>>, vector<1x32x32xbf16>
    %5 = vector.shape_cast %4 : vector<1x32x32xbf16> to vector<32x32xbf16>
    %cst_6 = arith.constant dense<0.000000e+00> : vector<64x32xf32>
    %6 = tpu.matmul %3, %5, %cst_6 {dimension_numbers = #tpu.dot_dimension_numbers<[1], [0], [0], [1], [0, 0, 1, 1], [], []>} : vector<64x32xbf16>, vector<32x32xbf16>, vector<64x32xf32> -> vector<64x32xf32>
    %7 = arith.addf %0, %6 : vector<64x32xf32>
    %c0_7 = arith.constant 0 : index
    %c0_8 = arith.constant 0 : index
    %c1 = arith.constant 1 : index
    %c0_9 = arith.constant 0 : index
    %8 = vector.load %arg1[%c0_7, %c0_8, %c1, %c0_9] : memref<1x10x10x32xbf16, #tpu.memory_space<vmem>>, vector<1x8x8x32xbf16>
    %9 = vector.shape_cast %8 : vector<1x8x8x32xbf16> to vector<8x8x32xbf16>
    %10 = vector.shape_cast %9 : vector<8x8x32xbf16> to vector<64x32xbf16>
    %c1_10 = arith.constant 1 : index
    %c0_11 = arith.constant 0 : index
    %c0_12 = arith.constant 0 : index
    %11 = vector.load %arg2[%c1_10, %c0_11, %c0_12] : memref<9x32x32xbf16, #tpu.memory_space<vmem>>, vector<1x32x32xbf16>
    %12 = vector.shape_cast %11 : vector<1x32x32xbf16> to vector<32x32xbf16>
    %cst_13 = arith.constant dense<0.000000e+00> : vector<64x32xf32>
    %13 = tpu.matmul %10, %12, %cst_13 {dimension_numbers = #tpu.dot_dimension_numbers<[1], [0], [0], [1], [0, 0, 1, 1], [], []>} : vector<64x32xbf16>, vector<32x32xbf16>, vector<64x32xf32> -> vector<64x32xf32>
    %14 = arith.addf %7, %13 : vector<64x32xf32>
    %c0_14 = arith.constant 0 : index
    %c0_15 = arith.constant 0 : index
    %c2 = arith.constant 2 : index
    %c0_16 = arith.constant 0 : index
    %15 = vector.load %arg1[%c0_14, %c0_15, %c2, %c0_16] : memref<1x10x10x32xbf16, #tpu.memory_space<vmem>>, vector<1x8x8x32xbf16>
    %16 = vector.shape_cast %15 : vector<1x8x8x32xbf16> to vector<8x8x32xbf16>
    %17 = vector.shape_cast %16 : vector<8x8x32xbf16> to vector<64x32xbf16>
    %c2_17 = arith.constant 2 : index
    %c0_18 = arith.constant 0 : index
    %c0_19 = arith.constant 0 : index
    %18 = vector.load %arg2[%c2_17, %c0_18, %c0_19] : memref<9x32x32xbf16, #tpu.memory_space<vmem>>, vector<1x32x32xbf16>
    %19 = vector.shape_cast %18 : vector<1x32x32xbf16> to vector<32x32xbf16>
    %cst_20 = arith.constant dense<0.000000e+00> : vector<64x32xf32>
    %20 = tpu.matmul %17, %19, %cst_20 {dimension_numbers = #tpu.dot_dimension_numbers<[1], [0], [0], [1], [0, 0, 1, 1], [], []>} : vector<64x32xbf16>, vector<32x32xbf16>, vector<64x32xf32> -> vector<64x32xf32>
    %21 = arith.addf %14, %20 : vector<64x32xf32>
    %c0_21 = arith.constant 0 : index
    %c1_22 = arith.constant 1 : index
    %c0_23 = arith.constant 0 : index
    %c0_24 = arith.constant 0 : index
    %22 = vector.load %arg1[%c0_21, %c1_22, %c0_23, %c0_24] : memref<1x10x10x32xbf16, #tpu.memory_space<vmem>>, vector<1x8x8x32xbf16>
    %23 = vector.shape_cast %22 : vector<1x8x8x32xbf16> to vector<8x8x32xbf16>
    %24 = vector.shape_cast %23 : vector<8x8x32xbf16> to vector<64x32xbf16>
    %c3 = arith.constant 3 : index
    %c0_25 = arith.constant 0 : index
    %c0_26 = arith.constant 0 : index
    %25 = vector.load %arg2[%c3, %c0_25, %c0_26] : memref<9x32x32xbf16, #tpu.memory_space<vmem>>, vector<1x32x32xbf16>
    %26 = vector.shape_cast %25 : vector<1x32x32xbf16> to vector<32x32xbf16>
    %cst_27 = arith.constant dense<0.000000e+00> : vector<64x32xf32>
    %27 = tpu.matmul %24, %26, %cst_27 {dimension_numbers = #tpu.dot_dimension_numbers<[1], [0], [0], [1], [0, 0, 1, 1], [], []>} : vector<64x32xbf16>, vector<32x32xbf16>, vector<64x32xf32> -> vector<64x32xf32>
    %28 = arith.addf %21, %27 : vector<64x32xf32>
    %c0_28 = arith.constant 0 : index
    %c1_29 = arith.constant 1 : index
    %c1_30 = arith.constant 1 : index
    %c0_31 = arith.constant 0 : index
    %29 = vector.load %arg1[%c0_28, %c1_29, %c1_30, %c0_31] : memref<1x10x10x32xbf16, #tpu.memory_space<vmem>>, vector<1x8x8x32xbf16>
    %30 = vector.shape_cast %29 : vector<1x8x8x32xbf16> to vector<8x8x32xbf16>
    %31 = vector.shape_cast %30 : vector<8x8x32xbf16> to vector<64x32xbf16>
    %c4 = arith.constant 4 : index
    %c0_32 = arith.constant 0 : index
    %c0_33 = arith.constant 0 : index
    %32 = vector.load %arg2[%c4, %c0_32, %c0_33] : memref<9x32x32xbf16, #tpu.memory_space<vmem>>, vector<1x32x32xbf16>
    %33 = vector.shape_cast %32 : vector<1x32x32xbf16> to vector<32x32xbf16>
    %cst_34 = arith.constant dense<0.000000e+00> : vector<64x32xf32>
    %34 = tpu.matmul %31, %33, %cst_34 {dimension_numbers = #tpu.dot_dimension_numbers<[1], [0], [0], [1], [0, 0, 1, 1], [], []>} : vector<64x32xbf16>, vector<32x32xbf16>, vector<64x32xf32> -> vector<64x32xf32>
    %35 = arith.addf %28, %34 : vector<64x32xf32>
    %c0_35 = arith.constant 0 : index
    %c1_36 = arith.constant 1 : index
    %c2_37 = arith.constant 2 : index
    %c0_38 = arith.constant 0 : index
    %36 = vector.load %arg1[%c0_35, %c1_36, %c2_37, %c0_38] : memref<1x10x10x32xbf16, #tpu.memory_space<vmem>>, vector<1x8x8x32xbf16>
    %37 = vector.shape_cast %36 : vector<1x8x8x32xbf16> to vector<8x8x32xbf16>
    %38 = vector.shape_cast %37 : vector<8x8x32xbf16> to vector<64x32xbf16>
    %c5 = arith.constant 5 : index
    %c0_39 = arith.constant 0 : index
    %c0_40 = arith.constant 0 : index
    %39 = vector.load %arg2[%c5, %c0_39, %c0_40] : memref<9x32x32xbf16, #tpu.memory_space<vmem>>, vector<1x32x32xbf16>
    %40 = vector.shape_cast %39 : vector<1x32x32xbf16> to vector<32x32xbf16>
    %cst_41 = arith.constant dense<0.000000e+00> : vector<64x32xf32>
    %41 = tpu.matmul %38, %40, %cst_41 {dimension_numbers = #tpu.dot_dimension_numbers<[1], [0], [0], [1], [0, 0, 1, 1], [], []>} : vector<64x32xbf16>, vector<32x32xbf16>, vector<64x32xf32> -> vector<64x32xf32>
    %42 = arith.addf %35, %41 : vector<64x32xf32>
    %c0_42 = arith.constant 0 : index
    %c2_43 = arith.constant 2 : index
    %c0_44 = arith.constant 0 : index
    %c0_45 = arith.constant 0 : index
    %43 = vector.load %arg1[%c0_42, %c2_43, %c0_44, %c0_45] : memref<1x10x10x32xbf16, #tpu.memory_space<vmem>>, vector<1x8x8x32xbf16>
    %44 = vector.shape_cast %43 : vector<1x8x8x32xbf16> to vector<8x8x32xbf16>
    %45 = vector.shape_cast %44 : vector<8x8x32xbf16> to vector<64x32xbf16>
    %c6 = arith.constant 6 : index
    %c0_46 = arith.constant 0 : index
    %c0_47 = arith.constant 0 : index
    %46 = vector.load %arg2[%c6, %c0_46, %c0_47] : memref<9x32x32xbf16, #tpu.memory_space<vmem>>, vector<1x32x32xbf16>
    %47 = vector.shape_cast %46 : vector<1x32x32xbf16> to vector<32x32xbf16>
    %cst_48 = arith.constant dense<0.000000e+00> : vector<64x32xf32>
    %48 = tpu.matmul %45, %47, %cst_48 {dimension_numbers = #tpu.dot_dimension_numbers<[1], [0], [0], [1], [0, 0, 1, 1], [], []>} : vector<64x32xbf16>, vector<32x32xbf16>, vector<64x32xf32> -> vector<64x32xf32>
    %49 = arith.addf %42, %48 : vector<64x32xf32>
    %c0_49 = arith.constant 0 : index
    %c2_50 = arith.constant 2 : index
    %c1_51 = arith.constant 1 : index
    %c0_52 = arith.constant 0 : index
    %50 = vector.load %arg1[%c0_49, %c2_50, %c1_51, %c0_52] : memref<1x10x10x32xbf16, #tpu.memory_space<vmem>>, vector<1x8x8x32xbf16>
    %51 = vector.shape_cast %50 : vector<1x8x8x32xbf16> to vector<8x8x32xbf16>
    %52 = vector.shape_cast %51 : vector<8x8x32xbf16> to vector<64x32xbf16>
    %c7 = arith.constant 7 : index
    %c0_53 = arith.constant 0 : index
    %c0_54 = arith.constant 0 : index
    %53 = vector.load %arg2[%c7, %c0_53, %c0_54] : memref<9x32x32xbf16, #tpu.memory_space<vmem>>, vector<1x32x32xbf16>
    %54 = vector.shape_cast %53 : vector<1x32x32xbf16> to vector<32x32xbf16>
    %cst_55 = arith.constant dense<0.000000e+00> : vector<64x32xf32>
    %55 = tpu.matmul %52, %54, %cst_55 {dimension_numbers = #tpu.dot_dimension_numbers<[1], [0], [0], [1], [0, 0, 1, 1], [], []>} : vector<64x32xbf16>, vector<32x32xbf16>, vector<64x32xf32> -> vector<64x32xf32>
    %56 = arith.addf %49, %55 : vector<64x32xf32>
    %c0_56 = arith.constant 0 : index
    %c2_57 = arith.constant 2 : index
    %c2_58 = arith.constant 2 : index
    %c0_59 = arith.constant 0 : index
    %57 = vector.load %arg1[%c0_56, %c2_57, %c2_58, %c0_59] : memref<1x10x10x32xbf16, #tpu.memory_space<vmem>>, vector<1x8x8x32xbf16>
    %58 = vector.shape_cast %57 : vector<1x8x8x32xbf16> to vector<8x8x32xbf16>
    %59 = vector.shape_cast %58 : vector<8x8x32xbf16> to vector<64x32xbf16>
    %c8 = arith.constant 8 : index
    %c0_60 = arith.constant 0 : index
    %c0_61 = arith.constant 0 : index
    %60 = vector.load %arg2[%c8, %c0_60, %c0_61] : memref<9x32x32xbf16, #tpu.memory_space<vmem>>, vector<1x32x32xbf16>
    %61 = vector.shape_cast %60 : vector<1x32x32xbf16> to vector<32x32xbf16>
    %cst_62 = arith.constant dense<0.000000e+00> : vector<64x32xf32>
    %62 = tpu.matmul %59, %61, %cst_62 {dimension_numbers = #tpu.dot_dimension_numbers<[1], [0], [0], [1], [0, 0, 1, 1], [], []>} : vector<64x32xbf16>, vector<32x32xbf16>, vector<64x32xf32> -> vector<64x32xf32>
    %63 = arith.addf %56, %62 : vector<64x32xf32>
    %64 = arith.truncf %63 : vector<64x32xf32> to vector<64x32xbf16>
    %c0_63 = arith.constant 0 : index
    %c0_64 = arith.constant 0 : index
    %c0_65 = arith.constant 0 : index
    %65 = vector.load %arg3[%c0_63, %c0_64, %c0_65] : memref<1x64x32xbf16, #tpu.memory_space<vmem>>, vector<1x64x32xbf16>
    %66 = vector.shape_cast %65 : vector<1x64x32xbf16> to vector<64x32xbf16>
    %67 = vector.shape_cast %64 : vector<64x32xbf16> to vector<1x64x32xbf16>
    tpu.vector_store %arg3[%c0_63, %c0_64, %c0_65], %67 {strides = array<i32>} : memref<1x64x32xbf16, #tpu.memory_space<vmem>>, vector<1x64x32xbf16>,
    %cst_66 = arith.constant dense<0.000000e+00> : vector<32xf32>
    %68 = vector.multi_reduction <add>, %63, %cst_66 [0] : vector<64x32xf32> to vector<32xf32>
    %69 = vector.shape_cast %68 : vector<32xf32> to vector<1x32xf32>
    %c0_67 = arith.constant 0 : index
    %c0_68 = arith.constant 0 : index
    %c0_69 = arith.constant 0 : index
    %70 = vector.load %arg4[%c0_67, %c0_68, %c0_69] : memref<1x1x32xf32, #tpu.memory_space<vmem>>, vector<1x1x32xf32>
    %71 = vector.shape_cast %70 : vector<1x1x32xf32> to vector<1x32xf32>
    %72 = vector.shape_cast %69 : vector<1x32xf32> to vector<1x1x32xf32>
    tpu.vector_store %arg4[%c0_67, %c0_68, %c0_69], %72 {strides = array<i32>} : memref<1x1x32xf32, #tpu.memory_space<vmem>>, vector<1x1x32xf32>,
    %73 = arith.mulf %63, %63 : vector<64x32xf32>
    %cst_70 = arith.constant dense<0.000000e+00> : vector<32xf32>
    %74 = vector.multi_reduction <add>, %73, %cst_70 [0] : vector<64x32xf32> to vector<32xf32>
    %75 = vector.shape_cast %74 : vector<32xf32> to vector<1x32xf32>
    %c0_71 = arith.constant 0 : index
    %c0_72 = arith.constant 0 : index
    %c0_73 = arith.constant 0 : index
    %76 = vector.load %arg5[%c0_71, %c0_72, %c0_73] : memref<1x1x32xf32, #tpu.memory_space<vmem>>, vector<1x1x32xf32>
    %77 = vector.shape_cast %76 : vector<1x1x32xf32> to vector<1x32xf32>
    %78 = vector.shape_cast %75 : vector<1x32xf32> to vector<1x1x32xf32>
    tpu.vector_store %arg5[%c0_71, %c0_72, %c0_73], %78 {strides = array<i32>} : memref<1x1x32xf32, #tpu.memory_space<vmem>>, vector<1x1x32xf32>,
    return
  }
  func.func @transform_0(%arg0: i32) -> (i32, i32, i32, i32) {
    %c0_i32 = arith.constant 0 : i32
    %c0_i32_0 = arith.constant 0 : i32
    %c0_i32_1 = arith.constant 0 : i32
    %c0_i32_2 = arith.constant 0 : i32
    return %arg0, %c0_i32, %c0_i32_0, %c0_i32_1 : i32, i32, i32, i32
  }
  func.func @transform_1(%arg0: i32) -> (i32, i32, i32) {
    %c0_i32 = arith.constant 0 : i32
    %c0_i32_0 = arith.constant 0 : i32
    %c0_i32_1 = arith.constant 0 : i32
    %c0_i32_2 = arith.constant 0 : i32
    return %c0_i32, %c0_i32_0, %c0_i32_1 : i32, i32, i32
  }
  func.func @transform_2(%arg0: i32) -> (i32, i32, i32) {
    %c0_i32 = arith.constant 0 : i32
    %c0_i32_0 = arith.constant 0 : i32
    %c0_i32_1 = arith.constant 0 : i32
    return %arg0, %c0_i32, %c0_i32_0 : i32, i32, i32
  }
  func.func @transform_3(%arg0: i32) -> (i32, i32, i32) {
    %c0_i32 = arith.constant 0 : i32
    %c0_i32_0 = arith.constant 0 : i32
    %c0_i32_1 = arith.constant 0 : i32
    return %arg0, %c0_i32, %c0_i32_0 : i32, i32, i32
  }
  func.func @transform_4(%arg0: i32) -> (i32, i32, i32) {
    %c0_i32 = arith.constant 0 : i32
    %c0_i32_0 = arith.constant 0 : i32
    %c0_i32_1 = arith.constant 0 : i32
    return %arg0, %c0_i32, %c0_i32_0 : i32, i32, i32
  }
}

</mosaic_0001>

<bundles_post_ra>
// kernel: corblock_s_forward.12
= control target key start
LH: loop header
LB: loop body
LE: loop exit
PB: predicated region body
PF: predicated region fallthrough
CT: control target
= control target key end

     0   :  { %vm334_vm0 = vcmask 1041408   ;;  %vm237_vm1 = vcmask 31744   ;;  %vm883_vm2 = vcmask 60416   ;;  %s1681_s1 = inlined_call_operand.vmem [shape: bf16[4,8], index: 1, kind: input, shape index: {}]   ;;  %s1682_s0 = inlined_call_operand.vmem [shape: bf16[512,4], index: 0, kind: input, shape index: {}]   ;;  %s1683_s2 = inlined_call_operand.vmem [shape: bf16[512,8], index: 2, kind: output, shape index: {}]  }
   0x1   :  { %v76_v0 = vld [vmem:[%s1681_s1] sm:$0x3]  ;;  %v1249_v4 = vld [vmem:[%s1682_s0 + $0x8] sm:$0xff]   ;;  %v1251_v6 = vld [vmem:[%s1682_s0 + $0x10] sm:$0xff]  }
   0x2   :  { %1245 = vmatprep.subr.msk.bf16.mxu0 %vm334_vm0, %v76_v0  ;;  %1246 = vmatprep.subr.msk.bf16.mxu1 %vm334_vm0, %v76_v0  ;;  %v336_v1 = vsel %vm334_vm0, %v76_v0, 0  ;;  %v1247_v2 = vld [vmem:[%s1682_s0] sm:$0xff]   ;;  %v1250_v5 = vld [vmem:[%s1682_s0 + $0x88] sm:$0xff]   ;;  %v1252_v7 = vld [vmem:[%s1682_s0 + $0x90] sm:$0xff]  }
   0x3   :  { %1178 = vmatpush3.bf16.msra.mxu0 %v336_v1  ;;  %1244 = vmatpush3.bf16.msra.mxu1 %v336_v1  ;;  %v1248_v3 = vld [vmem:[%s1682_s0 + $0x80] sm:$0xff]   ;;  %v1253_v8 = vld [vmem:[%s1682_s0 + $0x18] sm:$0xff]   ;;  %v1257_v12 = vld [vmem:[%s1682_s0 + $0x28] sm:$0xff]  }
   0x4   :  { %1179 = vmatprep.mubr.msk.bf16.mxu0 %vm237_vm1, %v1247_v2  ;;  %1211 = vmatprep.mubr.msk.bf16.mxu1 %vm237_vm1, %v1248_v3  ;;  %v1254_v9 = vld [vmem:[%s1682_s0 + $0x98] sm:$0xff]   ;;  %v1255_v10 = vld [vmem:[%s1682_s0 + $0x20] sm:$0xff]   ;;  %v1258_v13 = vld [vmem:[%s1682_s0 + $0xa8] sm:$0xff]  }
   0x5   :  { %v1256_v11 = vld [vmem:[%s1682_s0 + $0xa0] sm:$0xff]   ;;  %v1259_v14 = vld [vmem:[%s1682_s0 + $0x30] sm:$0xff]   ;;  %v1261_v16 = vld [vmem:[%s1682_s0 + $0x38] sm:$0xff]  }
   0x6   :  { %1180 = vmatmul.mubr.msk.bf16.vlgmr.msra.gmra.mrb[0].mxu0 %vm237_vm1, %v1249_v4  ;;  %1212 = vmatmul.mubr.msk.bf16.vlgmr.msra.gmra.mrb[0].mxu1 %vm237_vm1, %v1250_v5  ;;  %v1260_v15 = vld [vmem:[%s1682_s0 + $0xb0] sm:$0xff]   ;;  %v1262_v17 = vld [vmem:[%s1682_s0 + $0xb8] sm:$0xff]   ;;  %v1263_v18 = vld [vmem:[%s1682_s0 + $0x40] sm:$0xff]  }
   0x7   :  { %1183 = vmatprep.mubr.msk.bf16.mxu0 %vm237_vm1, %v1251_v6  ;;  %1215 = vmatprep.mubr.msk.bf16.mxu1 %vm237_vm1, %v1252_v7  ;;  %v1264_v19 = vld [vmem:[%s1682_s0 + $0xc0] sm:$0xff]   ;;  %v1265_v20 = vld [vmem:[%s1682_s0 + $0x48] sm:$0xff]   ;;  %v1267_v22 = vld [vmem:[%s1682_s0 + $0x50] sm:$0xff]  }
   0x8   :  { %v1266_v21 = vld [vmem:[%s1682_s0 + $0xc8] sm:$0xff]   ;;  %v1268_v23 = vld [vmem:[%s1682_s0 + $0xd0] sm:$0xff]   ;;  %v1269_v24 = vld [vmem:[%s1682_s0 + $0x58] sm:$0xff]  }
   0x9   :  { %v1270_v25 = vld [vmem:[%s1682_s0 + $0xd8] sm:$0xff]   ;;  %v1271_v26 = vld [vmem:[%s1682_s0 + $0x60] sm:$0xff]   ;;  %v1273_v28 = vld [vmem:[%s1682_s0 + $0x68] sm:$0xff]  }
   0xa   :  { %v1272_v27 = vld [vmem:[%s1682_s0 + $0xe0] sm:$0xff]   ;;  %v1274_v29 = vld [vmem:[%s1682_s0 + $0xe8] sm:$0xff]   ;;  %v1275_v30 = vld [vmem:[%s1682_s0 + $0x70] sm:$0xff]  }
   0xb   :  { %v1276_v31 = vld [vmem:[%s1682_s0 + $0xf0] sm:$0xff]   ;;  %v1277_v32 = vld [vmem:[%s1682_s0 + $0x78] sm:$0xff]  }
   0xc   :  { %v1278_v33 = vld [vmem:[%s1682_s0 + $0xf8] sm:$0xff]  }
   0xe   :  { %1184 = vmatmul.mubr.msk.bf16.gmra.mrb[4].mxu0 %vm237_vm1, %v1253_v8  ;;  %1216 = vmatmul.mubr.msk.bf16.gmra.mrb[4].mxu1 %vm237_vm1, %v1254_v9 }
   0xf   :  { %1187 = vmatprep.mubr.msk.bf16.mxu0 %vm237_vm1, %v1255_v10  ;;  %1219 = vmatprep.mubr.msk.bf16.mxu1 %vm237_vm1, %v1256_v11 }
  0x16   :  { %1188 = vmatmul.mubr.msk.bf16.gmra.mrb[8].mxu0 %vm237_vm1, %v1257_v12  ;;  %1220 = vmatmul.mubr.msk.bf16.gmra.mrb[8].mxu1 %vm237_vm1, %v1258_v13 }
  0x17   :  { %1191 = vmatprep.mubr.msk.bf16.mxu0 %vm237_vm1, %v1259_v14  ;;  %1223 = vmatprep.mubr.msk.bf16.mxu1 %vm237_vm1, %v1260_v15 }
  0x1e   :  { %1192 = vmatmul.mubr.msk.bf16.gmra.mrb[12].mxu0 %vm237_vm1, %v1261_v16  ;;  %1224 = vmatmul.mubr.msk.bf16.gmra.mrb[12].mxu1 %vm237_vm1, %v1262_v17 }
  0x1f   :  { %1195 = vmatprep.mubr.msk.bf16.mxu0 %vm237_vm1, %v1263_v18  ;;  %1227 = vmatprep.mubr.msk.bf16.mxu1 %vm237_vm1, %v1264_v19 }
  0x26   :  { %1196 = vmatmul.mubr.msk.bf16.gmra.mrb[16].mxu0 %vm237_vm1, %v1265_v20  ;;  %1228 = vmatmul.mubr.msk.bf16.gmra.mrb[16].mxu1 %vm237_vm1, %v1266_v21 }
  0x27   :  { %1199 = vmatprep.mubr.msk.bf16.mxu0 %vm237_vm1, %v1267_v22  ;;  %1231 = vmatprep.mubr.msk.bf16.mxu1 %vm237_vm1, %v1268_v23 }
  0x2e   :  { %1200 = vmatmul.mubr.msk.bf16.gmra.mrb[20].mxu0 %vm237_vm1, %v1269_v24  ;;  %1232 = vmatmul.mubr.msk.bf16.gmra.mrb[20].mxu1 %vm237_vm1, %v1270_v25 }
  0x2f   :  { %1203 = vmatprep.mubr.msk.bf16.mxu0 %vm237_vm1, %v1271_v26  ;;  %1235 = vmatprep.mubr.msk.bf16.mxu1 %vm237_vm1, %v1272_v27 }
  0x36   :  { %1204 = vmatmul.mubr.msk.bf16.gmra.mrb[24].mxu0 %vm237_vm1, %v1273_v28  ;;  %1236 = vmatmul.mubr.msk.bf16.gmra.mrb[24].mxu1 %vm237_vm1, %v1274_v29 }
  0x37   :  { %1207 = vmatprep.mubr.msk.bf16.mxu0 %vm237_vm1, %v1275_v30  ;;  %1239 = vmatprep.mubr.msk.bf16.mxu1 %vm237_vm1, %v1276_v31 }
  0x3e   :  { %1208 = vmatmul.mubr.msk.bf16.gmra.mrb[28].mxu0 %vm237_vm1, %v1277_v32  ;;  %1240 = vmatmul.mubr.msk.bf16.gmra.mrb[28].mxu1 %vm237_vm1, %v1278_v33 }
  0xd9   :  { %v1181_v34 = vpop.f32.mrb[0].mxu0  ;;  %v1213_v36 = vpop.f32.mrb[0].mxu1 }
  0xda   :  { %v1082_v35 = vpack.c.bf16 %v1181_v34, %v1181_v34  ;;  %v372_v37 = vpop.f32.mrb[1].mxu0  ;;  %v1114_v38 = vpack.c.bf16 %v1213_v36, %v1213_v36  ;;  %v500_v40 = vpop.f32.mrb[1].mxu1 }
  0xdb   :  { %v1080_v39 = vpack.c.bf16 %v372_v37, %v372_v37  ;;  %v1182_v41 = vpop.f32.mrb[2].mxu0  ;;  %v1112_v42 = vpack.c.bf16 %v500_v40, %v500_v40  ;;  %v1214_v44 = vpop.f32.mrb[2].mxu1 }
  0xdc   :  { %886 = vst.msk [vmem:[%s1683_s2 + $0x8] sm:$0xf] %vm883_vm2, %v1082_v35  ;;  %v1083_v43 = vpack.c.bf16 %v1182_v41, %v1182_v41  ;;  %v375_v45 = vpop.f32.mrb[3].mxu0  ;;  %918 = vst.msk [vmem:[%s1683_s2 + $0x88] sm:$0xf] %vm883_vm2, %v1114_v38  ;;  %v1115_v46 = vpack.c.bf16 %v1214_v44, %v1214_v44  ;;  %v503_v48 = vpop.f32.mrb[3].mxu1 }
  0xdd   :  { %884 = vst.msk [vmem:[%s1683_s2] sm:$0xf] %vm883_vm2, %v1080_v39  ;;  %v1081_v47 = vpack.c.bf16 %v375_v45, %v375_v45  ;;  %916 = vst.msk [vmem:[%s1683_s2 + $0x80] sm:$0xf] %vm883_vm2, %v1112_v42  ;;  %v1113_v49 = vpack.c.bf16 %v503_v48, %v503_v48 }
  0xde   :  { %887 = vst.msk [vmem:[%s1683_s2 + $0xc] sm:$0xf] %vm883_vm2, %v1083_v43  ;;  %919 = vst.msk [vmem:[%s1683_s2 + $0x8c] sm:$0xf] %vm883_vm2, %v1115_v46 }
  0xdf   :  { %885 = vst.msk [vmem:[%s1683_s2 + $0x4] sm:$0xf] %vm883_vm2, %v1081_v47  ;;  %917 = vst.msk [vmem:[%s1683_s2 + $0x84] sm:$0xf] %vm883_vm2, %v1113_v49 }
  0xe1   :  { %v1185_v50 = vpop.f32.mrb[4].mxu0  ;;  %v1217_v52 = vpop.f32.mrb[4].mxu1 }
  0xe2   :  { %v1086_v51 = vpack.c.bf16 %v1185_v50, %v1185_v50  ;;  %v388_v53 = vpop.f32.mrb[5].mxu0  ;;  %v1118_v54 = vpack.c.bf16 %v1217_v52, %v1217_v52  ;;  %v516_v56 = vpop.f32.mrb[5].mxu1 }
  0xe3   :  { %v1084_v55 = vpack.c.bf16 %v388_v53, %v388_v53  ;;  %v1186_v57 = vpop.f32.mrb[6].mxu0  ;;  %v1116_v58 = vpack.c.bf16 %v516_v56, %v516_v56  ;;  %v1218_v60 = vpop.f32.mrb[6].mxu1 }
  0xe4   :  { %890 = vst.msk [vmem:[%s1683_s2 + $0x18] sm:$0xf] %vm883_vm2, %v1086_v51  ;;  %v1087_v59 = vpack.c.bf16 %v1186_v57, %v1186_v57  ;;  %v391_v61 = vpop.f32.mrb[7].mxu0  ;;  %922 = vst.msk [vmem:[%s1683_s2 + $0x98] sm:$0xf] %vm883_vm2, %v1118_v54  ;;  %v1119_v62 = vpack.c.bf16 %v1218_v60, %v1218_v60  ;;  %v519_v0 = vpop.f32.mrb[7].mxu1 }
  0xe5   :  { %888 = vst.msk [vmem:[%s1683_s2 + $0x10] sm:$0xf] %vm883_vm2, %v1084_v55  ;;  %v1085_v63 = vpack.c.bf16 %v391_v61, %v391_v61  ;;  %920 = vst.msk [vmem:[%s1683_s2 + $0x90] sm:$0xf] %vm883_vm2, %v1116_v58  ;;  %v1117_v1 = vpack.c.bf16 %v519_v0, %v519_v0 }
  0xe6   :  { %891 = vst.msk [vmem:[%s1683_s2 + $0x1c] sm:$0xf] %vm883_vm2, %v1087_v59  ;;  %923 = vst.msk [vmem:[%s1683_s2 + $0x9c] sm:$0xf] %vm883_vm2, %v1119_v62 }
  0xe7   :  { %889 = vst.msk [vmem:[%s1683_s2 + $0x14] sm:$0xf] %vm883_vm2, %v1085_v63  ;;  %921 = vst.msk [vmem:[%s1683_s2 + $0x94] sm:$0xf] %vm883_vm2, %v1117_v1 }
  0xe9   :  { %v1189_v2 = vpop.f32.mrb[8].mxu0  ;;  %v1221_v4 = vpop.f32.mrb[8].mxu1 }
  0xea   :  { %v1090_v3 = vpack.c.bf16 %v1189_v2, %v1189_v2  ;;  %v404_v5 = vpop.f32.mrb[9].mxu0  ;;  %v1122_v6 = vpack.c.bf16 %v1221_v4, %v1221_v4  ;;  %v532_v8 = vpop.f32.mrb[9].mxu1 }
  0xeb   :  { %v1088_v7 = vpack.c.bf16 %v404_v5, %v404_v5  ;;  %v1190_v9 = vpop.f32.mrb[10].mxu0  ;;  %v1120_v10 = vpack.c.bf16 %v532_v8, %v532_v8  ;;  %v1222_v12 = vpop.f32.mrb[10].mxu1 }
  0xec   :  { %894 = vst.msk [vmem:[%s1683_s2 + $0x28] sm:$0xf] %vm883_vm2, %v1090_v3  ;;  %v1091_v11 = vpack.c.bf16 %v1190_v9, %v1190_v9  ;;  %v407_v13 = vpop.f32.mrb[11].mxu0  ;;  %926 = vst.msk [vmem:[%s1683_s2 + $0xa8] sm:$0xf] %vm883_vm2, %v1122_v6  ;;  %v1123_v14 = vpack.c.bf16 %v1222_v12, %v1222_v12  ;;  %v535_v16 = vpop.f32.mrb[11].mxu1 }
  0xed   :  { %892 = vst.msk [vmem:[%s1683_s2 + $0x20] sm:$0xf] %vm883_vm2, %v1088_v7  ;;  %v1089_v15 = vpack.c.bf16 %v407_v13, %v407_v13  ;;  %924 = vst.msk [vmem:[%s1683_s2 + $0xa0] sm:$0xf] %vm883_vm2, %v1120_v10  ;;  %v1121_v17 = vpack.c.bf16 %v535_v16, %v535_v16 }
  0xee   :  { %895 = vst.msk [vmem:[%s1683_s2 + $0x2c] sm:$0xf] %vm883_vm2, %v1091_v11  ;;  %927 = vst.msk [vmem:[%s1683_s2 + $0xac] sm:$0xf] %vm883_vm2, %v1123_v14 }
  0xef   :  { %893 = vst.msk [vmem:[%s1683_s2 + $0x24] sm:$0xf] %vm883_vm2, %v1089_v15  ;;  %925 = vst.msk [vmem:[%s1683_s2 + $0xa4] sm:$0xf] %vm883_vm2, %v1121_v17 }
  0xf1   :  { %v1193_v18 = vpop.f32.mrb[12].mxu0  ;;  %v1225_v20 = vpop.f32.mrb[12].mxu1 }
  0xf2   :  { %v1094_v19 = vpack.c.bf16 %v1193_v18, %v1193_v18  ;;  %v420_v21 = vpop.f32.mrb[13].mxu0  ;;  %v1126_v22 = vpack.c.bf16 %v1225_v20, %v1225_v20  ;;  %v548_v24 = vpop.f32.mrb[13].mxu1 }
  0xf3   :  { %v1092_v23 = vpack.c.bf16 %v420_v21, %v420_v21  ;;  %v1194_v25 = vpop.f32.mrb[14].mxu0  ;;  %v1124_v26 = vpack.c.bf16 %v548_v24, %v548_v24  ;;  %v1226_v28 = vpop.f32.mrb[14].mxu1 }
  0xf4   :  { %898 = vst.msk [vmem:[%s1683_s2 + $0x38] sm:$0xf] %vm883_vm2, %v1094_v19  ;;  %v1095_v27 = vpack.c.bf16 %v1194_v25, %v1194_v25  ;;  %v423_v29 = vpop.f32.mrb[15].mxu0  ;;  %930 = vst.msk [vmem:[%s1683_s2 + $0xb8] sm:$0xf] %vm883_vm2, %v1126_v22  ;;  %v1127_v30 = vpack.c.bf16 %v1226_v28, %v1226_v28  ;;  %v551_v32 = vpop.f32.mrb[15].mxu1 }
  0xf5   :  { %896 = vst.msk [vmem:[%s1683_s2 + $0x30] sm:$0xf] %vm883_vm2, %v1092_v23  ;;  %v1093_v31 = vpack.c.bf16 %v423_v29, %v423_v29  ;;  %928 = vst.msk [vmem:[%s1683_s2 + $0xb0] sm:$0xf] %vm883_vm2, %v1124_v26  ;;  %v1125_v33 = vpack.c.bf16 %v551_v32, %v551_v32 }
  0xf6   :  { %899 = vst.msk [vmem:[%s1683_s2 + $0x3c] sm:$0xf] %vm883_vm2, %v1095_v27  ;;  %931 = vst.msk [vmem:[%s1683_s2 + $0xbc] sm:$0xf] %vm883_vm2, %v1127_v30 }
  0xf7   :  { %897 = vst.msk [vmem:[%s1683_s2 + $0x34] sm:$0xf] %vm883_vm2, %v1093_v31  ;;  %929 = vst.msk [vmem:[%s1683_s2 + $0xb4] sm:$0xf] %vm883_vm2, %v1125_v33 }
  0xf9   :  { %v1197_v34 = vpop.f32.mrb[16].mxu0  ;;  %v1229_v36 = vpop.f32.mrb[16].mxu1 }
  0xfa   :  { %v1098_v35 = vpack.c.bf16 %v1197_v34, %v1197_v34  ;;  %v436_v37 = vpop.f32.mrb[17].mxu0  ;;  %v1130_v38 = vpack.c.bf16 %v1229_v36, %v1229_v36  ;;  %v564_v40 = vpop.f32.mrb[17].mxu1 }
  0xfb   :  { %v1096_v39 = vpack.c.bf16 %v436_v37, %v436_v37  ;;  %v1198_v41 = vpop.f32.mrb[18].mxu0  ;;  %v1128_v42 = vpack.c.bf16 %v564_v40, %v564_v40  ;;  %v1230_v44 = vpop.f32.mrb[18].mxu1 }
  0xfc   :  { %902 = vst.msk [vmem:[%s1683_s2 + $0x48] sm:$0xf] %vm883_vm2, %v1098_v35  ;;  %v1099_v43 = vpack.c.bf16 %v1198_v41, %v1198_v41  ;;  %v439_v45 = vpop.f32.mrb[19].mxu0  ;;  %934 = vst.msk [vmem:[%s1683_s2 + $0xc8] sm:$0xf] %vm883_vm2, %v1130_v38  ;;  %v1131_v46 = vpack.c.bf16 %v1230_v44, %v1230_v44  ;;  %v567_v48 = vpop.f32.mrb[19].mxu1 }
  0xfd   :  { %900 = vst.msk [vmem:[%s1683_s2 + $0x40] sm:$0xf] %vm883_vm2, %v1096_v39  ;;  %v1097_v47 = vpack.c.bf16 %v439_v45, %v439_v45  ;;  %932 = vst.msk [vmem:[%s1683_s2 + $0xc0] sm:$0xf] %vm883_vm2, %v1128_v42  ;;  %v1129_v49 = vpack.c.bf16 %v567_v48, %v567_v48 }
  0xfe   :  { %903 = vst.msk [vmem:[%s1683_s2 + $0x4c] sm:$0xf] %vm883_vm2, %v1099_v43  ;;  %935 = vst.msk [vmem:[%s1683_s2 + $0xcc] sm:$0xf] %vm883_vm2, %v1131_v46 }
  0xff   :  { %901 = vst.msk [vmem:[%s1683_s2 + $0x44] sm:$0xf] %vm883_vm2, %v1097_v47  ;;  %933 = vst.msk [vmem:[%s1683_s2 + $0xc4] sm:$0xf] %vm883_vm2, %v1129_v49 }
 0x101   :  { %v1201_v50 = vpop.f32.mrb[20].mxu0  ;;  %v1233_v52 = vpop.f32.mrb[20].mxu1 }
 0x102   :  { %v1102_v51 = vpack.c.bf16 %v1201_v50, %v1201_v50  ;;  %v452_v53 = vpop.f32.mrb[21].mxu0  ;;  %v1134_v54 = vpack.c.bf16 %v1233_v52, %v1233_v52  ;;  %v580_v56 = vpop.f32.mrb[21].mxu1 }
 0x103   :  { %v1100_v55 = vpack.c.bf16 %v452_v53, %v452_v53  ;;  %v1202_v57 = vpop.f32.mrb[22].mxu0  ;;  %v1132_v58 = vpack.c.bf16 %v580_v56, %v580_v56  ;;  %v1234_v60 = vpop.f32.mrb[22].mxu1 }
 0x104   :  { %906 = vst.msk [vmem:[%s1683_s2 + $0x58] sm:$0xf] %vm883_vm2, %v1102_v51  ;;  %v1103_v59 = vpack.c.bf16 %v1202_v57, %v1202_v57  ;;  %v455_v61 = vpop.f32.mrb[23].mxu0  ;;  %938 = vst.msk [vmem:[%s1683_s2 + $0xd8] sm:$0xf] %vm883_vm2, %v1134_v54  ;;  %v1135_v62 = vpack.c.bf16 %v1234_v60, %v1234_v60  ;;  %v583_v0 = vpop.f32.mrb[23].mxu1 }
 0x105   :  { %904 = vst.msk [vmem:[%s1683_s2 + $0x50] sm:$0xf] %vm883_vm2, %v1100_v55  ;;  %v1101_v63 = vpack.c.bf16 %v455_v61, %v455_v61  ;;  %936 = vst.msk [vmem:[%s1683_s2 + $0xd0] sm:$0xf] %vm883_vm2, %v1132_v58  ;;  %v1133_v1 = vpack.c.bf16 %v583_v0, %v583_v0 }
 0x106   :  { %907 = vst.msk [vmem:[%s1683_s2 + $0x5c] sm:$0xf] %vm883_vm2, %v1103_v59  ;;  %939 = vst.msk [vmem:[%s1683_s2 + $0xdc] sm:$0xf] %vm883_vm2, %v1135_v62 }
 0x107   :  { %905 = vst.msk [vmem:[%s1683_s2 + $0x54] sm:$0xf] %vm883_vm2, %v1101_v63  ;;  %937 = vst.msk [vmem:[%s1683_s2 + $0xd4] sm:$0xf] %vm883_vm2, %v1133_v1 }
 0x109   :  { %v1205_v2 = vpop.f32.mrb[24].mxu0  ;;  %v1237_v4 = vpop.f32.mrb[24].mxu1 }
 0x10a   :  { %v1106_v3 = vpack.c.bf16 %v1205_v2, %v1205_v2  ;;  %v468_v5 = vpop.f32.mrb[25].mxu0  ;;  %v1138_v6 = vpack.c.bf16 %v1237_v4, %v1237_v4  ;;  %v596_v8 = vpop.f32.mrb[25].mxu1 }
 0x10b   :  { %v1104_v7 = vpack.c.bf16 %v468_v5, %v468_v5  ;;  %v1206_v9 = vpop.f32.mrb[26].mxu0  ;;  %v1136_v10 = vpack.c.bf16 %v596_v8, %v596_v8  ;;  %v1238_v12 = vpop.f32.mrb[26].mxu1 }
 0x10c   :  { %910 = vst.msk [vmem:[%s1683_s2 + $0x68] sm:$0xf] %vm883_vm2, %v1106_v3  ;;  %v1107_v11 = vpack.c.bf16 %v1206_v9, %v1206_v9  ;;  %v471_v13 = vpop.f32.mrb[27].mxu0  ;;  %942 = vst.msk [vmem:[%s1683_s2 + $0xe8] sm:$0xf] %vm883_vm2, %v1138_v6  ;;  %v1139_v14 = vpack.c.bf16 %v1238_v12, %v1238_v12  ;;  %v599_v16 = vpop.f32.mrb[27].mxu1 }
 0x10d   :  { %908 = vst.msk [vmem:[%s1683_s2 + $0x60] sm:$0xf] %vm883_vm2, %v1104_v7  ;;  %v1105_v15 = vpack.c.bf16 %v471_v13, %v471_v13  ;;  %940 = vst.msk [vmem:[%s1683_s2 + $0xe0] sm:$0xf] %vm883_vm2, %v1136_v10  ;;  %v1137_v17 = vpack.c.bf16 %v599_v16, %v599_v16 }
 0x10e   :  { %911 = vst.msk [vmem:[%s1683_s2 + $0x6c] sm:$0xf] %vm883_vm2, %v1107_v11  ;;  %943 = vst.msk [vmem:[%s1683_s2 + $0xec] sm:$0xf] %vm883_vm2, %v1139_v14 }
 0x10f   :  { %909 = vst.msk [vmem:[%s1683_s2 + $0x64] sm:$0xf] %vm883_vm2, %v1105_v15  ;;  %941 = vst.msk [vmem:[%s1683_s2 + $0xe4] sm:$0xf] %vm883_vm2, %v1137_v17 }
 0x111   :  { %v1209_v18 = vpop.f32.mrb[28].mxu0  ;;  %v1241_v20 = vpop.f32.mrb[28].mxu1 }
 0x112   :  { %v1110_v19 = vpack.c.bf16 %v1209_v18, %v1209_v18  ;;  %v484_v21 = vpop.f32.mrb[29].mxu0  ;;  %v1142_v22 = vpack.c.bf16 %v1241_v20, %v1241_v20  ;;  %v612_v24 = vpop.f32.mrb[29].mxu1 }
 0x113   :  { %v1108_v23 = vpack.c.bf16 %v484_v21, %v484_v21  ;;  %v1210_v25 = vpop.f32.mrb[30].mxu0  ;;  %v1140_v26 = vpack.c.bf16 %v612_v24, %v612_v24  ;;  %v1242_v28 = vpop.f32.mrb[30].mxu1 }
 0x114   :  { %914 = vst.msk [vmem:[%s1683_s2 + $0x78] sm:$0xf] %vm883_vm2, %v1110_v19  ;;  %v1111_v27 = vpack.c.bf16 %v1210_v25, %v1210_v25  ;;  %v487_v29 = vpop.f32.mrb[31].mxu0  ;;  %946 = vst.msk [vmem:[%s1683_s2 + $0xf8] sm:$0xf] %vm883_vm2, %v1142_v22  ;;  %v1143_v30 = vpack.c.bf16 %v1242_v28, %v1242_v28  ;;  %v615_v32 = vpop.f32.mrb[31].mxu1 }
 0x115   :  { %912 = vst.msk [vmem:[%s1683_s2 + $0x70] sm:$0xf] %vm883_vm2, %v1108_v23  ;;  %v1109_v31 = vpack.c.bf16 %v487_v29, %v487_v29  ;;  %944 = vst.msk [vmem:[%s1683_s2 + $0xf0] sm:$0xf] %vm883_vm2, %v1140_v26  ;;  %v1141_v33 = vpack.c.bf16 %v615_v32, %v615_v32 }
 0x116   :  { %915 = vst.msk [vmem:[%s1683_s2 + $0x7c] sm:$0xf] %vm883_vm2, %v1111_v27  ;;  %947 = vst.msk [vmem:[%s1683_s2 + $0xfc] sm:$0xf] %vm883_vm2, %v1143_v30 }
 0x117   :  { %913 = vst.msk [vmem:[%s1683_s2 + $0x74] sm:$0xf] %vm883_vm2, %v1109_v31  ;;  %945 = vst.msk [vmem:[%s1683_s2 + $0xf4] sm:$0xf] %vm883_vm2, %v1141_v33 }

// kernel: corblock_s_forward.15
= control target key start
LH: loop header
LB: loop body
LE: loop exit
PB: predicated region body
PF: predicated region fallthrough
CT: control target
= control target key end

     0   :  { %s1269_s12 = smov 0   ;;  %s1730_s0 = inlined_call_operand.vmem [shape: bf16[2,16,16,32], index: 0, kind: input, shape index: {}]   ;;  %s1731_s1 = inlined_call_operand.vmem [shape: f32[1,32], index: 1, kind: input, shape index: {}]   ;;  %s1732_s2 = inlined_call_operand.vmem [shape: f32[1,32], index: 2, kind: input, shape index: {}]   ;;  %s1733_s3 = inlined_call_operand.vmem [shape: bf16[2,18,18,32], index: 3, kind: output, shape index: {}]  }
   0x1 LB: > { %s994_s13 = sadd.s32 4294967295, %s1246_s12   ;;  %p998_p0 = scmp.ge.s32.totalorder %s1246_s12, 1  ;;  %s1246_s12 = sphi %s1269_s12, %s13_s12  }
   0x2   : > { %p137_p1 = scmp.lt.s32.totalorder %s1246_s12, 3 }
   0x4   : > { %p138_p2 = pnand %p998_p0, %p137_p1 }
   0x5   : > { %p161_p3 = scmp.lt.s32.totalorder (!%p138_p2), %s994_s13, 1  ;;  %vm172_vm0 = vcmask (!%p138_p2), 257024   ;;  %vm175_vm1 = vcmask (!%p138_p2), 253952   ;;  %v1285_v0 = vld [vmem:[%s1731_s1] ss:$0 sm:$0xff] (!%p138_p2)  ;;  %v1248_v4 = vmov (!%p138_p2), 0  }
   0x6   : > { %141 = sbr.rel (%p138_p2) target bundleno = 124 (0x7c), region = 32  ;;  %vm823_vm2 = vsmask.f32 (!%p138_p2), 7938  ;;  %v1417_v10 = vld [vmem:[%s1732_s2] ss:$0 sm:$0xff] (!%p138_p2) }
   0x7   : > { %vm498_vm3 = vsmask.f32 (!%p138_p2), 256  ;;  %vm499_vm4 = vsmask.f32 (!%p138_p2), 4368  ;;  %vm1449_vm5 = vmand (!%p138_p2), %vm172_vm0, %vm823_vm2 }
   0x8   : > { %vm1455_vm6 = vmor (!%p138_p2), %vm498_vm3, %vm499_vm4 }
   0x9   : > { %vm1462_vm7 = vmand (!%p138_p2), %vm175_vm1, %vm498_vm3 }
   0xd   : > { %s1741_s13 = smov (!%p161_p3, %s994_s13), 1 }
   0xe   : > { %s1230_s14 = smul.u32 216, %s1741_s13  ;;  %s1118_s15 = sshll.u32 %s1741_s13, 7 }
   0xf   : > { %s1280_s18 = scalar_lea.vmem %s1730_s0, %s1118_s15 }
  0x10   : > { %s1290_s23 = scalar_lea.vmem %s1733_s3, %s1230_s14  ;;  %v1293_v1 = vld [vmem:[%s1280_s18] sm:$0xff]   ;;  %v1296_v2 = vld [vmem:[%s1280_s18 + $0x8] sm:$0xff]   ;;  %v1299_v3 = vld [vmem:[%s1280_s18 + $0x10] sm:$0xff]  }
  0x11   : > { %177 = vst.msk [vmem:[%s1290_s23 + $0xc] sm:$0xf] %vm172_vm0, %v1248_v4  ;;  %173 = vst.msk [vmem:[%s1290_s23] sm:$0xf] %vm172_vm0, %v1248_v4  ;;  %v1153_v5 = vunpack.c.l.bf16 %v1293_v1  ;;  %v1154_v6 = vunpack.c.h.bf16 %v1293_v1  ;;  %v1157_v7 = vunpack.c.l.bf16 %v1296_v2  ;;  %v1158_v8 = vunpack.c.h.bf16 %v1296_v2  ;;  %v1217_v9 = vld [vmem:[%s1280_s18 + $0x18] sm:$0xff]   ;;  %v1434_v27 = vld [vmem:[%s1280_s18 + $0x20] sm:$0xff]  }
  0x12   : > { %174 = vst.msk [vmem:[%s1290_s23 + $0x4] sm:$0xf] %vm172_vm0, %v1248_v4  ;;  %178 = vst.msk [vmem:[%s1290_s23 + $0x10] sm:$0xf] %vm172_vm0, %v1248_v4  ;;  %v1161_v11 = vunpack.c.l.bf16 %v1299_v3  ;;  %v1162_v12 = vunpack.c.h.bf16 %v1299_v3  ;;  %v1165_v13 = vunpack.c.l.bf16 %v1217_v9  ;;  %v1166_v14 = vunpack.c.h.bf16 %v1217_v9  ;;  %v1437_v28 = vld [vmem:[%s1280_s18 + $0x28] sm:$0xff]  }
  0x13   : > { %180 = vst.msk [vmem:[%s1290_s23 + $0x18] sm:$0xf] %vm172_vm0, %v1248_v4  ;;  %181 = vst.msk [vmem:[%s1290_s23 + $0x1c] sm:$0xf] %vm172_vm0, %v1248_v4  ;;  %v299_v15 = vmul.f32 %v1153_v5, %v1285_v0  ;;  %v300_v16 = vmul.f32 %v1154_v6, %v1285_v0  ;;  %v301_v17 = vmul.f32 %v1157_v7, %v1285_v0  ;;  %v1169_v37 = vunpack.c.l.bf16 %v1434_v27 }
  0x14   : > { %183 = vst.msk [vmem:[%s1290_s23 + $0x24] sm:$0xf] %vm172_vm0, %v1248_v4  ;;  %184 = vst.msk [vmem:[%s1290_s23 + $0x28] sm:$0xf] %vm172_vm0, %v1248_v4  ;;  %v302_v18 = vmul.f32 %v1158_v8, %v1285_v0  ;;  %v303_v19 = vmul.f32 %v1161_v11, %v1285_v0  ;;  %v304_v20 = vmul.f32 %v1162_v12, %v1285_v0  ;;  %v1170_v38 = vunpack.c.h.bf16 %v1434_v27 }
  0x15   : > { %186 = vst.msk [vmem:[%s1290_s23 + $0x30] sm:$0xf] %vm172_vm0, %v1248_v4  ;;  %187 = vst.msk [vmem:[%s1290_s23 + $0x34] sm:$0xf] %vm172_vm0, %v1248_v4  ;;  %v305_v21 = vmul.f32 %v1165_v13, %v1285_v0  ;;  %v306_v22 = vmul.f32 %v1166_v14, %v1285_v0  ;;  %v338_v23 = vadd.f32 %v1417_v10, %v299_v15  ;;  %v1173_v39 = vunpack.c.l.bf16 %v1437_v28 }
  0x16   : > { %189 = vst.msk [vmem:[%s1290_s23 + $0x3c] sm:$0xf] %vm172_vm0, %v1248_v4  ;;  %190 = vst.msk [vmem:[%s1290_s23 + $0x40] sm:$0xf] %vm172_vm0, %v1248_v4  ;;  %v339_v24 = vadd.f32 %v1417_v10, %v300_v16  ;;  %v340_v25 = vadd.f32 %v1417_v10, %v301_v17  ;;  %v341_v26 = vadd.f32 %v1417_v10, %v302_v18  ;;  %v1174_v40 = vunpack.c.h.bf16 %v1437_v28 }
  0x17   : > { %192 = vst.msk [vmem:[%s1290_s23 + $0x48] sm:$0xf] %vm172_vm0, %v1248_v4  ;;  %193 = vst.msk [vmem:[%s1290_s23 + $0x4c] sm:$0xf] %vm172_vm0, %v1248_v4  ;;  %v342_v29 = vadd.f32 %v1417_v10, %v303_v19  ;;  %v343_v30 = vadd.f32 %v1417_v10, %v304_v20  ;;  %v344_v31 = vadd.f32 %v1417_v10, %v305_v21  ;;  %v370_v33 = vmax.f32 %v338_v23, 0.0 }
  0x18   : > { %195 = vst.msk [vmem:[%s1290_s23 + $0x54] sm:$0xf] %vm172_vm0, %v1248_v4  ;;  %196 = vst.msk [vmem:[%s1290_s23 + $0x58] sm:$0xf] %vm172_vm0, %v1248_v4  ;;  %v345_v32 = vadd.f32 %v1417_v10, %v306_v22  ;;  %v371_v34 = vmax.f32 %v339_v24, 0.0  ;;  %v372_v35 = vmax.f32 %v340_v25, 0.0 }
  0x19   : > { %198 = vst.msk [vmem:[%s1290_s23 + $0x60] sm:$0xf] %vm172_vm0, %v1248_v4  ;;  %199 = vst.msk [vmem:[%s1290_s23 + $0x64] sm:$0xf] %vm172_vm0, %v1248_v4  ;;  %v373_v36 = vmax.f32 %v341_v26, 0.0  ;;  %v1119_v41 = vpack.c.bf16 %v370_v33, %v370_v33  ;;  %v374_v45 = vmax.f32 %v342_v29, 0.0 }
  0x1a   : > { %201 = vst.msk [vmem:[%s1290_s23 + $0x6c] sm:$0xf] %vm172_vm0, %v1248_v4  ;;  %202 = vst.msk [vmem:[%s1290_s23 + $0x70] sm:$0xf] %vm172_vm0, %v1248_v4  ;;  %v1120_v42 = vpack.c.bf16 %v371_v34, %v371_v34  ;;  %v1121_v43 = vpack.c.bf16 %v372_v35, %v372_v35  ;;  %v375_v46 = vmax.f32 %v343_v30, 0.0  ;;  %v376_v47 = vmax.f32 %v344_v31, 0.0 }
  0x1b   : > { %204 = vst.msk [vmem:[%s1290_s23 + $0x78] sm:$0xf] %vm172_vm0, %v1248_v4  ;;  %205 = vst.msk [vmem:[%s1290_s23 + $0x7c] sm:$0xf] %vm172_vm0, %v1248_v4  ;;  %v1122_v44 = vpack.c.bf16 %v373_v36, %v373_v36  ;;  %v377_v48 = vmax.f32 %v345_v32, 0.0  ;;  %v502_v49 = vshrl.u32 %v1119_v41, 16  ;;  %v1123_v61 = vpack.c.bf16 %v374_v45, %v374_v45 }
  0x1c   : > { %207 = vst.msk [vmem:[%s1290_s23 + $0x84] sm:$0xf] %vm172_vm0, %v1248_v4  ;;  %208 = vst.msk [vmem:[%s1290_s23 + $0x88] sm:$0xf] %vm172_vm0, %v1248_v4  ;;  %v505_v50 = vshll.u32 %v1119_v41, 16  ;;  %v510_v51 = vshrl.u32 %v1120_v42, 16  ;;  %v1124_v62 = vpack.c.bf16 %v375_v46, %v375_v46  ;;  %v1125_v5 = vpack.c.bf16 %v376_v47, %v376_v47 }
  0x1d   : > { %210 = vst.msk [vmem:[%s1290_s23 + $0x90] sm:$0xf] %vm172_vm0, %v1248_v4  ;;  %211 = vst.msk [vmem:[%s1290_s23 + $0x94] sm:$0xf] %vm172_vm0, %v1248_v4  ;;  %v513_v52 = vshll.u32 %v1120_v42, 16  ;;  %v519_v54 = vshrl.u32 %v1121_v43, 16  ;;  %v1126_v6 = vpack.c.bf16 %v377_v48, %v377_v48  ;;  %v307_v36 = vmul.f32 %v1169_v37, %v1285_v0 }
  0x1e   : > { %213 = vst.msk [vmem:[%s1290_s23 + $0x9c] sm:$0xf] %vm172_vm0, %v1248_v4  ;;  %214 = vst.msk [vmem:[%s1290_s23 + $0xa0] sm:$0xf] %vm172_vm0, %v1248_v4  ;;  %v522_v55 = vshll.u32 %v1121_v43, 16  ;;  %v527_v56 = vshrl.u32 %v1122_v44, 16 }
  0x1f   : > { %216 = vst.msk [vmem:[%s1290_s23 + $0xa8] sm:$0xf] %vm172_vm0, %v1248_v4  ;;  %217 = vst.msk [vmem:[%s1290_s23 + $0xac] sm:$0xf] %vm172_vm0, %v1248_v4  ;;  %v530_v57 = vshll.u32 %v1122_v44, 16  ;;  %v504_v58 = vrot.slane %v502_v49, 7  ;;  %v346_v48 = vadd.f32 %v1417_v10, %v307_v36  ;;  %v308_v49 = vmul.f32 %v1170_v38, %v1285_v0 }
  0x20   : > { %219 = vst.msk [vmem:[%s1290_s23 + $0xb4] sm:$0xf] %vm172_vm0, %v1248_v4  ;;  %220 = vst.msk [vmem:[%s1290_s23 + $0xb8] sm:$0xf] %vm172_vm0, %v1248_v4  ;;  %v512_v60 = vrot.slane %v510_v51, 7  ;;  %v521_v3 = vrot.slane %v519_v54, 7 }
  0x21   : > { %222 = vst.msk [vmem:[%s1290_s23 + $0xc0] sm:$0xf] %vm172_vm0, %v1248_v4  ;;  %223 = vst.msk [vmem:[%s1290_s23 + $0xc4] sm:$0xf] %vm172_vm0, %v1248_v4  ;;  %v1036_v63 = vld [vmem:[%s1290_s23 + $0xc] sm:$0xf]  ;;  %v507_v7 = vor.u32 %v505_v50, %v504_v58  ;;  %v309_v50 = vmul.f32 %v1173_v39, %v1285_v0 }
  0x22   : > { %225 = vst.msk [vmem:[%s1290_s23 + $0xcc] sm:$0xf] %vm172_vm0, %v1248_v4  ;;  %226 = vst.msk [vmem:[%s1290_s23 + $0xd0] sm:$0xf] %vm172_vm0, %v1248_v4  ;;  %v508_v8 = vrot.slane %v504_v58, 4  ;;  %v515_v9 = vor.u32 %v513_v52, %v512_v60  ;;  %v517_v11 = vrot.slane %v512_v60, 4  ;;  %v524_v14 = vor.u32 %v522_v55, %v521_v3 }
  0x23   : > { %179 = vst.msk [vmem:[%s1290_s23 + $0x14] sm:$0x1] %vm175_vm1, %v1248_v4  ;;  %176 = vst.msk [vmem:[%s1290_s23 + $0x8] sm:$0x1] %vm175_vm1, %v1248_v4  ;;  %v1041_v12 = vld [vmem:[%s1290_s23 + $0x18] sm:$0xf]  ;;  %v826_v18 = vsel %vm1449_vm5, %v507_v7, %v1036_v63  ;;  %v310_v7 = vmul.f32 %v1174_v40, %v1285_v0 }
  0x24   : > { %182 = vst.msk [vmem:[%s1290_s23 + $0x20] sm:$0x1] %vm175_vm1, %v1248_v4  ;;  %185 = vst.msk [vmem:[%s1290_s23 + $0x2c] sm:$0x1] %vm175_vm1, %v1248_v4  ;;  %v525_v15 = vrot.slane %v521_v3, 4  ;;  %v516_v19 = vsel %vm1455_vm6, %v508_v8, %v515_v9  ;;  %v536_v21 = vshrl.u32 %v1123_v61, 16  ;;  %v835_v22 = vsel %vm1449_vm5, %v524_v14, %v1041_v12 }
  0x25   : > { %188 = vst.msk [vmem:[%s1290_s23 + $0x38] sm:$0x1] %vm175_vm1, %v1248_v4  ;;  %191 = vst.msk [vmem:[%s1290_s23 + $0x44] sm:$0x1] %vm175_vm1, %v1248_v4  ;;  %v539_v25 = vshll.u32 %v1123_v61, 16  ;;  %v544_v29 = vshrl.u32 %v1124_v62, 16 }
  0x26   : > { %194 = vst.msk [vmem:[%s1290_s23 + $0x50] sm:$0x1] %vm175_vm1, %v1248_v4  ;;  %197 = vst.msk [vmem:[%s1290_s23 + $0x5c] sm:$0x1] %vm175_vm1, %v1248_v4  ;;  %v538_v26 = vrot.slane %v536_v21, 7  ;;  %v547_v30 = vshll.u32 %v1124_v62, 16  ;;  %v347_v62 = vadd.f32 %v1417_v10, %v308_v49 }
  0x27   : > { %200 = vst.msk [vmem:[%s1290_s23 + $0x68] sm:$0x1] %vm175_vm1, %v1248_v4  ;;  %203 = vst.msk [vmem:[%s1290_s23 + $0x74] sm:$0x1] %vm175_vm1, %v1248_v4  ;;  %v553_v31 = vshrl.u32 %v1125_v5, 16  ;;  %v556_v33 = vshll.u32 %v1125_v5, 16  ;;  %v348_v5 = vadd.f32 %v1417_v10, %v309_v50 }
  0x28   : > { %206 = vst.msk [vmem:[%s1290_s23 + $0x80] sm:$0x1] %vm175_vm1, %v1248_v4  ;;  %209 = vst.msk [vmem:[%s1290_s23 + $0x8c] sm:$0x1] %vm175_vm1, %v1248_v4  ;;  %v1046_v32 = vld [vmem:[%s1290_s23 + $0x24] sm:$0xf]  ;;  %v541_v41 = vor.u32 %v539_v25, %v538_v26 }
  0x29   : > { %212 = vst.msk [vmem:[%s1290_s23 + $0x98] sm:$0x1] %vm175_vm1, %v1248_v4  ;;  %215 = vst.msk [vmem:[%s1290_s23 + $0xa4] sm:$0x1] %vm175_vm1, %v1248_v4  ;;  %v561_v34 = vshrl.u32 %v1126_v6, 16  ;;  %v564_v35 = vshll.u32 %v1126_v6, 16 }
  0x2a   : > { %218 = vst.msk [vmem:[%s1290_s23 + $0xb0] sm:$0x1] %vm175_vm1, %v1248_v4  ;;  %221 = vst.msk [vmem:[%s1290_s23 + $0xbc] sm:$0x1] %vm175_vm1, %v1248_v4  ;;  %v1039_v2 = vld [vmem:[%s1290_s23 + $0x14] sm:$0x1]  ;;  %v842_v37 = vsel %vm1449_vm5, %v541_v41, %v1046_v32 }
  0x2b   : > { %224 = vst.msk [vmem:[%s1290_s23 + $0xc8] sm:$0x1] %vm175_vm1, %v1248_v4  ;;  %227 = vst.msk [vmem:[%s1290_s23 + $0xd4] sm:$0x1] %vm175_vm1, %v1248_v4  ;;  %v529_v4 = vrot.slane %v527_v56, 7  ;;  %v832_v20 = vsel %vm1462_vm7, %v517_v11, %v1039_v2  ;;  %v542_v42 = vrot.slane %v538_v26, 4 }
  0x2c   : > { %v1044_v13 = vld [vmem:[%s1290_s23 + $0x20] sm:$0x1]  ;;  %1037 = vst [vmem:[%s1290_s23 + $0xc] sm:$0xf] %v826_v18  ;;  %1038 = vst.msk [vmem:[%s1290_s23 + $0x10] sm:$0xf] %vm172_vm0, %v516_v19 }
  0x2d   : > { %v532_v16 = vor.u32 %v530_v57, %v529_v4  ;;  %v534_v17 = vrot.slane %v529_v4, 4  ;;  %1040 = vst [vmem:[%s1290_s23 + $0x14] sm:$0x1] %v832_v20  ;;  %1042 = vst [vmem:[%s1290_s23 + $0x18] sm:$0xf] %v835_v22  ;;  %v546_v43 = vrot.slane %v544_v29, 7 }
  0x2e   : > { %v555_v44 = vrot.slane %v553_v31, 7  ;;  %v1049_v45 = vld [vmem:[%s1290_s23 + $0x2c] sm:$0x1]  ;;  %v1051_v46 = vld [vmem:[%s1290_s23 + $0x30] sm:$0xf]  ;;  %v563_v47 = vrot.slane %v561_v34, 7 }
  0x2f   : > { %v533_v23 = vsel %vm1455_vm6, %v525_v15, %v532_v16  ;;  %v839_v24 = vsel %vm1462_vm7, %v534_v17, %v1044_v13  ;;  %v549_v51 = vor.u32 %v547_v30, %v546_v43  ;;  %v551_v52 = vrot.slane %v546_v43, 4  ;;  %v1054_v55 = vld [vmem:[%s1290_s23 + $0x38] sm:$0x1]  ;;  %1047 = vst [vmem:[%s1290_s23 + $0x24] sm:$0xf] %v842_v37  ;;  %v1220_v58 = vld [vmem:[%s1280_s18 + $0x30] sm:$0xff]  }
  0x30   : > { %1043 = vst.msk [vmem:[%s1290_s23 + $0x1c] sm:$0xf] %vm172_vm0, %v533_v23  ;;  %1045 = vst [vmem:[%s1290_s23 + $0x20] sm:$0x1] %v839_v24  ;;  %v558_v54 = vor.u32 %v556_v33, %v555_v44  ;;  %v559_v56 = vrot.slane %v555_v44, 4  ;;  %v566_v57 = vor.u32 %v564_v35, %v563_v47  ;;  %v568_v27 = vrot.slane %v563_v47, 4 }
  0x31   : > { %v378_v38 = vmax.f32 %v346_v48, 0.0  ;;  %v550_v39 = vsel %vm1455_vm6, %v542_v42, %v549_v51  ;;  %v846_v60 = vsel %vm1462_vm7, %v551_v52, %v1049_v45  ;;  %v1221_v63 = vld [vmem:[%s1280_s18 + $0x38] sm:$0xff]   ;;  %v379_v6 = vmax.f32 %v347_v62, 0.0  ;;  %v1059_v41 = vld [vmem:[%s1290_s23 + $0x44] sm:$0x1] }
  0x32   : > { %v849_v61 = vsel %vm1449_vm5, %v558_v54, %v1051_v46  ;;  %1048 = vst.msk [vmem:[%s1290_s23 + $0x28] sm:$0xf] %vm172_vm0, %v550_v39  ;;  %1050 = vst [vmem:[%s1290_s23 + $0x2c] sm:$0x1] %v846_v60  ;;  %v567_v2 = vsel %vm1455_vm6, %v559_v56, %v566_v57  ;;  %v853_v3 = vsel %vm1462_vm7, %v568_v27, %v1054_v55  ;;  %v1177_v8 = vunpack.c.l.bf16 %v1220_v58  ;;  %v1056_v40 = vld [vmem:[%s1290_s23 + $0x3c] sm:$0xf] }
  0x33   : > { %1052 = vst [vmem:[%s1290_s23 + $0x30] sm:$0xf] %v849_v61  ;;  %v1127_v4 = vpack.c.bf16 %v378_v38, %v378_v38  ;;  %1053 = vst.msk [vmem:[%s1290_s23 + $0x34] sm:$0xf] %vm172_vm0, %v567_v2  ;;  %v1178_v9 = vunpack.c.h.bf16 %v1220_v58  ;;  %v380_v13 = vmax.f32 %v348_v5, 0.0  ;;  %v1181_v14 = vunpack.c.l.bf16 %v1221_v63  ;;  %v1222_v27 = vld [vmem:[%s1280_s18 + $0x40] sm:$0xff]  }
  0x34   : > { %1055 = vst [vmem:[%s1290_s23 + $0x38] sm:$0x1] %v853_v3  ;;  %v1128_v15 = vpack.c.bf16 %v379_v6, %v379_v6  ;;  %v349_v16 = vadd.f32 %v1417_v10, %v310_v7  ;;  %v311_v17 = vmul.f32 %v1177_v8, %v1285_v0  ;;  %v1182_v28 = vunpack.c.h.bf16 %v1221_v63  ;;  %v1061_v47 = vld [vmem:[%s1290_s23 + $0x48] sm:$0xf]  ;;  %v1064_v58 = vld [vmem:[%s1290_s23 + $0x50] sm:$0x1] }
  0x35   : > { %v570_v11 = vshrl.u32 %v1127_v4, 16  ;;  %v573_v12 = vshll.u32 %v1127_v4, 16  ;;  %v312_v18 = vmul.f32 %v1178_v9, %v1285_v0  ;;  %v1129_v20 = vpack.c.bf16 %v380_v13, %v380_v13  ;;  %v1223_v8 = vld [vmem:[%s1280_s18 + $0x48] sm:$0xff]  }
  0x36   : > { %v313_v21 = vmul.f32 %v1181_v14, %v1285_v0  ;;  %v578_v22 = vshrl.u32 %v1128_v15, 16  ;;  %v581_v23 = vshll.u32 %v1128_v15, 16  ;;  %v381_v24 = vmax.f32 %v349_v16, 0.0 }
  0x37   : > { %v572_v19 = vrot.slane %v570_v11, 7  ;;  %v350_v25 = vadd.f32 %v1417_v10, %v311_v17  ;;  %v587_v30 = vshrl.u32 %v1129_v20, 16  ;;  %v590_v31 = vshll.u32 %v1129_v20, 16 }
  0x38   : > { %v580_v32 = vrot.slane %v578_v22, 7  ;;  %v1130_v33 = vpack.c.bf16 %v381_v24, %v381_v24  ;;  %v351_v35 = vadd.f32 %v1417_v10, %v312_v18  ;;  %v352_v43 = vadd.f32 %v1417_v10, %v313_v21 }
  0x39   : > { %v575_v26 = vor.u32 %v573_v12, %v572_v19  ;;  %v576_v29 = vrot.slane %v572_v19, 4  ;;  %v382_v34 = vmax.f32 %v350_v25, 0.0  ;;  %v589_v42 = vrot.slane %v587_v30, 7  ;;  %v1066_v12 = vld [vmem:[%s1290_s23 + $0x54] sm:$0xf] }
  0x3a   : > { %v314_v44 = vmul.f32 %v1182_v28, %v1285_v0  ;;  %v583_v45 = vor.u32 %v581_v23, %v580_v32  ;;  %v585_v46 = vrot.slane %v580_v32, 4  ;;  %v595_v48 = vshrl.u32 %v1130_v33, 16  ;;  %v1069_v19 = vld [vmem:[%s1290_s23 + $0x5c] sm:$0x1]  ;;  %v1071_v25 = vld [vmem:[%s1290_s23 + $0x60] sm:$0xf] }
  0x3b   : > { %v856_v36 = vsel %vm1449_vm5, %v575_v26, %v1056_v40  ;;  %v598_v49 = vshll.u32 %v1130_v33, 16  ;;  %v592_v50 = vor.u32 %v590_v31, %v589_v42  ;;  %v593_v37 = vrot.slane %v589_v42, 4  ;;  %v1224_v33 = vld [vmem:[%s1280_s18 + $0x50] sm:$0xff]   ;;  %v1580_v42 = vld [vmem:[%s1280_s18 + $0x58] sm:$0xff]  }
  0x3c   : > { %1057 = vst [vmem:[%s1290_s23 + $0x3c] sm:$0xf] %v856_v36  ;;  %v1131_v51 = vpack.c.bf16 %v382_v34, %v382_v34  ;;  %v383_v52 = vmax.f32 %v351_v35, 0.0  ;;  %v584_v54 = vsel %vm1455_vm6, %v576_v29, %v583_v45  ;;  %v860_v55 = vsel %vm1462_vm7, %v585_v46, %v1059_v41 }
  0x3d   : > { %v597_v56 = vrot.slane %v595_v48, 7  ;;  %v384_v57 = vmax.f32 %v352_v43, 0.0  ;;  %1058 = vst.msk [vmem:[%s1290_s23 + $0x40] sm:$0xf] %vm172_vm0, %v584_v54  ;;  %1060 = vst [vmem:[%s1290_s23 + $0x44] sm:$0x1] %v860_v55  ;;  %v863_v38 = vsel %vm1449_vm5, %v592_v50, %v1061_v47  ;;  %v353_v3 = vadd.f32 %v1417_v10, %v314_v44 }
  0x3e   : > { %v604_v39 = vshrl.u32 %v1131_v51, 16  ;;  %v607_v60 = vshll.u32 %v1131_v51, 16  ;;  %v1132_v61 = vpack.c.bf16 %v383_v52, %v383_v52  ;;  %1062 = vst [vmem:[%s1290_s23 + $0x48] sm:$0xf] %v863_v38  ;;  %v1185_v7 = vunpack.c.l.bf16 %v1222_v27 }
  0x3f   : > { %v600_v62 = vor.u32 %v598_v49, %v597_v56  ;;  %v602_v63 = vrot.slane %v597_v56, 4  ;;  %v1133_v2 = vpack.c.bf16 %v384_v57, %v384_v57  ;;  %v385_v18 = vmax.f32 %v353_v3, 0.0 }
  0x40   : > { %v606_v4 = vrot.slane %v604_v39, 7  ;;  %v612_v5 = vshrl.u32 %v1132_v61, 16  ;;  %v615_v6 = vshll.u32 %v1132_v61, 16  ;;  %v315_v21 = vmul.f32 %v1185_v7, %v1285_v0 }
  0x41   : > { %v601_v9 = vsel %vm1455_vm6, %v593_v37, %v600_v62  ;;  %v867_v11 = vsel %vm1462_vm7, %v602_v63, %v1064_v58  ;;  %v621_v13 = vshrl.u32 %v1133_v2, 16  ;;  %v624_v14 = vshll.u32 %v1133_v2, 16  ;;  %v1074_v37 = vld [vmem:[%s1290_s23 + $0x68] sm:$0x1] }
  0x42   : > { %1063 = vst.msk [vmem:[%s1290_s23 + $0x4c] sm:$0xf] %vm172_vm0, %v601_v9  ;;  %1065 = vst [vmem:[%s1290_s23 + $0x50] sm:$0x1] %v867_v11  ;;  %v609_v15 = vor.u32 %v607_v60, %v606_v4  ;;  %v610_v16 = vrot.slane %v606_v4, 4  ;;  %v614_v17 = vrot.slane %v612_v5, 7  ;;  %v1186_v28 = vunpack.c.h.bf16 %v1222_v27 }
  0x43   : > { %v623_v20 = vrot.slane %v621_v13, 7  ;;  %v1189_v40 = vunpack.c.l.bf16 %v1223_v8  ;;  %v1134_v26 = vpack.c.bf16 %v385_v18, %v385_v18  ;;  %v354_v31 = vadd.f32 %v1417_v10, %v315_v21  ;;  %v1079_v18 = vld [vmem:[%s1290_s23 + $0x74] sm:$0x1] }
  0x44   : > { %v870_v22 = vsel %vm1449_vm5, %v609_v15, %v1066_v12  ;;  %v617_v23 = vor.u32 %v615_v6, %v614_v17  ;;  %v619_v24 = vrot.slane %v614_v17, 4  ;;  %v316_v32 = vmul.f32 %v1186_v28, %v1285_v0 }
  0x45   : > { %1067 = vst [vmem:[%s1290_s23 + $0x54] sm:$0xf] %v870_v22  ;;  %v626_v29 = vor.u32 %v624_v14, %v623_v20  ;;  %v627_v30 = vrot.slane %v623_v20, 4  ;;  %v629_v36 = vshrl.u32 %v1134_v26, 16  ;;  %v632_v41 = vshll.u32 %v1134_v26, 16 }
  0x46   : > { %v618_v34 = vsel %vm1455_vm6, %v610_v16, %v617_v23  ;;  %v874_v35 = vsel %vm1462_vm7, %v619_v24, %v1069_v19  ;;  %v386_v44 = vmax.f32 %v354_v31, 0.0  ;;  %v355_v45 = vadd.f32 %v1417_v10, %v316_v32  ;;  %v1081_v26 = vld [vmem:[%s1290_s23 + $0x78] sm:$0xf] }
  0x47   : > { %1068 = vst.msk [vmem:[%s1290_s23 + $0x58] sm:$0xf] %vm172_vm0, %v618_v34  ;;  %1070 = vst [vmem:[%s1290_s23 + $0x5c] sm:$0x1] %v874_v35  ;;  %v877_v43 = vsel %vm1449_vm5, %v626_v29, %v1071_v25  ;;  %v317_v46 = vmul.f32 %v1189_v40, %v1285_v0  ;;  %v631_v47 = vrot.slane %v629_v36, 7  ;;  %v1190_v48 = vunpack.c.h.bf16 %v1223_v8  ;;  %v1226_v25 = vld [vmem:[%s1280_s18 + $0x60] sm:$0xff]  }
  0x48   : > { %1072 = vst [vmem:[%s1290_s23 + $0x60] sm:$0xf] %v877_v43  ;;  %v1193_v49 = vunpack.c.l.bf16 %v1224_v33  ;;  %v1194_v50 = vunpack.c.h.bf16 %v1224_v33  ;;  %v1135_v51 = vpack.c.bf16 %v386_v44, %v386_v44  ;;  %v387_v52 = vmax.f32 %v355_v45, 0.0  ;;  %v1076_v8 = vld [vmem:[%s1290_s23 + $0x6c] sm:$0xf] }
  0x49   : > { %v356_v54 = vadd.f32 %v1417_v10, %v317_v46  ;;  %v1197_v55 = vunpack.c.l.bf16 %v1580_v42  ;;  %v634_v56 = vor.u32 %v632_v41, %v631_v47  ;;  %v636_v57 = vrot.slane %v631_v47, 4  ;;  %v1084_v47 = vld [vmem:[%s1290_s23 + $0x80] sm:$0x1] }
  0x4a   : > { %v318_v27 = vmul.f32 %v1190_v48, %v1285_v0  ;;  %v319_v38 = vmul.f32 %v1193_v49, %v1285_v0  ;;  %v638_v58 = vshrl.u32 %v1135_v51, 16  ;;  %v641_v39 = vshll.u32 %v1135_v51, 16  ;;  %v1086_v48 = vld [vmem:[%s1290_s23 + $0x84] sm:$0xf] }
  0x4b   : > { %v1136_v60 = vpack.c.bf16 %v387_v52, %v387_v52  ;;  %v388_v61 = vmax.f32 %v356_v54, 0.0  ;;  %v635_v62 = vsel %vm1455_vm6, %v627_v30, %v634_v56  ;;  %v881_v63 = vsel %vm1462_vm7, %v636_v57, %v1074_v37 }
  0x4c   : > { %v357_v2 = vadd.f32 %v1417_v10, %v318_v27  ;;  %v358_v3 = vadd.f32 %v1417_v10, %v319_v38  ;;  %1073 = vst.msk [vmem:[%s1290_s23 + $0x64] sm:$0xf] %vm172_vm0, %v635_v62  ;;  %1075 = vst [vmem:[%s1290_s23 + $0x68] sm:$0x1] %v881_v63  ;;  %v640_v4 = vrot.slane %v638_v58, 7  ;;  %v320_v12 = vmul.f32 %v1194_v50, %v1285_v0  ;;  %v1227_v58 = vld [vmem:[%s1280_s18 + $0x68] sm:$0xff]  }
  0x4d   : > { %v646_v5 = vshrl.u32 %v1136_v60, 16  ;;  %v649_v6 = vshll.u32 %v1136_v60, 16  ;;  %v1137_v7 = vpack.c.bf16 %v388_v61, %v388_v61  ;;  %v321_v13 = vmul.f32 %v1197_v55, %v1285_v0 }
  0x4e   : > { %v389_v9 = vmax.f32 %v357_v2, 0.0  ;;  %v390_v11 = vmax.f32 %v358_v3, 0.0  ;;  %v643_v14 = vor.u32 %v641_v39, %v640_v4  ;;  %v644_v15 = vrot.slane %v640_v4, 4 }
  0x4f   : > { %v648_v16 = vrot.slane %v646_v5, 7  ;;  %v655_v17 = vshrl.u32 %v1137_v7, 16  ;;  %v658_v19 = vshll.u32 %v1137_v7, 16  ;;  %v359_v28 = vadd.f32 %v1417_v10, %v320_v12 }
  0x50   : > { %v1138_v20 = vpack.c.bf16 %v389_v9, %v389_v9  ;;  %v1139_v21 = vpack.c.bf16 %v390_v11, %v390_v11  ;;  %v884_v40 = vsel %vm1449_vm5, %v643_v14, %v1076_v8  ;;  %v360_v45 = vadd.f32 %v1417_v10, %v321_v13  ;;  %v1089_v8 = vld [vmem:[%s1290_s23 + $0x8c] sm:$0x1] }
  0x51   : > { %v651_v22 = vor.u32 %v649_v6, %v648_v16  ;;  %v653_v23 = vrot.slane %v648_v16, 4  ;;  %v657_v24 = vrot.slane %v655_v17, 7  ;;  %1077 = vst [vmem:[%s1290_s23 + $0x6c] sm:$0xf] %v884_v40  ;;  %v391_v44 = vmax.f32 %v359_v28, 0.0 }
  0x52   : > { %v663_v29 = vshrl.u32 %v1138_v20, 16  ;;  %v666_v30 = vshll.u32 %v1138_v20, 16  ;;  %v672_v31 = vshrl.u32 %v1139_v21, 16  ;;  %v675_v32 = vshll.u32 %v1139_v21, 16 }
  0x53   : > { %v652_v33 = vsel %vm1455_vm6, %v644_v15, %v651_v22  ;;  %v888_v34 = vsel %vm1462_vm7, %v653_v23, %v1079_v18  ;;  %v660_v35 = vor.u32 %v658_v19, %v657_v24  ;;  %v661_v36 = vrot.slane %v657_v24, 4  ;;  %v1091_v22 = vld [vmem:[%s1290_s23 + $0x90] sm:$0xf] }
  0x54   : > { %1078 = vst.msk [vmem:[%s1290_s23 + $0x70] sm:$0xf] %vm172_vm0, %v652_v33  ;;  %1080 = vst [vmem:[%s1290_s23 + $0x74] sm:$0x1] %v888_v34  ;;  %v665_v41 = vrot.slane %v663_v29, 7  ;;  %v674_v43 = vrot.slane %v672_v31, 7  ;;  %v1198_v49 = vunpack.c.h.bf16 %v1580_v42  ;;  %v1201_v50 = vunpack.c.l.bf16 %v1226_v25 }
  0x55   : > { %v891_v46 = vsel %vm1449_vm5, %v660_v35, %v1081_v26  ;;  %v1202_v37 = vunpack.c.h.bf16 %v1226_v25  ;;  %v1140_v55 = vpack.c.bf16 %v391_v44, %v391_v44  ;;  %v392_v57 = vmax.f32 %v360_v45, 0.0  ;;  %v1228_v25 = vld [vmem:[%s1280_s18 + $0x70] sm:$0xff]   ;;  %v1094_v45 = vld [vmem:[%s1290_s23 + $0x98] sm:$0x1] }
  0x56   : > { %1082 = vst [vmem:[%s1290_s23 + $0x78] sm:$0xf] %v891_v46  ;;  %v668_v51 = vor.u32 %v666_v30, %v665_v41  ;;  %v670_v52 = vrot.slane %v665_v41, 4  ;;  %v677_v54 = vor.u32 %v675_v32, %v674_v43  ;;  %v678_v56 = vrot.slane %v674_v43, 4 }
  0x57   : > { %v322_v27 = vmul.f32 %v1198_v49, %v1285_v0  ;;  %v323_v38 = vmul.f32 %v1201_v50, %v1285_v0  ;;  %v680_v61 = vshrl.u32 %v1140_v55, 16  ;;  %v683_v62 = vshll.u32 %v1140_v55, 16 }
  0x58   : > { %v669_v42 = vsel %vm1455_vm6, %v661_v36, %v668_v51  ;;  %v895_v39 = vsel %vm1462_vm7, %v670_v52, %v1084_v47  ;;  %v898_v60 = vsel %vm1449_vm5, %v677_v54, %v1086_v48  ;;  %v1141_v63 = vpack.c.bf16 %v392_v57, %v392_v57  ;;  %v1096_v51 = vld [vmem:[%s1290_s23 + $0x9c] sm:$0xf] }
  0x59   : > { %1083 = vst.msk [vmem:[%s1290_s23 + $0x7c] sm:$0xf] %vm172_vm0, %v669_v42  ;;  %1085 = vst [vmem:[%s1290_s23 + $0x80] sm:$0x1] %v895_v39  ;;  %v361_v2 = vadd.f32 %v1417_v10, %v322_v27  ;;  %v362_v3 = vadd.f32 %v1417_v10, %v323_v38  ;;  %v682_v4 = vrot.slane %v680_v61, 7  ;;  %v324_v5 = vmul.f32 %v1202_v37, %v1285_v0 }
  0x5a   : > { %1087 = vst [vmem:[%s1290_s23 + $0x84] sm:$0xf] %v898_v60  ;;  %v1205_v6 = vunpack.c.l.bf16 %v1227_v58  ;;  %v1206_v7 = vunpack.c.h.bf16 %v1227_v58  ;;  %v689_v9 = vshrl.u32 %v1141_v63, 16  ;;  %v692_v11 = vshll.u32 %v1141_v63, 16  ;;  %v1099_v42 = vld [vmem:[%s1290_s23 + $0xa4] sm:$0x1] }
  0x5b   : > { %v393_v12 = vmax.f32 %v361_v2, 0.0  ;;  %v394_v13 = vmax.f32 %v362_v3, 0.0  ;;  %v685_v14 = vor.u32 %v683_v62, %v682_v4  ;;  %v687_v15 = vrot.slane %v682_v4, 4  ;;  %v1229_v3 = vld [vmem:[%s1280_s18 + $0x78] sm:$0xff]   ;;  %v1101_v4 = vld [vmem:[%s1290_s23 + $0xa8] sm:$0xf] }
  0x5c   : > { %v363_v16 = vadd.f32 %v1417_v10, %v324_v5  ;;  %v325_v17 = vmul.f32 %v1205_v6, %v1285_v0  ;;  %v691_v18 = vrot.slane %v689_v9, 7  ;;  %v326_v21 = vmul.f32 %v1206_v7, %v1285_v0 }
  0x5d   : > { %v1142_v19 = vpack.c.bf16 %v393_v12, %v393_v12  ;;  %v1143_v20 = vpack.c.bf16 %v394_v13, %v394_v13  ;;  %v686_v28 = vsel %vm1455_vm6, %v678_v56, %v685_v14  ;;  %v902_v40 = vsel %vm1462_vm7, %v687_v15, %v1089_v8 }
  0x5e   : > { %v395_v23 = vmax.f32 %v363_v16, 0.0  ;;  %v364_v24 = vadd.f32 %v1417_v10, %v325_v17  ;;  %1088 = vst.msk [vmem:[%s1290_s23 + $0x88] sm:$0xf] %vm172_vm0, %v686_v28  ;;  %1090 = vst [vmem:[%s1290_s23 + $0x8c] sm:$0x1] %v902_v40  ;;  %v694_v26 = vor.u32 %v692_v11, %v691_v18  ;;  %v695_v29 = vrot.slane %v691_v18, 4 }
  0x5f   : > { %v697_v30 = vshrl.u32 %v1142_v19, 16  ;;  %v700_v31 = vshll.u32 %v1142_v19, 16  ;;  %v706_v32 = vshrl.u32 %v1143_v20, 16  ;;  %v709_v33 = vshll.u32 %v1143_v20, 16  ;;  %v1104_v19 = vld [vmem:[%s1290_s23 + $0xb0] sm:$0x1] }
  0x60   : > { %v1144_v34 = vpack.c.bf16 %v395_v23, %v395_v23  ;;  %v396_v35 = vmax.f32 %v364_v24, 0.0  ;;  %v905_v36 = vsel %vm1449_vm5, %v694_v26, %v1091_v22  ;;  %v365_v43 = vadd.f32 %v1417_v10, %v326_v21 }
  0x61   : > { %v699_v41 = vrot.slane %v697_v30, 7  ;;  %v1209_v44 = vunpack.c.l.bf16 %v1228_v25  ;;  %1092 = vst [vmem:[%s1290_s23 + $0x90] sm:$0xf] %v905_v36  ;;  %v708_v46 = vrot.slane %v706_v32, 7  ;;  %v1210_v8 = vunpack.c.h.bf16 %v1228_v25 }
  0x62   : > { %v714_v47 = vshrl.u32 %v1144_v34, 16  ;;  %v717_v48 = vshll.u32 %v1144_v34, 16  ;;  %v1145_v49 = vpack.c.bf16 %v396_v35, %v396_v35  ;;  %v397_v52 = vmax.f32 %v365_v43, 0.0  ;;  %v1106_v35 = vld [vmem:[%s1290_s23 + $0xb4] sm:$0xf] }
  0x63   : > { %v702_v50 = vor.u32 %v700_v31, %v699_v41  ;;  %v704_v37 = vrot.slane %v699_v41, 4  ;;  %v327_v54 = vmul.f32 %v1209_v44, %v1285_v0  ;;  %v711_v55 = vor.u32 %v709_v33, %v708_v46 }
  0x64   : > { %v712_v56 = vrot.slane %v708_v46, 4  ;;  %v716_v57 = vrot.slane %v714_v47, 7  ;;  %v723_v27 = vshrl.u32 %v1145_v49, 16  ;;  %v726_v39 = vshll.u32 %v1145_v49, 16 }
  0x65   : > { %v703_v38 = vsel %vm1455_vm6, %v695_v29, %v702_v50  ;;  %v909_v58 = vsel %vm1462_vm7, %v704_v37, %v1094_v45  ;;  %v1146_v60 = vpack.c.bf16 %v397_v52, %v397_v52  ;;  %v912_v61 = vsel %vm1449_vm5, %v711_v55, %v1096_v51  ;;  %v1109_v52 = vld [vmem:[%s1290_s23 + $0xbc] sm:$0x1] }
  0x66   : > { %1093 = vst.msk [vmem:[%s1290_s23 + $0x94] sm:$0xf] %vm172_vm0, %v703_v38  ;;  %1095 = vst [vmem:[%s1290_s23 + $0x98] sm:$0x1] %v909_v58  ;;  %v719_v62 = vor.u32 %v717_v48, %v716_v57  ;;  %v721_v63 = vrot.slane %v716_v57, 4  ;;  %v725_v2 = vrot.slane %v723_v27, 7  ;;  %v366_v7 = vadd.f32 %v1417_v10, %v327_v54 }
  0x67   : > { %1097 = vst [vmem:[%s1290_s23 + $0x9c] sm:$0xf] %v912_v61  ;;  %v731_v5 = vshrl.u32 %v1146_v60, 16  ;;  %v734_v6 = vshll.u32 %v1146_v60, 16  ;;  %v328_v16 = vmul.f32 %v1210_v8, %v1285_v0  ;;  %v1213_v17 = vunpack.c.l.bf16 %v1229_v3  ;;  %v1111_v38 = vld [vmem:[%s1290_s23 + $0xc0] sm:$0xf] }
  0x68   : > { %v720_v9 = vsel %vm1455_vm6, %v712_v56, %v719_v62  ;;  %v916_v11 = vsel %vm1462_vm7, %v721_v63, %v1099_v42  ;;  %v728_v12 = vor.u32 %v726_v39, %v725_v2  ;;  %v729_v13 = vrot.slane %v725_v2, 4  ;;  %v1114_v61 = vld [vmem:[%s1290_s23 + $0xc8] sm:$0x1] }
  0x69   : > { %1098 = vst.msk [vmem:[%s1290_s23 + $0xa0] sm:$0xf] %vm172_vm0, %v720_v9  ;;  %1100 = vst [vmem:[%s1290_s23 + $0xa4] sm:$0x1] %v916_v11  ;;  %v733_v14 = vrot.slane %v731_v5, 7  ;;  %v398_v15 = vmax.f32 %v366_v7, 0.0  ;;  %v1214_v20 = vunpack.c.h.bf16 %v1229_v3  ;;  %v367_v22 = vadd.f32 %v1417_v10, %v328_v16 }
  0x6a   : > { %v919_v18 = vsel %vm1449_vm5, %v728_v12, %v1101_v4  ;;  %v329_v23 = vmul.f32 %v1213_v17, %v1285_v0 }
  0x6b   : > { %1102 = vst [vmem:[%s1290_s23 + $0xa8] sm:$0xf] %v919_v18  ;;  %v736_v21 = vor.u32 %v734_v6, %v733_v14  ;;  %v738_v28 = vrot.slane %v733_v14, 4  ;;  %v1147_v40 = vpack.c.bf16 %v398_v15, %v398_v15  ;;  %v330_v24 = vmul.f32 %v1214_v20, %v1285_v0 }
  0x6c   : > { %v399_v31 = vmax.f32 %v367_v22, 0.0  ;;  %v368_v32 = vadd.f32 %v1417_v10, %v329_v23 }
  0x6d   : > { %v737_v25 = vsel %vm1455_vm6, %v729_v13, %v736_v21  ;;  %v923_v26 = vsel %vm1462_vm7, %v738_v28, %v1104_v19  ;;  %v740_v29 = vshrl.u32 %v1147_v40, 16  ;;  %v743_v30 = vshll.u32 %v1147_v40, 16 }
  0x6e   : > { %1103 = vst.msk [vmem:[%s1290_s23 + $0xac] sm:$0xf] %vm172_vm0, %v737_v25  ;;  %1105 = vst [vmem:[%s1290_s23 + $0xb0] sm:$0x1] %v923_v26  ;;  %v369_v33 = vadd.f32 %v1417_v10, %v330_v24  ;;  %v1148_v0 = vpack.c.bf16 %v399_v31, %v399_v31  ;;  %v400_v36 = vmax.f32 %v368_v32, 0.0 }
  0x6f   : > { %v742_v34 = vrot.slane %v740_v29, 7 }
  0x70   : > { %v401_v41 = vmax.f32 %v369_v33, 0.0  ;;  %v748_v44 = vshrl.u32 %v1148_v0, 16  ;;  %v751_v45 = vshll.u32 %v1148_v0, 16  ;;  %v1149_v46 = vpack.c.bf16 %v400_v36, %v400_v36 }
  0x71   : > { %v745_v43 = vor.u32 %v743_v30, %v742_v34  ;;  %v746_v49 = vrot.slane %v742_v34, 4 }
  0x72   : > { %v1150_v47 = vpack.c.bf16 %v401_v41, %v401_v41  ;;  %v750_v50 = vrot.slane %v748_v44, 7  ;;  %v757_v10 = vshrl.u32 %v1149_v46, 16  ;;  %v760_v37 = vshll.u32 %v1149_v46, 16 }
  0x73   : > { %v926_v48 = vsel %vm1449_vm5, %v745_v43, %v1106_v35 }
  0x74   : > { %1107 = vst [vmem:[%s1290_s23 + $0xb4] sm:$0xf] %v926_v48  ;;  %v765_v51 = vshrl.u32 %v1150_v47, 16  ;;  %v768_v54 = vshll.u32 %v1150_v47, 16  ;;  %v753_v55 = vor.u32 %v751_v45, %v750_v50  ;;  %v755_v56 = vrot.slane %v750_v50, 4 }
  0x75   : > { %v759_v57 = vrot.slane %v757_v10, 7 }
  0x76   : > { %v767_v27 = vrot.slane %v765_v51, 7  ;;  %v754_v58 = vsel %vm1455_vm6, %v746_v49, %v753_v55  ;;  %v930_v42 = vsel %vm1462_vm7, %v755_v56, %v1109_v52 }
  0x77   : > { %v762_v39 = vor.u32 %v760_v37, %v759_v57  ;;  %v763_v60 = vrot.slane %v759_v57, 4  ;;  %1108 = vst.msk [vmem:[%s1290_s23 + $0xb8] sm:$0xf] %vm172_vm0, %v754_v58  ;;  %1110 = vst [vmem:[%s1290_s23 + $0xbc] sm:$0x1] %v930_v42 }
  0x78   : > { %v770_v62 = vor.u32 %v768_v54, %v767_v27  ;;  %v772_v63 = vrot.slane %v767_v27, 4 }
  0x79   : > { %v933_v2 = vsel %vm1449_vm5, %v762_v39, %v1111_v38 }
  0x7a   : > { %1112 = vst [vmem:[%s1290_s23 + $0xc0] sm:$0xf] %v933_v2  ;;  %v771_v3 = vsel %vm1455_vm6, %v763_v60, %v770_v62  ;;  %v937_v4 = vsel %vm1462_vm7, %v772_v63, %v1114_v61 }
  0x7b   : > { %1113 = vst.msk [vmem:[%s1290_s23 + $0xc4] sm:$0xf] %vm172_vm0, %v771_v3  ;;  %1115 = vst [vmem:[%s1290_s23 + $0xc8] sm:$0x1] %v937_v4 }
  0x7c PF: > { %s13_s12 = sadd.s32 1, %s1246_s12  }
  0x7d   : > { %p10_p4 = scmp.ge.s32.totalorder %s13_s12, 4  }
  0x7f   :  { %12 = sbr.rel (!%p10_p4) target bundleno = 1 (0x1), region = 63 }

// kernel: corblock_s_forward.14
= control target key start
LH: loop header
LB: loop body
LE: loop exit
PB: predicated region body
PF: predicated region fallthrough
CT: control target
= control target key end

     0   :  { %vm337_vm0 = vcmask 1043456   ;;  %vm240_vm1 = vcmask 64512   ;;  %vm886_vm2 = vcmask 257024   ;;  %vm951_vm3 = vcmask 261120   ;;  %s2394_s1 = inlined_call_operand.vmem [shape: bf16[8,32], index: 1, kind: input, shape index: {}]   ;;  %s2395_s0 = inlined_call_operand.vmem [shape: bf16[512,8], index: 0, kind: input, shape index: {}]   ;;  %s2396_s2 = inlined_call_operand.vmem [shape: bf16[512,32], index: 2, kind: output, shape index: {0}]   ;;  %s2397_s3 = inlined_call_operand.vmem [shape: f32[1,1,32], index: 3, kind: output, shape index: {1}]   ;;  %s2398_s4 = inlined_call_operand.vmem [shape: f32[1,1,32], index: 4, kind: output, shape index: {2}]  }
   0x1   :  { %v79_v0 = vld [vmem:[%s2394_s1] sm:$0xf]  ;;  %v1593_v3 = vld [vmem:[%s2395_s0 + $0x8] sm:$0xff]   ;;  %v1594_v4 = vld [vmem:[%s2395_s0 + $0x10] sm:$0xff]   ;;  %vm1085_vm4 = vcmask 253952  }
   0x2   :  { %1590 = vmatprep.subr.msk.bf16.mxu0 %vm337_vm0, %v79_v0  ;;  %v339_v1 = vsel %vm337_vm0, %v79_v0, 0  ;;  %v1592_v2 = vld [vmem:[%s2395_s0] sm:$0xff]   ;;  %1591 = vmatprep.subr.msk.bf16.mxu1 %vm337_vm0, %v79_v0  ;;  %v1595_v5 = vld [vmem:[%s2395_s0 + $0x18] sm:$0xff]   ;;  %v1597_v7 = vld [vmem:[%s2395_s0 + $0x28] sm:$0xff]  }
   0x3   :  { %1523 = vmatpush3.bf16.msra.mxu0 %v339_v1  ;;  %1589 = vmatpush3.bf16.msra.mxu1 %v339_v1  ;;  %v1596_v6 = vld [vmem:[%s2395_s0 + $0x20] sm:$0xff]   ;;  %v1598_v8 = vld [vmem:[%s2395_s0 + $0x30] sm:$0xff]   ;;  %v1609_v10 = vld [vmem:[%s2395_s0 + $0x88] sm:$0xff]  }
   0x4   :  { %1524 = vmatprep.mubr.msk.bf16.mxu0 %vm240_vm1, %v1592_v2  ;;  %v1608_v9 = vld [vmem:[%s2395_s0 + $0x80] sm:$0xff]   ;;  %v1610_v11 = vld [vmem:[%s2395_s0 + $0x90] sm:$0xff]   ;;  %v1599_v12 = vld [vmem:[%s2395_s0 + $0x38] sm:$0xff]  }
   0x5   :  { %1556 = vmatprep.mubr.msk.bf16.mxu1 %vm240_vm1, %v1608_v9  ;;  %v1611_v13 = vld [vmem:[%s2395_s0 + $0x98] sm:$0xff]   ;;  %v1612_v14 = vld [vmem:[%s2395_s0 + $0xa0] sm:$0xff]   ;;  %v1613_v16 = vld [vmem:[%s2395_s0 + $0xa8] sm:$0xff]  }
   0x6   :  { %1525 = vmatmul.mubr.msk.bf16.vlgmr.msra.gmra.mrb[0].mxu0 %vm240_vm1, %v1593_v3  ;;  %1557 = vmatmul.mubr.msk.bf16.vlgmr.msra.gmra.mrb[0].mxu1 %vm240_vm1, %v1609_v10  ;;  %v1600_v15 = vld [vmem:[%s2395_s0 + $0x40] sm:$0xff]   ;;  %v1601_v17 = vld [vmem:[%s2395_s0 + $0x48] sm:$0xff]   ;;  %v1614_v18 = vld [vmem:[%s2395_s0 + $0xb0] sm:$0xff]  }
   0x7   :  { %1528 = vmatprep.mubr.msk.bf16.mxu0 %vm240_vm1, %v1594_v4  ;;  %1560 = vmatprep.mubr.msk.bf16.mxu1 %vm240_vm1, %v1610_v11  ;;  %v1602_v19 = vld [vmem:[%s2395_s0 + $0x50] sm:$0xff]   ;;  %v1615_v20 = vld [vmem:[%s2395_s0 + $0xb8] sm:$0xff]   ;;  %v1616_v22 = vld [vmem:[%s2395_s0 + $0xc0] sm:$0xff]  }
   0x8   :  { %v1603_v21 = vld [vmem:[%s2395_s0 + $0x58] sm:$0xff]   ;;  %v1604_v23 = vld [vmem:[%s2395_s0 + $0x60] sm:$0xff]   ;;  %v1617_v24 = vld [vmem:[%s2395_s0 + $0xc8] sm:$0xff]  }
   0x9   :  { %v1605_v25 = vld [vmem:[%s2395_s0 + $0x68] sm:$0xff]   ;;  %v1618_v26 = vld [vmem:[%s2395_s0 + $0xd0] sm:$0xff]   ;;  %v1619_v28 = vld [vmem:[%s2395_s0 + $0xd8] sm:$0xff]  }
   0xa   :  { %v1606_v27 = vld [vmem:[%s2395_s0 + $0x70] sm:$0xff]   ;;  %v1607_v29 = vld [vmem:[%s2395_s0 + $0x78] sm:$0xff]   ;;  %v1620_v30 = vld [vmem:[%s2395_s0 + $0xe0] sm:$0xff]  }
   0xb   :  { %v1621_v31 = vld [vmem:[%s2395_s0 + $0xe8] sm:$0xff]   ;;  %v1622_v32 = vld [vmem:[%s2395_s0 + $0xf0] sm:$0xff]   ;;  %v1623_v33 = vld [vmem:[%s2395_s0 + $0xf8] sm:$0xff]  }
   0xe   :  { %1529 = vmatmul.mubr.msk.bf16.gmra.mrb[4].mxu0 %vm240_vm1, %v1595_v5  ;;  %1561 = vmatmul.mubr.msk.bf16.gmra.mrb[4].mxu1 %vm240_vm1, %v1611_v13 }
   0xf   :  { %1532 = vmatprep.mubr.msk.bf16.mxu0 %vm240_vm1, %v1596_v6  ;;  %1564 = vmatprep.mubr.msk.bf16.mxu1 %vm240_vm1, %v1612_v14 }
  0x16   :  { %1533 = vmatmul.mubr.msk.bf16.gmra.mrb[8].mxu0 %vm240_vm1, %v1597_v7  ;;  %1565 = vmatmul.mubr.msk.bf16.gmra.mrb[8].mxu1 %vm240_vm1, %v1613_v16 }
  0x17   :  { %1536 = vmatprep.mubr.msk.bf16.mxu0 %vm240_vm1, %v1598_v8  ;;  %1568 = vmatprep.mubr.msk.bf16.mxu1 %vm240_vm1, %v1614_v18 }
  0x1e   :  { %1537 = vmatmul.mubr.msk.bf16.gmra.mrb[12].mxu0 %vm240_vm1, %v1599_v12  ;;  %1569 = vmatmul.mubr.msk.bf16.gmra.mrb[12].mxu1 %vm240_vm1, %v1615_v20 }
  0x1f   :  { %1540 = vmatprep.mubr.msk.bf16.mxu0 %vm240_vm1, %v1600_v15  ;;  %1572 = vmatprep.mubr.msk.bf16.mxu1 %vm240_vm1, %v1616_v22 }
  0x26   :  { %1541 = vmatmul.mubr.msk.bf16.gmra.mrb[16].mxu0 %vm240_vm1, %v1601_v17  ;;  %1573 = vmatmul.mubr.msk.bf16.gmra.mrb[16].mxu1 %vm240_vm1, %v1617_v24 }
  0x27   :  { %1544 = vmatprep.mubr.msk.bf16.mxu0 %vm240_vm1, %v1602_v19  ;;  %1576 = vmatprep.mubr.msk.bf16.mxu1 %vm240_vm1, %v1618_v26 }
  0x2e   :  { %1545 = vmatmul.mubr.msk.bf16.gmra.mrb[20].mxu0 %vm240_vm1, %v1603_v21  ;;  %1577 = vmatmul.mubr.msk.bf16.gmra.mrb[20].mxu1 %vm240_vm1, %v1619_v28 }
  0x2f   :  { %1548 = vmatprep.mubr.msk.bf16.mxu0 %vm240_vm1, %v1604_v23  ;;  %1580 = vmatprep.mubr.msk.bf16.mxu1 %vm240_vm1, %v1620_v30 }
  0x36   :  { %1549 = vmatmul.mubr.msk.bf16.gmra.mrb[24].mxu0 %vm240_vm1, %v1605_v25  ;;  %1581 = vmatmul.mubr.msk.bf16.gmra.mrb[24].mxu1 %vm240_vm1, %v1621_v31 }
  0x37   :  { %1552 = vmatprep.mubr.msk.bf16.mxu0 %vm240_vm1, %v1606_v27  ;;  %1584 = vmatprep.mubr.msk.bf16.mxu1 %vm240_vm1, %v1622_v32 }
  0x3e   :  { %1553 = vmatmul.mubr.msk.bf16.gmra.mrb[28].mxu0 %vm240_vm1, %v1607_v29  ;;  %1585 = vmatmul.mubr.msk.bf16.gmra.mrb[28].mxu1 %vm240_vm1, %v1623_v33 }
  0xd9   :  { %v1526_v34 = vpop.f32.mrb[0].mxu0  ;;  %v1825_v16 = vpop.f32.mrb[0].mxu1 }
  0xda   :  { %v1427_v35 = vpack.c.bf16 %v1526_v34, %v1526_v34  ;;  %v375_v36 = vpop.f32.mrb[1].mxu0  ;;  %v1089_v40 = vmul.f32 %v1526_v34, %v1526_v34  ;;  %v955_v49 = vsel %vm951_vm3, %v1526_v34, 0.0  ;;  %v1459_v20 = vpack.c.bf16 %v1825_v16, %v1825_v16  ;;  %v1829_v21 = vpop.f32.mrb[1].mxu1 }
  0xdb   :  { %v1425_v37 = vpack.c.bf16 %v375_v36, %v375_v36  ;;  %v1087_v38 = vmul.f32 %v375_v36, %v375_v36  ;;  %v1527_v39 = vpop.f32.mrb[2].mxu0  ;;  %v952_v43 = vsel %vm951_vm3, %v375_v36, 0.0  ;;  %v1833_v26 = vpop.f32.mrb[2].mxu1 }
  0xdc   :  { %889 = vst.msk [vmem:[%s2396_s2 + $0x8] sm:$0xf] %vm886_vm2, %v1427_v35  ;;  %v1428_v41 = vpack.c.bf16 %v1527_v39, %v1527_v39  ;;  %v378_v42 = vpop.f32.mrb[3].mxu0  ;;  %v1090_v47 = vmul.f32 %v1527_v39, %v1527_v39  ;;  %v1154_v54 = vsel %vm951_vm3, %v1089_v40, 0.0  ;;  %v957_v56 = vsel %vm951_vm3, %v1527_v39, 0.0  ;;  %v1840_v32 = vpop.f32.mrb[3].mxu1 }
  0xdd   :  { %887 = vst.msk [vmem:[%s2396_s2] sm:$0xf] %vm886_vm2, %v1425_v37  ;;  %v1426_v44 = vpack.c.bf16 %v378_v42, %v378_v42  ;;  %v953_v45 = vsel %vm951_vm3, %v378_v42, 0.0  ;;  %v1088_v46 = vmul.f32 %v378_v42, %v378_v42  ;;  %v1151_v50 = vsel %vm951_vm3, %v1087_v38, 0.0  ;;  %921 = vst.msk [vmem:[%s2396_s2 + $0x88] sm:$0xf] %vm886_vm2, %v1459_v20 }
  0xde   :  { %890 = vst.msk [vmem:[%s2396_s2 + $0xc] sm:$0xf] %vm886_vm2, %v1428_v41  ;;  %v954_v48 = vadd.f32 %v953_v45, %v952_v43  ;;  %v1156_v57 = vsel %vm951_vm3, %v1090_v47, 0.0 }
  0xdf   :  { %888 = vst.msk [vmem:[%s2396_s2 + $0x4] sm:$0xf] %vm886_vm2, %v1426_v44  ;;  %v1152_v51 = vsel %vm951_vm3, %v1088_v46, 0.0  ;;  %v1457_v46 = vpack.c.bf16 %v1829_v21, %v1829_v21 }
  0xe0   :  { %v956_v52 = vadd.f32 %v955_v49, %v954_v48  ;;  %v1153_v53 = vadd.f32 %v1152_v51, %v1151_v50  ;;  %v1460_v50 = vpack.c.bf16 %v1833_v26, %v1833_v26 }
  0xe1   :  { %v1530_v55 = vpop.f32.mrb[4].mxu0  ;;  %v1867_v51 = vpop.f32.mrb[4].mxu1  ;;  %919 = vst.msk [vmem:[%s2396_s2 + $0x80] sm:$0xf] %vm886_vm2, %v1457_v46 }
  0xe2   :  { %v1155_v58 = vadd.f32 %v1154_v54, %v1153_v53  ;;  %v1431_v59 = vpack.c.bf16 %v1530_v55, %v1530_v55  ;;  %v391_v60 = vpop.f32.mrb[5].mxu0  ;;  %v958_v62 = vadd.f32 %v957_v56, %v956_v52  ;;  %v1093_v8 = vmul.f32 %v1530_v55, %v1530_v55  ;;  %922 = vst.msk [vmem:[%s2396_s2 + $0x8c] sm:$0xf] %vm886_vm2, %v1460_v50 }
  0xe3   :  { %v1429_v61 = vpack.c.bf16 %v391_v60, %v391_v60  ;;  %v959_v63 = vsel %vm951_vm3, %v391_v60, 0.0  ;;  %v1091_v0 = vmul.f32 %v391_v60, %v391_v60  ;;  %v1531_v1 = vpop.f32.mrb[6].mxu0  ;;  %v963_v13 = vsel %vm951_vm3, %v1530_v55, 0.0  ;;  %v1873_v55 = vpop.f32.mrb[5].mxu1 }
  0xe4   :  { %893 = vst.msk [vmem:[%s2396_s2 + $0x18] sm:$0xf] %vm886_vm2, %v1431_v59  ;;  %v1157_v2 = vadd.f32 %v1156_v57, %v1155_v58  ;;  %v1432_v3 = vpack.c.bf16 %v1531_v1, %v1531_v1  ;;  %v394_v4 = vpop.f32.mrb[7].mxu0  ;;  %v960_v5 = vadd.f32 %v959_v63, %v958_v62  ;;  %v1094_v14 = vmul.f32 %v1531_v1, %v1531_v1  ;;  %v1881_v60 = vpop.f32.mrb[6].mxu1 }
  0xe5   :  { %891 = vst.msk [vmem:[%s2396_s2 + $0x10] sm:$0xf] %vm886_vm2, %v1429_v61  ;;  %v1158_v6 = vsel %vm951_vm3, %v1091_v0, 0.0  ;;  %v1430_v7 = vpack.c.bf16 %v394_v4, %v394_v4  ;;  %v961_v10 = vsel %vm951_vm3, %v394_v4, 0.0  ;;  %v1092_v11 = vmul.f32 %v394_v4, %v394_v4 }
  0xe6   :  { %v1159_v9 = vadd.f32 %v1158_v6, %v1157_v2  ;;  %894 = vst.msk [vmem:[%s2396_s2 + $0x1c] sm:$0xf] %vm886_vm2, %v1432_v3  ;;  %v962_v12 = vadd.f32 %v961_v10, %v960_v5  ;;  %v1162_v22 = vsel %vm951_vm3, %v1093_v8, 0.0  ;;  %v965_v23 = vsel %vm951_vm3, %v1531_v1, 0.0  ;;  %v1884_v2 = vpop.f32.mrb[7].mxu1 }
  0xe7   :  { %892 = vst.msk [vmem:[%s2396_s2 + $0x14] sm:$0xf] %vm886_vm2, %v1430_v7  ;;  %v1160_v15 = vsel %vm951_vm3, %v1092_v11, 0.0  ;;  %v1164_v33 = vsel %vm951_vm3, %v1094_v14, 0.0 }
  0xe8   :  { %v964_v17 = vadd.f32 %v963_v13, %v962_v12  ;;  %v1161_v18 = vadd.f32 %v1160_v15, %v1159_v9 }
  0xe9   :  { %v1534_v19 = vpop.f32.mrb[8].mxu0 }
  0xea   :  { %v1435_v24 = vpack.c.bf16 %v1534_v19, %v1534_v19  ;;  %v407_v25 = vpop.f32.mrb[9].mxu0  ;;  %v1163_v27 = vadd.f32 %v1162_v22, %v1161_v18  ;;  %v966_v29 = vadd.f32 %v965_v23, %v964_v17  ;;  %v1097_v40 = vmul.f32 %v1534_v19, %v1534_v19  ;;  %v1911_v23 = vpop.f32.mrb[8].mxu1 }
  0xeb   :  { %v1433_v28 = vpack.c.bf16 %v407_v25, %v407_v25  ;;  %v967_v30 = vsel %vm951_vm3, %v407_v25, 0.0  ;;  %v1535_v31 = vpop.f32.mrb[10].mxu0  ;;  %v1095_v34 = vmul.f32 %v407_v25, %v407_v25  ;;  %v971_v47 = vsel %vm951_vm3, %v1534_v19, 0.0 }
  0xec   :  { %897 = vst.msk [vmem:[%s2396_s2 + $0x28] sm:$0xf] %vm886_vm2, %v1435_v24  ;;  %v1436_v35 = vpack.c.bf16 %v1535_v31, %v1535_v31  ;;  %v410_v36 = vpop.f32.mrb[11].mxu0  ;;  %v968_v37 = vadd.f32 %v967_v30, %v966_v29  ;;  %v1165_v38 = vadd.f32 %v1164_v33, %v1163_v27  ;;  %v1098_v48 = vmul.f32 %v1535_v31, %v1535_v31 }
  0xed   :  { %895 = vst.msk [vmem:[%s2396_s2 + $0x20] sm:$0xf] %vm886_vm2, %v1433_v28  ;;  %v1434_v39 = vpack.c.bf16 %v410_v36, %v410_v36  ;;  %v1166_v41 = vsel %vm951_vm3, %v1095_v34, 0.0  ;;  %v969_v42 = vsel %vm951_vm3, %v410_v36, 0.0  ;;  %v1096_v43 = vmul.f32 %v410_v36, %v410_v36  ;;  %v1917_v28 = vpop.f32.mrb[9].mxu1 }
  0xee   :  { %898 = vst.msk [vmem:[%s2396_s2 + $0x2c] sm:$0xf] %vm886_vm2, %v1436_v35  ;;  %v1167_v44 = vadd.f32 %v1166_v41, %v1165_v38  ;;  %v970_v45 = vadd.f32 %v969_v42, %v968_v37  ;;  %v1170_v56 = vsel %vm951_vm3, %v1097_v40, 0.0  ;;  %v973_v57 = vsel %vm951_vm3, %v1535_v31, 0.0  ;;  %v1925_v34 = vpop.f32.mrb[10].mxu1 }
  0xef   :  { %896 = vst.msk [vmem:[%s2396_s2 + $0x24] sm:$0xf] %vm886_vm2, %v1434_v39  ;;  %v1168_v49 = vsel %vm951_vm3, %v1096_v43, 0.0  ;;  %v1172_v3 = vsel %vm951_vm3, %v1098_v48, 0.0  ;;  %v1458_v17 = vpack.c.bf16 %v1840_v32, %v1840_v32  ;;  %v1463_v22 = vpack.c.bf16 %v1867_v51, %v1867_v51  ;;  %v1928_v40 = vpop.f32.mrb[11].mxu1 }
  0xf0   :  { %v972_v52 = vadd.f32 %v971_v47, %v970_v45  ;;  %v1169_v53 = vadd.f32 %v1168_v49, %v1167_v44 }
  0xf1   :  { %v1538_v54 = vpop.f32.mrb[12].mxu0  ;;  %920 = vst.msk [vmem:[%s2396_s2 + $0x84] sm:$0xf] %vm886_vm2, %v1458_v17  ;;  %925 = vst.msk [vmem:[%s2396_s2 + $0x98] sm:$0xf] %vm886_vm2, %v1463_v22 }
  0xf2   :  { %v1439_v58 = vpack.c.bf16 %v1538_v54, %v1538_v54  ;;  %v423_v59 = vpop.f32.mrb[13].mxu0  ;;  %v1171_v61 = vadd.f32 %v1170_v56, %v1169_v53  ;;  %v974_v63 = vadd.f32 %v973_v57, %v972_v52  ;;  %v1101_v10 = vmul.f32 %v1538_v54, %v1538_v54 }
  0xf3   :  { %v1437_v62 = vpack.c.bf16 %v423_v59, %v423_v59  ;;  %v975_v0 = vsel %vm951_vm3, %v423_v59, 0.0  ;;  %v1539_v1 = vpop.f32.mrb[14].mxu0  ;;  %v1099_v4 = vmul.f32 %v423_v59, %v423_v59  ;;  %v979_v18 = vsel %vm951_vm3, %v1538_v54, 0.0 }
  0xf4   :  { %901 = vst.msk [vmem:[%s2396_s2 + $0x38] sm:$0xf] %vm886_vm2, %v1439_v58  ;;  %v1440_v5 = vpack.c.bf16 %v1539_v1, %v1539_v1  ;;  %v426_v6 = vpop.f32.mrb[15].mxu0  ;;  %v976_v7 = vadd.f32 %v975_v0, %v974_v63  ;;  %v1173_v8 = vadd.f32 %v1172_v3, %v1171_v61  ;;  %v1102_v19 = vmul.f32 %v1539_v1, %v1539_v1 }
  0xf5   :  { %899 = vst.msk [vmem:[%s2396_s2 + $0x30] sm:$0xf] %vm886_vm2, %v1437_v62  ;;  %v1438_v9 = vpack.c.bf16 %v426_v6, %v426_v6  ;;  %v1174_v11 = vsel %vm951_vm3, %v1099_v4, 0.0  ;;  %v977_v12 = vsel %vm951_vm3, %v426_v6, 0.0  ;;  %v1100_v13 = vmul.f32 %v426_v6, %v426_v6  ;;  %v1955_v62 = vpop.f32.mrb[12].mxu1 }
  0xf6   :  { %902 = vst.msk [vmem:[%s2396_s2 + $0x3c] sm:$0xf] %vm886_vm2, %v1440_v5  ;;  %v1175_v14 = vadd.f32 %v1174_v11, %v1173_v8  ;;  %v978_v15 = vadd.f32 %v977_v12, %v976_v7  ;;  %v1178_v29 = vsel %vm951_vm3, %v1101_v10, 0.0  ;;  %v981_v30 = vsel %vm951_vm3, %v1539_v1, 0.0  ;;  %v1961_v3 = vpop.f32.mrb[13].mxu1 }
  0xf7   :  { %900 = vst.msk [vmem:[%s2396_s2 + $0x34] sm:$0xf] %vm886_vm2, %v1438_v9  ;;  %v1176_v20 = vsel %vm951_vm3, %v1100_v13, 0.0  ;;  %v1180_v41 = vsel %vm951_vm3, %v1102_v19, 0.0  ;;  %v1461_v56 = vpack.c.bf16 %v1873_v55, %v1873_v55  ;;  %v1464_v61 = vpack.c.bf16 %v1881_v60, %v1881_v60  ;;  %v1969_v8 = vpop.f32.mrb[14].mxu1 }
  0xf8   :  { %v980_v24 = vadd.f32 %v979_v18, %v978_v15  ;;  %v1177_v25 = vadd.f32 %v1176_v20, %v1175_v14  ;;  %v1972_v14 = vpop.f32.mrb[15].mxu1 }
  0xf9   :  { %v1542_v27 = vpop.f32.mrb[16].mxu0  ;;  %923 = vst.msk [vmem:[%s2396_s2 + $0x90] sm:$0xf] %vm886_vm2, %v1461_v56  ;;  %926 = vst.msk [vmem:[%s2396_s2 + $0x9c] sm:$0xf] %vm886_vm2, %v1464_v61 }
  0xfa   :  { %v1443_v31 = vpack.c.bf16 %v1542_v27, %v1542_v27  ;;  %v439_v33 = vpop.f32.mrb[17].mxu0  ;;  %v1179_v35 = vadd.f32 %v1178_v29, %v1177_v25  ;;  %v982_v37 = vadd.f32 %v981_v30, %v980_v24  ;;  %v1105_v48 = vmul.f32 %v1542_v27, %v1542_v27 }
  0xfb   :  { %v1441_v36 = vpack.c.bf16 %v439_v33, %v439_v33  ;;  %v983_v38 = vsel %vm951_vm3, %v439_v33, 0.0  ;;  %v1543_v39 = vpop.f32.mrb[18].mxu0  ;;  %v1103_v42 = vmul.f32 %v439_v33, %v439_v33  ;;  %v987_v57 = vsel %vm951_vm3, %v1542_v27, 0.0 }
  0xfc   :  { %905 = vst.msk [vmem:[%s2396_s2 + $0x48] sm:$0xf] %vm886_vm2, %v1443_v31  ;;  %v1444_v43 = vpack.c.bf16 %v1543_v39, %v1543_v39  ;;  %v442_v44 = vpop.f32.mrb[19].mxu0  ;;  %v984_v45 = vadd.f32 %v983_v38, %v982_v37  ;;  %v1181_v46 = vadd.f32 %v1180_v41, %v1179_v35  ;;  %v1106_v58 = vmul.f32 %v1543_v39, %v1543_v39  ;;  %v1999_v41 = vpop.f32.mrb[16].mxu1 }
  0xfd   :  { %903 = vst.msk [vmem:[%s2396_s2 + $0x40] sm:$0xf] %vm886_vm2, %v1441_v36  ;;  %v1442_v47 = vpack.c.bf16 %v442_v44, %v442_v44  ;;  %v1182_v49 = vsel %vm951_vm3, %v1103_v42, 0.0  ;;  %v985_v50 = vsel %vm951_vm3, %v442_v44, 0.0  ;;  %v1104_v52 = vmul.f32 %v442_v44, %v442_v44 }
  0xfe   :  { %906 = vst.msk [vmem:[%s2396_s2 + $0x4c] sm:$0xf] %vm886_vm2, %v1444_v43  ;;  %v1183_v53 = vadd.f32 %v1182_v49, %v1181_v46  ;;  %v986_v54 = vadd.f32 %v985_v50, %v984_v45  ;;  %v1186_v4 = vsel %vm951_vm3, %v1105_v48, 0.0  ;;  %v989_v5 = vsel %vm951_vm3, %v1543_v39, 0.0  ;;  %v2005_v45 = vpop.f32.mrb[17].mxu1 }
  0xff   :  { %904 = vst.msk [vmem:[%s2396_s2 + $0x44] sm:$0xf] %vm886_vm2, %v1442_v47  ;;  %v1184_v59 = vsel %vm951_vm3, %v1104_v52, 0.0  ;;  %v1188_v15 = vsel %vm951_vm3, %v1106_v58, 0.0  ;;  %v1462_v35 = vpack.c.bf16 %v1884_v2, %v1884_v2  ;;  %v1467_v39 = vpack.c.bf16 %v1911_v23, %v1911_v23  ;;  %v2013_v50 = vpop.f32.mrb[18].mxu1 }
 0x100   :  { %v988_v63 = vadd.f32 %v987_v57, %v986_v54  ;;  %v1185_v0 = vadd.f32 %v1184_v59, %v1183_v53  ;;  %v2016_v58 = vpop.f32.mrb[19].mxu1 }
 0x101   :  { %v1546_v1 = vpop.f32.mrb[20].mxu0  ;;  %924 = vst.msk [vmem:[%s2396_s2 + $0x94] sm:$0xf] %vm886_vm2, %v1462_v35  ;;  %929 = vst.msk [vmem:[%s2396_s2 + $0xa8] sm:$0xf] %vm886_vm2, %v1467_v39 }
 0x102   :  { %v1447_v6 = vpack.c.bf16 %v1546_v1, %v1546_v1  ;;  %v455_v7 = vpop.f32.mrb[21].mxu0  ;;  %v1187_v9 = vadd.f32 %v1186_v4, %v1185_v0  ;;  %v990_v11 = vadd.f32 %v989_v5, %v988_v63  ;;  %v1109_v25 = vmul.f32 %v1546_v1, %v1546_v1 }
 0x103   :  { %v1445_v10 = vpack.c.bf16 %v455_v7, %v455_v7  ;;  %v991_v12 = vsel %vm951_vm3, %v455_v7, 0.0  ;;  %v1547_v13 = vpop.f32.mrb[22].mxu0  ;;  %v1107_v17 = vmul.f32 %v455_v7, %v455_v7  ;;  %v995_v36 = vsel %vm951_vm3, %v1546_v1, 0.0 }
 0x104   :  { %909 = vst.msk [vmem:[%s2396_s2 + $0x58] sm:$0xf] %vm886_vm2, %v1447_v6  ;;  %v1448_v18 = vpack.c.bf16 %v1547_v13, %v1547_v13  ;;  %v458_v19 = vpop.f32.mrb[23].mxu0  ;;  %v992_v20 = vadd.f32 %v991_v12, %v990_v11  ;;  %v1189_v22 = vadd.f32 %v1188_v15, %v1187_v9  ;;  %v1110_v37 = vmul.f32 %v1547_v13, %v1547_v13 }
 0x105   :  { %907 = vst.msk [vmem:[%s2396_s2 + $0x50] sm:$0xf] %vm886_vm2, %v1445_v10  ;;  %v1446_v24 = vpack.c.bf16 %v458_v19, %v458_v19  ;;  %v1190_v27 = vsel %vm951_vm3, %v1107_v17, 0.0  ;;  %v993_v29 = vsel %vm951_vm3, %v458_v19, 0.0  ;;  %v1108_v30 = vmul.f32 %v458_v19, %v458_v19 }
 0x106   :  { %910 = vst.msk [vmem:[%s2396_s2 + $0x5c] sm:$0xf] %vm886_vm2, %v1448_v18  ;;  %v1191_v31 = vadd.f32 %v1190_v27, %v1189_v22  ;;  %v994_v33 = vadd.f32 %v993_v29, %v992_v20  ;;  %v1194_v46 = vsel %vm951_vm3, %v1109_v25, 0.0  ;;  %v997_v47 = vsel %vm951_vm3, %v1547_v13, 0.0  ;;  %v2043_v20 = vpop.f32.mrb[20].mxu1 }
 0x107   :  { %908 = vst.msk [vmem:[%s2396_s2 + $0x54] sm:$0xf] %vm886_vm2, %v1446_v24  ;;  %v1192_v38 = vsel %vm951_vm3, %v1108_v30, 0.0  ;;  %v1196_v59 = vsel %vm951_vm3, %v1110_v37, 0.0  ;;  %v1465_v13 = vpack.c.bf16 %v1917_v28, %v1917_v28  ;;  %v1468_v19 = vpack.c.bf16 %v1925_v34, %v1925_v34  ;;  %v2049_v27 = vpop.f32.mrb[21].mxu1 }
 0x108   :  { %v996_v42 = vadd.f32 %v995_v36, %v994_v33  ;;  %v1193_v43 = vadd.f32 %v1192_v38, %v1191_v31  ;;  %v2057_v35 = vpop.f32.mrb[22].mxu1 }
 0x109   :  { %v1550_v44 = vpop.f32.mrb[24].mxu0  ;;  %927 = vst.msk [vmem:[%s2396_s2 + $0xa0] sm:$0xf] %vm886_vm2, %v1465_v13  ;;  %930 = vst.msk [vmem:[%s2396_s2 + $0xac] sm:$0xf] %vm886_vm2, %v1468_v19 }
 0x10a   :  { %v1451_v48 = vpack.c.bf16 %v1550_v44, %v1550_v44  ;;  %v471_v49 = vpop.f32.mrb[25].mxu0  ;;  %v1195_v52 = vadd.f32 %v1194_v46, %v1193_v43  ;;  %v998_v54 = vadd.f32 %v997_v47, %v996_v42  ;;  %v1113_v6 = vmul.f32 %v1550_v44, %v1550_v44  ;;  %v2060_v43 = vpop.f32.mrb[23].mxu1 }
 0x10b   :  { %v1449_v53 = vpack.c.bf16 %v471_v49, %v471_v49  ;;  %v999_v56 = vsel %vm951_vm3, %v471_v49, 0.0  ;;  %v1551_v57 = vpop.f32.mrb[26].mxu0  ;;  %v1111_v61 = vmul.f32 %v471_v49, %v471_v49  ;;  %v1003_v15 = vsel %vm951_vm3, %v1550_v44, 0.0 }
 0x10c   :  { %913 = vst.msk [vmem:[%s2396_s2 + $0x68] sm:$0xf] %vm886_vm2, %v1451_v48  ;;  %v1452_v63 = vpack.c.bf16 %v1551_v57, %v1551_v57  ;;  %v474_v0 = vpop.f32.mrb[27].mxu0  ;;  %v1000_v1 = vadd.f32 %v999_v56, %v998_v54  ;;  %v1197_v4 = vadd.f32 %v1196_v59, %v1195_v52  ;;  %v1114_v17 = vmul.f32 %v1551_v57, %v1551_v57 }
 0x10d   :  { %911 = vst.msk [vmem:[%s2396_s2 + $0x60] sm:$0xf] %vm886_vm2, %v1449_v53  ;;  %v1450_v5 = vpack.c.bf16 %v474_v0, %v474_v0  ;;  %v1198_v7 = vsel %vm951_vm3, %v1111_v61, 0.0  ;;  %v1001_v9 = vsel %vm951_vm3, %v474_v0, 0.0  ;;  %v1112_v10 = vmul.f32 %v474_v0, %v474_v0 }
 0x10e   :  { %914 = vst.msk [vmem:[%s2396_s2 + $0x6c] sm:$0xf] %vm886_vm2, %v1452_v63  ;;  %v1199_v11 = vadd.f32 %v1198_v7, %v1197_v4  ;;  %v1002_v12 = vadd.f32 %v1001_v9, %v1000_v1  ;;  %v1202_v29 = vsel %vm951_vm3, %v1113_v6, 0.0  ;;  %v1005_v30 = vsel %vm951_vm3, %v1551_v57, 0.0  ;;  %v2089_v9 = vpop.f32.mrb[24].mxu1 }
 0x10f   :  { %912 = vst.msk [vmem:[%s2396_s2 + $0x64] sm:$0xf] %vm886_vm2, %v1450_v5  ;;  %v1200_v18 = vsel %vm951_vm3, %v1112_v10, 0.0  ;;  %v1204_v44 = vsel %vm951_vm3, %v1114_v17, 0.0  ;;  %v1119_v0 = vmul.f32 %v1829_v21, %v1829_v21  ;;  %v1466_v1 = vpack.c.bf16 %v1928_v40, %v1928_v40 }
 0x110   :  { %v1004_v22 = vadd.f32 %v1003_v15, %v1002_v12  ;;  %v1201_v24 = vadd.f32 %v1200_v18, %v1199_v11  ;;  %v1471_v7 = vpack.c.bf16 %v1955_v62, %v1955_v62  ;;  %v2095_v12 = vpop.f32.mrb[25].mxu1  ;;  %v1015_v17 = vsel %vm951_vm3, %v1829_v21, 0.0 }
 0x111   :  { %v1554_v25 = vpop.f32.mrb[28].mxu0  ;;  %928 = vst.msk [vmem:[%s2396_s2 + $0xa4] sm:$0xf] %vm886_vm2, %v1466_v1  ;;  %v1469_v18 = vpack.c.bf16 %v1961_v3, %v1961_v3  ;;  %v2107_v19 = vpop.f32.mrb[26].mxu1  ;;  %v1214_v21 = vsel %vm951_vm3, %v1119_v0, 0.0  ;;  %v1474_v0 = vpack.c.bf16 %v2016_v58, %v2016_v58 }
 0x112   :  { %v1455_v31 = vpack.c.bf16 %v1554_v25, %v1554_v25  ;;  %v487_v33 = vpop.f32.mrb[29].mxu0  ;;  %v1203_v36 = vadd.f32 %v1202_v29, %v1201_v24  ;;  %v1006_v38 = vadd.f32 %v1005_v30, %v1004_v22  ;;  %v1117_v54 = vmul.f32 %v1554_v25, %v1554_v25  ;;  %933 = vst.msk [vmem:[%s2396_s2 + $0xb8] sm:$0xf] %vm886_vm2, %v1471_v7  ;;  %v2111_v29 = vpop.f32.mrb[27].mxu1 }
 0x113   :  { %v1453_v37 = vpack.c.bf16 %v487_v33, %v487_v33  ;;  %v1007_v39 = vsel %vm951_vm3, %v487_v33, 0.0  ;;  %v1555_v42 = vpop.f32.mrb[30].mxu0  ;;  %v1115_v46 = vmul.f32 %v487_v33, %v487_v33  ;;  %v1011_v4 = vsel %vm951_vm3, %v1554_v25, 0.0  ;;  %931 = vst.msk [vmem:[%s2396_s2 + $0xb0] sm:$0xf] %vm886_vm2, %v1469_v18 }
 0x114   :  { %917 = vst.msk [vmem:[%s2396_s2 + $0x78] sm:$0xf] %vm886_vm2, %v1455_v31  ;;  %v1456_v47 = vpack.c.bf16 %v1555_v42, %v1555_v42  ;;  %v490_v48 = vpop.f32.mrb[31].mxu0  ;;  %v1008_v49 = vadd.f32 %v1007_v39, %v1006_v38  ;;  %v1205_v52 = vadd.f32 %v1204_v44, %v1203_v36  ;;  %v1118_v5 = vmul.f32 %v1555_v42, %v1555_v42 }
 0x115   :  { %915 = vst.msk [vmem:[%s2396_s2 + $0x70] sm:$0xf] %vm886_vm2, %v1453_v37  ;;  %v1454_v53 = vpack.c.bf16 %v490_v48, %v490_v48  ;;  %v1206_v56 = vsel %vm951_vm3, %v1115_v46, 0.0  ;;  %v1009_v57 = vsel %vm951_vm3, %v490_v48, 0.0  ;;  %v1116_v59 = vmul.f32 %v490_v48, %v490_v48  ;;  %936 = vst.msk [vmem:[%s2396_s2 + $0xc4] sm:$0xf] %vm886_vm2, %v1474_v0 }
 0x116   :  { %918 = vst.msk [vmem:[%s2396_s2 + $0x7c] sm:$0xf] %vm886_vm2, %v1456_v47  ;;  %v1207_v61 = vadd.f32 %v1206_v56, %v1205_v52  ;;  %v1010_v63 = vadd.f32 %v1009_v57, %v1008_v49  ;;  %v1210_v13 = vsel %vm951_vm3, %v1117_v54, 0.0  ;;  %v1013_v15 = vsel %vm951_vm3, %v1555_v42, 0.0 }
 0x117   :  { %916 = vst.msk [vmem:[%s2396_s2 + $0x74] sm:$0xf] %vm886_vm2, %v1454_v53  ;;  %v1208_v6 = vsel %vm951_vm3, %v1116_v59, 0.0  ;;  %v1472_v25 = vpack.c.bf16 %v1969_v8, %v1969_v8  ;;  %v1212_v30 = vsel %vm951_vm3, %v1118_v5, 0.0  ;;  %v1120_v31 = vmul.f32 %v1840_v32, %v1840_v32  ;;  %v2152_v53 = vpop.f32.mrb[28].mxu1 }
 0x118   :  { %v1012_v10 = vadd.f32 %v1011_v4, %v1010_v63  ;;  %v1209_v11 = vadd.f32 %v1208_v6, %v1207_v61  ;;  %v1470_v33 = vpack.c.bf16 %v1972_v14, %v1972_v14  ;;  %v1121_v38 = vmul.f32 %v1825_v16, %v1825_v16  ;;  %v2158_v57 = vpop.f32.mrb[29].mxu1 }
 0x119   :  { %934 = vst.msk [vmem:[%s2396_s2 + $0xbc] sm:$0xf] %vm886_vm2, %v1472_v25  ;;  %v1017_v39 = vsel %vm951_vm3, %v1840_v32, 0.0  ;;  %v1475_v42 = vpack.c.bf16 %v1999_v41, %v1999_v41  ;;  %v1019_v44 = vsel %vm951_vm3, %v1825_v16, 0.0  ;;  %v1473_v48 = vpack.c.bf16 %v2005_v45, %v2005_v45  ;;  %v2171_v1 = vpop.f32.mrb[30].mxu1 }
 0x11a   :  { %v1211_v22 = vadd.f32 %v1210_v13, %v1209_v11  ;;  %v1014_v24 = vadd.f32 %v1013_v15, %v1012_v10  ;;  %932 = vst.msk [vmem:[%s2396_s2 + $0xb4] sm:$0xf] %vm886_vm2, %v1470_v33  ;;  %v1122_v49 = vmul.f32 %v1833_v26, %v1833_v26  ;;  %v1216_v32 = vsel %vm951_vm3, %v1120_v31, 0.0  ;;  %v2175_v7 = vpop.f32.mrb[31].mxu1 }
 0x11b   :  { %v1123_v52 = vmul.f32 %v1873_v55, %v1873_v55  ;;  %937 = vst.msk [vmem:[%s2396_s2 + $0xc8] sm:$0xf] %vm886_vm2, %v1475_v42  ;;  %v1476_v16 = vpack.c.bf16 %v2013_v50, %v2013_v50  ;;  %935 = vst.msk [vmem:[%s2396_s2 + $0xc0] sm:$0xf] %vm886_vm2, %v1473_v48  ;;  %v1218_v59 = vsel %vm951_vm3, %v1121_v38, 0.0  ;;  %v1021_v61 = vsel %vm951_vm3, %v1833_v26, 0.0 }
 0x11c   :  { %v1016_v36 = vadd.f32 %v1015_v17, %v1014_v24  ;;  %v1213_v37 = vadd.f32 %v1212_v30, %v1211_v22  ;;  %v1023_v63 = vsel %vm951_vm3, %v1873_v55, 0.0  ;;  %v1479_v6 = vpack.c.bf16 %v2043_v20, %v2043_v20 }
 0x11d   :  { %938 = vst.msk [vmem:[%s2396_s2 + $0xcc] sm:$0xf] %vm886_vm2, %v1476_v16  ;;  %v1220_v26 = vsel %vm951_vm3, %v1122_v49, 0.0  ;;  %v1222_v55 = vsel %vm951_vm3, %v1123_v52, 0.0  ;;  %v1124_v10 = vmul.f32 %v1884_v2, %v1884_v2  ;;  %v1477_v11 = vpack.c.bf16 %v2049_v27, %v2049_v27 }
 0x11e   :  { %v1215_v46 = vadd.f32 %v1214_v21, %v1213_v37  ;;  %v1018_v47 = vadd.f32 %v1017_v39, %v1016_v36  ;;  %941 = vst.msk [vmem:[%s2396_s2 + $0xd8] sm:$0xf] %vm886_vm2, %v1479_v6  ;;  %v1125_v17 = vmul.f32 %v1867_v51, %v1867_v51  ;;  %v1025_v18 = vsel %vm951_vm3, %v1884_v2, 0.0 }
 0x11f   :  { %939 = vst.msk [vmem:[%s2396_s2 + $0xd0] sm:$0xf] %vm886_vm2, %v1477_v11  ;;  %v1480_v22 = vpack.c.bf16 %v2057_v35, %v2057_v35  ;;  %v1027_v24 = vsel %vm951_vm3, %v1867_v51, 0.0  ;;  %v1478_v21 = vpack.c.bf16 %v2060_v43, %v2060_v43  ;;  %v1126_v31 = vmul.f32 %v1881_v60, %v1881_v60 }
 0x120   :  { %v1020_v54 = vadd.f32 %v1019_v44, %v1018_v47  ;;  %v1217_v56 = vadd.f32 %v1216_v32, %v1215_v46  ;;  %v1224_v2 = vsel %vm951_vm3, %v1124_v10, 0.0  ;;  %v1127_v33 = vmul.f32 %v1917_v28, %v1917_v28 }
 0x121   :  { %942 = vst.msk [vmem:[%s2396_s2 + $0xdc] sm:$0xf] %vm886_vm2, %v1480_v22  ;;  %v1483_v51 = vpack.c.bf16 %v2089_v9, %v2089_v9  ;;  %940 = vst.msk [vmem:[%s2396_s2 + $0xd4] sm:$0xf] %vm886_vm2, %v1478_v21  ;;  %v1226_v38 = vsel %vm951_vm3, %v1125_v17, 0.0  ;;  %v1029_v39 = vsel %vm951_vm3, %v1881_v60, 0.0  ;;  %v1481_v44 = vpack.c.bf16 %v2095_v12, %v2095_v12 }
 0x122   :  { %v1219_v4 = vadd.f32 %v1218_v59, %v1217_v56  ;;  %v1022_v5 = vadd.f32 %v1021_v61, %v1020_v54  ;;  %v1031_v42 = vsel %vm951_vm3, %v1917_v28, 0.0  ;;  %v1484_v48 = vpack.c.bf16 %v2107_v19, %v2107_v19 }
 0x123   :  { %945 = vst.msk [vmem:[%s2396_s2 + $0xe8] sm:$0xf] %vm886_vm2, %v1483_v51  ;;  %v1228_v49 = vsel %vm951_vm3, %v1126_v31, 0.0  ;;  %v1230_v60 = vsel %vm951_vm3, %v1127_v33, 0.0  ;;  %v1128_v28 = vmul.f32 %v1928_v40, %v1928_v40  ;;  %943 = vst.msk [vmem:[%s2396_s2 + $0xe0] sm:$0xf] %vm886_vm2, %v1481_v44  ;;  %v1482_v32 = vpack.c.bf16 %v2111_v29, %v2111_v29 }
 0x124   :  { %v1024_v13 = vadd.f32 %v1023_v63, %v1022_v5  ;;  %v1221_v15 = vadd.f32 %v1220_v26, %v1219_v4  ;;  %946 = vst.msk [vmem:[%s2396_s2 + $0xec] sm:$0xf] %vm886_vm2, %v1484_v48  ;;  %v1129_v54 = vmul.f32 %v1911_v23, %v1911_v23  ;;  %v1033_v56 = vsel %vm951_vm3, %v1928_v40, 0.0 }
 0x125   :  { %944 = vst.msk [vmem:[%s2396_s2 + $0xe4] sm:$0xf] %vm886_vm2, %v1482_v32  ;;  %v1487_v59 = vpack.c.bf16 %v2152_v53, %v2152_v53  ;;  %v1035_v61 = vsel %vm951_vm3, %v1911_v23, 0.0  ;;  %v1485_v4 = vpack.c.bf16 %v2158_v57, %v2158_v57  ;;  %v1130_v5 = vmul.f32 %v1925_v34, %v1925_v34 }
 0x126   :  { %v1223_v25 = vadd.f32 %v1222_v55, %v1221_v15  ;;  %v1026_v30 = vadd.f32 %v1025_v18, %v1024_v13  ;;  %v1232_v40 = vsel %vm951_vm3, %v1128_v28, 0.0  ;;  %v1131_v6 = vmul.f32 %v1961_v3, %v1961_v3 }
 0x127   :  { %949 = vst.msk [vmem:[%s2396_s2 + $0xf8] sm:$0xf] %vm886_vm2, %v1487_v59  ;;  %v1488_v23 = vpack.c.bf16 %v2171_v1, %v2171_v1  ;;  %947 = vst.msk [vmem:[%s2396_s2 + $0xf0] sm:$0xf] %vm886_vm2, %v1485_v4  ;;  %v1234_v10 = vsel %vm951_vm3, %v1129_v54, 0.0  ;;  %v1037_v11 = vsel %vm951_vm3, %v1925_v34, 0.0  ;;  %v1486_v15 = vpack.c.bf16 %v2175_v7, %v2175_v7 }
 0x128   :  { %v1028_v36 = vadd.f32 %v1027_v24, %v1026_v30  ;;  %v1225_v37 = vadd.f32 %v1224_v2, %v1223_v25  ;;  %v1039_v13 = vsel %vm951_vm3, %v1961_v3, 0.0  ;;  %v1236_v22 = vsel %vm951_vm3, %v1130_v5, 0.0 }
 0x129   :  { %950 = vst.msk [vmem:[%s2396_s2 + $0xfc] sm:$0xf] %vm886_vm2, %v1488_v23  ;;  %v1238_v24 = vsel %vm951_vm3, %v1131_v6, 0.0  ;;  %v1132_v34 = vmul.f32 %v1972_v14, %v1972_v14  ;;  %948 = vst.msk [vmem:[%s2396_s2 + $0xf4] sm:$0xf] %vm886_vm2, %v1486_v15  ;;  %v1133_v30 = vmul.f32 %v1955_v62, %v1955_v62  ;;  %v1041_v21 = vsel %vm951_vm3, %v1972_v14, 0.0 }
 0x12a   :  { %v1227_v46 = vadd.f32 %v1226_v38, %v1225_v37  ;;  %v1030_v47 = vadd.f32 %v1029_v39, %v1028_v36  ;;  %v1043_v33 = vsel %vm951_vm3, %v1955_v62, 0.0  ;;  %v1134_v51 = vmul.f32 %v1969_v8, %v1969_v8 }
 0x12b   :  { %v1240_v36 = vsel %vm951_vm3, %v1132_v34, 0.0  ;;  %v1135_v37 = vmul.f32 %v2005_v45, %v2005_v45  ;;  %v1045_v14 = vsel %vm951_vm3, %v1969_v8, 0.0  ;;  %v1047_v44 = vsel %vm951_vm3, %v2005_v45, 0.0 }
 0x12c   :  { %v1032_v52 = vadd.f32 %v1031_v42, %v1030_v47  ;;  %v1229_v16 = vadd.f32 %v1228_v49, %v1227_v46  ;;  %v1242_v42 = vsel %vm951_vm3, %v1133_v30, 0.0  ;;  %v1244_v47 = vsel %vm951_vm3, %v1134_v51, 0.0 }
 0x12d   :  { %v1246_v48 = vsel %vm951_vm3, %v1135_v37, 0.0  ;;  %v1136_v49 = vmul.f32 %v2016_v58, %v2016_v58  ;;  %v1137_v32 = vmul.f32 %v1999_v41, %v1999_v41  ;;  %v1049_v8 = vsel %vm951_vm3, %v2016_v58, 0.0 }
 0x12e   :  { %v1231_v63 = vadd.f32 %v1230_v60, %v1229_v16  ;;  %v1034_v0 = vadd.f32 %v1033_v56, %v1032_v52  ;;  %v1051_v45 = vsel %vm951_vm3, %v1999_v41, 0.0  ;;  %v1138_v54 = vmul.f32 %v2013_v50, %v2013_v50 }
 0x12f   :  { %v1248_v56 = vsel %vm951_vm3, %v1136_v49, 0.0  ;;  %v1139_v59 = vmul.f32 %v2049_v27, %v2049_v27  ;;  %v1053_v58 = vsel %vm951_vm3, %v2013_v50, 0.0  ;;  %v1055_v4 = vsel %vm951_vm3, %v2049_v27, 0.0 }
 0x130   :  { %v1036_v26 = vadd.f32 %v1035_v61, %v1034_v0  ;;  %v1233_v55 = vadd.f32 %v1232_v40, %v1231_v63  ;;  %v1250_v0 = vsel %vm951_vm3, %v1137_v32, 0.0  ;;  %v1252_v40 = vsel %vm951_vm3, %v1138_v54, 0.0 }
 0x131   :  { %v1254_v6 = vsel %vm951_vm3, %v1139_v59, 0.0  ;;  %v1140_v23 = vmul.f32 %v2060_v43, %v2060_v43  ;;  %v1057_v50 = vsel %vm951_vm3, %v2060_v43, 0.0  ;;  %v1059_v27 = vsel %vm951_vm3, %v2043_v20, 0.0 }
 0x132   :  { %v1235_v17 = vadd.f32 %v1234_v10, %v1233_v55  ;;  %v1038_v18 = vadd.f32 %v1037_v11, %v1036_v26  ;;  %v1141_v10 = vmul.f32 %v2043_v20, %v2043_v20  ;;  %v1142_v15 = vmul.f32 %v2057_v35, %v2057_v35 }
 0x133   :  { %v1061_v43 = vsel %vm951_vm3, %v2057_v35, 0.0  ;;  %v1145_v51 = vmul.f32 %v2089_v9, %v2089_v9  ;;  %v1065_v35 = vsel %vm951_vm3, %v2111_v29, 0.0 }
 0x134   :  { %v1040_v3 = vadd.f32 %v1039_v13, %v1038_v18  ;;  %v1237_v25 = vadd.f32 %v1236_v22, %v1235_v17  ;;  %v1256_v17 = vsel %vm951_vm3, %v1140_v23, 0.0  ;;  %v1143_v18 = vmul.f32 %v2095_v12, %v2095_v12 }
 0x135   :  { %v1258_v34 = vsel %vm951_vm3, %v1141_v10, 0.0  ;;  %v1260_v30 = vsel %vm951_vm3, %v1142_v15, 0.0 }
 0x136   :  { %v1239_v31 = vadd.f32 %v1238_v24, %v1237_v25  ;;  %v1042_v2 = vadd.f32 %v1041_v21, %v1040_v3  ;;  %v1063_v3 = vsel %vm951_vm3, %v2095_v12, 0.0  ;;  %v1262_v21 = vsel %vm951_vm3, %v1143_v18, 0.0 }
 0x137   :  { %v1067_v12 = vsel %vm951_vm3, %v2089_v9, 0.0 }
 0x138   :  { %v1044_v38 = vadd.f32 %v1043_v33, %v1042_v2  ;;  %v1241_v39 = vadd.f32 %v1240_v36, %v1239_v31  ;;  %v1144_v31 = vmul.f32 %v2111_v29, %v2111_v29  ;;  %v1069_v29 = vsel %vm951_vm3, %v2107_v19, 0.0 }
 0x13a   :  { %v1243_v46 = vadd.f32 %v1242_v42, %v1241_v39  ;;  %v1046_v62 = vadd.f32 %v1045_v14, %v1044_v38  ;;  %v1146_v38 = vmul.f32 %v2107_v19, %v2107_v19  ;;  %v1264_v39 = vsel %vm951_vm3, %v1144_v31, 0.0 }
 0x13b   :  { %v1147_v42 = vmul.f32 %v2158_v57, %v2158_v57  ;;  %v1073_v19 = vsel %vm951_vm3, %v2175_v7, 0.0 }
 0x13c   :  { %v1048_v60 = vadd.f32 %v1047_v44, %v1046_v62  ;;  %v1245_v28 = vadd.f32 %v1244_v47, %v1243_v46  ;;  %v1266_v46 = vsel %vm951_vm3, %v1145_v51, 0.0  ;;  %v1071_v62 = vsel %vm951_vm3, %v2158_v57, 0.0 }
 0x13d   :  { %v1270_v49 = vsel %vm951_vm3, %v1147_v42, 0.0  ;;  %v1075_v57 = vsel %vm951_vm3, %v2152_v53, 0.0 }
 0x13e   :  { %v1247_v52 = vadd.f32 %v1246_v48, %v1245_v28  ;;  %v1050_v16 = vadd.f32 %v1049_v8, %v1048_v60  ;;  %v1268_v48 = vsel %vm951_vm3, %v1146_v38, 0.0  ;;  %v1148_v60 = vmul.f32 %v2175_v7, %v2175_v7 }
 0x13f   :  { %v1149_v8 = vmul.f32 %v2152_v53, %v2152_v53 }
 0x140   :  { %v1052_v61 = vadd.f32 %v1051_v45, %v1050_v16  ;;  %v1249_v63 = vadd.f32 %v1248_v56, %v1247_v52  ;;  %v1150_v45 = vmul.f32 %v2171_v1, %v2171_v1  ;;  %v1272_v54 = vsel %vm951_vm3, %v1148_v60, 0.0 }
 0x142   :  { %v1251_v5 = vadd.f32 %v1250_v0, %v1249_v63  ;;  %v1054_v41 = vadd.f32 %v1053_v58, %v1052_v61  ;;  %v1274_v61 = vsel %vm951_vm3, %v1149_v8, 0.0  ;;  %v1077_v63 = vsel %vm951_vm3, %v2171_v1, 0.0 }
 0x143   :  { %v1276_v7 = vsel %vm951_vm3, %v1150_v45, 0.0 }
 0x144   :  { %v1056_v26 = vadd.f32 %v1055_v4, %v1054_v41  ;;  %v1253_v55 = vadd.f32 %v1252_v40, %v1251_v5 }
 0x146   :  { %v1255_v11 = vadd.f32 %v1254_v6, %v1253_v55  ;;  %v1058_v13 = vadd.f32 %v1057_v50, %v1056_v26 }
 0x148   :  { %v1060_v22 = vadd.f32 %v1059_v27, %v1058_v13  ;;  %v1257_v24 = vadd.f32 %v1256_v17, %v1255_v11 }
 0x14a   :  { %v1259_v25 = vadd.f32 %v1258_v34, %v1257_v24  ;;  %v1062_v20 = vadd.f32 %v1061_v43, %v1060_v22 }
 0x14c   :  { %v1064_v2 = vadd.f32 %v1063_v3, %v1062_v20  ;;  %v1261_v33 = vadd.f32 %v1260_v30, %v1259_v25 }
 0x14e   :  { %v1263_v36 = vadd.f32 %v1262_v21, %v1261_v33  ;;  %v1066_v37 = vadd.f32 %v1065_v35, %v1064_v2 }
 0x150   :  { %v1068_v14 = vadd.f32 %v1067_v12, %v1066_v37  ;;  %v1265_v44 = vadd.f32 %v1264_v39, %v1263_v36 }
 0x152   :  { %v1267_v47 = vadd.f32 %v1266_v46, %v1265_v44  ;;  %v1070_v9 = vadd.f32 %v1069_v29, %v1068_v14 }
 0x154   :  { %v1072_v28 = vadd.f32 %v1071_v62, %v1070_v9  ;;  %v1269_v32 = vadd.f32 %v1268_v48, %v1267_v47 }
 0x156   :  { %v1271_v52 = vadd.f32 %v1270_v49, %v1269_v32  ;;  %v1074_v16 = vadd.f32 %v1073_v19, %v1072_v28 }
 0x158   :  { %v1076_v56 = vadd.f32 %v1075_v57, %v1074_v16  ;;  %v1273_v59 = vadd.f32 %v1272_v54, %v1271_v52 }
 0x15a   :  { %v1078_v0 = vadd.f32 %v1077_v63, %v1076_v56  ;;  %v1275_v58 = vadd.f32 %v1274_v61, %v1273_v59 }
 0x15c   :  { %v1079_v4 = vrot.slane %v1078_v0, 4  ;;  %v1277_v5 = vadd.f32 %v1276_v7, %v1275_v58 }
 0x15e   :  { %v1080_v41 = vadd.f32 %v1079_v4, %v1078_v0  ;;  %v1278_v53 = vrot.slane %v1277_v5, 4 }
 0x160   :  { %v1081_v40 = vrot.slane %v1080_v41, 2  ;;  %v1279_v6 = vadd.f32 %v1278_v53, %v1277_v5 }
 0x162   :  { %v1082_v23 = vadd.f32 %v1081_v40, %v1080_v41  ;;  %v1280_v26 = vrot.slane %v1279_v6, 2 }
 0x164   :  { %v1083_v55 = vrot.slane %v1082_v23, 1  ;;  %v1281_v10 = vadd.f32 %v1280_v26, %v1279_v6 }
 0x166   :  { %v1084_v50 = vadd.f32 %v1083_v55, %v1082_v23  ;;  %v1282_v11 = vrot.slane %v1281_v10, 1 }
 0x168   :  { %1086 = vst.msk [vmem:[%s2397_s3] sm:$0x1] %vm1085_vm4, %v1084_v50  ;;  %v1283_v1 = vadd.f32 %v1282_v11, %v1281_v10 }
 0x16a   :  { %1284 = vst.msk [vmem:[%s2398_s4] sm:$0x1] %vm1085_vm4, %v1283_v1 }

// kernel: corblock_s_forward.13
= control target key start
LH: loop header
LB: loop body
LE: loop exit
PB: predicated region body
PF: predicated region fallthrough
CT: control target
= control target key end

     0   :  { %s631_s15 = smov 0   ;;  %s697_s0 = inlined_call_operand.vmem [shape: bf16[2,16,8,16], index: 0, kind: input, shape index: {}]   ;;  %s698_s1 = inlined_call_operand.vmem [shape: bf16[1,16,8], index: 1, kind: input, shape index: {}]   ;;  %s699_s2 = inlined_call_operand.vmem [shape: bf16[2,64,8], index: 2, kind: output, shape index: {0}]   ;;  %s700_s3 = inlined_call_operand.vmem [shape: f32[2,1,8], index: 3, kind: output, shape index: {1}]   ;;  %s701_s4 = inlined_call_operand.vmem [shape: f32[2,1,8], index: 4, kind: output, shape index: {2}]  }
   0x1 LB: > { %s530_s16 = sadd.s32 4294967295, %s604_s15   ;;  %p534_p0 = scmp.ge.s32.totalorder %s604_s15, 1  ;;  %s604_s15 = sphi %s631_s15, %s15_s15  }
   0x2   : > { %p167_p1 = scmp.lt.s32.totalorder %s604_s15, 3 }
   0x4   : > { %p168_p2 = pnand %p534_p0, %p167_p1 }
   0x5   : > { %v593_v0 = vld [vmem:[%s698_s1] sm:$0xff] (!%p168_p2)   ;;  %p199_p3 = scmp.lt.s32.totalorder (!%p168_p2), %s530_s16, 1  ;;  %vm252_vm0 = vcmask (!%p168_p2), 130048   ;;  %vm362_vm1 = vcmask (!%p168_p2), 60416   ;;  %vm371_vm2 = vcmask (!%p168_p2), 64512   ;;  %vm393_vm3 = vcmask (!%p168_p2), 57344  }
   0x6   : > { %171 = sbr.rel (%p168_p2) target bundleno = 263 (0x107), region = 28  ;;  %573 = vmatprep.subr.bf16.mxu0 (!%p168_p2), %v593_v0  ;;  %583 = vmatprep.subr.bf16.mxu1 (!%p168_p2), %v593_v0 }
   0x7   : > { %574 = vmatpush3.bf16.msra.mxu0 (!%p168_p2), %v593_v0  ;;  %584 = vmatpush3.bf16.msra.mxu1 (!%p168_p2), %v593_v0 }
   0xd   : > { %s703_s16 = smov (!%p199_p3, %s530_s16), 1 }
   0xe   : > { %s558_s19 = sshll.u32 %s703_s16, 6  ;;  %s559_s23 = sshll.u32 %s703_s16, 5 }
   0xf   : > { %s203_s22 = scalar_lea.vmem %s697_s0, %s558_s19  ;;  %s652_s26 = scalar_lea.vmem %s699_s2, %s559_s23 }
  0x10   : > { %v594_v1 = vld [vmem:[%s203_s22] ss:$8 sps:$4 sm:$0xff]   ;;  %v595_v2 = vld [vmem:[%s203_s22 + $0x10] ss:$8 sps:$4 sm:$0xff]   ;;  %s211_s29 = scalar_lea.vmem %s700_s3, %s703_s16  ;;  %s214_s6 = scalar_lea.vmem %s701_s4, %s703_s16 }
  0x11   : > { %575 = vmatprep.mubr.msk.bf16.mxu0 %vm252_vm0, %v594_v1  ;;  %v596_v3 = vld [vmem:[%s203_s22 + $0x20] ss:$8 sps:$4 sm:$0xff]   ;;  %v597_v4 = vld [vmem:[%s203_s22 + $0x30] ss:$8 sps:$4 sm:$0xff]  }
  0x12   : > { %576 = vmatmul.mubr.msk.bf16.vlgmr.msra.gmra.mrb[0].mxu0 %vm252_vm0, %v595_v2  ;;  %579 = vmatprep.mubr.msk.bf16.mxu1 %vm252_vm0, %v596_v3 }
  0x13   : > { %580 = vmatmul.mubr.msk.bf16.vlgmr.msra.gmra.mrb[0].mxu1 %vm252_vm0, %v597_v4 }
  0xe5   : > { %v577_v5 = vpop.f32.mrb[0].mxu0 }
  0xe6   : > { %v562_v6 = vpack.c.bf16 %v577_v5, %v577_v5  ;;  %v299_v7 = vpop.f32.mrb[1].mxu0  ;;  %v581_v11 = vpop.f32.mrb[0].mxu1  ;;  %v397_v12 = vmul.f32 %v577_v5, %v577_v5  ;;  %v375_v21 = vsel %vm371_vm2, %v577_v5, 0.0 }
  0xe7   : > { %v560_v8 = vpack.c.bf16 %v299_v7, %v299_v7  ;;  %v395_v9 = vmul.f32 %v299_v7, %v299_v7  ;;  %v578_v10 = vpop.f32.mrb[2].mxu0  ;;  %v315_v15 = vpop.f32.mrb[1].mxu1  ;;  %v372_v16 = vsel %vm371_vm2, %v299_v7, 0.0  ;;  %v566_v23 = vpack.c.bf16 %v581_v11, %v581_v11 }
  0xe8   : > { %365 = vst.msk [vmem:[%s652_s26 + $0x8] sm:$0xf] %vm362_vm1, %v562_v6  ;;  %v563_v13 = vpack.c.bf16 %v578_v10, %v578_v10  ;;  %v302_v14 = vpop.f32.mrb[3].mxu0  ;;  %v582_v20 = vpop.f32.mrb[2].mxu1  ;;  %v398_v26 = vmul.f32 %v578_v10, %v578_v10  ;;  %v564_v28 = vpack.c.bf16 %v315_v15, %v315_v15  ;;  %v399_v31 = vmul.f32 %v315_v15, %v315_v15 }
  0xe9   : > { %363 = vst.msk [vmem:[%s652_s26] sm:$0xf] %vm362_vm1, %v560_v8  ;;  %v561_v17 = vpack.c.bf16 %v302_v14, %v302_v14  ;;  %v373_v18 = vsel %vm371_vm2, %v302_v14, 0.0  ;;  %v396_v19 = vmul.f32 %v302_v14, %v302_v14  ;;  %v318_v24 = vpop.f32.mrb[3].mxu1  ;;  %v403_v25 = vsel %vm371_vm2, %v395_v9, 0.0 }
  0xea   : > { %366 = vst.msk [vmem:[%s652_s26 + $0xc] sm:$0xf] %vm362_vm1, %v563_v13  ;;  %v374_v22 = vadd.f32 %v373_v18, %v372_v16  ;;  %369 = vst.msk [vmem:[%s652_s26 + $0x18] sm:$0xf] %vm362_vm1, %v566_v23  ;;  %v567_v32 = vpack.c.bf16 %v582_v20, %v582_v20  ;;  %v406_v33 = vsel %vm371_vm2, %v397_v12, 0.0  ;;  %v377_v34 = vsel %vm371_vm2, %v578_v10, 0.0 }
  0xeb   : > { %364 = vst.msk [vmem:[%s652_s26 + $0x4] sm:$0xf] %vm362_vm1, %v561_v17  ;;  %v404_v27 = vsel %vm371_vm2, %v396_v19, 0.0  ;;  %367 = vst.msk [vmem:[%s652_s26 + $0x10] sm:$0xf] %vm362_vm1, %v564_v28  ;;  %v379_v35 = vsel %vm371_vm2, %v315_v15, 0.0  ;;  %v565_v36 = vpack.c.bf16 %v318_v24, %v318_v24  ;;  %v400_v41 = vmul.f32 %v318_v24, %v318_v24 }
  0xec   : > { %v376_v29 = vadd.f32 %v375_v21, %v374_v22  ;;  %v405_v30 = vadd.f32 %v404_v27, %v403_v25  ;;  %370 = vst.msk [vmem:[%s652_s26 + $0x1c] sm:$0xf] %vm362_vm1, %v567_v32  ;;  %v408_v39 = vsel %vm371_vm2, %v398_v26, 0.0  ;;  %v410_v40 = vsel %vm371_vm2, %v399_v31, 0.0 }
  0xed   : > { %368 = vst.msk [vmem:[%s652_s26 + $0x14] sm:$0xf] %vm362_vm1, %v565_v36  ;;  %v401_v44 = vmul.f32 %v581_v11, %v581_v11  ;;  %v381_v45 = vsel %vm371_vm2, %v318_v24, 0.0  ;;  %v383_v48 = vsel %vm371_vm2, %v581_v11, 0.0  ;;  %v402_v49 = vmul.f32 %v582_v20, %v582_v20 }
  0xee   : > { %v407_v37 = vadd.f32 %v406_v33, %v405_v30  ;;  %v378_v38 = vadd.f32 %v377_v34, %v376_v29  ;;  %v412_v50 = vsel %vm371_vm2, %v400_v41, 0.0  ;;  %v385_v54 = vsel %vm371_vm2, %v582_v20, 0.0 }
  0xef   : > { %v414_v53 = vsel %vm371_vm2, %v401_v44, 0.0  ;;  %v416_v57 = vsel %vm371_vm2, %v402_v49, 0.0 }
  0xf0   : > { %v380_v42 = vadd.f32 %v379_v35, %v378_v38  ;;  %v409_v43 = vadd.f32 %v408_v39, %v407_v37 }
  0xf2   : > { %v411_v46 = vadd.f32 %v410_v40, %v409_v43  ;;  %v382_v47 = vadd.f32 %v381_v45, %v380_v42 }
  0xf4   : > { %v384_v51 = vadd.f32 %v383_v48, %v382_v47  ;;  %v413_v52 = vadd.f32 %v412_v50, %v411_v46 }
  0xf6   : > { %v386_v55 = vadd.f32 %v385_v54, %v384_v51  ;;  %v415_v56 = vadd.f32 %v414_v53, %v413_v52 }
  0xf8   : > { %v387_v58 = vrot.slane %v386_v55, 4  ;;  %v417_v59 = vadd.f32 %v416_v57, %v415_v56 }
  0xfa   : > { %v388_v60 = vadd.f32 %v387_v58, %v386_v55  ;;  %v418_v61 = vrot.slane %v417_v59, 4 }
  0xfc   : > { %v389_v62 = vrot.slane %v388_v60, 2  ;;  %v419_v63 = vadd.f32 %v418_v61, %v417_v59 }
  0xfe   : > { %v390_v0 = vadd.f32 %v389_v62, %v388_v60  ;;  %v420_v1 = vrot.slane %v419_v63, 2 }
 0x100   : > { %v391_v2 = vrot.slane %v390_v0, 1  ;;  %v421_v3 = vadd.f32 %v420_v1, %v419_v63 }
 0x102   : > { %v392_v4 = vadd.f32 %v391_v2, %v390_v0  ;;  %v422_v5 = vrot.slane %v421_v3, 1 }
 0x104   : > { %394 = vst.msk [vmem:[%s211_s29] sm:$0x1] %vm393_vm3, %v392_v4  ;;  %v423_v6 = vadd.f32 %v422_v5, %v421_v3 }
 0x106   : > { %424 = vst.msk [vmem:[%s214_s6] sm:$0x1] %vm393_vm3, %v423_v6 }
 0x107 PF: > { %s15_s15 = sadd.s32 1, %s604_s15  }
 0x108   : > { %p12_p4 = scmp.ge.s32.totalorder %s15_s15, 4  }
 0x10a   :  { %14 = sbr.rel (!%p12_p4) target bundleno = 1 (0x1), region = 82 }

// kernel: corblock_s_forward.17
= control target key start
LH: loop header
LB: loop body
LE: loop exit
PB: predicated region body
PF: predicated region fallthrough
CT: control target
= control target key end

     0   :  { %vm139_vm0 = vcmask 261120   ;;  %vm325_vm1 = vcmask 60416   ;;  %vm342_vm2 = vcmask 64512   ;;  %vm380_vm3 = vcmask 57344   ;;  %s784_s1 = inlined_call_operand.vmem [shape: bf16[32,8], index: 1, kind: input, shape index: {}]   ;;  %s785_s0 = inlined_call_operand.vmem [shape: bf16[128,32], index: 0, kind: input, shape index: {}]   ;;  %s786_s2 = inlined_call_operand.vmem [shape: f32[1,32], index: 2, kind: input, shape index: {}]   ;;  %s787_s3 = inlined_call_operand.vmem [shape: f32[1,32], index: 3, kind: input, shape index: {}]   ;;  %s788_s4 = inlined_call_operand.vmem [shape: bf16[128,8], index: 4, kind: output, shape index: {0}]   ;;  %s789_s5 = inlined_call_operand.vmem [shape: f32[1,1,8], index: 5, kind: output, shape index: {1}]   ;;  %s790_s6 = inlined_call_operand.vmem [shape: f32[1,1,8], index: 6, kind: output, shape index: {2}]  }
   0x1   :  { %v565_v0 = vld [vmem:[%s784_s1] sm:$0xff]   ;;  %v566_v1 = vld [vmem:[%s784_s1 + $0x8] sm:$0xff]   ;;  %v525_v7 = vld [vmem:[%s785_s0 + $0x10] sm:$0xff]  }
   0x2   :  { %541 = vmatprep.subr.bf16.mxu0 %v565_v0  ;;  %v493_v2 = vld [vmem:[%s785_s0] sm:$0xff]   ;;  %561 = vmatprep.subr.bf16.mxu1 %v565_v0  ;;  %v524_v6 = vld [vmem:[%s785_s0 + $0x8] sm:$0xff]   ;;  %v526_v8 = vld [vmem:[%s785_s0 + $0x18] sm:$0xff]   ;;  %v502_v12 = vunpack.c.l.bf16 %v525_v7  ;;  %v503_v13 = vunpack.c.h.bf16 %v525_v7 }
   0x3   :  { %v614_v3 = vld [vmem:[%s786_s2] ss:$0 sm:$0xff]  ;;  %542 = vmatpush3.bf16.msra.mxu0 %v565_v0  ;;  %v494_v4 = vunpack.c.l.bf16 %v493_v2  ;;  %v495_v5 = vunpack.c.h.bf16 %v493_v2  ;;  %563 = vmatpush3.bf16.msra.mxu1 %v565_v0  ;;  %v498_v10 = vunpack.c.l.bf16 %v524_v6  ;;  %v499_v11 = vunpack.c.h.bf16 %v524_v6  ;;  %v528_v35 = vld [vmem:[%s785_s0 + $0x28] sm:$0xff]   ;;  %v529_v40 = vld [vmem:[%s785_s0 + $0x30] sm:$0xff]  }
   0x4   :  { %543 = vmatprep.subr.bf16.mxu0 %v566_v1  ;;  %v628_v9 = vld [vmem:[%s787_s3] ss:$0 sm:$0xff]  ;;  %562 = vmatprep.subr.bf16.mxu1 %v566_v1  ;;  %v506_v16 = vunpack.c.l.bf16 %v526_v8  ;;  %v507_v17 = vunpack.c.h.bf16 %v526_v8  ;;  %v64_v20 = vmul.f32 %v502_v12, %v614_v3  ;;  %v65_v21 = vmul.f32 %v503_v13, %v614_v3  ;;  %v530_v44 = vld [vmem:[%s785_s0 + $0x38] sm:$0xff]  }
   0x5   :  { %v60_v14 = vmul.f32 %v494_v4, %v614_v3  ;;  %v61_v15 = vmul.f32 %v495_v5, %v614_v3  ;;  %v62_v18 = vmul.f32 %v498_v10, %v614_v3  ;;  %v63_v19 = vmul.f32 %v499_v11, %v614_v3  ;;  %v527_v30 = vld [vmem:[%s785_s0 + $0x20] sm:$0xff]  }
   0x6   :  { %v66_v24 = vmul.f32 %v506_v16, %v614_v3  ;;  %v67_v25 = vmul.f32 %v507_v17, %v614_v3  ;;  %v87_v28 = vadd.f32 %v628_v9, %v64_v20  ;;  %v88_v29 = vadd.f32 %v628_v9, %v65_v21 }
   0x7   :  { %544 = vmatpush3.bf16.msra.mxu0 %v566_v1  ;;  %v83_v22 = vadd.f32 %v628_v9, %v60_v14  ;;  %v84_v23 = vadd.f32 %v628_v9, %v61_v15  ;;  %v85_v26 = vadd.f32 %v628_v9, %v62_v18  ;;  %v86_v27 = vadd.f32 %v628_v9, %v63_v19 }
   0x8   :  { %564 = vmatpush3.bf16.msra.mxu1 %v566_v1  ;;  %v89_v33 = vadd.f32 %v628_v9, %v66_v24  ;;  %v90_v34 = vadd.f32 %v628_v9, %v67_v25  ;;  %v103_v38 = vmax.f32 %v87_v28, 0.0  ;;  %v104_v39 = vmax.f32 %v88_v29, 0.0 }
   0x9   :  { %v99_v31 = vmax.f32 %v83_v22, 0.0  ;;  %v100_v32 = vmax.f32 %v84_v23, 0.0  ;;  %v101_v36 = vmax.f32 %v85_v26, 0.0  ;;  %v102_v37 = vmax.f32 %v86_v27, 0.0 }
   0xa   :  { %v105_v42 = vmax.f32 %v89_v33, 0.0  ;;  %v510_v43 = vunpack.c.l.bf16 %v527_v30  ;;  %v117_v46 = vpack.c.bf16 %v104_v39, %v103_v38  ;;  %v511_v47 = vunpack.c.h.bf16 %v527_v30 }
   0xb   :  { %v115_v41 = vpack.c.bf16 %v100_v32, %v99_v31  ;;  %v116_v45 = vpack.c.bf16 %v102_v37, %v101_v36  ;;  %v514_v48 = vunpack.c.l.bf16 %v528_v35  ;;  %v106_v49 = vmax.f32 %v90_v34, 0.0 }
   0xc   :  { %v68_v50 = vmul.f32 %v510_v43, %v614_v3  ;;  %v515_v51 = vunpack.c.h.bf16 %v528_v35  ;;  %v518_v52 = vunpack.c.l.bf16 %v529_v40  ;;  %v69_v53 = vmul.f32 %v511_v47, %v614_v3 }
   0xd   :  { %545 = vmatprep.mubr.msk.bf16.mxu0 %vm139_vm0, %v115_v41  ;;  %v70_v54 = vmul.f32 %v514_v48, %v614_v3  ;;  %v519_v55 = vunpack.c.h.bf16 %v529_v40  ;;  %v522_v56 = vunpack.c.l.bf16 %v530_v44  ;;  %v523_v60 = vunpack.c.h.bf16 %v530_v44 }
   0xe   :  { %546 = vmatmul.mubr.msk.bf16.vlgmr.msra.gmra.mrb[0].mxu0 %vm139_vm0, %v116_v45  ;;  %v91_v57 = vadd.f32 %v628_v9, %v68_v50  ;;  %v71_v58 = vmul.f32 %v515_v51, %v614_v3  ;;  %v72_v59 = vmul.f32 %v518_v52, %v614_v3  ;;  %v92_v61 = vadd.f32 %v628_v9, %v69_v53 }
   0xf   :  { %549 = vmatprep.mubr.msk.bf16.mxu0 %vm139_vm0, %v117_v46  ;;  %v93_v62 = vadd.f32 %v628_v9, %v70_v54  ;;  %v73_v63 = vmul.f32 %v519_v55, %v614_v3  ;;  %v74_v0 = vmul.f32 %v522_v56, %v614_v3  ;;  %v75_v5 = vmul.f32 %v523_v60, %v614_v3 }
  0x10   :  { %v107_v1 = vmax.f32 %v91_v57, 0.0  ;;  %v94_v2 = vadd.f32 %v628_v9, %v71_v58  ;;  %v95_v4 = vadd.f32 %v628_v9, %v72_v59  ;;  %v118_v6 = vpack.c.bf16 %v106_v49, %v105_v42 }
  0x11   :  { %v108_v7 = vmax.f32 %v92_v61, 0.0  ;;  %v109_v8 = vmax.f32 %v93_v62, 0.0  ;;  %v96_v10 = vadd.f32 %v628_v9, %v73_v63  ;;  %v97_v13 = vadd.f32 %v628_v9, %v74_v0 }
  0x12   :  { %v110_v11 = vmax.f32 %v94_v2, 0.0  ;;  %v111_v12 = vmax.f32 %v95_v4, 0.0  ;;  %v98_v14 = vadd.f32 %v628_v9, %v75_v5 }
  0x13   :  { %v119_v15 = vpack.c.bf16 %v108_v7, %v107_v1  ;;  %v112_v16 = vmax.f32 %v96_v10, 0.0  ;;  %v113_v3 = vmax.f32 %v97_v13, 0.0 }
  0x14   :  { %v120_v17 = vpack.c.bf16 %v110_v11, %v109_v8  ;;  %v114_v19 = vmax.f32 %v98_v14, 0.0 }
  0x15   :  { %553 = vmatprep.mubr.msk.bf16.mxu1 %vm139_vm0, %v119_v15  ;;  %v121_v18 = vpack.c.bf16 %v112_v16, %v111_v12 }
  0x16   :  { %550 = vmatmul.mubr.msk.bf16.gmra.mrb[4].mxu0 %vm139_vm0, %v118_v6  ;;  %554 = vmatmul.mubr.msk.bf16.vlgmr.msra.gmra.mrb[0].mxu1 %vm139_vm0, %v120_v17  ;;  %v122_v20 = vpack.c.bf16 %v114_v19, %v113_v3 }
  0x17   :  { %557 = vmatprep.mubr.msk.bf16.mxu1 %vm139_vm0, %v121_v18 }
  0x1e   :  { %558 = vmatmul.mubr.msk.bf16.gmra.mrb[4].mxu1 %vm139_vm0, %v122_v20 }
  0xe1   :  { %v547_v21 = vpop.f32.mrb[0].mxu0 }
  0xe2   :  { %v478_v9 = vpack.c.bf16 %v547_v21, %v547_v21  ;;  %v198_v22 = vpop.f32.mrb[1].mxu0  ;;  %v384_v26 = vmul.f32 %v547_v21, %v547_v21  ;;  %v346_v35 = vsel %vm342_vm2, %v547_v21, 0.0 }
  0xe3   :  { %v476_v23 = vpack.c.bf16 %v198_v22, %v198_v22  ;;  %v382_v24 = vmul.f32 %v198_v22, %v198_v22  ;;  %v548_v25 = vpop.f32.mrb[2].mxu0  ;;  %v343_v29 = vsel %vm342_vm2, %v198_v22, 0.0 }
  0xe4   :  { %328 = vst.msk [vmem:[%s788_s4 + $0x8] sm:$0xf] %vm325_vm1, %v478_v9  ;;  %v479_v27 = vpack.c.bf16 %v548_v25, %v548_v25  ;;  %v201_v28 = vpop.f32.mrb[3].mxu0  ;;  %v385_v33 = vmul.f32 %v548_v25, %v548_v25  ;;  %v401_v40 = vsel %vm342_vm2, %v384_v26, 0.0  ;;  %v348_v42 = vsel %vm342_vm2, %v548_v25, 0.0 }
  0xe5   :  { %326 = vst.msk [vmem:[%s788_s4] sm:$0xf] %vm325_vm1, %v476_v23  ;;  %v477_v30 = vpack.c.bf16 %v201_v28, %v201_v28  ;;  %v344_v31 = vsel %vm342_vm2, %v201_v28, 0.0  ;;  %v383_v32 = vmul.f32 %v201_v28, %v201_v28  ;;  %v398_v36 = vsel %vm342_vm2, %v382_v24, 0.0 }
  0xe6   :  { %329 = vst.msk [vmem:[%s788_s4 + $0xc] sm:$0xf] %vm325_vm1, %v479_v27  ;;  %v345_v34 = vadd.f32 %v344_v31, %v343_v29  ;;  %v403_v43 = vsel %vm342_vm2, %v385_v33, 0.0 }
  0xe7   :  { %327 = vst.msk [vmem:[%s788_s4 + $0x4] sm:$0xf] %vm325_vm1, %v477_v30  ;;  %v399_v37 = vsel %vm342_vm2, %v383_v32, 0.0 }
  0xe8   :  { %v347_v38 = vadd.f32 %v346_v35, %v345_v34  ;;  %v400_v39 = vadd.f32 %v399_v37, %v398_v36 }
  0xe9   :  { %v551_v41 = vpop.f32.mrb[4].mxu0  ;;  %v555_v47 = vpop.f32.mrb[0].mxu1 }
  0xea   :  { %v402_v44 = vadd.f32 %v401_v40, %v400_v39  ;;  %v482_v45 = vpack.c.bf16 %v551_v41, %v551_v41  ;;  %v214_v46 = vpop.f32.mrb[5].mxu0  ;;  %v349_v49 = vadd.f32 %v348_v42, %v347_v38  ;;  %v230_v53 = vpop.f32.mrb[1].mxu1  ;;  %v388_v58 = vmul.f32 %v551_v41, %v551_v41 }
  0xeb   :  { %v480_v48 = vpack.c.bf16 %v214_v46, %v214_v46  ;;  %v350_v50 = vsel %vm342_vm2, %v214_v46, 0.0  ;;  %v386_v51 = vmul.f32 %v214_v46, %v214_v46  ;;  %v552_v52 = vpop.f32.mrb[6].mxu0  ;;  %v556_v57 = vpop.f32.mrb[2].mxu1  ;;  %v486_v2 = vpack.c.bf16 %v555_v47, %v555_v47 }
  0xec   :  { %332 = vst.msk [vmem:[%s788_s4 + $0x18] sm:$0xf] %vm325_vm1, %v482_v45  ;;  %v404_v54 = vadd.f32 %v403_v43, %v402_v44  ;;  %v483_v55 = vpack.c.bf16 %v552_v52, %v552_v52  ;;  %v217_v56 = vpop.f32.mrb[7].mxu0  ;;  %v351_v59 = vadd.f32 %v350_v50, %v349_v49  ;;  %v233_v62 = vpop.f32.mrb[3].mxu1  ;;  %v354_v4 = vsel %vm342_vm2, %v551_v41, 0.0 }
  0xed   :  { %330 = vst.msk [vmem:[%s788_s4 + $0x10] sm:$0xf] %vm325_vm1, %v480_v48  ;;  %v405_v60 = vsel %vm342_vm2, %v386_v51, 0.0  ;;  %v481_v61 = vpack.c.bf16 %v217_v56, %v217_v56  ;;  %v352_v0 = vsel %vm342_vm2, %v217_v56, 0.0  ;;  %v387_v1 = vmul.f32 %v217_v56, %v217_v56  ;;  %336 = vst.msk [vmem:[%s788_s4 + $0x28] sm:$0xf] %vm325_vm1, %v486_v2 }
  0xee   :  { %v406_v63 = vadd.f32 %v405_v60, %v404_v54  ;;  %333 = vst.msk [vmem:[%s788_s4 + $0x1c] sm:$0xf] %vm325_vm1, %v483_v55  ;;  %v353_v5 = vadd.f32 %v352_v0, %v351_v59  ;;  %v389_v6 = vmul.f32 %v552_v52, %v552_v52  ;;  %v484_v8 = vpack.c.bf16 %v230_v53, %v230_v53 }
  0xef   :  { %331 = vst.msk [vmem:[%s788_s4 + $0x14] sm:$0xf] %vm325_vm1, %v481_v61  ;;  %v407_v7 = vsel %vm342_vm2, %v387_v1, 0.0  ;;  %v390_v10 = vmul.f32 %v230_v53, %v230_v53  ;;  %v487_v13 = vpack.c.bf16 %v556_v57, %v556_v57  ;;  %v409_v14 = vsel %vm342_vm2, %v388_v58, 0.0 }
  0xf0   :  { %v355_v11 = vadd.f32 %v354_v4, %v353_v5  ;;  %v408_v12 = vadd.f32 %v407_v7, %v406_v63  ;;  %v356_v15 = vsel %vm342_vm2, %v552_v52, 0.0  ;;  %334 = vst.msk [vmem:[%s788_s4 + $0x20] sm:$0xf] %vm325_vm1, %v484_v8  ;;  %v358_v16 = vsel %vm342_vm2, %v230_v53, 0.0 }
  0xf1   :  { %v485_v17 = vpack.c.bf16 %v233_v62, %v233_v62  ;;  %v559_v18 = vpop.f32.mrb[4].mxu1  ;;  %337 = vst.msk [vmem:[%s788_s4 + $0x2c] sm:$0xf] %vm325_vm1, %v487_v13  ;;  %v411_v21 = vsel %vm342_vm2, %v389_v6, 0.0  ;;  %v413_v9 = vsel %vm342_vm2, %v390_v10, 0.0  ;;  %v391_v22 = vmul.f32 %v233_v62, %v233_v62 }
  0xf2   :  { %v410_v3 = vadd.f32 %v409_v14, %v408_v12  ;;  %v357_v19 = vadd.f32 %v356_v15, %v355_v11  ;;  %v246_v20 = vpop.f32.mrb[5].mxu1  ;;  %v490_v23 = vpack.c.bf16 %v559_v18, %v559_v18  ;;  %v392_v29 = vmul.f32 %v555_v47, %v555_v47 }
  0xf3   :  { %335 = vst.msk [vmem:[%s788_s4 + $0x24] sm:$0xf] %vm325_vm1, %v485_v17  ;;  %v560_v24 = vpop.f32.mrb[6].mxu1  ;;  %v488_v27 = vpack.c.bf16 %v246_v20, %v246_v20  ;;  %v360_v30 = vsel %vm342_vm2, %v233_v62, 0.0  ;;  %v362_v32 = vsel %vm342_vm2, %v555_v47, 0.0  ;;  %v393_v35 = vmul.f32 %v556_v57, %v556_v57 }
  0xf4   :  { %v359_v25 = vadd.f32 %v358_v16, %v357_v19  ;;  %v412_v26 = vadd.f32 %v411_v21, %v410_v3  ;;  %v249_v28 = vpop.f32.mrb[7].mxu1  ;;  %340 = vst.msk [vmem:[%s788_s4 + $0x38] sm:$0xf] %vm325_vm1, %v490_v23  ;;  %v491_v31 = vpack.c.bf16 %v560_v24, %v560_v24  ;;  %v415_v36 = vsel %vm342_vm2, %v391_v22, 0.0 }
  0xf5   :  { %338 = vst.msk [vmem:[%s788_s4 + $0x30] sm:$0xf] %vm325_vm1, %v488_v27  ;;  %v394_v37 = vmul.f32 %v246_v20, %v246_v20  ;;  %v489_v38 = vpack.c.bf16 %v249_v28, %v249_v28  ;;  %v417_v41 = vsel %vm342_vm2, %v392_v29, 0.0  ;;  %v364_v42 = vsel %vm342_vm2, %v556_v57, 0.0 }
  0xf6   :  { %v414_v33 = vadd.f32 %v413_v9, %v412_v26  ;;  %v361_v34 = vadd.f32 %v360_v30, %v359_v25  ;;  %341 = vst.msk [vmem:[%s788_s4 + $0x3c] sm:$0xf] %vm325_vm1, %v491_v31  ;;  %v366_v43 = vsel %vm342_vm2, %v246_v20, 0.0  ;;  %v419_v46 = vsel %vm342_vm2, %v393_v35, 0.0 }
  0xf7   :  { %339 = vst.msk [vmem:[%s788_s4 + $0x34] sm:$0xf] %vm325_vm1, %v489_v38  ;;  %v421_v47 = vsel %vm342_vm2, %v394_v37, 0.0  ;;  %v395_v48 = vmul.f32 %v249_v28, %v249_v28  ;;  %v396_v51 = vmul.f32 %v559_v18, %v559_v18  ;;  %v368_v52 = vsel %vm342_vm2, %v249_v28, 0.0 }
  0xf8   :  { %v363_v39 = vadd.f32 %v362_v32, %v361_v34  ;;  %v416_v40 = vadd.f32 %v415_v36, %v414_v33  ;;  %v370_v55 = vsel %vm342_vm2, %v559_v18, 0.0  ;;  %v397_v56 = vmul.f32 %v560_v24, %v560_v24 }
  0xf9   :  { %v423_v57 = vsel %vm342_vm2, %v395_v48, 0.0  ;;  %v425_v60 = vsel %vm342_vm2, %v396_v51, 0.0  ;;  %v372_v61 = vsel %vm342_vm2, %v560_v24, 0.0 }
  0xfa   :  { %v418_v44 = vadd.f32 %v417_v41, %v416_v40  ;;  %v365_v45 = vadd.f32 %v364_v42, %v363_v39  ;;  %v427_v0 = vsel %vm342_vm2, %v397_v56, 0.0 }
  0xfc   :  { %v367_v49 = vadd.f32 %v366_v43, %v365_v45  ;;  %v420_v50 = vadd.f32 %v419_v46, %v418_v44 }
  0xfe   :  { %v422_v53 = vadd.f32 %v421_v47, %v420_v50  ;;  %v369_v54 = vadd.f32 %v368_v52, %v367_v49 }
 0x100   :  { %v371_v58 = vadd.f32 %v370_v55, %v369_v54  ;;  %v424_v59 = vadd.f32 %v423_v57, %v422_v53 }
 0x102   :  { %v373_v62 = vadd.f32 %v372_v61, %v371_v58  ;;  %v426_v63 = vadd.f32 %v425_v60, %v424_v59 }
 0x104   :  { %v374_v1 = vrot.slane %v373_v62, 4  ;;  %v428_v2 = vadd.f32 %v427_v0, %v426_v63 }
 0x106   :  { %v375_v4 = vadd.f32 %v374_v1, %v373_v62  ;;  %v429_v5 = vrot.slane %v428_v2, 4 }
 0x108   :  { %v376_v6 = vrot.slane %v375_v4, 2  ;;  %v430_v7 = vadd.f32 %v429_v5, %v428_v2 }
 0x10a   :  { %v377_v8 = vadd.f32 %v376_v6, %v375_v4  ;;  %v431_v10 = vrot.slane %v430_v7, 2 }
 0x10c   :  { %v378_v11 = vrot.slane %v377_v8, 1  ;;  %v432_v12 = vadd.f32 %v431_v10, %v430_v7 }
 0x10e   :  { %v379_v13 = vadd.f32 %v378_v11, %v377_v8  ;;  %v433_v14 = vrot.slane %v432_v12, 1 }
 0x110   :  { %381 = vst.msk [vmem:[%s789_s5] sm:$0x1] %vm380_vm3, %v379_v13  ;;  %v434_v15 = vadd.f32 %v433_v14, %v432_v12 }
 0x112   :  { %435 = vst.msk [vmem:[%s790_s6] sm:$0x1] %vm380_vm3, %v434_v15 }

// kernel: corblock_s_forward.16
= control target key start
LH: loop header
LB: loop body
LE: loop exit
PB: predicated region body
PF: predicated region fallthrough
CT: control target
= control target key end

     0   :  { %s2058_s15 = smov 0   ;;  %s2391_s0 = inlined_call_operand.vmem [shape: bf16[2,18,9,64], index: 0, kind: input, shape index: {}]   ;;  %s2392_s1 = inlined_call_operand.vmem [shape: bf16[6,64,32], index: 1, kind: input, shape index: {}]   ;;  %s2393_s2 = inlined_call_operand.vmem [shape: bf16[2,64,32], index: 2, kind: output, shape index: {0}]   ;;  %s2394_s3 = inlined_call_operand.vmem [shape: f32[2,1,32], index: 3, kind: output, shape index: {1}]   ;;  %s2395_s4 = inlined_call_operand.vmem [shape: f32[2,1,32], index: 4, kind: output, shape index: {2}]  }
   0x1 LB: > { %s1609_s16 = sadd.s32 4294967295, %s2031_s15   ;;  %p1613_p0 = scmp.ge.s32.totalorder %s2031_s15, 1  ;;  %s2031_s15 = sphi %s2058_s15, %s15_s15  }
   0x2   : > { %p167_p1 = scmp.lt.s32.totalorder %s2031_s15, 3 }
   0x4   : > { %p168_p2 = pnand %p1613_p0, %p167_p1 }
   0x5   : > { %v1989_v0 = vld [vmem:[%s2392_s1 + $0x20] sm:$0xff] (!%p168_p2)   ;;  %p199_p3 = scmp.lt.s32.totalorder (!%p168_p2), %s1609_s16, 1  ;;  %v1991_v2 = vld [vmem:[%s2392_s1 + $0x28] sm:$0xff] (!%p168_p2)   ;;  %v1993_v4 = vld [vmem:[%s2392_s1 + $0x30] sm:$0xff] (!%p168_p2)   ;;  %vm240_vm0 = vsmask.f32 (!%p168_p2), 3328 }
   0x6   : > { %171 = sbr.rel (%p168_p2) target bundleno = 334 (0x14e), region = 28  ;;  %v1990_v1 = vld [vmem:[%s2392_s1 + $0x60] sm:$0xff] (!%p168_p2)   ;;  %1844 = vmatprep.subr.bf16.mxu1 (!%p168_p2), %v1989_v0  ;;  %v1992_v3 = vld [vmem:[%s2392_s1 + $0x68] sm:$0xff] (!%p168_p2)   ;;  %v1994_v5 = vld [vmem:[%s2392_s1 + $0x70] sm:$0xff] (!%p168_p2)   ;;  %vm241_vm1 = vsmask.f32 (!%p168_p2), 7440 }
   0x7   : > { %1892 = vmatprep.subr.bf16.mxu0 (!%p168_p2), %v1990_v1  ;;  %1845 = vmatpush3.bf16.msra.mxu1 (!%p168_p2), %v1989_v0  ;;  %v1995_v6 = vld [vmem:[%s2392_s1 + $0x38] sm:$0xff] (!%p168_p2)   ;;  %vm400_vm2 = vcmask (!%p168_p2), 523264   ;;  %v2113_v18 = vld [vmem:[%s2392_s1] sm:$0xff] (!%p168_p2)   ;;  %vm2126_vm3 = vmor (!%p168_p2), %vm240_vm0, %vm241_vm1  ;;  %vm1441_vm4 = vcmask (!%p168_p2), 257024   ;;  %vm1450_vm5 = vcmask (!%p168_p2), 261120   ;;  %vm1472_vm6 = vcmask (!%p168_p2), 253952  }
   0x8   : > { %1893 = vmatpush3.bf16.msra.mxu0 (!%p168_p2), %v1990_v1  ;;  %1846 = vmatprep.subr.bf16.mxu1 (!%p168_p2), %v1991_v2  ;;  %v1996_v7 = vld [vmem:[%s2392_s1 + $0x78] sm:$0xff] (!%p168_p2)   ;;  %v2118_v19 = vld [vmem:[%s2392_s1 + $0x80] sm:$0xff] (!%p168_p2)  }
   0x9   : > { %1894 = vmatprep.subr.bf16.mxu0 (!%p168_p2), %v1992_v3 }
   0xb   : > { %1847 = vmatpush3.bf16.msra.mxu1 (!%p168_p2), %v1991_v2 }
   0xc   : > { %1895 = vmatpush3.bf16.msra.mxu0 (!%p168_p2), %v1992_v3  ;;  %1848 = vmatprep.subr.bf16.mxu1 (!%p168_p2), %v1993_v4 }
   0xd   : > { %s2399_s16 = smov (!%p199_p3, %s1609_s16), 1  ;;  %1896 = vmatprep.subr.bf16.mxu0 %v1994_v5 }
   0xe   : > { %s1980_s27 = smul.u32 144, %s2399_s16  ;;  %s214_s30 = scalar_lea.vmem %s2395_s4, %s2399_s16 }
   0xf   : > { %1849 = vmatpush3.bf16.msra.mxu1 %v1993_v4 }
  0x10   : > { %s2093_s8 = scalar_lea.vmem %s2391_s0, %s1980_s27  ;;  %1897 = vmatpush3.bf16.msra.mxu0 %v1994_v5  ;;  %1850 = vmatprep.subr.bf16.mxu1 %v1995_v6  ;;  %s211_s27 = scalar_lea.vmem %s2394_s3, %s2399_s16 }
  0x11   : > { %v2099_v8 = vld [vmem:[%s2093_s8] sm:$0xf]  ;;  %v2102_v9 = vld [vmem:[%s2093_s8 + $0x10] sm:$0xf]  ;;  %v232_v10 = vld [vmem:[%s2093_s8 + $0x4] sm:$0x1]  ;;  %1898 = vmatprep.subr.bf16.mxu0 %v1996_v7 }
  0x12   : > { %v233_v11 = vld [vmem:[%s2093_s8 + $0x14] sm:$0x1]  ;;  %v244_v12 = vshrl.u32 %v2099_v8, 16  ;;  %v247_v13 = vshll.u32 %v2099_v8, 16  ;;  %v253_v14 = vshll.u32 %v232_v10, 16  ;;  %v258_v15 = vshrl.u32 %v2102_v9, 16 }
  0x13   : > { %v261_v16 = vshll.u32 %v2102_v9, 16  ;;  %v267_v17 = vshll.u32 %v233_v11, 16  ;;  %v1677_v24 = vld [vmem:[%s2093_s8 + $0x8] sm:$0xf]  ;;  %v1678_v27 = vld [vmem:[%s2093_s8 + $0xc] sm:$0x1]  ;;  %1851 = vmatpush3.bf16.msra.mxu1 %v1995_v6 }
  0x14   : > { %v246_v20 = vrot.slane %v244_v12, 4  ;;  %v249_v21 = vrot.slane %v247_v13, 5  ;;  %v255_v22 = vrot.slane %v253_v14, 5  ;;  %v260_v23 = vrot.slane %v258_v15, 4  ;;  %v1679_v28 = vld [vmem:[%s2093_s8 + $0x18] sm:$0xf]  ;;  %1899 = vmatpush3.bf16.msra.mxu0 %v1996_v7  ;;  %1860 = vmatprep.subr.bf16.mxu1 %v2113_v18 }
  0x15   : > { %v263_v25 = vrot.slane %v261_v16, 5  ;;  %v269_v26 = vrot.slane %v267_v17, 5  ;;  %v1680_v30 = vld [vmem:[%s2093_s8 + $0x1c] sm:$0x1]  ;;  %v763_v31 = vshrl.u32 %v1677_v24, 16  ;;  %v766_v32 = vshll.u32 %v1677_v24, 16  ;;  %1908 = vmatprep.subr.bf16.mxu0 %v2118_v19 }
  0x16   : > { %v250_v29 = vor.u32 %v249_v21, %v246_v20  ;;  %v772_v33 = vshll.u32 %v1678_v27, 16  ;;  %v777_v36 = vshrl.u32 %v1679_v28, 16  ;;  %v780_v37 = vshll.u32 %v1679_v28, 16  ;;  %v2133_v47 = vld [vmem:[%s2093_s8 + $0x20] sm:$0xf] }
  0x17   : > { %v264_v35 = vor.u32 %v263_v25, %v260_v23  ;;  %v786_v38 = vshll.u32 %v1680_v30, 16  ;;  %v765_v40 = vrot.slane %v763_v31, 4  ;;  %v768_v41 = vrot.slane %v766_v32, 5  ;;  %v2138_v50 = vld [vmem:[%s2093_s8 + $0x30] sm:$0xf] }
  0x18   : > { %v251_v39 = vrot.slane %v250_v29, 4  ;;  %v774_v42 = vrot.slane %v772_v33, 5  ;;  %v779_v44 = vrot.slane %v777_v36, 4  ;;  %v782_v45 = vrot.slane %v780_v37, 5  ;;  %v234_v51 = vld [vmem:[%s2093_s8 + $0x24] sm:$0x1] }
  0x19   : > { %v265_v43 = vrot.slane %v264_v35, 4  ;;  %v788_v46 = vrot.slane %v786_v38, 5  ;;  %v769_v49 = vor.u32 %v768_v41, %v765_v40  ;;  %v235_v52 = vld [vmem:[%s2093_s8 + $0x34] sm:$0x1]  ;;  %v272_v55 = vshrl.u32 %v2133_v47, 16 }
  0x1a   : > { %v256_v48 = vsel %vm2126_vm3, %v251_v39, %v255_v22  ;;  %v783_v54 = vor.u32 %v782_v45, %v779_v44  ;;  %v275_v56 = vshll.u32 %v2133_v47, 16  ;;  %v1681_v57 = vld [vmem:[%s2093_s8 + $0x28] sm:$0xf]  ;;  %v1682_v58 = vld [vmem:[%s2093_s8 + $0x2c] sm:$0x1]  ;;  %v281_v61 = vshll.u32 %v234_v51, 16 }
  0x1b   : > { %v270_v53 = vsel %vm2126_vm3, %v265_v43, %v269_v26  ;;  %v770_v60 = vrot.slane %v769_v49, 4  ;;  %v286_v62 = vshrl.u32 %v2138_v50, 16  ;;  %v1683_v63 = vld [vmem:[%s2093_s8 + $0x38] sm:$0xf]  ;;  %v274_v1 = vrot.slane %v272_v55, 4 }
  0x1c   : > { %v1625_v59 = vcombine.low %v256_v48, %v270_v53  ;;  %v784_v0 = vrot.slane %v783_v54, 4  ;;  %v277_v2 = vrot.slane %v275_v56, 5  ;;  %v289_v3 = vshll.u32 %v2138_v50, 16  ;;  %v1684_v4 = vld [vmem:[%s2093_s8 + $0x3c] sm:$0x1] }
  0x1d   : > { %v775_v5 = vsel %vm2126_vm3, %v770_v60, %v774_v42  ;;  %v283_v6 = vrot.slane %v281_v61, 5  ;;  %v288_v7 = vrot.slane %v286_v62, 4  ;;  %v295_v10 = vshll.u32 %v235_v52, 16  ;;  %v2158_v25 = vld [vmem:[%s2093_s8 + $0x40] sm:$0xf]  ;;  %v1999_v42 = vld [vmem:[%s2392_s1 + $0x8] sm:$0xff]  }
  0x1e   : > { %1852 = vmatprep.mubr.msk.bf16.mxu1 %vm400_vm2, %v1625_v59  ;;  %v789_v11 = vsel %vm2126_vm3, %v784_v0, %v788_v46  ;;  %v278_v12 = vor.u32 %v277_v2, %v274_v1  ;;  %v291_v13 = vrot.slane %v289_v3, 5  ;;  %v791_v14 = vshrl.u32 %v1681_v57, 16  ;;  %v2162_v30 = vld [vmem:[%s2093_s8 + $0x50] sm:$0xf]  ;;  %v236_v35 = vld [vmem:[%s2093_s8 + $0x44] sm:$0x1] }
  0x1f   : > { %v1701_v15 = vcombine.low %v775_v5, %v789_v11  ;;  %v297_v16 = vrot.slane %v295_v10, 5  ;;  %v794_v17 = vshll.u32 %v1681_v57, 16  ;;  %v800_v20 = vshll.u32 %v1682_v58, 16  ;;  %v237_v36 = vld [vmem:[%s2093_s8 + $0x54] sm:$0x1]  ;;  %v2000_v0 = vld [vmem:[%s2392_s1 + $0x88] sm:$0xff]  }
  0x20   : > { %v279_v21 = vrot.slane %v278_v12, 4  ;;  %v292_v22 = vor.u32 %v291_v13, %v288_v7  ;;  %v793_v23 = vrot.slane %v791_v14, 4  ;;  %v805_v24 = vshrl.u32 %v1683_v63, 16  ;;  %v1685_v52 = vld [vmem:[%s2093_s8 + $0x48] sm:$0xf] }
  0x21   : > { %1900 = vmatprep.mubr.msk.bf16.mxu0 %vm400_vm2, %v1701_v15  ;;  %v796_v26 = vrot.slane %v794_v17, 5  ;;  %v802_v27 = vrot.slane %v800_v20, 5  ;;  %v808_v28 = vshll.u32 %v1683_v63, 16  ;;  %v814_v29 = vshll.u32 %v1684_v4, 16  ;;  %v1686_v53 = vld [vmem:[%s2093_s8 + $0x4c] sm:$0x1] }
  0x22   : > { %v284_v31 = vsel %vm2126_vm3, %v279_v21, %v283_v6  ;;  %v293_v32 = vrot.slane %v292_v22, 4  ;;  %v807_v33 = vrot.slane %v805_v24, 4  ;;  %v300_v40 = vshrl.u32 %v2158_v25, 16  ;;  %v1687_v58 = vld [vmem:[%s2093_s8 + $0x58] sm:$0xf] }
  0x23   : > { %v797_v37 = vor.u32 %v796_v26, %v793_v23  ;;  %v810_v38 = vrot.slane %v808_v28, 5  ;;  %v816_v39 = vrot.slane %v814_v29, 5  ;;  %v303_v43 = vshll.u32 %v2158_v25, 16  ;;  %v1688_v62 = vld [vmem:[%s2093_s8 + $0x5c] sm:$0x1] }
  0x24   : > { %v298_v41 = vsel %vm2126_vm3, %v293_v32, %v297_v16  ;;  %v309_v44 = vshll.u32 %v236_v35, 16  ;;  %v314_v45 = vshrl.u32 %v2162_v30, 16  ;;  %v302_v51 = vrot.slane %v300_v40, 4  ;;  %v2194_v15 = vld [vmem:[%s2093_s8 + $0x60] sm:$0xf]  ;;  %v2002_v32 = vld [vmem:[%s2392_s1 + $0x90] sm:$0xff]  }
  0x25   : > { %v1626_v46 = vcombine.low %v284_v31, %v298_v41  ;;  %v798_v48 = vrot.slane %v797_v37, 4  ;;  %v811_v49 = vor.u32 %v810_v38, %v807_v33  ;;  %v305_v54 = vrot.slane %v303_v43, 5  ;;  %v2197_v16 = vld [vmem:[%s2093_s8 + $0x70] sm:$0xf]  ;;  %v238_v23 = vld [vmem:[%s2093_s8 + $0x64] sm:$0x1] }
  0x26   : > { %v311_v55 = vrot.slane %v309_v44, 5  ;;  %v316_v56 = vrot.slane %v314_v45, 4  ;;  %v317_v57 = vshll.u32 %v2162_v30, 16  ;;  %v323_v61 = vshll.u32 %v237_v36, 16  ;;  %v239_v28 = vld [vmem:[%s2093_s8 + $0x74] sm:$0x1] }
  0x27   : > { %1853 = vmatmul.mubr.msk.bf16.vlgmr.msra.gmra.mrb[0].mxu1 %vm400_vm2, %v1626_v46  ;;  %v803_v59 = vsel %vm2126_vm3, %v798_v48, %v802_v27  ;;  %v812_v60 = vrot.slane %v811_v49, 4  ;;  %v819_v63 = vshrl.u32 %v1685_v52, 16  ;;  %v306_v1 = vor.u32 %v305_v54, %v302_v51  ;;  %v1689_v36 = vld [vmem:[%s2093_s8 + $0x68] sm:$0xf]  ;;  %v1690_v40 = vld [vmem:[%s2093_s8 + $0x6c] sm:$0x1] }
  0x28   : > { %1861 = vmatpush3.bf16.msra.mxu1 %v2113_v18  ;;  %v319_v2 = vrot.slane %v317_v57, 5  ;;  %v822_v3 = vshll.u32 %v1685_v52, 16  ;;  %v828_v4 = vshll.u32 %v1686_v53, 16  ;;  %v325_v6 = vrot.slane %v323_v61, 5  ;;  %v2001_v18 = vld [vmem:[%s2392_s1 + $0x10] sm:$0xff]   ;;  %v2003_v41 = vld [vmem:[%s2392_s1 + $0x18] sm:$0xff]  }
  0x29   : > { %v817_v5 = vsel %vm2126_vm3, %v812_v60, %v816_v39  ;;  %1862 = vmatprep.subr.bf16.mxu1 %v1999_v42  ;;  %v821_v7 = vrot.slane %v819_v63, 4  ;;  %v833_v10 = vshrl.u32 %v1687_v58, 16  ;;  %v307_v12 = vrot.slane %v306_v1, 4  ;;  %v1691_v46 = vld [vmem:[%s2093_s8 + $0x78] sm:$0xf] }
  0x2a   : > { %v1702_v11 = vcombine.low %v803_v59, %v817_v5  ;;  %v320_v13 = vor.u32 %v319_v2, %v316_v56  ;;  %v824_v14 = vrot.slane %v822_v3, 5  ;;  %v830_v17 = vrot.slane %v828_v4, 5  ;;  %v1692_v53 = vld [vmem:[%s2093_s8 + $0x7c] sm:$0x1]  ;;  %v2230_v59 = vld [vmem:[%s2392_s1 + $0x40] sm:$0xff]  }
  0x2b   : > { %v835_v20 = vrot.slane %v833_v10, 4  ;;  %v836_v21 = vshll.u32 %v1687_v58, 16  ;;  %v842_v22 = vshll.u32 %v1688_v62, 16  ;;  %v312_v24 = vsel %vm2126_vm3, %v307_v12, %v311_v55  ;;  %v2004_v54 = vld [vmem:[%s2392_s1 + $0x98] sm:$0xff]  }
  0x2c   : > { %1901 = vmatmul.mubr.msk.bf16.vlgmr.msra.gmra.mrb[0].mxu0 %vm400_vm2, %v1702_v11  ;;  %1863 = vmatpush3.bf16.msra.mxu1 %v1999_v42  ;;  %v321_v26 = vrot.slane %v320_v13, 4  ;;  %v825_v27 = vor.u32 %v824_v14, %v821_v7  ;;  %v328_v29 = vshrl.u32 %v2194_v15, 16  ;;  %v331_v33 = vshll.u32 %v2194_v15, 16  ;;  %v2241_v14 = vld [vmem:[%s2392_s1 + $0xa0] sm:$0xff]  }
  0x2d   : > { %1909 = vmatpush3.bf16.msra.mxu0 %v2118_v19  ;;  %1864 = vmatprep.subr.bf16.mxu1 %v2001_v18  ;;  %v838_v31 = vrot.slane %v836_v21, 5  ;;  %v337_v35 = vshll.u32 %v238_v23, 16  ;;  %v342_v19 = vshrl.u32 %v2197_v16, 16  ;;  %v844_v44 = vrot.slane %v842_v22, 5 }
  0x2e   : > { %1910 = vmatprep.subr.bf16.mxu0 %v2000_v0  ;;  %v326_v37 = vsel %vm2126_vm3, %v321_v26, %v325_v6  ;;  %v826_v38 = vrot.slane %v825_v27, 4  ;;  %v330_v39 = vrot.slane %v328_v29, 4  ;;  %v333_v45 = vrot.slane %v331_v33, 5  ;;  %v2011_v33 = vld [vmem:[%s2392_s1 + $0x48] sm:$0xff]  }
  0x2f   : > { %v1627_v42 = vcombine.low %v312_v24, %v326_v37  ;;  %v839_v43 = vor.u32 %v838_v31, %v835_v20  ;;  %v344_v49 = vrot.slane %v342_v19, 4  ;;  %v345_v51 = vshll.u32 %v2197_v16, 16  ;;  %v1742_v37 = vld [vmem:[%s2093_s8 + $0x14] sm:$0x1] }
  0x30   : > { %v831_v48 = vsel %vm2126_vm3, %v826_v38, %v830_v17  ;;  %v351_v52 = vshll.u32 %v239_v28, 16  ;;  %1865 = vmatpush3.bf16.msra.mxu1 %v2001_v18  ;;  %v334_v56 = vor.u32 %v333_v45, %v330_v39  ;;  %v847_v57 = vshrl.u32 %v1689_v36, 16  ;;  %v1743_v38 = vld [vmem:[%s2093_s8 + $0x20] sm:$0xf]  ;;  %v1744_v39 = vld [vmem:[%s2093_s8 + $0x24] sm:$0x1] }
  0x31   : > { %1911 = vmatpush3.bf16.msra.mxu0 %v2000_v0  ;;  %1856 = vmatprep.mubr.msk.bf16.mxu1 %vm400_vm2, %v1627_v42  ;;  %v840_v55 = vrot.slane %v839_v43, 4  ;;  %v850_v58 = vshll.u32 %v1689_v36, 16  ;;  %v339_v60 = vrot.slane %v337_v35, 5  ;;  %v347_v61 = vrot.slane %v345_v51, 5  ;;  %v1741_v36 = vld [vmem:[%s2093_s8 + $0x10] sm:$0xf] }
  0x32   : > { %1912 = vmatprep.subr.bf16.mxu0 %v2002_v32  ;;  %v856_v62 = vshll.u32 %v1690_v40, 16  ;;  %v861_v63 = vshrl.u32 %v1691_v46, 16  ;;  %1866 = vmatprep.subr.bf16.mxu1 %v2003_v41  ;;  %v335_v1 = vrot.slane %v334_v56, 4  ;;  %v849_v2 = vrot.slane %v847_v57, 4  ;;  %v2010_v43 = vld [vmem:[%s2093_s8 + $0x30] ss:$16 sps:$4 sm:$0xff]  }
  0x33   : > { %v845_v0 = vsel %vm2126_vm3, %v840_v55, %v844_v44  ;;  %v852_v3 = vrot.slane %v850_v58, 5  ;;  %v348_v5 = vor.u32 %v347_v61, %v344_v49  ;;  %v353_v6 = vrot.slane %v351_v52, 5  ;;  %v1745_v52 = vld [vmem:[%s2093_s8 + $0x30] sm:$0xf]  ;;  %v1747_v56 = vld [vmem:[%s2093_s8 + $0x40] sm:$0xf] }
  0x34   : > { %v1703_v4 = vcombine.low %v831_v48, %v845_v0  ;;  %1867 = vmatpush3.bf16.msra.mxu1 %v2003_v41  ;;  %v863_v7 = vrot.slane %v861_v63, 4  ;;  %v864_v10 = vshll.u32 %v1691_v46, 16  ;;  %v870_v11 = vshll.u32 %v1692_v53, 16  ;;  %v2015_v48 = vld [vmem:[%s2093_s8 + $0x50] ss:$16 sps:$4 sm:$0xff]  }
  0x35   : > { %v853_v18 = vor.u32 %v852_v3, %v849_v2  ;;  %1913 = vmatpush3.bf16.msra.mxu0 %v2002_v32  ;;  %1876 = vmatprep.subr.bf16.mxu1 %v2230_v59  ;;  %v340_v12 = vsel %vm2126_vm3, %v335_v1, %v339_v60  ;;  %v349_v13 = vrot.slane %v348_v5, 4  ;;  %v858_v20 = vrot.slane %v856_v62, 5  ;;  %v1746_v53 = vld [vmem:[%s2093_s8 + $0x34] sm:$0x1]  ;;  %v1748_v57 = vld [vmem:[%s2093_s8 + $0x44] sm:$0x1] }
  0x36   : > { %1904 = vmatprep.mubr.msk.bf16.mxu0 %vm400_vm2, %v1703_v4  ;;  %1914 = vmatprep.subr.bf16.mxu0 %v2004_v54  ;;  %v866_v21 = vrot.slane %v864_v10, 5  ;;  %v872_v23 = vrot.slane %v870_v11, 5  ;;  %v1637_v24 = vcombine.low %v2099_v8, %v2102_v9  ;;  %v2007_v9 = vld [vmem:[%s2093_s8 + $0x10] ss:$16 sps:$4 sm:$0xff]   ;;  %v1638_v32 = vcombine.low %v2133_v47, %v2138_v50  ;;  %v2021_v4 = vld [vmem:[%s2093_s8 + $0x8] ss:$16 sps:$4 sm:$0xff]  }
  0x37   : > { %v854_v17 = vrot.slane %v853_v18, 4  ;;  %v354_v22 = vsel %vm2126_vm3, %v349_v13, %v353_v6  ;;  %v1639_v35 = vcombine.low %v2158_v25, %v2162_v30  ;;  %v1168_v19 = vshrl.u32 %v1741_v36, 16  ;;  %v2014_v25 = vld [vmem:[%s2392_s1 + $0x50] sm:$0xff]  }
  0x38   : > { %v1628_v26 = vcombine.low %v340_v12, %v354_v22  ;;  %v867_v27 = vor.u32 %v866_v21, %v863_v7  ;;  %v1171_v40 = vshll.u32 %v1741_v36, 16  ;;  %v1177_v47 = vshll.u32 %v1742_v37, 16  ;;  %v2019_v7 = vld [vmem:[%s2392_s1 + $0x58] sm:$0xff]   ;;  %v1749_v13 = vld [vmem:[%s2093_s8 + $0x50] sm:$0xf] }
  0x39   : > { %1915 = vmatpush3.bf16.msra.mxu0 %v2004_v54  ;;  %v859_v28 = vsel %vm2126_vm3, %v854_v17, %v858_v20  ;;  %v1182_v50 = vshrl.u32 %v1743_v38, 16  ;;  %v1185_v41 = vshll.u32 %v1743_v38, 16  ;;  %v1191_v42 = vshll.u32 %v1744_v39, 16  ;;  %v1750_v17 = vld [vmem:[%s2093_s8 + $0x54] sm:$0x1] }
  0x3a   : > { %1924 = vmatprep.subr.bf16.mxu0 %v2241_v14  ;;  %1857 = vmatmul.mubr.msk.bf16.gmra.mrb[4].mxu1 %vm400_vm2, %v1628_v26  ;;  %v868_v29 = vrot.slane %v867_v27, 4  ;;  %v1170_v30 = vrot.slane %v1168_v19, 4  ;;  %v1173_v44 = vrot.slane %v1171_v40, 5  ;;  %v2273_v45 = vrot.slane %v1177_v47, 5  ;;  %v2018_v20 = vld [vmem:[%s2093_s8 + $0x70] ss:$16 sps:$4 sm:$0xff]  }
  0x3b   : > { %1868 = vmatprep.mubr.msk.bf16.mxu1 %vm400_vm2, %v1637_v24  ;;  %v1184_v46 = vrot.slane %v1182_v50, 4  ;;  %v1187_v49 = vrot.slane %v1185_v41, 5  ;;  %v1193_v51 = vrot.slane %v1191_v42, 5  ;;  %v1640_v54 = vcombine.low %v2194_v15, %v2197_v16  ;;  %v2016_v16 = vld [vmem:[%s2392_s1 + $0xb0] sm:$0xff]   ;;  %v1751_v22 = vld [vmem:[%s2093_s8 + $0x60] sm:$0xf] }
  0x3c   : > { %v873_v8 = vsel %vm2126_vm3, %v868_v29, %v872_v23  ;;  %v1174_v55 = vor.u32 %v1173_v44, %v1170_v30  ;;  %v1196_v58 = vshrl.u32 %v1745_v52, 16  ;;  %v1199_v60 = vshll.u32 %v1745_v52, 16  ;;  %v1752_v23 = vld [vmem:[%s2093_s8 + $0x64] sm:$0x1]  ;;  %v2022_v37 = vld [vmem:[%s2093_s8 + $0x28] ss:$16 sps:$4 sm:$0xff]  }
  0x3d   : > { %v1704_v31 = vcombine.low %v859_v28, %v873_v8  ;;  %v1188_v61 = vor.u32 %v1187_v49, %v1184_v46  ;;  %v1205_v62 = vshll.u32 %v1746_v53, 16  ;;  %v1210_v63 = vshrl.u32 %v1747_v56, 16  ;;  %v1753_v50 = vld [vmem:[%s2093_s8 + $0x70] sm:$0xf]  ;;  %v1754_v41 = vld [vmem:[%s2093_s8 + $0x74] sm:$0x1] }
  0x3e   : > { %v1213_v0 = vshll.u32 %v1747_v56, 16  ;;  %v1175_v1 = vrot.slane %v1174_v55, 4  ;;  %v1198_v2 = vrot.slane %v1196_v58, 4  ;;  %v1201_v3 = vrot.slane %v1199_v60, 5  ;;  %v1755_v30 = vld [vmem:[%s2093_s8 + $0x80] sm:$0xf] }
  0x3f   : > { %1905 = vmatmul.mubr.msk.bf16.gmra.mrb[4].mxu0 %vm400_vm2, %v1704_v31  ;;  %v1219_v15 = vshll.u32 %v1748_v57, 16  ;;  %v1189_v5 = vrot.slane %v1188_v61, 4  ;;  %v1212_v6 = vrot.slane %v1210_v63, 4  ;;  %v2299_v12 = vrot.slane %v1205_v62, 5  ;;  %v1756_v44 = vld [vmem:[%s2093_s8 + $0x84] sm:$0x1] }
  0x40   : > { %1916 = vmatprep.mubr.msk.bf16.mxu0 %vm400_vm2, %v2007_v9  ;;  %v1215_v18 = vrot.slane %v1213_v0, 5  ;;  %v1180_v10 = vsel %vm2126_vm3, %v1175_v1, %v2273_v45  ;;  %v1202_v11 = vor.u32 %v1201_v3, %v1198_v2  ;;  %v1224_v24 = vshrl.u32 %v1749_v13, 16  ;;  %v2023_v46 = vld [vmem:[%s2093_s8 + $0x48] ss:$16 sps:$4 sm:$0xff]  }
  0x41   : > { %v1227_v26 = vshll.u32 %v1749_v13, 16  ;;  %v1221_v28 = vrot.slane %v1219_v15, 5  ;;  %v1233_v29 = vshll.u32 %v1750_v17, 16  ;;  %v1238_v8 = vshrl.u32 %v1751_v22, 16 }
  0x42   : > { %1869 = vmatmul.mubr.msk.bf16.vlgmr.msra.gmra.mrb[0].mxu1 %vm400_vm2, %v1638_v32  ;;  %v1216_v21 = vor.u32 %v1215_v18, %v1212_v6  ;;  %v1203_v27 = vrot.slane %v1202_v11, 4  ;;  %v1226_v31 = vrot.slane %v1224_v24, 4  ;;  %v1247_v39 = vshll.u32 %v1752_v23, 16 }
  0x43   : > { %1877 = vmatpush3.bf16.msra.mxu1 %v2230_v59  ;;  %1872 = vmatprep.mubr.msk.bf16.mxu1 %vm400_vm2, %v1639_v35  ;;  %v2012_v59 = vld [vmem:[%s2392_s1 + $0xa8] sm:$0xff]   ;;  %v1229_v32 = vrot.slane %v1227_v26, 5  ;;  %v2020_v35 = vld [vmem:[%s2392_s1 + $0xb8] sm:$0xff]   ;;  %v1240_v38 = vrot.slane %v1238_v8, 4  ;;  %v1235_v40 = vrot.slane %v1233_v29, 5  ;;  %v1252_v45 = vshrl.u32 %v1753_v50, 16 }
  0x44   : > { %1878 = vmatprep.subr.bf16.mxu1 %v2011_v33  ;;  %v1217_v9 = vrot.slane %v1216_v21, 4  ;;  %v1208_v42 = vsel %vm2126_vm3, %v1203_v27, %v2299_v12  ;;  %v1261_v52 = vshll.u32 %v1754_v41, 16  ;;  %v1269_v55 = vshll.u32 %v1755_v30, 16 }
  0x45   : > { %v1230_v19 = vor.u32 %v1229_v32, %v1226_v31  ;;  %v1254_v53 = vrot.slane %v1252_v45, 4  ;;  %v1275_v56 = vshll.u32 %v1756_v44, 16 }
  0x46   : > { %v1271_v61 = vrot.slane %v1269_v55, 5  ;;  %v1263_v1 = vrot.slane %v1261_v52, 5 }
  0x47   : > { %1917 = vmatmul.mubr.msk.bf16.vlgmr.msra.gmra.mrb[0].mxu0 %vm400_vm2, %v2010_v43  ;;  %1879 = vmatpush3.bf16.msra.mxu1 %v2011_v33  ;;  %v1241_v33 = vshll.u32 %v1751_v22, 16  ;;  %v1222_v43 = vsel %vm2126_vm3, %v1217_v9, %v1221_v28  ;;  %v1277_v15 = vrot.slane %v1275_v56, 5 }
  0x48   : > { %1925 = vmatpush3.bf16.msra.mxu0 %v2241_v14  ;;  %1880 = vmatprep.subr.bf16.mxu1 %v2014_v25  ;;  %v1194_v14 = vsel %vm2126_vm3, %v1189_v5, %v1193_v51  ;;  %v1255_v51 = vshll.u32 %v1753_v50, 16  ;;  %v1766_v62 = vcombine.low %v1208_v42, %v1222_v43 }
  0x49   : > { %1926 = vmatprep.subr.bf16.mxu0 %v2012_v59  ;;  %1920 = vmatprep.mubr.msk.bf16.mxu0 %vm400_vm2, %v2015_v48  ;;  %v1765_v36 = vcombine.low %v1180_v10, %v1194_v14  ;;  %v1243_v47 = vrot.slane %v1241_v33, 5  ;;  %v1231_v48 = vrot.slane %v1230_v19, 4 }
  0x4a   : > { %1873 = vmatmul.mubr.msk.bf16.gmra.mrb[4].mxu1 %vm400_vm2, %v1640_v54  ;;  %v1266_v54 = vshrl.u32 %v1755_v30, 16  ;;  %v1257_v60 = vrot.slane %v1255_v51, 5 }
  0x4b   : > { %1881 = vmatpush3.bf16.msra.mxu1 %v2014_v25  ;;  %1884 = vmatprep.mubr.msk.bf16.mxu1 %vm400_vm2, %v2021_v4  ;;  %v1249_v25 = vrot.slane %v1247_v39, 5  ;;  %v1244_v49 = vor.u32 %v1243_v47, %v1240_v38  ;;  %v1236_v57 = vsel %vm2126_vm3, %v1231_v48, %v1235_v40  ;;  %v2024_v4 = vld [vmem:[%s2093_s8 + $0x68] ss:$16 sps:$4 sm:$0xff]   ;;  %s1787_s8 = sshll.u32 %s2399_s16, 5 }
  0x4c   : > { %1927 = vmatpush3.bf16.msra.mxu0 %v2012_v59  ;;  %1882 = vmatprep.subr.bf16.mxu1 %v2019_v7  ;;  %v1268_v59 = vrot.slane %v1266_v54, 4  ;;  %v1258_v0 = vor.u32 %v1257_v60, %v1254_v53  ;;  %s2346_s24 = scalar_lea.vmem %s2393_s2, %s1787_s8 }
  0x4d   : > { %1928 = vmatprep.subr.bf16.mxu0 %v2016_v16  ;;  %v1245_v58 = vrot.slane %v1244_v49, 4 }
  0x4e   : > { %v1272_v3 = vor.u32 %v1271_v61, %v1268_v59 }
  0x4f   : > { %1921 = vmatmul.mubr.msk.bf16.gmra.mrb[4].mxu0 %vm400_vm2, %v2018_v20  ;;  %1883 = vmatpush3.bf16.msra.mxu1 %v2019_v7  ;;  %v1250_v63 = vsel %vm2126_vm3, %v1245_v58, %v1249_v25 }
  0x50   : > { %1929 = vmatpush3.bf16.msra.mxu0 %v2016_v16  ;;  %1932 = vmatprep.mubr.msk.bf16.mxu0 %vm400_vm2, %v1765_v36  ;;  %v1767_v2 = vcombine.low %v1236_v57, %v1250_v63  ;;  %v1259_v16 = vrot.slane %v1258_v0, 4  ;;  %v1273_v5 = vrot.slane %v1272_v3, 4 }
  0x51   : > { %1930 = vmatprep.subr.bf16.mxu0 %v2020_v35 }
  0x52   : > { %1885 = vmatmul.mubr.msk.bf16.vlgmr.msra.gmra.mrb[0].mxu1 %vm400_vm2, %v2022_v37  ;;  %v1264_v6 = vsel %vm2126_vm3, %v1259_v16, %v1263_v1  ;;  %v1278_v18 = vsel %vm2126_vm3, %v1273_v5, %v1277_v15 }
  0x53   : > { %1888 = vmatprep.mubr.msk.bf16.mxu1 %vm400_vm2, %v2023_v46  ;;  %v1768_v7 = vcombine.low %v1264_v6, %v1278_v18 }
  0x54   : > { %1931 = vmatpush3.bf16.msra.mxu0 %v2020_v35 }
  0x57   : > { %1933 = vmatmul.mubr.msk.bf16.vlgmr.msra.gmra.mrb[0].mxu0 %vm400_vm2, %v1766_v62 }
  0x58   : > { %1936 = vmatprep.mubr.msk.bf16.mxu0 %vm400_vm2, %v1767_v2 }
  0x5a   : > { %1889 = vmatmul.mubr.msk.bf16.gmra.mrb[4].mxu1 %vm400_vm2, %v2024_v4 }
  0x5f   : > { %1937 = vmatmul.mubr.msk.bf16.gmra.mrb[4].mxu0 %vm400_vm2, %v1768_v7 }
 0x125   : > { %v1886_v10 = vpop.f32.mrb[0].mxu1 }
 0x126   : > { %v707_v11 = vpop.f32.mrb[1].mxu1 }
 0x127   : > { %v1887_v12 = vpop.f32.mrb[2].mxu1 }
 0x128   : > { %v710_v13 = vpop.f32.mrb[3].mxu1 }
 0x12a   : > { %v1934_v17 = vpop.f32.mrb[0].mxu0 }
 0x12b   : > { %v1940_v20 = vadd.f32 %v1934_v17, %v1886_v10  ;;  %v1370_v14 = vpop.f32.mrb[1].mxu0 }
 0x12c   : > { %v1941_v34 = vadd.f32 %v1370_v14, %v707_v11  ;;  %v1935_v21 = vpop.f32.mrb[2].mxu0 }
 0x12d   : > { %v1790_v22 = vpack.c.bf16 %v1940_v20, %v1940_v20  ;;  %v1942_v23 = vadd.f32 %v1935_v21, %v1887_v12  ;;  %v1373_v24 = vpop.f32.mrb[3].mxu0  ;;  %v1890_v26 = vpop.f32.mrb[4].mxu1  ;;  %v1476_v9 = vmul.f32 %v1940_v20, %v1940_v20  ;;  %v1454_v40 = vsel %vm1450_vm5, %v1940_v20, 0.0 }
 0x12e   : > { %v1788_v27 = vpack.c.bf16 %v1941_v34, %v1941_v34  ;;  %v1474_v28 = vmul.f32 %v1941_v34, %v1941_v34  ;;  %v1943_v29 = vadd.f32 %v1373_v24, %v710_v13  ;;  %v723_v8 = vpop.f32.mrb[5].mxu1  ;;  %v1451_v33 = vsel %vm1450_vm5, %v1941_v34, 0.0 }
 0x12f   : > { %1444 = vst.msk [vmem:[%s2346_s24 + $0x8] sm:$0xf] %vm1441_vm4, %v1790_v22  ;;  %v1791_v31 = vpack.c.bf16 %v1942_v23, %v1942_v23  ;;  %v1891_v32 = vpop.f32.mrb[6].mxu1  ;;  %v1477_v39 = vmul.f32 %v1942_v23, %v1942_v23  ;;  %v1485_v44 = vsel %vm1450_vm5, %v1476_v9, 0.0  ;;  %v1456_v48 = vsel %vm1450_vm5, %v1942_v23, 0.0 }
 0x130   : > { %1442 = vst.msk [vmem:[%s2346_s24] sm:$0xf] %vm1441_vm4, %v1788_v27  ;;  %v1789_v35 = vpack.c.bf16 %v1943_v29, %v1943_v29  ;;  %v1452_v36 = vsel %vm1450_vm5, %v1943_v29, 0.0  ;;  %v1475_v37 = vmul.f32 %v1943_v29, %v1943_v29  ;;  %v726_v38 = vpop.f32.mrb[7].mxu1  ;;  %v1482_v47 = vsel %vm1450_vm5, %v1474_v28, 0.0 }
 0x131   : > { %1445 = vst.msk [vmem:[%s2346_s24 + $0xc] sm:$0xf] %vm1441_vm4, %v1791_v31  ;;  %v1453_v19 = vadd.f32 %v1452_v36, %v1451_v33  ;;  %v1487_v49 = vsel %vm1450_vm5, %v1477_v39, 0.0 }
 0x132   : > { %1443 = vst.msk [vmem:[%s2346_s24 + $0x4] sm:$0xf] %vm1441_vm4, %v1789_v35  ;;  %v1483_v50 = vsel %vm1450_vm5, %v1475_v37, 0.0  ;;  %v1938_v41 = vpop.f32.mrb[4].mxu0 }
 0x133   : > { %v1455_v42 = vadd.f32 %v1454_v40, %v1453_v19  ;;  %v1484_v43 = vadd.f32 %v1483_v50, %v1482_v47  ;;  %v1944_v25 = vadd.f32 %v1938_v41, %v1890_v26  ;;  %v1386_v30 = vpop.f32.mrb[5].mxu0 }
 0x134   : > { %v1945_v45 = vadd.f32 %v1386_v30, %v723_v8  ;;  %v1939_v46 = vpop.f32.mrb[6].mxu0 }
 0x135   : > { %v1486_v51 = vadd.f32 %v1485_v44, %v1484_v43  ;;  %v1794_v52 = vpack.c.bf16 %v1944_v25, %v1944_v25  ;;  %v1389_v53 = vpop.f32.mrb[7].mxu0  ;;  %v1457_v55 = vadd.f32 %v1456_v48, %v1455_v42  ;;  %v1946_v60 = vadd.f32 %v1939_v46, %v1891_v32 }
 0x136   : > { %v1792_v54 = vpack.c.bf16 %v1945_v45, %v1945_v45  ;;  %v1458_v56 = vsel %vm1450_vm5, %v1945_v45, 0.0  ;;  %v1478_v57 = vmul.f32 %v1945_v45, %v1945_v45  ;;  %v1947_v59 = vadd.f32 %v1389_v53, %v726_v38 }
 0x137   : > { %1448 = vst.msk [vmem:[%s2346_s24 + $0x18] sm:$0xf] %vm1441_vm4, %v1794_v52  ;;  %v1488_v58 = vadd.f32 %v1487_v49, %v1486_v51  ;;  %v1459_v61 = vadd.f32 %v1458_v56, %v1457_v55  ;;  %v1795_v0 = vpack.c.bf16 %v1946_v60, %v1946_v60  ;;  %v1480_v1 = vmul.f32 %v1944_v25, %v1944_v25 }
 0x138   : > { %1446 = vst.msk [vmem:[%s2346_s24 + $0x10] sm:$0xf] %vm1441_vm4, %v1792_v54  ;;  %v1489_v62 = vsel %vm1450_vm5, %v1478_v57, 0.0  ;;  %v1793_v2 = vpack.c.bf16 %v1947_v59, %v1947_v59  ;;  %v1460_v3 = vsel %vm1450_vm5, %v1947_v59, 0.0  ;;  %v1479_v15 = vmul.f32 %v1947_v59, %v1947_v59 }
 0x139   : > { %v1490_v63 = vadd.f32 %v1489_v62, %v1488_v58  ;;  %1449 = vst.msk [vmem:[%s2346_s24 + $0x1c] sm:$0xf] %vm1441_vm4, %v1795_v0  ;;  %v1461_v16 = vadd.f32 %v1460_v3, %v1459_v61  ;;  %v1462_v4 = vsel %vm1450_vm5, %v1944_v25, 0.0  ;;  %v1481_v5 = vmul.f32 %v1946_v60, %v1946_v60 }
 0x13a   : > { %1447 = vst.msk [vmem:[%s2346_s24 + $0x14] sm:$0xf] %vm1441_vm4, %v1793_v2  ;;  %v1491_v6 = vsel %vm1450_vm5, %v1479_v15, 0.0  ;;  %v1493_v10 = vsel %vm1450_vm5, %v1480_v1, 0.0  ;;  %v1464_v11 = vsel %vm1450_vm5, %v1946_v60, 0.0 }
 0x13b   : > { %v1463_v18 = vadd.f32 %v1462_v4, %v1461_v16  ;;  %v1492_v7 = vadd.f32 %v1491_v6, %v1490_v63  ;;  %v1495_v17 = vsel %vm1450_vm5, %v1481_v5, 0.0 }
 0x13d   : > { %v1465_v12 = vadd.f32 %v1464_v11, %v1463_v18  ;;  %v1494_v13 = vadd.f32 %v1493_v10, %v1492_v7 }
 0x13f   : > { %v1466_v20 = vrot.slane %v1465_v12, 4  ;;  %v1496_v14 = vadd.f32 %v1495_v17, %v1494_v13 }
 0x141   : > { %v1467_v34 = vadd.f32 %v1466_v20, %v1465_v12  ;;  %v1497_v21 = vrot.slane %v1496_v14, 4 }
 0x143   : > { %v1468_v22 = vrot.slane %v1467_v34, 2  ;;  %v1498_v23 = vadd.f32 %v1497_v21, %v1496_v14 }
 0x145   : > { %v1469_v24 = vadd.f32 %v1468_v22, %v1467_v34  ;;  %v1499_v26 = vrot.slane %v1498_v23, 2 }
 0x147   : > { %v1470_v27 = vrot.slane %v1469_v24, 1  ;;  %v1500_v28 = vadd.f32 %v1499_v26, %v1498_v23 }
 0x149   : > { %v1471_v29 = vadd.f32 %v1470_v27, %v1469_v24  ;;  %v1501_v8 = vrot.slane %v1500_v28, 1 }
 0x14b   : > { %1473 = vst.msk [vmem:[%s211_s27] sm:$0x1] %vm1472_vm6, %v1471_v29  ;;  %v1502_v9 = vadd.f32 %v1501_v8, %v1500_v28 }
 0x14d   : > { %1503 = vst.msk [vmem:[%s214_s30] sm:$0x1] %vm1472_vm6, %v1502_v9 }
 0x14e PF: > { %s15_s15 = sadd.s32 1, %s2031_s15  }
 0x14f   : > { %p12_p4 = scmp.ge.s32.totalorder %s15_s15, 4  }
 0x151   :  { %14 = sbr.rel (!%p12_p4) target bundleno = 1 (0x1), region = 89 }

// kernel: corblock_s_forward.18
= control target key start
LH: loop header
LB: loop body
LE: loop exit
PB: predicated region body
PF: predicated region fallthrough
CT: control target
= control target key end

     0   :  { %s127_s0 = inlined_call_operand.vmem [shape: bf16[8,128], index: 0, kind: input, shape index: {}]   ;;  %s128_s1 = inlined_call_operand.vmem [shape: bf16[8,128], index: 1, kind: input, shape index: {}]   ;;  %s129_s2 = inlined_call_operand.vmem [shape: f32[1,128], index: 2, kind: input, shape index: {}]   ;;  %s130_s3 = inlined_call_operand.vmem [shape: f32[1,128], index: 3, kind: input, shape index: {}]   ;;  %s131_s4 = inlined_call_operand.vmem [shape: f32[1,128], index: 4, kind: input, shape index: {}]   ;;  %s132_s5 = inlined_call_operand.vmem [shape: f32[1,128], index: 5, kind: input, shape index: {}]   ;;  %s133_s6 = inlined_call_operand.vmem [shape: bf16[8,128], index: 6, kind: output, shape index: {}]  }
   0x1   :  { %v23_v0 = vld [vmem:[%s127_s0] sm:$0xf] }
   0x2   :  { %v67_v1 = vld [vmem:[%s129_s2] ss:$0 sm:$0xff]  ;;  %v24_v2 = vunpack.c.l.bf16 %v23_v0 }
   0x3   :  { %v41_v3 = vld [vmem:[%s128_s1] sm:$0xf] }
   0x4   :  { %v69_v4 = vld [vmem:[%s131_s4] ss:$0 sm:$0xff]  ;;  %v42_v6 = vunpack.c.l.bf16 %v41_v3  ;;  %v32_v7 = vmul.f32 %v67_v1, %v24_v2 }
   0x5   :  { %v68_v5 = vld [vmem:[%s130_s3] ss:$0 sm:$0xff] }
   0x6   :  { %v50_v8 = vmul.f32 %v69_v4, %v42_v6  ;;  %v40_v9 = vadd.f32 %v68_v5, %v32_v7  ;;  %v70_v10 = vld [vmem:[%s132_s5] ss:$0 sm:$0xff] }
   0x8   :  { %v51_v11 = vadd.f32 %v50_v8, %v40_v9 }
   0xa   :  { %v59_v12 = vadd.f32 %v70_v10, %v51_v11 }
   0xc   :  { %v60_v13 = vmax.f32 %v59_v12, 0.0 }
   0xe   :  { %v61_v14 = vpack.c.bf16 %v60_v13, %v60_v13 }
  0x10   :  { %62 = vst [vmem:[%s133_s6] sm:$0xf] %v61_v14 }

// kernel: tile.32
= control target key start
LH: loop header
LB: loop body
LE: loop exit
PB: predicated region body
PF: predicated region fallthrough
CT: control target
= control target key end

     0   :  { %s20_s0 = inlined_call_operand.<no memory space> [shape: f32[], index: 0, kind: input, shape index: {}]   ;;  %s21_s1 = inlined_call_operand.vmem [shape: f32[1,128], index: 1, kind: output, shape index: {}]  }
   0x1   :  { %v2_v0 = vstv %s20_s0 }
   0x2   :  { %3 = vst [vmem:[%s21_s1] sm:$0x1] %v2_v0 }

// kernel: corblock_s_forward.20
= control target key start
LH: loop header
LB: loop body
LE: loop exit
PB: predicated region body
PF: predicated region fallthrough
CT: control target
= control target key end

     0   :  { %s589_s12 = smov 0   ;;  %s736_s0 = inlined_call_operand.vmem [shape: bf16[2,8,8,32], index: 0, kind: input, shape index: {}]   ;;  %s737_s1 = inlined_call_operand.vmem [shape: f32[1,32], index: 1, kind: input, shape index: {}]   ;;  %s738_s2 = inlined_call_operand.vmem [shape: f32[1,32], index: 2, kind: input, shape index: {}]   ;;  %s739_s3 = inlined_call_operand.vmem [shape: bf16[2,10,10,32], index: 3, kind: output, shape index: {}]  }
   0x1 LB: > { %s470_s13 = sadd.s32 4294967295, %s566_s12   ;;  %p474_p0 = scmp.ge.s32.totalorder %s566_s12, 1  ;;  %s566_s12 = sphi %s589_s12, %s13_s12  }
   0x2   : > { %p137_p1 = scmp.lt.s32.totalorder %s566_s12, 3 }
   0x4   : > { %p138_p2 = pnand %p474_p0, %p137_p1 }
   0x5   : > { %p161_p3 = scmp.lt.s32.totalorder (!%p138_p2), %s470_s13, 1  ;;  %vm172_vm0 = vcmask (!%p138_p2), 257024   ;;  %vm174_vm1 = vcmask (!%p138_p2), 253952   ;;  %v478_v0 = vld [vmem:[%s737_s1] ss:$0 sm:$0xff] (!%p138_p2)  ;;  %v568_v4 = vmov (!%p138_p2), 0  }
   0x6   : > { %141 = sbr.rel (%p138_p2) target bundleno = 47 (0x2f), region = 32  ;;  %v479_v10 = vld [vmem:[%s738_s2] ss:$0 sm:$0xff] (!%p138_p2)  ;;  %vm362_vm2 = vsmask.f32 (!%p138_p2), 7938 }
   0x7   : > { %vm368_vm3 = vsmask.f32 (!%p138_p2), 256  ;;  %vm662_vm4 = vmand (!%p138_p2), %vm172_vm0, %vm362_vm2 }
   0x8   : > { %vm670_vm5 = vmand (!%p138_p2), %vm174_vm1, %vm368_vm3 }
   0xd   : > { %s745_s13 = smov (!%p161_p3, %s470_s13), 1 }
   0xe   : > { %s550_s14 = smul.u32 80, %s745_s13  ;;  %s522_s15 = sshll.u32 %s745_s13, 5 }
   0xf   : > { %s600_s18 = scalar_lea.vmem %s736_s0, %s522_s15 }
  0x10   : > { %s608_s23 = scalar_lea.vmem %s739_s3, %s550_s14  ;;  %v532_v1 = vld [vmem:[%s600_s18] sm:$0xff]   ;;  %v547_v2 = vld [vmem:[%s600_s18 + $0x8] sm:$0xff]   ;;  %v548_v3 = vld [vmem:[%s600_s18 + $0x10] sm:$0xff]  }
  0x11   : > { %176 = vst.msk [vmem:[%s608_s23 + $0x8] sm:$0xf] %vm172_vm0, %v568_v4  ;;  %173 = vst.msk [vmem:[%s608_s23] sm:$0xf] %vm172_vm0, %v568_v4  ;;  %v533_v5 = vunpack.c.l.bf16 %v532_v1  ;;  %v534_v6 = vunpack.c.h.bf16 %v532_v1  ;;  %v537_v7 = vunpack.c.l.bf16 %v547_v2  ;;  %v538_v8 = vunpack.c.h.bf16 %v547_v2  ;;  %v549_v9 = vld [vmem:[%s600_s18 + $0x18] sm:$0xff]  }
  0x12   : > { %178 = vst.msk [vmem:[%s608_s23 + $0x10] sm:$0xf] %vm172_vm0, %v568_v4  ;;  %180 = vst.msk [vmem:[%s608_s23 + $0x18] sm:$0xf] %vm172_vm0, %v568_v4  ;;  %v541_v11 = vunpack.c.l.bf16 %v548_v3  ;;  %v542_v12 = vunpack.c.h.bf16 %v548_v3  ;;  %v545_v13 = vunpack.c.l.bf16 %v549_v9  ;;  %v546_v14 = vunpack.c.h.bf16 %v549_v9 }
  0x13   : > { %182 = vst.msk [vmem:[%s608_s23 + $0x20] sm:$0xf] %vm172_vm0, %v568_v4  ;;  %184 = vst.msk [vmem:[%s608_s23 + $0x28] sm:$0xf] %vm172_vm0, %v568_v4  ;;  %v217_v15 = vmul.f32 %v533_v5, %v478_v0  ;;  %v218_v16 = vmul.f32 %v534_v6, %v478_v0  ;;  %v219_v17 = vmul.f32 %v537_v7, %v478_v0 }
  0x14   : > { %186 = vst.msk [vmem:[%s608_s23 + $0x30] sm:$0xf] %vm172_vm0, %v568_v4  ;;  %188 = vst.msk [vmem:[%s608_s23 + $0x38] sm:$0xf] %vm172_vm0, %v568_v4  ;;  %v220_v18 = vmul.f32 %v538_v8, %v478_v0  ;;  %v221_v19 = vmul.f32 %v541_v11, %v478_v0  ;;  %v222_v20 = vmul.f32 %v542_v12, %v478_v0 }
  0x15   : > { %190 = vst.msk [vmem:[%s608_s23 + $0x40] sm:$0xf] %vm172_vm0, %v568_v4  ;;  %192 = vst.msk [vmem:[%s608_s23 + $0x48] sm:$0xf] %vm172_vm0, %v568_v4  ;;  %v232_v21 = vadd.f32 %v479_v10, %v217_v15  ;;  %v233_v22 = vadd.f32 %v479_v10, %v218_v16  ;;  %v234_v23 = vadd.f32 %v479_v10, %v219_v17 }
  0x16   : > { %177 = vst.msk [vmem:[%s608_s23 + $0xc] sm:$0x1] %vm174_vm1, %v568_v4  ;;  %175 = vst.msk [vmem:[%s608_s23 + $0x4] sm:$0x1] %vm174_vm1, %v568_v4  ;;  %v235_v24 = vadd.f32 %v479_v10, %v220_v18  ;;  %v236_v25 = vadd.f32 %v479_v10, %v221_v19  ;;  %v237_v26 = vadd.f32 %v479_v10, %v222_v20 }
  0x17   : > { %179 = vst.msk [vmem:[%s608_s23 + $0x14] sm:$0x1] %vm174_vm1, %v568_v4  ;;  %181 = vst.msk [vmem:[%s608_s23 + $0x1c] sm:$0x1] %vm174_vm1, %v568_v4  ;;  %v223_v27 = vmul.f32 %v545_v13, %v478_v0  ;;  %v224_v28 = vmul.f32 %v546_v14, %v478_v0  ;;  %v240_v29 = vmax.f32 %v232_v21, 0.0  ;;  %v241_v30 = vmax.f32 %v233_v22, 0.0 }
  0x18   : > { %183 = vst.msk [vmem:[%s608_s23 + $0x24] sm:$0x1] %vm174_vm1, %v568_v4  ;;  %185 = vst.msk [vmem:[%s608_s23 + $0x2c] sm:$0x1] %vm174_vm1, %v568_v4  ;;  %v242_v31 = vmax.f32 %v234_v23, 0.0  ;;  %v243_v32 = vmax.f32 %v235_v24, 0.0 }
  0x19   : > { %187 = vst.msk [vmem:[%s608_s23 + $0x34] sm:$0x1] %vm174_vm1, %v568_v4  ;;  %189 = vst.msk [vmem:[%s608_s23 + $0x3c] sm:$0x1] %vm174_vm1, %v568_v4  ;;  %v523_v33 = vpack.c.bf16 %v240_v29, %v240_v29  ;;  %v524_v34 = vpack.c.bf16 %v241_v30, %v241_v30  ;;  %v244_v37 = vmax.f32 %v236_v25, 0.0  ;;  %v245_v38 = vmax.f32 %v237_v26, 0.0 }
  0x1a   : > { %191 = vst.msk [vmem:[%s608_s23 + $0x44] sm:$0x1] %vm174_vm1, %v568_v4  ;;  %193 = vst.msk [vmem:[%s608_s23 + $0x4c] sm:$0x1] %vm174_vm1, %v568_v4  ;;  %v525_v35 = vpack.c.bf16 %v242_v31, %v242_v31  ;;  %v526_v36 = vpack.c.bf16 %v243_v32, %v243_v32  ;;  %v238_v39 = vadd.f32 %v479_v10, %v223_v27  ;;  %v488_v45 = vld [vmem:[%s608_s23 + $0x8] sm:$0xf] }
  0x1b   : > { %v239_v40 = vadd.f32 %v479_v10, %v224_v28  ;;  %v281_v41 = vshrl.u32 %v523_v33, 16  ;;  %v284_v42 = vshll.u32 %v523_v33, 16  ;;  %v289_v43 = vshrl.u32 %v524_v34, 16  ;;  %v492_v47 = vld [vmem:[%s608_s23 + $0x10] sm:$0xf] }
  0x1c   : > { %v292_v44 = vshll.u32 %v524_v34, 16  ;;  %v297_v48 = vshrl.u32 %v525_v35, 16  ;;  %v300_v49 = vshll.u32 %v525_v35, 16  ;;  %v305_v50 = vshrl.u32 %v526_v36, 16  ;;  %v496_v56 = vld [vmem:[%s608_s23 + $0x18] sm:$0xf] }
  0x1d   : > { %v490_v46 = vld [vmem:[%s608_s23 + $0xc] sm:$0x1]  ;;  %v308_v51 = vshll.u32 %v526_v36, 16  ;;  %v283_v52 = vrot.slane %v281_v41, 7  ;;  %v291_v54 = vrot.slane %v289_v43, 7  ;;  %v527_v57 = vpack.c.bf16 %v244_v37, %v244_v37 }
  0x1e   : > { %v494_v55 = vld [vmem:[%s608_s23 + $0x14] sm:$0x1]  ;;  %v528_v58 = vpack.c.bf16 %v245_v38, %v245_v38  ;;  %v299_v60 = vrot.slane %v297_v48, 7  ;;  %v498_v61 = vld [vmem:[%s608_s23 + $0x1c] sm:$0x1]  ;;  %v307_v62 = vrot.slane %v305_v50, 7 }
  0x1f   : > { %v246_v63 = vmax.f32 %v238_v39, 0.0  ;;  %v247_v0 = vmax.f32 %v239_v40, 0.0  ;;  %v286_v1 = vor.u32 %v284_v42, %v283_v52  ;;  %v287_v2 = vrot.slane %v283_v52, 4  ;;  %v500_v5 = vld [vmem:[%s608_s23 + $0x20] sm:$0xf] }
  0x20   : > { %v294_v3 = vor.u32 %v292_v44, %v291_v54  ;;  %v295_v4 = vrot.slane %v291_v54, 4  ;;  %v502_v6 = vld [vmem:[%s608_s23 + $0x24] sm:$0x1]  ;;  %v302_v7 = vor.u32 %v300_v49, %v299_v60  ;;  %v303_v8 = vrot.slane %v299_v60, 4  ;;  %v504_v23 = vld [vmem:[%s608_s23 + $0x28] sm:$0xf] }
  0x21   : > { %v310_v9 = vor.u32 %v308_v51, %v307_v62  ;;  %v311_v10 = vrot.slane %v307_v62, 4  ;;  %v365_v11 = vsel %vm662_vm4, %v286_v1, %v488_v45  ;;  %v371_v12 = vsel %vm670_vm5, %v287_v2, %v490_v46  ;;  %v506_v27 = vld [vmem:[%s608_s23 + $0x2c] sm:$0x1]  ;;  %v508_v29 = vld [vmem:[%s608_s23 + $0x30] sm:$0xf] }
  0x22   : > { %v374_v13 = vsel %vm662_vm4, %v294_v3, %v492_v47  ;;  %v377_v14 = vsel %vm670_vm5, %v295_v4, %v494_v55  ;;  %489 = vst [vmem:[%s608_s23 + $0x8] sm:$0xf] %v365_v11  ;;  %491 = vst [vmem:[%s608_s23 + $0xc] sm:$0x1] %v371_v12  ;;  %v380_v15 = vsel %vm662_vm4, %v302_v7, %v496_v56  ;;  %v313_v19 = vshrl.u32 %v527_v57, 16 }
  0x23   : > { %493 = vst [vmem:[%s608_s23 + $0x10] sm:$0xf] %v374_v13  ;;  %495 = vst [vmem:[%s608_s23 + $0x14] sm:$0x1] %v377_v14  ;;  %v383_v16 = vsel %vm670_vm5, %v303_v8, %v498_v61  ;;  %v386_v17 = vsel %vm662_vm4, %v310_v9, %v500_v5  ;;  %v389_v18 = vsel %vm670_vm5, %v311_v10, %v502_v6  ;;  %v316_v20 = vshll.u32 %v527_v57, 16 }
  0x24   : > { %497 = vst [vmem:[%s608_s23 + $0x18] sm:$0xf] %v380_v15  ;;  %499 = vst [vmem:[%s608_s23 + $0x1c] sm:$0x1] %v383_v16  ;;  %v321_v21 = vshrl.u32 %v528_v58, 16  ;;  %v324_v22 = vshll.u32 %v528_v58, 16  ;;  %v529_v24 = vpack.c.bf16 %v246_v63, %v246_v63  ;;  %v530_v25 = vpack.c.bf16 %v247_v0, %v247_v0 }
  0x25   : > { %501 = vst [vmem:[%s608_s23 + $0x20] sm:$0xf] %v386_v17  ;;  %503 = vst [vmem:[%s608_s23 + $0x24] sm:$0x1] %v389_v18  ;;  %v315_v26 = vrot.slane %v313_v19, 7 }
  0x26   : > { %v323_v28 = vrot.slane %v321_v21, 7  ;;  %v510_v30 = vld [vmem:[%s608_s23 + $0x34] sm:$0x1]  ;;  %v329_v31 = vshrl.u32 %v529_v24, 16  ;;  %v332_v32 = vshll.u32 %v529_v24, 16  ;;  %v337_v33 = vshrl.u32 %v530_v25, 16 }
  0x27   : > { %v340_v34 = vshll.u32 %v530_v25, 16  ;;  %v318_v35 = vor.u32 %v316_v20, %v315_v26  ;;  %v319_v36 = vrot.slane %v315_v26, 4  ;;  %v512_v40 = vld [vmem:[%s608_s23 + $0x38] sm:$0xf]  ;;  %v514_v46 = vld [vmem:[%s608_s23 + $0x3c] sm:$0x1] }
  0x28   : > { %v326_v37 = vor.u32 %v324_v22, %v323_v28  ;;  %v327_v38 = vrot.slane %v323_v28, 4  ;;  %v331_v39 = vrot.slane %v329_v31, 7  ;;  %v339_v41 = vrot.slane %v337_v33, 7  ;;  %v516_v47 = vld [vmem:[%s608_s23 + $0x40] sm:$0xf] }
  0x29   : > { %v392_v42 = vsel %vm662_vm4, %v318_v35, %v504_v23  ;;  %v395_v43 = vsel %vm670_vm5, %v319_v36, %v506_v27  ;;  %v518_v48 = vld [vmem:[%s608_s23 + $0x44] sm:$0x1] }
  0x2a   : > { %v398_v44 = vsel %vm662_vm4, %v326_v37, %v508_v29  ;;  %v401_v45 = vsel %vm670_vm5, %v327_v38, %v510_v30  ;;  %505 = vst [vmem:[%s608_s23 + $0x28] sm:$0xf] %v392_v42  ;;  %507 = vst [vmem:[%s608_s23 + $0x2c] sm:$0x1] %v395_v43  ;;  %v334_v49 = vor.u32 %v332_v32, %v331_v39  ;;  %v335_v50 = vrot.slane %v331_v39, 4 }
  0x2b   : > { %509 = vst [vmem:[%s608_s23 + $0x30] sm:$0xf] %v398_v44  ;;  %511 = vst [vmem:[%s608_s23 + $0x34] sm:$0x1] %v401_v45  ;;  %v342_v51 = vor.u32 %v340_v34, %v339_v41  ;;  %v343_v52 = vrot.slane %v339_v41, 4 }
  0x2c   : > { %v404_v54 = vsel %vm662_vm4, %v334_v49, %v512_v40  ;;  %v407_v55 = vsel %vm670_vm5, %v335_v50, %v514_v46 }
  0x2d   : > { %v410_v56 = vsel %vm662_vm4, %v342_v51, %v516_v47  ;;  %v413_v57 = vsel %vm670_vm5, %v343_v52, %v518_v48  ;;  %513 = vst [vmem:[%s608_s23 + $0x38] sm:$0xf] %v404_v54  ;;  %515 = vst [vmem:[%s608_s23 + $0x3c] sm:$0x1] %v407_v55 }
  0x2e   : > { %517 = vst [vmem:[%s608_s23 + $0x40] sm:$0xf] %v410_v56  ;;  %519 = vst [vmem:[%s608_s23 + $0x44] sm:$0x1] %v413_v57 }
  0x2f PF: > { %s13_s12 = sadd.s32 1, %s566_s12  }
  0x30   : > { %p10_p4 = scmp.ge.s32.totalorder %s13_s12, 4  }
  0x32   :  { %12 = sbr.rel (!%p10_p4) target bundleno = 1 (0x1), region = 63 }

// kernel: corblock_s_forward.19
= control target key start
LH: loop header
LB: loop body
LE: loop exit
PB: predicated region body
PF: predicated region fallthrough
CT: control target
= control target key end

     0   :  { %vm97_vm0 = vcmask 1043456   ;;  %vm72_vm1 = vcmask 64512   ;;  %vm262_vm2 = vcmask 257024   ;;  %vm279_vm3 = vcmask 261120   ;;  %s662_s1 = inlined_call_operand.vmem [shape: bf16[8,32], index: 1, kind: input, shape index: {}]   ;;  %s663_s0 = inlined_call_operand.vmem [shape: bf16[128,8], index: 0, kind: input, shape index: {}]   ;;  %s664_s2 = inlined_call_operand.vmem [shape: bf16[128,32], index: 2, kind: output, shape index: {0}]   ;;  %s665_s3 = inlined_call_operand.vmem [shape: f32[1,1,32], index: 3, kind: output, shape index: {1}]   ;;  %s666_s4 = inlined_call_operand.vmem [shape: f32[1,1,32], index: 4, kind: output, shape index: {2}]  }
   0x1   :  { %v31_v0 = vld [vmem:[%s662_s1] sm:$0xf]  ;;  %v465_v3 = vld [vmem:[%s663_s0 + $0x8] sm:$0xff]   ;;  %v466_v4 = vld [vmem:[%s663_s0 + $0x10] sm:$0xff]   ;;  %vm317_vm4 = vcmask 253952  }
   0x2   :  { %462 = vmatprep.subr.msk.bf16.mxu0 %vm97_vm0, %v31_v0  ;;  %v99_v1 = vsel %vm97_vm0, %v31_v0, 0  ;;  %v464_v2 = vld [vmem:[%s663_s0] sm:$0xff]   ;;  %463 = vmatprep.subr.msk.bf16.mxu1 %vm97_vm0, %v31_v0  ;;  %v469_v6 = vld [vmem:[%s663_s0 + $0x28] sm:$0xff]   ;;  %v470_v7 = vld [vmem:[%s663_s0 + $0x30] sm:$0xff]  }
   0x3   :  { %443 = vmatpush3.bf16.msra.mxu0 %v99_v1  ;;  %461 = vmatpush3.bf16.msra.mxu1 %v99_v1  ;;  %v468_v5 = vld [vmem:[%s663_s0 + $0x20] sm:$0xff]   ;;  %v467_v8 = vld [vmem:[%s663_s0 + $0x18] sm:$0xff]  }
   0x4   :  { %444 = vmatprep.mubr.msk.bf16.mxu0 %vm72_vm1, %v464_v2  ;;  %452 = vmatprep.mubr.msk.bf16.mxu1 %vm72_vm1, %v468_v5  ;;  %v471_v9 = vld [vmem:[%s663_s0 + $0x38] sm:$0xff]  }
   0x6   :  { %445 = vmatmul.mubr.msk.bf16.vlgmr.msra.gmra.mrb[0].mxu0 %vm72_vm1, %v465_v3  ;;  %453 = vmatmul.mubr.msk.bf16.vlgmr.msra.gmra.mrb[0].mxu1 %vm72_vm1, %v469_v6 }
   0x7   :  { %448 = vmatprep.mubr.msk.bf16.mxu0 %vm72_vm1, %v466_v4  ;;  %456 = vmatprep.mubr.msk.bf16.mxu1 %vm72_vm1, %v470_v7 }
   0xe   :  { %449 = vmatmul.mubr.msk.bf16.gmra.mrb[4].mxu0 %vm72_vm1, %v467_v8  ;;  %457 = vmatmul.mubr.msk.bf16.gmra.mrb[4].mxu1 %vm72_vm1, %v471_v9 }
  0xd9   :  { %v446_v10 = vpop.f32.mrb[0].mxu0  ;;  %v536_v19 = vpop.f32.mrb[0].mxu1 }
  0xda   :  { %v419_v11 = vpack.c.bf16 %v446_v10, %v446_v10  ;;  %v135_v12 = vpop.f32.mrb[1].mxu0  ;;  %v321_v16 = vmul.f32 %v446_v10, %v446_v10  ;;  %v167_v24 = vpop.f32.mrb[1].mxu1  ;;  %v427_v27 = vpack.c.bf16 %v536_v19, %v536_v19  ;;  %v283_v29 = vsel %vm279_vm3, %v446_v10, 0.0 }
  0xdb   :  { %v417_v13 = vpack.c.bf16 %v135_v12, %v135_v12  ;;  %v319_v14 = vmul.f32 %v135_v12, %v135_v12  ;;  %v447_v15 = vpop.f32.mrb[2].mxu0  ;;  %v280_v20 = vsel %vm279_vm3, %v135_v12, 0.0  ;;  %v550_v28 = vpop.f32.mrb[2].mxu1  ;;  %v425_v32 = vpack.c.bf16 %v167_v24, %v167_v24 }
  0xdc   :  { %265 = vst.msk [vmem:[%s664_s2 + $0x8] sm:$0xf] %vm262_vm2, %v419_v11  ;;  %v420_v17 = vpack.c.bf16 %v447_v15, %v447_v15  ;;  %v138_v18 = vpop.f32.mrb[3].mxu0  ;;  %v322_v25 = vmul.f32 %v447_v15, %v447_v15  ;;  %v559_v33 = vpop.f32.mrb[3].mxu1  ;;  %273 = vst.msk [vmem:[%s664_s2 + $0x28] sm:$0xf] %vm262_vm2, %v427_v27  ;;  %v428_v36 = vpack.c.bf16 %v550_v28, %v550_v28 }
  0xdd   :  { %263 = vst.msk [vmem:[%s664_s2] sm:$0xf] %vm262_vm2, %v417_v13  ;;  %v418_v21 = vpack.c.bf16 %v138_v18, %v138_v18  ;;  %v281_v22 = vsel %vm279_vm3, %v138_v18, 0.0  ;;  %v320_v23 = vmul.f32 %v138_v18, %v138_v18  ;;  %v335_v30 = vsel %vm279_vm3, %v319_v14, 0.0  ;;  %271 = vst.msk [vmem:[%s664_s2 + $0x20] sm:$0xf] %vm262_vm2, %v425_v32 }
  0xde   :  { %266 = vst.msk [vmem:[%s664_s2 + $0xc] sm:$0xf] %vm262_vm2, %v420_v17  ;;  %v282_v26 = vadd.f32 %v281_v22, %v280_v20  ;;  %v338_v37 = vsel %vm279_vm3, %v321_v16, 0.0  ;;  %v426_v39 = vpack.c.bf16 %v559_v33, %v559_v33  ;;  %v285_v40 = vsel %vm279_vm3, %v447_v15, 0.0  ;;  %274 = vst.msk [vmem:[%s664_s2 + $0x2c] sm:$0xf] %vm262_vm2, %v428_v36 }
  0xdf   :  { %264 = vst.msk [vmem:[%s664_s2 + $0x4] sm:$0xf] %vm262_vm2, %v418_v21  ;;  %v336_v31 = vsel %vm279_vm3, %v320_v23, 0.0  ;;  %v340_v41 = vsel %vm279_vm3, %v322_v25, 0.0  ;;  %v327_v0 = vmul.f32 %v167_v24, %v167_v24  ;;  %v295_v11 = vsel %vm279_vm3, %v167_v24, 0.0 }
  0xe0   :  { %v284_v34 = vadd.f32 %v283_v29, %v282_v26  ;;  %v337_v35 = vadd.f32 %v336_v31, %v335_v30  ;;  %272 = vst.msk [vmem:[%s664_s2 + $0x24] sm:$0xf] %vm262_vm2, %v426_v39  ;;  %v328_v17 = vmul.f32 %v559_v33, %v559_v33  ;;  %v329_v22 = vmul.f32 %v536_v19, %v536_v19 }
  0xe1   :  { %v450_v38 = vpop.f32.mrb[4].mxu0  ;;  %v589_v53 = vpop.f32.mrb[4].mxu1  ;;  %v350_v16 = vsel %vm279_vm3, %v327_v0, 0.0  ;;  %v297_v23 = vsel %vm279_vm3, %v559_v33, 0.0  ;;  %v299_v26 = vsel %vm279_vm3, %v536_v19, 0.0  ;;  %v330_v27 = vmul.f32 %v550_v28, %v550_v28 }
  0xe2   :  { %v339_v42 = vadd.f32 %v338_v37, %v337_v35  ;;  %v423_v43 = vpack.c.bf16 %v450_v38, %v450_v38  ;;  %v151_v44 = vpop.f32.mrb[5].mxu0  ;;  %v286_v46 = vadd.f32 %v285_v40, %v284_v34  ;;  %v183_v57 = vpop.f32.mrb[5].mxu1  ;;  %v325_v58 = vmul.f32 %v450_v38, %v450_v38 }
  0xe3   :  { %v421_v45 = vpack.c.bf16 %v151_v44, %v151_v44  ;;  %v287_v47 = vsel %vm279_vm3, %v151_v44, 0.0  ;;  %v323_v48 = vmul.f32 %v151_v44, %v151_v44  ;;  %v451_v49 = vpop.f32.mrb[6].mxu0  ;;  %v459_v62 = vpop.f32.mrb[6].mxu1  ;;  %v291_v2 = vsel %vm279_vm3, %v450_v38, 0.0 }
  0xe4   :  { %269 = vst.msk [vmem:[%s664_s2 + $0x18] sm:$0xf] %vm262_vm2, %v423_v43  ;;  %v341_v50 = vadd.f32 %v340_v41, %v339_v42  ;;  %v424_v51 = vpack.c.bf16 %v451_v49, %v451_v49  ;;  %v154_v52 = vpop.f32.mrb[7].mxu0  ;;  %v288_v54 = vadd.f32 %v287_v47, %v286_v46  ;;  %v186_v1 = vpop.f32.mrb[7].mxu1  ;;  %v326_v3 = vmul.f32 %v451_v49, %v451_v49 }
  0xe5   :  { %267 = vst.msk [vmem:[%s664_s2 + $0x10] sm:$0xf] %vm262_vm2, %v421_v45  ;;  %v342_v55 = vsel %vm279_vm3, %v323_v48, 0.0  ;;  %v422_v56 = vpack.c.bf16 %v154_v52, %v154_v52  ;;  %v289_v60 = vsel %vm279_vm3, %v154_v52, 0.0  ;;  %v324_v61 = vmul.f32 %v154_v52, %v154_v52 }
  0xe6   :  { %v343_v59 = vadd.f32 %v342_v55, %v341_v50  ;;  %270 = vst.msk [vmem:[%s664_s2 + $0x1c] sm:$0xf] %vm262_vm2, %v424_v51  ;;  %v290_v63 = vadd.f32 %v289_v60, %v288_v54  ;;  %v431_v5 = vpack.c.bf16 %v589_v53, %v589_v53  ;;  %v429_v8 = vpack.c.bf16 %v183_v57, %v183_v57 }
  0xe7   :  { %268 = vst.msk [vmem:[%s664_s2 + $0x14] sm:$0xf] %vm262_vm2, %v422_v56  ;;  %v344_v4 = vsel %vm279_vm3, %v324_v61, 0.0  ;;  %v346_v9 = vsel %vm279_vm3, %v325_v58, 0.0  ;;  %v293_v10 = vsel %vm279_vm3, %v451_v49, 0.0  ;;  %v432_v12 = vpack.c.bf16 %v459_v62, %v459_v62 }
  0xe8   :  { %v292_v6 = vadd.f32 %v291_v2, %v290_v63  ;;  %v345_v7 = vadd.f32 %v344_v4, %v343_v59  ;;  %277 = vst.msk [vmem:[%s664_s2 + $0x38] sm:$0xf] %vm262_vm2, %v431_v5  ;;  %275 = vst.msk [vmem:[%s664_s2 + $0x30] sm:$0xf] %vm262_vm2, %v429_v8  ;;  %v348_v15 = vsel %vm279_vm3, %v326_v3, 0.0  ;;  %v430_v18 = vpack.c.bf16 %v186_v1, %v186_v1 }
  0xe9   :  { %278 = vst.msk [vmem:[%s664_s2 + $0x3c] sm:$0xf] %vm262_vm2, %v432_v12  ;;  %v352_v29 = vsel %vm279_vm3, %v328_v17, 0.0  ;;  %v331_v30 = vmul.f32 %v183_v57, %v183_v57  ;;  %v354_v33 = vsel %vm279_vm3, %v329_v22, 0.0  ;;  %v301_v34 = vsel %vm279_vm3, %v550_v28, 0.0 }
  0xea   :  { %v347_v13 = vadd.f32 %v346_v9, %v345_v7  ;;  %v294_v14 = vadd.f32 %v293_v10, %v292_v6  ;;  %276 = vst.msk [vmem:[%s664_s2 + $0x34] sm:$0xf] %vm262_vm2, %v430_v18  ;;  %v303_v35 = vsel %vm279_vm3, %v183_v57, 0.0  ;;  %v356_v38 = vsel %vm279_vm3, %v330_v27, 0.0 }
  0xeb   :  { %v358_v19 = vsel %vm279_vm3, %v331_v30, 0.0  ;;  %v332_v39 = vmul.f32 %v186_v1, %v186_v1  ;;  %v333_v42 = vmul.f32 %v589_v53, %v589_v53  ;;  %v305_v43 = vsel %vm279_vm3, %v186_v1, 0.0 }
  0xec   :  { %v296_v20 = vadd.f32 %v295_v11, %v294_v14  ;;  %v349_v21 = vadd.f32 %v348_v15, %v347_v13  ;;  %v307_v28 = vsel %vm279_vm3, %v589_v53, 0.0  ;;  %v334_v46 = vmul.f32 %v459_v62, %v459_v62 }
  0xed   :  { %v360_v47 = vsel %vm279_vm3, %v332_v39, 0.0  ;;  %v362_v50 = vsel %vm279_vm3, %v333_v42, 0.0  ;;  %v309_v51 = vsel %vm279_vm3, %v459_v62, 0.0 }
  0xee   :  { %v351_v24 = vadd.f32 %v350_v16, %v349_v21  ;;  %v298_v25 = vadd.f32 %v297_v23, %v296_v20  ;;  %v364_v55 = vsel %vm279_vm3, %v334_v46, 0.0 }
  0xf0   :  { %v300_v31 = vadd.f32 %v299_v26, %v298_v25  ;;  %v353_v32 = vadd.f32 %v352_v29, %v351_v24 }
  0xf2   :  { %v355_v36 = vadd.f32 %v354_v33, %v353_v32  ;;  %v302_v37 = vadd.f32 %v301_v34, %v300_v31 }
  0xf4   :  { %v304_v40 = vadd.f32 %v303_v35, %v302_v37  ;;  %v357_v41 = vadd.f32 %v356_v38, %v355_v36 }
  0xf6   :  { %v359_v44 = vadd.f32 %v358_v19, %v357_v41  ;;  %v306_v45 = vadd.f32 %v305_v43, %v304_v40 }
  0xf8   :  { %v308_v48 = vadd.f32 %v307_v28, %v306_v45  ;;  %v361_v49 = vadd.f32 %v360_v47, %v359_v44 }
  0xfa   :  { %v310_v52 = vadd.f32 %v309_v51, %v308_v48  ;;  %v363_v54 = vadd.f32 %v362_v50, %v361_v49 }
  0xfc   :  { %v311_v56 = vrot.slane %v310_v52, 4  ;;  %v365_v57 = vadd.f32 %v364_v55, %v363_v54 }
  0xfe   :  { %v312_v58 = vadd.f32 %v311_v56, %v310_v52  ;;  %v366_v59 = vrot.slane %v365_v57, 4 }
 0x100   :  { %v313_v60 = vrot.slane %v312_v58, 2  ;;  %v367_v61 = vadd.f32 %v366_v59, %v365_v57 }
 0x102   :  { %v314_v53 = vadd.f32 %v313_v60, %v312_v58  ;;  %v368_v63 = vrot.slane %v367_v61, 2 }
 0x104   :  { %v315_v0 = vrot.slane %v314_v53, 1  ;;  %v369_v1 = vadd.f32 %v368_v63, %v367_v61 }
 0x106   :  { %v316_v2 = vadd.f32 %v315_v0, %v314_v53  ;;  %v370_v3 = vrot.slane %v369_v1, 1 }
 0x108   :  { %318 = vst.msk [vmem:[%s665_s3] sm:$0x1] %vm317_vm4, %v316_v2  ;;  %v371_v62 = vadd.f32 %v370_v3, %v369_v1 }
 0x10a   :  { %372 = vst.msk [vmem:[%s666_s4] sm:$0x1] %vm317_vm4, %v371_v62 }

// kernel: corblock_s_forward.21
= control target key start
LH: loop header
LB: loop body
LE: loop exit
PB: predicated region body
PF: predicated region fallthrough
CT: control target
= control target key end

     0   :  { %s2564_s15 = smov 0   ;;  %s3112_s0 = inlined_call_operand.vmem [shape: bf16[2,10,10,32], index: 0, kind: input, shape index: {}]   ;;  %s3113_s1 = inlined_call_operand.vmem [shape: bf16[9,32,32], index: 1, kind: input, shape index: {}]   ;;  %s3114_s2 = inlined_call_operand.vmem [shape: bf16[2,64,32], index: 2, kind: output, shape index: {0}]   ;;  %s3115_s3 = inlined_call_operand.vmem [shape: f32[2,1,32], index: 3, kind: output, shape index: {1}]   ;;  %s3116_s4 = inlined_call_operand.vmem [shape: f32[2,1,32], index: 4, kind: output, shape index: {2}]  }
   0x1 LB: > { %s2025_s16 = sadd.s32 4294967295, %s2537_s15   ;;  %p2029_p0 = scmp.ge.s32.totalorder %s2537_s15, 1  ;;  %s2537_s15 = sphi %s2564_s15, %s15_s15  }
   0x2   : > { %p167_p1 = scmp.lt.s32.totalorder %s2537_s15, 3 }
   0x4   : > { %p168_p2 = pnand %p2029_p0, %p167_p1 }
   0x5   : > { %v2501_v0 = vld [vmem:[%s3113_s1 + $0x10] sm:$0xff] (!%p168_p2)   ;;  %p199_p3 = scmp.lt.s32.totalorder (!%p168_p2), %s2025_s16, 1  ;;  %v2578_v1 = vld [vmem:[%s3113_s1 + $0x40] sm:$0xff] (!%p168_p2)   ;;  %v2503_v2 = vld [vmem:[%s3113_s1 + $0x18] sm:$0xff] (!%p168_p2)   ;;  %vm236_vm0 = vsmask.f32 (!%p168_p2), 3328 }
   0x6   : > { %171 = sbr.rel (%p168_p2) target bundleno = 353 (0x161), region = 28  ;;  %2316 = vmatprep.subr.bf16.mxu1 (!%p168_p2), %v2501_v0  ;;  %2364 = vmatprep.subr.bf16.mxu0 (!%p168_p2), %v2578_v1  ;;  %v2589_v3 = vld [vmem:[%s3113_s1 + $0x48] sm:$0xff] (!%p168_p2)   ;;  %v2596_v4 = vld [vmem:[%s3113_s1] sm:$0xff] (!%p168_p2)   ;;  %v2607_v5 = vld [vmem:[%s3113_s1 + $0x50] sm:$0xff] (!%p168_p2)   ;;  %vm237_vm1 = vsmask.f32 (!%p168_p2), 7440 }
   0x7   : > { %2317 = vmatpush3.bf16.msra.mxu1 (!%p168_p2), %v2501_v0  ;;  %2365 = vmatpush3.bf16.msra.mxu0 (!%p168_p2), %v2578_v1  ;;  %vm2641_vm2 = vmor (!%p168_p2), %vm236_vm0, %vm237_vm1  ;;  %vm380_vm3 = vcmask (!%p168_p2), 261120   ;;  %vm591_vm4 = vcmask (!%p168_p2), 1042432   ;;  %vm592_vm5 = vcmask (!%p168_p2), 1046532   ;;  %vm1858_vm7 = vcmask (!%p168_p2), 257024  }
   0x8   : > { %2318 = vmatprep.subr.bf16.mxu1 (!%p168_p2), %v2503_v2  ;;  %2366 = vmatprep.subr.bf16.mxu0 (!%p168_p2), %v2589_v3  ;;  %vm2748_vm6 = vmor (!%p168_p2), %vm591_vm4, %vm592_vm5  ;;  %vm1888_vm8 = vcmask (!%p168_p2), 253952  }
   0xb   : > { %2319 = vmatpush3.bf16.msra.mxu1 (!%p168_p2), %v2503_v2  ;;  %2367 = vmatpush3.bf16.msra.mxu0 (!%p168_p2), %v2589_v3 }
   0xc   : > { %2328 = vmatprep.subr.bf16.mxu1 (!%p168_p2), %v2596_v4  ;;  %2376 = vmatprep.subr.bf16.mxu0 (!%p168_p2), %v2607_v5 }
   0xd   : > { %s3122_s16 = smov (!%p199_p3, %s2025_s16), 1 }
   0xe   : > { %s2492_s25 = smul.u32 80, %s3122_s16  ;;  %s211_s13 = scalar_lea.vmem %s3115_s3, %s3122_s16 }
   0xf   : > { %s214_s18 = scalar_lea.vmem %s3116_s4, %s3122_s16 }
  0x10   : > { %s2602_s30 = scalar_lea.vmem %s3112_s0, %s2492_s25 }
  0x11   : > { %v2610_v6 = vld [vmem:[%s2602_s30] sm:$0xf]  ;;  %v2613_v7 = vld [vmem:[%s2602_s30 + $0x8] sm:$0xf]  ;;  %v2616_v8 = vld [vmem:[%s2602_s30 + $0x4] sm:$0x1] }
  0x12   : > { %v2620_v9 = vld [vmem:[%s2602_s30 + $0xc] sm:$0x1]  ;;  %v240_v10 = vshrl.u32 %v2610_v6, 16  ;;  %v243_v11 = vshll.u32 %v2610_v6, 16  ;;  %v249_v12 = vshll.u32 %v2616_v8, 16  ;;  %v254_v13 = vshrl.u32 %v2613_v7, 16 }
  0x13   : > { %v257_v14 = vshll.u32 %v2613_v7, 16  ;;  %v263_v15 = vshll.u32 %v2620_v9, 16  ;;  %v2101_v16 = vld [vmem:[%s2602_s30 + $0x8] sm:$0xf]  ;;  %v2632_v21 = vld [vmem:[%s2602_s30 + $0xc] sm:$0x1] }
  0x14   : > { %v242_v17 = vrot.slane %v240_v10, 4  ;;  %v245_v18 = vrot.slane %v243_v11, 5  ;;  %v251_v19 = vrot.slane %v249_v12, 5  ;;  %v256_v20 = vrot.slane %v254_v13, 4  ;;  %v2103_v24 = vld [vmem:[%s2602_s30 + $0x10] sm:$0xf] }
  0x15   : > { %v259_v22 = vrot.slane %v257_v14, 5  ;;  %v265_v23 = vrot.slane %v263_v15, 5  ;;  %v2636_v25 = vld [vmem:[%s2602_s30 + $0x14] sm:$0x1]  ;;  %v888_v27 = vshrl.u32 %v2101_v16, 16  ;;  %v891_v28 = vshll.u32 %v2101_v16, 16 }
  0x16   : > { %v246_v26 = vor.u32 %v245_v18, %v242_v17  ;;  %v897_v29 = vshll.u32 %v2632_v21, 16  ;;  %v902_v32 = vshrl.u32 %v2103_v24, 16  ;;  %v905_v33 = vshll.u32 %v2103_v24, 16  ;;  %v2647_v35 = vld [vmem:[%s2602_s30 + $0x10] sm:$0xf] }
  0x17   : > { %v260_v31 = vor.u32 %v259_v22, %v256_v20  ;;  %v911_v34 = vshll.u32 %v2636_v25, 16  ;;  %v890_v37 = vrot.slane %v888_v27, 4  ;;  %v893_v38 = vrot.slane %v891_v28, 5  ;;  %v2650_v39 = vld [vmem:[%s2602_s30 + $0x18] sm:$0xf] }
  0x18   : > { %v247_v36 = vrot.slane %v246_v26, 4  ;;  %v904_v41 = vrot.slane %v902_v32, 4  ;;  %v907_v42 = vrot.slane %v905_v33, 5  ;;  %v2653_v43 = vld [vmem:[%s2602_s30 + $0x14] sm:$0x1]  ;;  %v899_v46 = vrot.slane %v897_v29, 5 }
  0x19   : > { %v261_v40 = vrot.slane %v260_v31, 4  ;;  %v894_v45 = vor.u32 %v893_v38, %v890_v37  ;;  %v913_v47 = vrot.slane %v911_v34, 5  ;;  %v2660_v50 = vld [vmem:[%s2602_s30 + $0x1c] sm:$0x1]  ;;  %v268_v51 = vshrl.u32 %v2647_v35, 16 }
  0x1a   : > { %v252_v44 = vsel %vm2641_vm2, %v247_v36, %v251_v19  ;;  %v908_v49 = vor.u32 %v907_v42, %v904_v41  ;;  %v271_v52 = vshll.u32 %v2647_v35, 16  ;;  %v2105_v53 = vld [vmem:[%s2602_s30 + $0x18] sm:$0xf]  ;;  %v277_v56 = vshll.u32 %v2653_v43, 16  ;;  %v2674_v10 = vld [vmem:[%s2602_s30 + $0x1c] sm:$0x1] }
  0x1b   : > { %v266_v48 = vsel %vm2641_vm2, %v261_v40, %v265_v23  ;;  %v895_v55 = vrot.slane %v894_v45, 4  ;;  %v282_v57 = vshrl.u32 %v2650_v39, 16  ;;  %v270_v59 = vrot.slane %v268_v51, 4  ;;  %v2107_v15 = vld [vmem:[%s2602_s30 + $0x20] sm:$0xf] }
  0x1c   : > { %v2037_v54 = vcombine.low %v252_v44, %v266_v48  ;;  %v909_v58 = vrot.slane %v908_v49, 4  ;;  %v273_v60 = vrot.slane %v271_v52, 5  ;;  %v285_v61 = vshll.u32 %v2650_v39, 16  ;;  %v2680_v16 = vld [vmem:[%s2602_s30 + $0x24] sm:$0x1]  ;;  %v2508_v52 = vld [vmem:[%s3113_s1 + $0x8] sm:$0xff]  }
  0x1d   : > { %v900_v62 = vsel %vm2641_vm2, %v895_v55, %v899_v46  ;;  %v1139_v63 = vrot.slane %v2632_v21, 5  ;;  %v284_v0 = vrot.slane %v282_v57, 4  ;;  %v291_v2 = vshll.u32 %v2660_v50, 16  ;;  %v2684_v22 = vld [vmem:[%s2602_s30 + $0x20] sm:$0xf] }
  0x1e   : > { %2320 = vmatprep.mubr.msk.bf16.mxu1 %vm380_vm3, %v2037_v54  ;;  %v914_v11 = vsel %vm2641_vm2, %v909_v58, %v913_v47  ;;  %v274_v12 = vor.u32 %v273_v60, %v270_v59  ;;  %v279_v13 = vrot.slane %v277_v56, 5  ;;  %v287_v14 = vrot.slane %v285_v61, 5  ;;  %v2692_v38 = vld [vmem:[%s2602_s30 + $0x24] sm:$0x1]  ;;  %v2696_v45 = vld [vmem:[%s2602_s30 + $0x28] sm:$0xf] }
  0x1f   : > { %v2121_v17 = vcombine.low %v900_v62, %v914_v11  ;;  %v1143_v18 = vrot.slane %v2636_v25, 5  ;;  %v293_v19 = vrot.slane %v291_v2, 5  ;;  %v916_v20 = vshrl.u32 %v2105_v53, 16  ;;  %v2702_v49 = vld [vmem:[%s2602_s30 + $0x2c] sm:$0x1] }
  0x20   : > { %v275_v23 = vrot.slane %v274_v12, 4  ;;  %v288_v24 = vor.u32 %v287_v14, %v284_v0  ;;  %v919_v26 = vshll.u32 %v2105_v53, 16  ;;  %v925_v27 = vshll.u32 %v2674_v10, 16  ;;  %v2711_v57 = vld [vmem:[%s2602_s30 + $0x30] sm:$0xf] }
  0x21   : > { %2368 = vmatprep.mubr.msk.bf16.mxu0 %vm380_vm3, %v2121_v17  ;;  %v918_v28 = vrot.slane %v916_v20, 4  ;;  %v930_v29 = vshrl.u32 %v2107_v15, 16  ;;  %v933_v31 = vshll.u32 %v2107_v15, 16  ;;  %v939_v32 = vshll.u32 %v2680_v16, 16  ;;  %v2714_v58 = vld [vmem:[%s2602_s30 + $0x34] sm:$0x1] }
  0x22   : > { %v280_v33 = vsel %vm2641_vm2, %v275_v23, %v279_v13  ;;  %v289_v34 = vrot.slane %v288_v24, 4  ;;  %v921_v36 = vrot.slane %v919_v26, 5  ;;  %v927_v37 = vrot.slane %v925_v27, 5  ;;  %v2719_v0 = vld [vmem:[%s2602_s30 + $0x38] sm:$0xf]  ;;  %v2736_v24 = vld [vmem:[%s3113_s1 + $0x20] sm:$0xff]  }
  0x23   : > { %v932_v40 = vrot.slane %v930_v29, 4  ;;  %v935_v41 = vrot.slane %v933_v31, 5  ;;  %v941_v42 = vrot.slane %v939_v32, 5  ;;  %v1147_v44 = vrot.slane %v2674_v10, 5  ;;  %v2507_v15 = vld [vmem:[%s3113_s1 + $0x58] sm:$0xff]  }
  0x24   : > { %v294_v46 = vsel %vm2641_vm2, %v289_v34, %v293_v19  ;;  %v922_v47 = vor.u32 %v921_v36, %v918_v28  ;;  %v1151_v48 = vrot.slane %v2680_v16, 5  ;;  %v296_v51 = vshrl.u32 %v2684_v22, 16  ;;  %v2730_v20 = vld [vmem:[%s2602_s30 + $0x3c] sm:$0x1]  ;;  %v2131_v29 = vld [vmem:[%s2602_s30 + $0x8] sm:$0xe] }
  0x25   : > { %v2038_v53 = vcombine.low %v280_v33, %v294_v46  ;;  %v936_v54 = vor.u32 %v935_v41, %v932_v40  ;;  %v299_v55 = vshll.u32 %v2684_v22, 16  ;;  %v305_v56 = vshll.u32 %v2692_v38, 16  ;;  %v2132_v36 = vld [vmem:[%s2602_s30 + $0x10] sm:$0xe]  ;;  %v2138_v16 = vld [vmem:[%s2602_s30 + $0x40] sm:$0xe] }
  0x26   : > { %v923_v59 = vrot.slane %v922_v47, 4  ;;  %v298_v60 = vrot.slane %v296_v51, 4  ;;  %v310_v61 = vshrl.u32 %v2696_v45, 16  ;;  %v313_v62 = vshll.u32 %v2696_v45, 16  ;;  %v2133_v47 = vld [vmem:[%s2602_s30 + $0x18] sm:$0xe] }
  0x27   : > { %2321 = vmatmul.mubr.msk.bf16.vlgmr.msra.gmra.mrb[0].mxu1 %vm380_vm3, %v2038_v53  ;;  %v937_v2 = vrot.slane %v936_v54, 4  ;;  %v301_v11 = vrot.slane %v299_v55, 5  ;;  %v307_v12 = vrot.slane %v305_v56, 5  ;;  %v319_v13 = vshll.u32 %v2702_v49, 16  ;;  %v2509_v56 = vld [vmem:[%s3113_s1 + $0x60] sm:$0xff]  }
  0x28   : > { %2329 = vmatpush3.bf16.msra.mxu1 %v2596_v4  ;;  %v928_v14 = vsel %vm2641_vm2, %v923_v59, %v927_v37  ;;  %v312_v17 = vrot.slane %v310_v61, 4  ;;  %v315_v19 = vrot.slane %v313_v62, 5  ;;  %v324_v23 = vshrl.u32 %v2711_v57, 16  ;;  %v2134_v59 = vld [vmem:[%s2602_s30 + $0x20] sm:$0xe] }
  0x29   : > { %v942_v4 = vsel %vm2641_vm2, %v937_v2, %v941_v42  ;;  %v302_v26 = vor.u32 %v301_v11, %v298_v60  ;;  %v321_v27 = vrot.slane %v319_v13, 5  ;;  %2330 = vmatprep.subr.bf16.mxu1 %v2508_v52  ;;  %v327_v28 = vshll.u32 %v2711_v57, 16 }
  0x2a   : > { %v2122_v31 = vcombine.low %v928_v14, %v942_v4  ;;  %v316_v32 = vor.u32 %v315_v19, %v312_v17  ;;  %v326_v33 = vrot.slane %v324_v23, 4  ;;  %v333_v34 = vshll.u32 %v2714_v58, 16  ;;  %v2771_v14 = vld [vmem:[%s2602_s30 + $0x2c] sm:$0x1] }
  0x2b   : > { %v303_v37 = vrot.slane %v302_v26, 4  ;;  %v329_v40 = vrot.slane %v327_v28, 5  ;;  %v338_v41 = vshrl.u32 %v2719_v0, 16  ;;  %v341_v42 = vshll.u32 %v2719_v0, 16  ;;  %v2774_v26 = vld [vmem:[%s2602_s30 + $0x34] sm:$0x1] }
  0x2c   : > { %2369 = vmatmul.mubr.msk.bf16.vlgmr.msra.gmra.mrb[0].mxu0 %vm380_vm3, %v2122_v31  ;;  %v317_v51 = vrot.slane %v316_v32, 4  ;;  %v335_v53 = vrot.slane %v333_v34, 5  ;;  %v347_v54 = vshll.u32 %v2730_v20, 16  ;;  %2331 = vmatpush3.bf16.msra.mxu1 %v2508_v52  ;;  %v2139_v55 = vrot.slane %v2131_v29, 9  ;;  %v2135_v52 = vld [vmem:[%s2602_s30 + $0x28] sm:$0xe] }
  0x2d   : > { %2377 = vmatpush3.bf16.msra.mxu0 %v2607_v5  ;;  %v308_v60 = vsel %vm2641_vm2, %v303_v37, %v307_v12  ;;  %v330_v61 = vor.u32 %v329_v40, %v326_v33  ;;  %v340_v62 = vrot.slane %v338_v41, 4  ;;  %v343_v2 = vrot.slane %v341_v42, 5  ;;  %2340 = vmatprep.subr.bf16.mxu1 %v2736_v24  ;;  %v2136_v28 = vld [vmem:[%s2602_s30 + $0x30] sm:$0xe]  ;;  %v2782_v31 = vld [vmem:[%s2602_s30 + $0x3c] sm:$0x1] }
  0x2e   : > { %2378 = vmatprep.subr.bf16.mxu0 %v2507_v15  ;;  %v322_v11 = vsel %vm2641_vm2, %v317_v51, %v321_v27  ;;  %v349_v13 = vrot.slane %v347_v54, 5  ;;  %v1140_v5 = vsel %vm2748_vm6, %v2139_v55, %v1139_v63  ;;  %v2140_v12 = vrot.slane %v2132_v36, 9  ;;  %v2137_v63 = vld [vmem:[%s2602_s30 + $0x38] sm:$0xe] }
  0x2f   : > { %v2039_v17 = vcombine.low %v308_v60, %v322_v11  ;;  %v331_v19 = vrot.slane %v330_v61, 4  ;;  %v344_v23 = vor.u32 %v343_v2, %v340_v62  ;;  %v2141_v4 = vrot.slane %v2133_v47, 9  ;;  %v568_v60 = vld [vmem:[%s2602_s30 + $0x8] sm:$0xe] }
  0x30   : > { %v1144_v27 = vsel %vm2748_vm6, %v2140_v12, %v1143_v18  ;;  %v2142_v29 = vrot.slane %v2134_v59, 9  ;;  %v2143_v21 = vrot.slane %v2135_v52, 9  ;;  %v2144_v36 = vrot.slane %v2136_v28, 9  ;;  %v567_v59 = vld [vmem:[%s2602_s30] sm:$0xe] }
  0x31   : > { %2379 = vmatpush3.bf16.msra.mxu0 %v2507_v15  ;;  %2324 = vmatprep.mubr.msk.bf16.mxu1 %vm380_vm3, %v2039_v17  ;;  %v336_v32 = vsel %vm2641_vm2, %v331_v19, %v335_v53  ;;  %v345_v33 = vrot.slane %v344_v23, 4  ;;  %v2151_v34 = vcombine.low %v1140_v5, %v1144_v27  ;;  %v1148_v25 = vsel %vm2748_vm6, %v2141_v4, %v1147_v44  ;;  %v2804_v44 = vld [vmem:[%s2602_s30 + $0x44] sm:$0x1]  ;;  %v569_v12 = vld [vmem:[%s2602_s30 + $0x10] sm:$0xe] }
  0x32   : > { %2388 = vmatprep.subr.bf16.mxu0 %v2509_v56  ;;  %v1152_v18 = vsel %vm2748_vm6, %v2142_v29, %v1151_v48  ;;  %v1155_v15 = vrot.slane %v2771_v14, 5  ;;  %v1159_v37 = vrot.slane %v2774_v26, 5  ;;  %v2047_v10 = vcombine.low %v2610_v6, %v2613_v7  ;;  %v2513_v6 = vld [vmem:[%s3113_s1 + $0x68] sm:$0xff]   ;;  %v570_v17 = vld [vmem:[%s2602_s30 + $0x18] sm:$0xe] }
  0x33   : > { %v350_v40 = vsel %vm2641_vm2, %v345_v33, %v349_v13  ;;  %2380 = vmatprep.mubr.msk.bf16.mxu0 %vm380_vm3, %v2151_v34  ;;  %v2152_v48 = vcombine.low %v1148_v25, %v1152_v18  ;;  %v2145_v53 = vrot.slane %v2137_v63, 9  ;;  %v1163_v54 = vrot.slane %v2782_v31, 5  ;;  %v2517_v28 = vld [vmem:[%s2602_s30 + $0x10] ss:$8 sps:$4 sm:$0xff]   ;;  %v571_v29 = vld [vmem:[%s2602_s30 + $0x20] sm:$0xe] }
  0x34   : > { %v2040_v41 = vcombine.low %v336_v32, %v350_v40  ;;  %v1156_v42 = vsel %vm2748_vm6, %v2143_v21, %v1155_v15  ;;  %v1160_v47 = vsel %vm2748_vm6, %v2144_v36, %v1159_v37  ;;  %v2146_v7 = vrot.slane %v2138_v16, 9  ;;  %v572_v33 = vld [vmem:[%s2602_s30 + $0x28] sm:$0xe]  ;;  %v2866_v34 = vld [vmem:[%s2602_s30 + $0x30] sm:$0xe] }
  0x35   : > { %v2153_v51 = vcombine.low %v1156_v42, %v1160_v47  ;;  %v1167_v55 = vrot.slane %v2804_v44, 5  ;;  %v596_v61 = vrot.slane %v2616_v8, 5  ;;  %v600_v62 = vrot.slane %v2620_v9, 5  ;;  %v2833_v8 = vld [vmem:[%s3113_s1 + $0x70] sm:$0xff]   ;;  %v2185_v37 = vld [vmem:[%s2602_s30 + $0x18] sm:$0xf] }
  0x36   : > { %2325 = vmatmul.mubr.msk.bf16.gmra.mrb[4].mxu1 %vm380_vm3, %v2040_v41  ;;  %v604_v2 = vrot.slane %v2653_v43, 5  ;;  %v608_v52 = vrot.slane %v2660_v50, 5  ;;  %v1164_v11 = vsel %vm2748_vm6, %v2145_v53, %v1163_v54  ;;  %v2057_v9 = vrot.slane %v567_v59, 9  ;;  %v2183_v25 = vld [vmem:[%s2602_s30 + $0x10] sm:$0xf]  ;;  %v2522_v50 = vld [vmem:[%s3113_s1 + $0x78] sm:$0xff]  }
  0x37   : > { %2332 = vmatprep.mubr.msk.bf16.mxu1 %vm380_vm3, %v2047_v10  ;;  %v1168_v13 = vsel %vm2748_vm6, %v2146_v7, %v1167_v55  ;;  %v2058_v43 = vrot.slane %v568_v60, 9  ;;  %v2048_v5 = vcombine.low %v2647_v35, %v2650_v39  ;;  %v2049_v19 = vcombine.low %v2684_v22, %v2696_v45  ;;  %v2873_v36 = vld [vmem:[%s2602_s30 + $0x14] sm:$0x1]  ;;  %v2882_v16 = vld [vmem:[%s2602_s30 + $0x1c] sm:$0x1] }
  0x38   : > { %2381 = vmatmul.mubr.msk.bf16.vlgmr.msra.gmra.mrb[0].mxu0 %vm380_vm3, %v2152_v48  ;;  %v981_v23 = vshll.u32 %v2782_v31, 16  ;;  %v2154_v4 = vcombine.low %v1164_v11, %v1168_v13  ;;  %v612_v27 = vrot.slane %v2692_v38, 5  ;;  %v597_v35 = vsel %vm2748_vm6, %v2057_v9, %v596_v61  ;;  %v2858_v38 = vld [vmem:[%s3113_s1 + $0x30] sm:$0xff]   ;;  %v2187_v59 = vld [vmem:[%s2602_s30 + $0x20] sm:$0xf] }
  0x39   : > { %2389 = vmatpush3.bf16.msra.mxu0 %v2509_v56  ;;  %2384 = vmatprep.mubr.msk.bf16.mxu0 %vm380_vm3, %v2153_v51  ;;  %v2515_v56 = vld [vmem:[%s3113_s1 + $0x28] sm:$0xff]   ;;  %v2059_v39 = vrot.slane %v569_v12, 9  ;;  %v616_v21 = vrot.slane %v2702_v49, 5  ;;  %v601_v22 = vsel %vm2748_vm6, %v2058_v43, %v600_v62  ;;  %v2060_v45 = vrot.slane %v570_v17, 9  ;;  %v2521_v53 = vld [vmem:[%s2602_s30 + $0x30] ss:$8 sps:$4 sm:$0xff]  }
  0x3a   : > { %2390 = vmatprep.subr.bf16.mxu0 %v2513_v6  ;;  %v620_v63 = vrot.slane %v2714_v58, 5  ;;  %v624_v32 = vrot.slane %v2730_v20, 5  ;;  %v2050_v18 = vcombine.low %v2711_v57, %v2719_v0  ;;  %v2061_v15 = vrot.slane %v571_v29, 9  ;;  %v2519_v57 = vld [vmem:[%s2602_s30 + $0x20] ss:$8 sps:$4 sm:$0xff]  }
  0x3b   : > { %v1431_v40 = vshrl.u32 %v2183_v25, 16  ;;  %v2879_v10 = vsel %vm2748_vm6, %v2059_v39, %v604_v2  ;;  %v1434_v41 = vshll.u32 %v2183_v25, 16  ;;  %v1440_v48 = vshll.u32 %v2873_v36, 16  ;;  %v574_v62 = vld [vmem:[%s2602_s30 + $0x38] sm:$0xe] }
  0x3c   : > { %v2062_v0 = vrot.slane %v572_v33, 9  ;;  %v1445_v47 = vshrl.u32 %v2185_v37, 16  ;;  %v1448_v51 = vshll.u32 %v2185_v37, 16  ;;  %v2063_v54 = vrot.slane %v2866_v34, 9  ;;  %v2901_v13 = vld [vmem:[%s2602_s30 + $0x24] sm:$0x1] }
  0x3d   : > { %2391 = vmatpush3.bf16.msra.mxu0 %v2513_v6  ;;  %v1433_v42 = vrot.slane %v1431_v40, 4  ;;  %v1436_v6 = vrot.slane %v1434_v41, 5  ;;  %v1442_v7 = vrot.slane %v1440_v48, 5  ;;  %v1454_v55 = vshll.u32 %v2882_v16, 16  ;;  %v2189_v9 = vld [vmem:[%s2602_s30 + $0x28] sm:$0xf] }
  0x3e   : > { %2333 = vmatmul.mubr.msk.bf16.vlgmr.msra.gmra.mrb[0].mxu1 %vm380_vm3, %v2048_v5  ;;  %2400 = vmatprep.subr.bf16.mxu0 %v2833_v8  ;;  %v609_v60 = vsel %vm2748_vm6, %v2060_v45, %v608_v52  ;;  %v2897_v61 = vsel %vm2748_vm6, %v2061_v15, %v612_v27  ;;  %v1447_v2 = vrot.slane %v1445_v47, 4  ;;  %v1450_v11 = vrot.slane %v1448_v51, 5  ;;  %v2523_v49 = vld [vmem:[%s2602_s30 + $0x40] ss:$8 sps:$4 sm:$0xff]   ;;  %v2191_v48 = vld [vmem:[%s2602_s30 + $0x30] sm:$0xf] }
  0x3f   : > { %2341 = vmatpush3.bf16.msra.mxu1 %v2736_v24  ;;  %2336 = vmatprep.mubr.msk.bf16.mxu1 %vm380_vm3, %v2049_v19  ;;  %v2069_v24 = vcombine.low %v597_v35, %v601_v22  ;;  %v1437_v43 = vor.u32 %v1436_v6, %v1433_v42  ;;  %v1456_v5 = vrot.slane %v1454_v55, 5  ;;  %v1459_v12 = vshrl.u32 %v2187_v59, 16  ;;  %v2193_v51 = vld [vmem:[%s2602_s30 + $0x38] sm:$0xf] }
  0x40   : > { %2385 = vmatmul.mubr.msk.bf16.gmra.mrb[4].mxu0 %vm380_vm3, %v2154_v4  ;;  %2342 = vmatprep.subr.bf16.mxu1 %v2515_v56  ;;  %v1462_v17 = vshll.u32 %v2187_v59, 16  ;;  %v1451_v52 = vor.u32 %v1450_v11, %v1447_v2  ;;  %v1468_v19 = vshll.u32 %v2901_v13, 16  ;;  %v1473_v4 = vshrl.u32 %v2189_v9, 16 }
  0x41   : > { %2392 = vmatprep.mubr.msk.bf16.mxu0 %vm380_vm3, %v2517_v28  ;;  %v1476_v28 = vshll.u32 %v2189_v9, 16  ;;  %v1438_v27 = vrot.slane %v1437_v43, 4  ;;  %v1461_v35 = vrot.slane %v1459_v12, 4  ;;  %v617_v22 = vsel %vm2748_vm6, %v2062_v0, %v616_v21  ;;  %v2524_v21 = vld [vmem:[%s3113_s1 + $0x38] sm:$0xff]   ;;  %v2195_v43 = vld [vmem:[%s2602_s30 + $0x40] sm:$0xf] }
  0x42   : > { %v1464_v39 = vrot.slane %v1462_v17, 5  ;;  %v1452_v45 = vrot.slane %v1451_v52, 4  ;;  %v1475_v33 = vrot.slane %v1473_v4, 4  ;;  %v2070_v25 = vcombine.low %v2879_v10, %v609_v60  ;;  %v2969_v17 = vld [vmem:[%s2602_s30 + $0x44] sm:$0x1] }
  0x43   : > { %2343 = vmatpush3.bf16.msra.mxu1 %v2515_v56  ;;  %v2905_v56 = vld [vmem:[%s2602_s30 + $0x2c] sm:$0x1]  ;;  %v1478_v34 = vrot.slane %v1476_v28, 5  ;;  %v2922_v37 = vrot.slane %v1468_v19, 5  ;;  %v1443_v40 = vsel %vm2641_vm2, %v1438_v27, %v1442_v7  ;;  %v2071_v0 = vcombine.low %v2897_v61, %v617_v22 }
  0x44   : > { %2352 = vmatprep.subr.bf16.mxu1 %v2858_v38  ;;  %v1482_v29 = vshll.u32 %v2905_v56, 16  ;;  %v1465_v15 = vor.u32 %v1464_v39, %v1461_v35  ;;  %v2946_v42 = vsel %vm2748_vm6, %v2063_v54, %v620_v63  ;;  %v1487_v6 = vshrl.u32 %v2191_v48, 16 }
  0x45   : > { %v1479_v10 = vor.u32 %v1478_v34, %v1475_v33  ;;  %v1490_v55 = vshll.u32 %v2191_v48, 16  ;;  %v1501_v60 = vshrl.u32 %v2193_v51, 16  ;;  %v1504_v58 = vshll.u32 %v2193_v51, 16 }
  0x46   : > { %2337 = vmatmul.mubr.msk.bf16.gmra.mrb[4].mxu1 %vm380_vm3, %v2050_v18  ;;  %v2064_v18 = vrot.slane %v574_v62, 9  ;;  %v1484_v41 = vrot.slane %v1482_v29, 5  ;;  %v1466_v47 = vrot.slane %v1465_v15, 4  ;;  %v1489_v61 = vrot.slane %v1487_v6, 4  ;;  %v2528_v6 = vld [vmem:[%s3113_s1 + $0x88] sm:$0xff]  }
  0x47   : > { %2344 = vmatprep.mubr.msk.bf16.mxu1 %vm380_vm3, %v2069_v24  ;;  %v2935_v24 = vld [vmem:[%s3113_s1 + $0x80] sm:$0xff]   ;;  %v1480_v7 = vrot.slane %v1479_v10, 4  ;;  %v1492_v2 = vrot.slane %v1490_v55, 5  ;;  %v1503_v9 = vrot.slane %v1501_v60, 4  ;;  %v1506_v12 = vrot.slane %v1504_v58, 5 }
  0x48   : > { %2393 = vmatmul.mubr.msk.bf16.vlgmr.msra.gmra.mrb[0].mxu0 %vm380_vm3, %v2519_v57  ;;  %v2939_v57 = vld [vmem:[%s2602_s30 + $0x34] sm:$0x1]  ;;  %v625_v54 = vsel %vm2748_vm6, %v2064_v18, %v624_v32  ;;  %v1515_v19 = vshrl.u32 %v2195_v43, 16  ;;  %v1518_v4 = vshll.u32 %v2195_v43, 16  ;;  %v1524_v28 = vshll.u32 %v2969_v17, 16 }
  0x49   : > { %2401 = vmatpush3.bf16.msra.mxu0 %v2833_v8  ;;  %2396 = vmatprep.mubr.msk.bf16.mxu0 %vm380_vm3, %v2521_v53  ;;  %v1457_v8 = vsel %vm2641_vm2, %v1452_v45, %v1456_v5  ;;  %v2950_v53 = vld [vmem:[%s2602_s30 + $0x3c] sm:$0x1]  ;;  %v1496_v59 = vshll.u32 %v2939_v57, 16  ;;  %v1471_v5 = vsel %vm2641_vm2, %v1466_v47, %v2922_v37  ;;  %v1485_v20 = vsel %vm2641_vm2, %v1480_v7, %v1484_v41  ;;  %v2214_v47 = vld [vmem:[%s2602_s30 + $0x18] sm:$0xe] }
  0x4a   : > { %2402 = vmatprep.subr.bf16.mxu0 %v2522_v50  ;;  %v2203_v62 = vcombine.low %v1443_v40, %v1457_v8  ;;  %v1510_v63 = vshll.u32 %v2950_v53, 16  ;;  %v1493_v52 = vor.u32 %v1492_v2, %v1489_v61  ;;  %v1507_v27 = vor.u32 %v1506_v12, %v1503_v9  ;;  %v2215_v60 = vld [vmem:[%s2602_s30 + $0x20] sm:$0xe]  ;;  %v2216_v61 = vld [vmem:[%s2602_s30 + $0x28] sm:$0xe] }
  0x4b   : > { %v1498_v11 = vrot.slane %v1496_v59, 5  ;;  %v2072_v22 = vcombine.low %v2946_v42, %v625_v54  ;;  %v1517_v33 = vrot.slane %v1515_v19, 4  ;;  %v1520_v34 = vrot.slane %v1518_v4, 5  ;;  %v2213_v42 = vld [vmem:[%s2602_s30 + $0x10] sm:$0xe] }
  0x4c   : > { %v1512_v32 = vrot.slane %v1510_v63, 5  ;;  %v1494_v45 = vrot.slane %v1493_v52, 4  ;;  %v1508_v18 = vrot.slane %v1507_v27, 4  ;;  %v2204_v40 = vcombine.low %v1471_v5, %v1485_v20  ;;  %v2527_v54 = vld [vmem:[%s2602_s30 + $0x18] ss:$8 sps:$4 sm:$0xff]  }
  0x4d   : > { %2403 = vmatpush3.bf16.msra.mxu0 %v2522_v50  ;;  %v2197_v50 = vld [vmem:[%s2602_s30 + $0x48] sm:$0xf]  ;;  %v1521_v10 = vor.u32 %v1520_v34, %v1517_v33  ;;  %v1526_v41 = vrot.slane %v1524_v28, 5  ;;  %v2221_v55 = vrot.slane %v2213_v42, 9  ;;  %v2222_v59 = vrot.slane %v2214_v47, 9 }
  0x4e   : > { %2345 = vmatmul.mubr.msk.bf16.vlgmr.msra.gmra.mrb[0].mxu1 %vm380_vm3, %v2070_v25  ;;  %2412 = vmatprep.subr.bf16.mxu0 %v2935_v24  ;;  %v1529_v35 = vshrl.u32 %v2197_v50, 16  ;;  %v1532_v39 = vshll.u32 %v2197_v50, 16  ;;  %v2526_v25 = vld [vmem:[%s2602_s30 + $0x8] ss:$8 sps:$4 sm:$0xff]   ;;  %v1499_v8 = vsel %vm2641_vm2, %v1494_v45, %v1498_v11  ;;  %v1513_v48 = vsel %vm2641_vm2, %v1508_v18, %v1512_v32  ;;  %v2218_v50 = vld [vmem:[%s2602_s30 + $0x38] sm:$0xe] }
  0x4f   : > { %2353 = vmatpush3.bf16.msra.mxu1 %v2858_v38  ;;  %2348 = vmatprep.mubr.msk.bf16.mxu1 %vm380_vm3, %v2071_v0  ;;  %v2974_v38 = vld [vmem:[%s2602_s30 + $0x4c] sm:$0x1]  ;;  %v2205_v51 = vcombine.low %v1499_v8, %v1513_v48  ;;  %v1522_v7 = vrot.slane %v1521_v10, 4  ;;  %v953_v58 = vshll.u32 %v2771_v14, 16  ;;  %v967_v63 = vshll.u32 %v2774_v26, 16 }
  0x50   : > { %2397 = vmatmul.mubr.msk.bf16.gmra.mrb[4].mxu0 %vm380_vm3, %v2523_v49  ;;  %2354 = vmatprep.subr.bf16.mxu1 %v2524_v21  ;;  %v1538_v29 = vshll.u32 %v2974_v38, 16  ;;  %v1531_v15 = vrot.slane %v1529_v35, 4  ;;  %v1534_v37 = vrot.slane %v1532_v39, 5  ;;  %v1682_v49 = vrot.slane %v2873_v36, 5  ;;  %v2111_v14 = vld [vmem:[%s2602_s30 + $0x30] sm:$0xf] }
  0x51   : > { %2404 = vmatprep.mubr.msk.bf16.mxu0 %vm380_vm3, %v2203_v62  ;;  %v1686_v36 = vrot.slane %v2882_v16, 5  ;;  %v1690_v16 = vrot.slane %v2901_v13, 5  ;;  %v1527_v2 = vsel %vm2641_vm2, %v1522_v7, %v1526_v41  ;;  %v2223_v43 = vrot.slane %v2215_v60, 9  ;;  %v2109_v13 = vld [vmem:[%s2602_s30 + $0x28] sm:$0xf] }
  0x52   : > { %v1540_v0 = vrot.slane %v1538_v29, 5  ;;  %v1683_v11 = vsel %vm2748_vm6, %v2221_v55, %v1682_v49  ;;  %v2529_v5 = vld [vmem:[%s2602_s30 + $0x28] ss:$8 sps:$4 sm:$0xff]   ;;  %v1694_v20 = vrot.slane %v2905_v56, 5  ;;  %v944_v12 = vshrl.u32 %v2109_v13, 16 }
  0x53   : > { %2355 = vmatpush3.bf16.msra.mxu1 %v2524_v21  ;;  %v1535_v21 = vor.u32 %v1534_v37, %v1531_v15  ;;  %v1687_v9 = vsel %vm2748_vm6, %v2222_v59, %v1686_v36  ;;  %v2217_v32 = vld [vmem:[%s2602_s30 + $0x30] sm:$0xe]  ;;  %v2224_v19 = vrot.slane %v2216_v61, 9  ;;  %v947_v4 = vshll.u32 %v2109_v13, 16  ;;  %v2113_v27 = vld [vmem:[%s2602_s30 + $0x38] sm:$0xf] }
  0x54   : > { %2424 = vmatprep.subr.bf16.mxu1 %v2578_v1  ;;  %v2233_v52 = vcombine.low %v1683_v11, %v1687_v9  ;;  %v958_v28 = vshrl.u32 %v2111_v14, 16  ;;  %v961_v39 = vshll.u32 %v2111_v14, 16  ;;  %v2225_v29 = vrot.slane %v2217_v32, 9  ;;  %v2530_v7 = vld [vmem:[%s2602_s30 + $0x38] ss:$8 sps:$4 sm:$0xff]  }
  0x55   : > { %v1536_v62 = vrot.slane %v1535_v21, 4  ;;  %v949_v45 = vrot.slane %v947_v4, 5  ;;  %v1698_v34 = vrot.slane %v2939_v57, 5  ;;  %v1702_v18 = vrot.slane %v2950_v53, 5  ;;  %v2219_v59 = vld [vmem:[%s2602_s30 + $0x40] sm:$0xe] }
  0x56   : > { %2349 = vmatmul.mubr.msk.bf16.gmra.mrb[4].mxu1 %vm380_vm3, %v2072_v22  ;;  %v2115_v22 = vld [vmem:[%s2602_s30 + $0x40] sm:$0xf]  ;;  %v960_v33 = vrot.slane %v958_v28, 4  ;;  %v963_v56 = vrot.slane %v961_v39, 5  ;;  %v972_v15 = vshrl.u32 %v2113_v27, 16  ;;  %v975_v37 = vshll.u32 %v2113_v27, 16 }
  0x57   : > { %2356 = vmatprep.mubr.msk.bf16.mxu1 %vm380_vm3, %v2526_v25  ;;  %v1541_v26 = vsel %vm2641_vm2, %v1536_v62, %v1540_v0  ;;  %v2226_v25 = vrot.slane %v2218_v50, 9  ;;  %v986_v8 = vshrl.u32 %v2115_v22, 16  ;;  %v989_v10 = vshll.u32 %v2115_v22, 16  ;;  %v2220_v60 = vld [vmem:[%s2602_s30 + $0x48] sm:$0xe]  ;;  %s2253_s30 = sshll.u32 %s3122_s16, 5 }
  0x58   : > { %2405 = vmatmul.mubr.msk.bf16.vlgmr.msra.gmra.mrb[0].mxu0 %vm380_vm3, %v2204_v40  ;;  %v2206_v35 = vcombine.low %v1527_v2, %v1541_v26  ;;  %v955_v40 = vrot.slane %v953_v58, 5  ;;  %v964_v41 = vor.u32 %v963_v56, %v960_v33  ;;  %v969_v57 = vrot.slane %v967_v63, 5  ;;  %s3067_s10 = scalar_lea.vmem %s3114_s2, %s2253_s30 }
  0x59   : > { %2413 = vmatpush3.bf16.msra.mxu0 %v2935_v24  ;;  %2408 = vmatprep.mubr.msk.bf16.mxu0 %vm380_vm3, %v2205_v51  ;;  %v946_v24 = vrot.slane %v944_v12, 4  ;;  %v974_v48 = vrot.slane %v972_v15, 4  ;;  %v977_v21 = vrot.slane %v975_v37, 5  ;;  %v1691_v53 = vsel %vm2748_vm6, %v2223_v43, %v1690_v16 }
  0x5a   : > { %2414 = vmatprep.subr.bf16.mxu0 %v2528_v6  ;;  %v988_v42 = vrot.slane %v986_v8, 4  ;;  %v991_v47 = vrot.slane %v989_v10, 5  ;;  %v965_v36 = vrot.slane %v964_v41, 4  ;;  %v1699_v51 = vsel %vm2748_vm6, %v2225_v29, %v1698_v34 }
  0x5b   : > { %v950_v49 = vor.u32 %v949_v45, %v946_v24  ;;  %v995_v62 = vshll.u32 %v2804_v44, 16  ;;  %v978_v16 = vor.u32 %v977_v21, %v974_v48  ;;  %v2227_v11 = vrot.slane %v2219_v59, 9 }
  0x5c   : > { %v970_v61 = vsel %vm2641_vm2, %v965_v36, %v969_v57  ;;  %v992_v58 = vor.u32 %v991_v47, %v988_v42  ;;  %v1706_v9 = vrot.slane %v2969_v17, 5  ;;  %v2228_v43 = vrot.slane %v2220_v60, 9 }
  0x5d   : > { %2415 = vmatpush3.bf16.msra.mxu0 %v2528_v6  ;;  %v951_v0 = vrot.slane %v950_v49, 4  ;;  %v1703_v6 = vsel %vm2748_vm6, %v2226_v25, %v1702_v18  ;;  %v1710_v13 = vrot.slane %v2974_v38, 5  ;;  %v983_v44 = vrot.slane %v981_v23, 5 }
  0x5e   : > { %2357 = vmatmul.mubr.msk.bf16.vlgmr.msra.gmra.mrb[0].mxu1 %vm380_vm3, %v2527_v54  ;;  %v2235_v2 = vcombine.low %v1699_v51, %v1703_v6  ;;  %v979_v14 = vrot.slane %v978_v16, 4  ;;  %v993_v26 = vrot.slane %v992_v58, 4  ;;  %v1707_v17 = vsel %vm2748_vm6, %v2227_v11, %v1706_v9 }
  0x5f   : > { %2426 = vmatpush3.bf16.msra.mxu1 %v2578_v1  ;;  %2360 = vmatprep.mubr.msk.bf16.mxu1 %vm380_vm3, %v2529_v5  ;;  %v1695_v1 = vsel %vm2748_vm6, %v2224_v19, %v1694_v20  ;;  %v956_v55 = vsel %vm2641_vm2, %v951_v0, %v955_v40  ;;  %v1711_v38 = vsel %vm2748_vm6, %v2228_v43, %v1710_v13 }
  0x60   : > { %2409 = vmatmul.mubr.msk.bf16.gmra.mrb[4].mxu0 %vm380_vm3, %v2206_v35  ;;  %2425 = vmatprep.subr.bf16.mxu1 %v2589_v3  ;;  %v2234_v63 = vcombine.low %v1691_v53, %v1695_v1  ;;  %v2123_v54 = vcombine.low %v956_v55, %v970_v61  ;;  %v984_v31 = vsel %vm2641_vm2, %v979_v14, %v983_v44 }
  0x61   : > { %2416 = vmatprep.mubr.msk.bf16.mxu0 %vm380_vm3, %v2233_v52  ;;  %v2236_v5 = vcombine.low %v1707_v17, %v1711_v38 }
  0x63   : > { %2427 = vmatpush3.bf16.msra.mxu1 %v2589_v3  ;;  %v997_v3 = vrot.slane %v995_v62, 5 }
  0x65   : > { %v998_v23 = vsel %vm2641_vm2, %v993_v26, %v997_v3 }
  0x66   : > { %2361 = vmatmul.mubr.msk.bf16.gmra.mrb[4].mxu1 %vm380_vm3, %v2530_v7  ;;  %v2124_v20 = vcombine.low %v984_v31, %v998_v23 }
  0x67   : > { %2372 = vmatprep.mubr.msk.bf16.mxu1 %vm380_vm3, %v2123_v54 }
  0x68   : > { %2417 = vmatmul.mubr.msk.bf16.vlgmr.msra.gmra.mrb[0].mxu0 %vm380_vm3, %v2234_v63 }
  0x69   : > { %2420 = vmatprep.mubr.msk.bf16.mxu0 %vm380_vm3, %v2235_v2 }
  0x70   : > { %2421 = vmatmul.mubr.msk.bf16.gmra.mrb[4].mxu0 %vm380_vm3, %v2236_v5 }
  0x72   : > { %2373 = vmatmul.mubr.msk.bf16.vlgmr.msra.gmra.mrb[4].mxu1 %vm380_vm3, %v2124_v20 }
 0x131   : > { %v2358_v12 = vpop.f32.mrb[0].mxu1 }
 0x132   : > { %v832_v32 = vpop.f32.mrb[1].mxu1 }
 0x133   : > { %v2359_v50 = vpop.f32.mrb[2].mxu1 }
 0x134   : > { %v835_v52 = vpop.f32.mrb[3].mxu1 }
 0x13b   : > { %v2418_v19 = vpop.f32.mrb[0].mxu0 }
 0x13c   : > { %v2428_v46 = vadd.f32 %v2418_v19, %v2358_v12  ;;  %v1787_v4 = vpop.f32.mrb[1].mxu0 }
 0x13d   : > { %v2429_v30 = vadd.f32 %v1787_v4, %v832_v32  ;;  %v2419_v28 = vpop.f32.mrb[2].mxu0 }
 0x13e   : > { %v2256_v27 = vpack.c.bf16 %v2428_v46, %v2428_v46  ;;  %v2430_v35 = vadd.f32 %v2419_v28, %v2359_v50  ;;  %v1790_v24 = vpop.f32.mrb[3].mxu0  ;;  %v1892_v45 = vmul.f32 %v2428_v46, %v2428_v46  ;;  %v1870_v37 = vsel %vm380_vm3, %v2428_v46, 0.0 }
 0x13f   : > { %v2254_v39 = vpack.c.bf16 %v2429_v30, %v2429_v30  ;;  %v1890_v29 = vmul.f32 %v2429_v30, %v2429_v30  ;;  %v2431_v22 = vadd.f32 %v1790_v24, %v835_v52  ;;  %v1867_v34 = vsel %vm380_vm3, %v2429_v30, 0.0 }
 0x140   : > { %1861 = vst.msk [vmem:[%s3067_s10 + $0x8] sm:$0xf] %vm1858_vm7, %v2256_v27  ;;  %v2257_v33 = vpack.c.bf16 %v2430_v35, %v2430_v35  ;;  %v1893_v40 = vmul.f32 %v2430_v35, %v2430_v35  ;;  %v1901_v21 = vsel %vm380_vm3, %v1892_v45, 0.0  ;;  %v1872_v53 = vsel %vm380_vm3, %v2430_v35, 0.0 }
 0x141   : > { %1859 = vst.msk [vmem:[%s3067_s10] sm:$0xf] %vm1858_vm7, %v2254_v39  ;;  %v2255_v25 = vpack.c.bf16 %v2431_v22, %v2431_v22  ;;  %v1868_v56 = vsel %vm380_vm3, %v2431_v22, 0.0  ;;  %v1891_v18 = vmul.f32 %v2431_v22, %v2431_v22  ;;  %v1898_v49 = vsel %vm380_vm3, %v1890_v29, 0.0 }
 0x142   : > { %1862 = vst.msk [vmem:[%s3067_s10 + $0xc] sm:$0xf] %vm1858_vm7, %v2257_v33  ;;  %v1869_v15 = vadd.f32 %v1868_v56, %v1867_v34  ;;  %v1903_v7 = vsel %vm380_vm3, %v1893_v40, 0.0 }
 0x143   : > { %1860 = vst.msk [vmem:[%s3067_s10 + $0x4] sm:$0xf] %vm1858_vm7, %v2255_v25  ;;  %v1899_v8 = vsel %vm380_vm3, %v1891_v18, 0.0  ;;  %v2422_v10 = vpop.f32.mrb[4].mxu0 }
 0x144   : > { %v1871_v41 = vadd.f32 %v1870_v37, %v1869_v15  ;;  %v1900_v57 = vadd.f32 %v1899_v8, %v1898_v49  ;;  %v1803_v48 = vpop.f32.mrb[5].mxu0 }
 0x145   : > { %v2374_v0 = vpop.f32.mrb[4].mxu1  ;;  %v2423_v42 = vpop.f32.mrb[6].mxu0 }
 0x146   : > { %v1902_v47 = vadd.f32 %v1901_v21, %v1900_v57  ;;  %v2432_v1 = vadd.f32 %v2422_v10, %v2374_v0  ;;  %v1090_v36 = vpop.f32.mrb[5].mxu1  ;;  %v1873_v51 = vadd.f32 %v1872_v53, %v1871_v41  ;;  %v1806_v6 = vpop.f32.mrb[7].mxu0 }
 0x147   : > { %v2433_v55 = vadd.f32 %v1803_v48, %v1090_v36  ;;  %v2375_v59 = vpop.f32.mrb[6].mxu1 }
 0x148   : > { %v2260_v60 = vpack.c.bf16 %v2432_v1, %v2432_v1  ;;  %v1904_v62 = vadd.f32 %v1903_v7, %v1902_v47  ;;  %v1093_v61 = vpop.f32.mrb[7].mxu1  ;;  %v2434_v54 = vadd.f32 %v2423_v42, %v2375_v59  ;;  %v1896_v9 = vmul.f32 %v2432_v1, %v2432_v1 }
 0x149   : > { %v2258_v16 = vpack.c.bf16 %v2433_v55, %v2433_v55  ;;  %v1874_v58 = vsel %vm380_vm3, %v2433_v55, 0.0  ;;  %v1894_v63 = vmul.f32 %v2433_v55, %v2433_v55  ;;  %v2435_v11 = vadd.f32 %v1806_v6, %v1093_v61 }
 0x14a   : > { %1865 = vst.msk [vmem:[%s3067_s10 + $0x18] sm:$0xf] %vm1858_vm7, %v2260_v60  ;;  %v1875_v2 = vadd.f32 %v1874_v58, %v1873_v51  ;;  %v2261_v13 = vpack.c.bf16 %v2434_v54, %v2434_v54  ;;  %v1878_v38 = vsel %vm380_vm3, %v2432_v1, 0.0  ;;  %v1897_v31 = vmul.f32 %v2434_v54, %v2434_v54 }
 0x14b   : > { %1863 = vst.msk [vmem:[%s3067_s10 + $0x10] sm:$0xf] %vm1858_vm7, %v2258_v16  ;;  %v1905_v43 = vsel %vm380_vm3, %v1894_v63, 0.0  ;;  %v2259_v3 = vpack.c.bf16 %v2435_v11, %v2435_v11  ;;  %v1876_v14 = vsel %vm380_vm3, %v2435_v11, 0.0  ;;  %v1895_v26 = vmul.f32 %v2435_v11, %v2435_v11 }
 0x14c   : > { %v1906_v44 = vadd.f32 %v1905_v43, %v1904_v62  ;;  %1866 = vst.msk [vmem:[%s3067_s10 + $0x1c] sm:$0xf] %vm1858_vm7, %v2261_v13  ;;  %v1877_v17 = vadd.f32 %v1876_v14, %v1875_v2  ;;  %v1909_v12 = vsel %vm380_vm3, %v1896_v9, 0.0  ;;  %v1880_v32 = vsel %vm380_vm3, %v2434_v54, 0.0 }
 0x14d   : > { %1864 = vst.msk [vmem:[%s3067_s10 + $0x14] sm:$0xf] %vm1858_vm7, %v2259_v3  ;;  %v1907_v23 = vsel %vm380_vm3, %v1895_v26, 0.0  ;;  %v1911_v19 = vsel %vm380_vm3, %v1897_v31, 0.0 }
 0x14e   : > { %v1879_v5 = vadd.f32 %v1878_v38, %v1877_v17  ;;  %v1908_v20 = vadd.f32 %v1907_v23, %v1906_v44 }
 0x150   : > { %v1881_v50 = vadd.f32 %v1880_v32, %v1879_v5  ;;  %v1910_v52 = vadd.f32 %v1909_v12, %v1908_v20 }
 0x152   : > { %v1882_v46 = vrot.slane %v1881_v50, 4  ;;  %v1912_v4 = vadd.f32 %v1911_v19, %v1910_v52 }
 0x154   : > { %v1883_v30 = vadd.f32 %v1882_v46, %v1881_v50  ;;  %v1913_v28 = vrot.slane %v1912_v4, 4 }
 0x156   : > { %v1884_v27 = vrot.slane %v1883_v30, 2  ;;  %v1914_v35 = vadd.f32 %v1913_v28, %v1912_v4 }
 0x158   : > { %v1885_v24 = vadd.f32 %v1884_v27, %v1883_v30  ;;  %v1915_v39 = vrot.slane %v1914_v35, 2 }
 0x15a   : > { %v1886_v29 = vrot.slane %v1885_v24, 1  ;;  %v1916_v22 = vadd.f32 %v1915_v39, %v1914_v35 }
 0x15c   : > { %v1887_v45 = vadd.f32 %v1886_v29, %v1885_v24  ;;  %v1917_v33 = vrot.slane %v1916_v22, 1 }
 0x15e   : > { %1889 = vst.msk [vmem:[%s211_s13] sm:$0x1] %vm1888_vm8, %v1887_v45  ;;  %v1918_v34 = vadd.f32 %v1917_v33, %v1916_v22 }
 0x160   : > { %1919 = vst.msk [vmem:[%s214_s18] sm:$0x1] %vm1888_vm8, %v1918_v34 }
 0x161 PF: > { %s15_s15 = sadd.s32 1, %s2537_s15  }
 0x162   : > { %p12_p4 = scmp.ge.s32.totalorder %s15_s15, 4  }
 0x164   :  { %14 = sbr.rel (!%p12_p4) target bundleno = 1 (0x1), region = 92 }

</bundles_post_ra>
